<compile_context>
chip_gen: v5e
topology: v5e:2x2
jax: 0.10.0
libtpu: 0.0.40
codegen_flags: <defaults>
</compile_context>

<pallas_src>
import jax
import jax.numpy as jnp
from jax.experimental import pallas as pl
from jax.experimental.pallas import tpu as pltpu

KS = 3  # kernel size (ks=3, dilation=1 -> padding=1)


def _residual_block_kernel(x_ref, a1_ref, a2_ref, out_ref,
                           xk_ref, y1_ref, hk_ref, y2_ref):
    # x_ref  : (Bt, H, W*C)        f32   lane-dense input rows
    # a1_ref : (3*W*C, NP)         bf16  conv1 banded weights (kh-blocked rows)
    # a2_ref : (3*NP,  W*C)        bf16  conv2 banded weights (kh-blocked rows)
    # out_ref: (Bt, H, W*C)        f32
    # xk_ref : (Bt*HP, 3*W*C)      bf16  conv1 K-packed operand (HP = H + 4)
    # y1_ref : (Bt*HP, NP)         f32   conv1 pre-activation (column-padded)
    # hk_ref : (Bt*HP, 3*NP)       bf16  conv2 K-packed operand
    # y2_ref : (Bt*HP, W*C)        f32   conv2 output
    Bt, H, WC = x_ref.shape
    HP = H + 4
    NP = y1_ref.shape[1]

    z_x = jnp.zeros((3, 3 * WC), jnp.bfloat16)   # hoisted border-zero constants
    z_h = jnp.zeros((3, 3 * NP), jnp.bfloat16)

    # ---- conv1 operand: 3 row-shifted copies of x, lane-block aligned --------
    # xk[r0 + 2 + y, kh*WC:(kh+1)*WC] = x[b, y + kh - 1]   (0 outside [0, H))
    for b in range(Bt):
        r0 = b * HP
        xk_ref[pl.ds(r0, 3), :] = z_x                # top border / halo rows
        xk_ref[pl.ds(r0 + H + 1, 3), :] = z_x        # bottom border / halo rows
        xb = x_ref[b].astype(jnp.bfloat16)           # (H, WC)
        for kh in range(KS):
            xk_ref[pl.ds(r0 + 3 - kh, H), kh * WC:(kh + 1) * WC] = xb

    y1_ref[...] = jnp.dot(xk_ref[...], a1_ref[...],
                          preferred_element_type=jnp.float32)

    # ---- conv2 operand: relu(conv1), already column-padded by A1's band ------
    for b in range(Bt):
        r0 = b * HP
        hk_ref[pl.ds(r0, 3), :] = z_h
        hk_ref[pl.ds(r0 + H + 1, 3), :] = z_h
        hb = jnp.maximum(y1_ref[pl.ds(r0 + 2, H), :], 0.0).astype(jnp.bfloat16)
        for kh in range(KS):
            hk_ref[pl.ds(r0 + 3 - kh, H), kh * NP:(kh + 1) * NP] = hb

    y2_ref[...] = jnp.dot(hk_ref[...], a2_ref[...],
                          preferred_element_type=jnp.float32)

    # ---- residual add (identity from the f32 input) + relu -------------------
    for b in range(Bt):
        r0 = b * HP
        out_ref[b] = jnp.maximum(y2_ref[pl.ds(r0 + 2, H), :] + x_ref[b],
                                 0.0).astype(out_ref.dtype)


def _build_a1(w1_hwio, W, C, np_pad):
    """conv1 banded weights: rows = (kh, xin, ci), cols = (x_out_padded, co)."""
    Wp = W + 2
    cols = jnp.arange(Wp)
    valid = ((cols >= 1) & (cols <= W)).astype(jnp.float32)   # interior out cols
    blocks = []
    for kh in range(KS):
        a = jnp.zeros((W * C, Wp * C), jnp.float32)
        for kw in range(KS):
            # xin == (xoutp - 1) + (kw - 1)  ->  xoutp - xin == 2 - kw
            s = jnp.eye(W, Wp, k=2 - kw, dtype=jnp.float32) * valid[None, :]
            a = a + jnp.einsum('io,cd->icod', s,
                               w1_hwio[kh, kw]).reshape(W * C, Wp * C)
        blocks.append(a)
    a1 = jnp.concatenate(blocks, axis=0)                       # (3*W*C, Wp*C)
    a1 = jnp.pad(a1, ((0, 0), (0, np_pad - Wp * C)))           # lane-pad to 128x
    return a1.astype(jnp.bfloat16)


def _build_a2(w2_hwio, W, C, np_pad):
    """conv2 banded weights: rows = (kh, x_in_padded, ci), cols = (x_out, co)."""
    Wp = W + 2
    blocks = []
    for kh in range(KS):
        a = jnp.zeros((Wp * C, W * C), jnp.float32)
        for kw in range(KS):
            # xinp == xout + kw  ->  xout - xinp == -kw
            s = jnp.eye(Wp, W, k=-kw, dtype=jnp.float32)
            a = a + jnp.einsum('io,cd->icod', s,
                               w2_hwio[kh, kw]).reshape(Wp * C, W * C)
        a = jnp.pad(a, ((0, np_pad - Wp * C), (0, 0)))         # match hk filler
        blocks.append(a)
    return jnp.concatenate(blocks, axis=0).astype(jnp.bfloat16)  # (3*NP, W*C)


def residual_block(x_nchw, w1_hwio, w2_hwio, *, batch_tile=None):
    """x_nchw: (B, C, H, W) f32; w*_hwio: (3, 3, C, C). Returns (B, C, H, W) f32."""
    B, C, H, W = x_nchw.shape
    WC = W * C
    assert WC % 128 == 0, "W*C must be a multiple of 128 for lane-aligned blocks"
    if batch_tile is None:
        batch_tile = min(B, 16)          # M = Bt*(H+4) >= ~256 amortizes weights
    assert B % batch_tile == 0
    Bt = batch_tile
    HP = H + 4
    NP = (((W + 2) * C) + 127) // 128 * 128

    x = jnp.transpose(x_nchw, (0, 2, 3, 1)).reshape(B, H, WC)   # lane-dense slab
    a1 = _build_a1(w1_hwio, W, C, NP)                            # (3*WC, NP) bf16
    a2 = _build_a2(w2_hwio, W, C, NP)                            # (3*NP, WC) bf16

    out = pl.pallas_call(
        _residual_block_kernel,
        out_shape=jax.ShapeDtypeStruct((B, H, WC), x.dtype),
        grid_spec=pltpu.PrefetchScalarGridSpec(
            num_scalar_prefetch=0,
            grid=(B // Bt,),
            in_specs=[
                pl.BlockSpec((Bt, H, WC), lambda i: (i, 0, 0)),
                pl.BlockSpec((3 * WC, NP), lambda i: (0, 0)),   # resident weights
                pl.BlockSpec((3 * NP, WC), lambda i: (0, 0)),   # resident weights
            ],
            out_specs=pl.BlockSpec((Bt, H, WC), lambda i: (i, 0, 0)),
            scratch_shapes=[
                pltpu.VMEM((Bt * HP, 3 * WC), jnp.bfloat16),    # conv1 operand
                pltpu.VMEM((Bt * HP, NP), jnp.float32),         # conv1 output
                pltpu.VMEM((Bt * HP, 3 * NP), jnp.bfloat16),    # conv2 operand
                pltpu.VMEM((Bt * HP, WC), jnp.float32),         # conv2 output
            ],
        ),
        compiler_params=pltpu.CompilerParams(
            dimension_semantics=("parallel",),       # v7x: shard batch over TCs
            vmem_limit_bytes=48 * 1024 * 1024,       # safe on v5e/v6e/v7x
        ),
    )(x, a1, a2)

    return jnp.transpose(out.reshape(B, H, W, C), (0, 3, 1, 2))  # -> NCHW


if __name__ == "__main__":
    B, C, H, W = 2, 32, 16, 16          # inc == outc == 32 (identity residual path)
    key = jax.random.PRNGKey(0)
    kx, k1, k2 = jax.random.split(key, 3)

    x = jax.random.normal(kx, (B, C, H, W), jnp.float32)
    std = 1.0 / jnp.sqrt(C * KS * KS)
    w1 = jax.random.normal(k1, (KS, KS, C, C), jnp.float32) * std
    w2 = jax.random.normal(k2, (KS, KS, C, C), jnp.float32) * std

    out = residual_block(x, w1, w2, batch_tile=2)
    out = jax.block_until_ready(out)

    # Reference (XLA conv, NCHW / OIHW like PyTorch, full f32).
    def ref(xn):
        dn = jax.lax.conv_dimension_numbers(
            xn.shape, (C, C, KS, KS), ('NCHW', 'OIHW', 'NCHW'))
        w1o = jnp.transpose(w1, (3, 2, 0, 1))
        w2o = jnp.transpose(w2, (3, 2, 0, 1))
        h = jax.lax.conv_general_dilated(xn, w1o, (1, 1), ((1, 1), (1, 1)),
                                         dimension_numbers=dn)
        h = jnp.maximum(h, 0.0)
        o = jax.lax.conv_general_dilated(h, w2o, (1, 1), ((1, 1), (1, 1)),
                                         dimension_numbers=dn)
        return jnp.maximum(o + xn, 0.0)

    expected = ref(x)
    assert out.shape == (B, C, H, W) and out.dtype == jnp.float32
    # bf16 MXU operands (f32 accumulation): expected max abs err ~1e-2 here.
    assert bool(jnp.allclose(out, expected, atol=3e-2, rtol=3e-2))
    print("KERNEL_OK")
</pallas_src>

<mosaic_0001>
module attributes {stable_mosaic.version = 11 : i64} {
  func.func @_residual_block_kernel(%arg0: i32, %arg1: memref<2x16x512xf32, #tpu.memory_space<vmem>>, %arg2: memref<1536x640xbf16, #tpu.memory_space<vmem>>, %arg3: memref<1920x512xbf16, #tpu.memory_space<vmem>>, %arg4: memref<2x16x512xf32, #tpu.memory_space<vmem>>, %arg5: memref<40x1536xbf16, #tpu.memory_space<vmem>>, %arg6: memref<40x640xf32, #tpu.memory_space<vmem>>, %arg7: memref<40x1920xbf16, #tpu.memory_space<vmem>>, %arg8: memref<40x512xf32, #tpu.memory_space<vmem>>) attributes {dimension_semantics = [#tpu.dimension_semantics<parallel>], iteration_bounds = array<i64: 1>, scalar_prefetch = 0 : i64, scratch_operands = 4 : i64, tpu.core_type = #tpu.core_type<tc>, window_params = [{transform_indices = @transform_0, window_bounds = array<i64: 2, 16, 512>}, {pipeline_mode = #tpu.pipeline_mode<synchronous>, transform_indices = @transform_1, window_bounds = array<i64: 1536, 640>}, {pipeline_mode = #tpu.pipeline_mode<synchronous>, transform_indices = @transform_2, window_bounds = array<i64: 1920, 512>}, {transform_indices = @transform_3, window_bounds = array<i64: 2, 16, 512>}]} {
    %cst = arith.constant 0.000000e+00 : bf16
    %0 = vector.broadcast %cst : bf16 to vector<3x1536xbf16>
    %cst_0 = arith.constant 0.000000e+00 : bf16
    %1 = vector.broadcast %cst_0 : bf16 to vector<3x1920xbf16>
    %c0 = arith.constant 0 : index
    %c0_1 = arith.constant 0 : index
    %2 = vector.load %arg5[%c0, %c0_1] : memref<40x1536xbf16, #tpu.memory_space<vmem>>, vector<3x1536xbf16>
    tpu.vector_store %arg5[%c0, %c0_1], %0 {strides = array<i32>} : memref<40x1536xbf16, #tpu.memory_space<vmem>>, vector<3x1536xbf16>,
    %c17 = arith.constant 17 : index
    %c0_2 = arith.constant 0 : index
    %3 = vector.load %arg5[%c17, %c0_2] : memref<40x1536xbf16, #tpu.memory_space<vmem>>, vector<3x1536xbf16>
    tpu.vector_store %arg5[%c17, %c0_2], %0 {strides = array<i32>} : memref<40x1536xbf16, #tpu.memory_space<vmem>>, vector<3x1536xbf16>,
    %c0_3 = arith.constant 0 : index
    %c0_4 = arith.constant 0 : index
    %c0_5 = arith.constant 0 : index
    %4 = vector.load %arg1[%c0_3, %c0_4, %c0_5] : memref<2x16x512xf32, #tpu.memory_space<vmem>>, vector<1x16x512xf32>
    %5 = vector.shape_cast %4 : vector<1x16x512xf32> to vector<16x512xf32>
    %6 = arith.truncf %5 : vector<16x512xf32> to vector<16x512xbf16>
    %c3 = arith.constant 3 : index
    %c0_6 = arith.constant 0 : index
    %7 = vector.load %arg5[%c3, %c0_6] : memref<40x1536xbf16, #tpu.memory_space<vmem>>, vector<16x512xbf16>
    tpu.vector_store %arg5[%c3, %c0_6], %6 {strides = array<i32>} : memref<40x1536xbf16, #tpu.memory_space<vmem>>, vector<16x512xbf16>,
    %c2 = arith.constant 2 : index
    %c512 = arith.constant 512 : index
    %8 = vector.load %arg5[%c2, %c512] : memref<40x1536xbf16, #tpu.memory_space<vmem>>, vector<16x512xbf16>
    tpu.vector_store %arg5[%c2, %c512], %6 {strides = array<i32>} : memref<40x1536xbf16, #tpu.memory_space<vmem>>, vector<16x512xbf16>,
    %c1 = arith.constant 1 : index
    %c1024 = arith.constant 1024 : index
    %9 = vector.load %arg5[%c1, %c1024] : memref<40x1536xbf16, #tpu.memory_space<vmem>>, vector<16x512xbf16>
    tpu.vector_store %arg5[%c1, %c1024], %6 {strides = array<i32>} : memref<40x1536xbf16, #tpu.memory_space<vmem>>, vector<16x512xbf16>,
    %c20 = arith.constant 20 : index
    %c0_7 = arith.constant 0 : index
    %10 = vector.load %arg5[%c20, %c0_7] : memref<40x1536xbf16, #tpu.memory_space<vmem>>, vector<3x1536xbf16>
    tpu.vector_store %arg5[%c20, %c0_7], %0 {strides = array<i32>} : memref<40x1536xbf16, #tpu.memory_space<vmem>>, vector<3x1536xbf16>,
    %c37 = arith.constant 37 : index
    %c0_8 = arith.constant 0 : index
    %11 = vector.load %arg5[%c37, %c0_8] : memref<40x1536xbf16, #tpu.memory_space<vmem>>, vector<3x1536xbf16>
    tpu.vector_store %arg5[%c37, %c0_8], %0 {strides = array<i32>} : memref<40x1536xbf16, #tpu.memory_space<vmem>>, vector<3x1536xbf16>,
    %c1_9 = arith.constant 1 : index
    %c0_10 = arith.constant 0 : index
    %c0_11 = arith.constant 0 : index
    %12 = vector.load %arg1[%c1_9, %c0_10, %c0_11] : memref<2x16x512xf32, #tpu.memory_space<vmem>>, vector<1x16x512xf32>
    %13 = vector.shape_cast %12 : vector<1x16x512xf32> to vector<16x512xf32>
    %14 = arith.truncf %13 : vector<16x512xf32> to vector<16x512xbf16>
    %c23 = arith.constant 23 : index
    %c0_12 = arith.constant 0 : index
    %15 = vector.load %arg5[%c23, %c0_12] : memref<40x1536xbf16, #tpu.memory_space<vmem>>, vector<16x512xbf16>
    tpu.vector_store %arg5[%c23, %c0_12], %14 {strides = array<i32>} : memref<40x1536xbf16, #tpu.memory_space<vmem>>, vector<16x512xbf16>,
    %c22 = arith.constant 22 : index
    %c512_13 = arith.constant 512 : index
    %16 = vector.load %arg5[%c22, %c512_13] : memref<40x1536xbf16, #tpu.memory_space<vmem>>, vector<16x512xbf16>
    tpu.vector_store %arg5[%c22, %c512_13], %14 {strides = array<i32>} : memref<40x1536xbf16, #tpu.memory_space<vmem>>, vector<16x512xbf16>,
    %c21 = arith.constant 21 : index
    %c1024_14 = arith.constant 1024 : index
    %17 = vector.load %arg5[%c21, %c1024_14] : memref<40x1536xbf16, #tpu.memory_space<vmem>>, vector<16x512xbf16>
    tpu.vector_store %arg5[%c21, %c1024_14], %14 {strides = array<i32>} : memref<40x1536xbf16, #tpu.memory_space<vmem>>, vector<16x512xbf16>,
    %c0_15 = arith.constant 0 : index
    %c0_16 = arith.constant 0 : index
    %18 = vector.load %arg5[%c0_15, %c0_16] : memref<40x1536xbf16, #tpu.memory_space<vmem>>, vector<40x1536xbf16>
    %c0_17 = arith.constant 0 : index
    %c0_18 = arith.constant 0 : index
    %19 = vector.load %arg2[%c0_17, %c0_18] : memref<1536x640xbf16, #tpu.memory_space<vmem>>, vector<1536x640xbf16>
    %cst_19 = arith.constant dense<0.000000e+00> : vector<40x640xf32>
    %20 = tpu.matmul %18, %19, %cst_19 {dimension_numbers = #tpu.dot_dimension_numbers<[1], [0], [0], [1], [0, 0, 1, 1], [], []>} : vector<40x1536xbf16>, vector<1536x640xbf16>, vector<40x640xf32> -> vector<40x640xf32>
    %c0_20 = arith.constant 0 : index
    %c0_21 = arith.constant 0 : index
    %21 = vector.load %arg6[%c0_20, %c0_21] : memref<40x640xf32, #tpu.memory_space<vmem>>, vector<40x640xf32>
    tpu.vector_store %arg6[%c0_20, %c0_21], %20 {strides = array<i32>} : memref<40x640xf32, #tpu.memory_space<vmem>>, vector<40x640xf32>,
    %c0_22 = arith.constant 0 : index
    %c0_23 = arith.constant 0 : index
    %22 = vector.load %arg7[%c0_22, %c0_23] : memref<40x1920xbf16, #tpu.memory_space<vmem>>, vector<3x1920xbf16>
    tpu.vector_store %arg7[%c0_22, %c0_23], %1 {strides = array<i32>} : memref<40x1920xbf16, #tpu.memory_space<vmem>>, vector<3x1920xbf16>,
    %c17_24 = arith.constant 17 : index
    %c0_25 = arith.constant 0 : index
    %23 = vector.load %arg7[%c17_24, %c0_25] : memref<40x1920xbf16, #tpu.memory_space<vmem>>, vector<3x1920xbf16>
    tpu.vector_store %arg7[%c17_24, %c0_25], %1 {strides = array<i32>} : memref<40x1920xbf16, #tpu.memory_space<vmem>>, vector<3x1920xbf16>,
    %c2_26 = arith.constant 2 : index
    %c0_27 = arith.constant 0 : index
    %24 = vector.load %arg6[%c2_26, %c0_27] : memref<40x640xf32, #tpu.memory_space<vmem>>, vector<16x640xf32>
    %cst_28 = arith.constant 0.000000e+00 : f32
    %25 = vector.broadcast %cst_28 : f32 to vector<16x640xf32>
    %26 = arith.maximumf %24, %25 : vector<16x640xf32>
    %27 = arith.truncf %26 : vector<16x640xf32> to vector<16x640xbf16>
    %c3_29 = arith.constant 3 : index
    %c0_30 = arith.constant 0 : index
    %28 = vector.load %arg7[%c3_29, %c0_30] : memref<40x1920xbf16, #tpu.memory_space<vmem>>, vector<16x640xbf16>
    tpu.vector_store %arg7[%c3_29, %c0_30], %27 {strides = array<i32>} : memref<40x1920xbf16, #tpu.memory_space<vmem>>, vector<16x640xbf16>,
    %c2_31 = arith.constant 2 : index
    %c640 = arith.constant 640 : index
    %29 = vector.load %arg7[%c2_31, %c640] : memref<40x1920xbf16, #tpu.memory_space<vmem>>, vector<16x640xbf16>
    tpu.vector_store %arg7[%c2_31, %c640], %27 {strides = array<i32>} : memref<40x1920xbf16, #tpu.memory_space<vmem>>, vector<16x640xbf16>,
    %c1_32 = arith.constant 1 : index
    %c1280 = arith.constant 1280 : index
    %30 = vector.load %arg7[%c1_32, %c1280] : memref<40x1920xbf16, #tpu.memory_space<vmem>>, vector<16x640xbf16>
    tpu.vector_store %arg7[%c1_32, %c1280], %27 {strides = array<i32>} : memref<40x1920xbf16, #tpu.memory_space<vmem>>, vector<16x640xbf16>,
    %c20_33 = arith.constant 20 : index
    %c0_34 = arith.constant 0 : index
    %31 = vector.load %arg7[%c20_33, %c0_34] : memref<40x1920xbf16, #tpu.memory_space<vmem>>, vector<3x1920xbf16>
    tpu.vector_store %arg7[%c20_33, %c0_34], %1 {strides = array<i32>} : memref<40x1920xbf16, #tpu.memory_space<vmem>>, vector<3x1920xbf16>,
    %c37_35 = arith.constant 37 : index
    %c0_36 = arith.constant 0 : index
    %32 = vector.load %arg7[%c37_35, %c0_36] : memref<40x1920xbf16, #tpu.memory_space<vmem>>, vector<3x1920xbf16>
    tpu.vector_store %arg7[%c37_35, %c0_36], %1 {strides = array<i32>} : memref<40x1920xbf16, #tpu.memory_space<vmem>>, vector<3x1920xbf16>,
    %c22_37 = arith.constant 22 : index
    %c0_38 = arith.constant 0 : index
    %33 = vector.load %arg6[%c22_37, %c0_38] : memref<40x640xf32, #tpu.memory_space<vmem>>, vector<16x640xf32>
    %cst_39 = arith.constant 0.000000e+00 : f32
    %34 = vector.broadcast %cst_39 : f32 to vector<16x640xf32>
    %35 = arith.maximumf %33, %34 : vector<16x640xf32>
    %36 = arith.truncf %35 : vector<16x640xf32> to vector<16x640xbf16>
    %c23_40 = arith.constant 23 : index
    %c0_41 = arith.constant 0 : index
    %37 = vector.load %arg7[%c23_40, %c0_41] : memref<40x1920xbf16, #tpu.memory_space<vmem>>, vector<16x640xbf16>
    tpu.vector_store %arg7[%c23_40, %c0_41], %36 {strides = array<i32>} : memref<40x1920xbf16, #tpu.memory_space<vmem>>, vector<16x640xbf16>,
    %c22_42 = arith.constant 22 : index
    %c640_43 = arith.constant 640 : index
    %38 = vector.load %arg7[%c22_42, %c640_43] : memref<40x1920xbf16, #tpu.memory_space<vmem>>, vector<16x640xbf16>
    tpu.vector_store %arg7[%c22_42, %c640_43], %36 {strides = array<i32>} : memref<40x1920xbf16, #tpu.memory_space<vmem>>, vector<16x640xbf16>,
    %c21_44 = arith.constant 21 : index
    %c1280_45 = arith.constant 1280 : index
    %39 = vector.load %arg7[%c21_44, %c1280_45] : memref<40x1920xbf16, #tpu.memory_space<vmem>>, vector<16x640xbf16>
    tpu.vector_store %arg7[%c21_44, %c1280_45], %36 {strides = array<i32>} : memref<40x1920xbf16, #tpu.memory_space<vmem>>, vector<16x640xbf16>,
    %c0_46 = arith.constant 0 : index
    %c0_47 = arith.constant 0 : index
    %40 = vector.load %arg7[%c0_46, %c0_47] : memref<40x1920xbf16, #tpu.memory_space<vmem>>, vector<40x1920xbf16>
    %c0_48 = arith.constant 0 : index
    %c0_49 = arith.constant 0 : index
    %41 = vector.load %arg3[%c0_48, %c0_49] : memref<1920x512xbf16, #tpu.memory_space<vmem>>, vector<1920x512xbf16>
    %cst_50 = arith.constant dense<0.000000e+00> : vector<40x512xf32>
    %42 = tpu.matmul %40, %41, %cst_50 {dimension_numbers = #tpu.dot_dimension_numbers<[1], [0], [0], [1], [0, 0, 1, 1], [], []>} : vector<40x1920xbf16>, vector<1920x512xbf16>, vector<40x512xf32> -> vector<40x512xf32>
    %c0_51 = arith.constant 0 : index
    %c0_52 = arith.constant 0 : index
    %43 = vector.load %arg8[%c0_51, %c0_52] : memref<40x512xf32, #tpu.memory_space<vmem>>, vector<40x512xf32>
    tpu.vector_store %arg8[%c0_51, %c0_52], %42 {strides = array<i32>} : memref<40x512xf32, #tpu.memory_space<vmem>>, vector<40x512xf32>,
    %c2_53 = arith.constant 2 : index
    %c0_54 = arith.constant 0 : index
    %44 = vector.load %arg8[%c2_53, %c0_54] : memref<40x512xf32, #tpu.memory_space<vmem>>, vector<16x512xf32>
    %c0_55 = arith.constant 0 : index
    %c0_56 = arith.constant 0 : index
    %c0_57 = arith.constant 0 : index
    %45 = vector.load %arg1[%c0_55, %c0_56, %c0_57] : memref<2x16x512xf32, #tpu.memory_space<vmem>>, vector<1x16x512xf32>
    %46 = vector.shape_cast %45 : vector<1x16x512xf32> to vector<16x512xf32>
    %47 = arith.addf %44, %46 : vector<16x512xf32>
    %cst_58 = arith.constant 0.000000e+00 : f32
    %48 = vector.broadcast %cst_58 : f32 to vector<16x512xf32>
    %49 = arith.maximumf %47, %48 : vector<16x512xf32>
    %c0_59 = arith.constant 0 : index
    %c0_60 = arith.constant 0 : index
    %c0_61 = arith.constant 0 : index
    %50 = vector.load %arg4[%c0_59, %c0_60, %c0_61] : memref<2x16x512xf32, #tpu.memory_space<vmem>>, vector<1x16x512xf32>
    %51 = vector.shape_cast %50 : vector<1x16x512xf32> to vector<16x512xf32>
    %52 = vector.shape_cast %49 : vector<16x512xf32> to vector<1x16x512xf32>
    tpu.vector_store %arg4[%c0_59, %c0_60, %c0_61], %52 {strides = array<i32>} : memref<2x16x512xf32, #tpu.memory_space<vmem>>, vector<1x16x512xf32>,
    %c22_62 = arith.constant 22 : index
    %c0_63 = arith.constant 0 : index
    %53 = vector.load %arg8[%c22_62, %c0_63] : memref<40x512xf32, #tpu.memory_space<vmem>>, vector<16x512xf32>
    %c1_64 = arith.constant 1 : index
    %c0_65 = arith.constant 0 : index
    %c0_66 = arith.constant 0 : index
    %54 = vector.load %arg1[%c1_64, %c0_65, %c0_66] : memref<2x16x512xf32, #tpu.memory_space<vmem>>, vector<1x16x512xf32>
    %55 = vector.shape_cast %54 : vector<1x16x512xf32> to vector<16x512xf32>
    %56 = arith.addf %53, %55 : vector<16x512xf32>
    %cst_67 = arith.constant 0.000000e+00 : f32
    %57 = vector.broadcast %cst_67 : f32 to vector<16x512xf32>
    %58 = arith.maximumf %56, %57 : vector<16x512xf32>
    %c1_68 = arith.constant 1 : index
    %c0_69 = arith.constant 0 : index
    %c0_70 = arith.constant 0 : index
    %59 = vector.load %arg4[%c1_68, %c0_69, %c0_70] : memref<2x16x512xf32, #tpu.memory_space<vmem>>, vector<1x16x512xf32>
    %60 = vector.shape_cast %59 : vector<1x16x512xf32> to vector<16x512xf32>
    %61 = vector.shape_cast %58 : vector<16x512xf32> to vector<1x16x512xf32>
    tpu.vector_store %arg4[%c1_68, %c0_69, %c0_70], %61 {strides = array<i32>} : memref<2x16x512xf32, #tpu.memory_space<vmem>>, vector<1x16x512xf32>,
    return
  }
  func.func @transform_0(%arg0: i32) -> (i32, i32, i32) {
    %c0_i32 = arith.constant 0 : i32
    %c0_i32_0 = arith.constant 0 : i32
    %c0_i32_1 = arith.constant 0 : i32
    return %arg0, %c0_i32, %c0_i32_0 : i32, i32, i32
  }
  func.func @transform_1(%arg0: i32) -> (i32, i32) {
    %c0_i32 = arith.constant 0 : i32
    %c0_i32_0 = arith.constant 0 : i32
    %c0_i32_1 = arith.constant 0 : i32
    return %c0_i32, %c0_i32_0 : i32, i32
  }
  func.func @transform_2(%arg0: i32) -> (i32, i32) {
    %c0_i32 = arith.constant 0 : i32
    %c0_i32_0 = arith.constant 0 : i32
    %c0_i32_1 = arith.constant 0 : i32
    return %c0_i32, %c0_i32_0 : i32, i32
  }
  func.func @transform_3(%arg0: i32) -> (i32, i32, i32) {
    %c0_i32 = arith.constant 0 : i32
    %c0_i32_0 = arith.constant 0 : i32
    %c0_i32_1 = arith.constant 0 : i32
    return %arg0, %c0_i32, %c0_i32_0 : i32, i32, i32
  }
}

</mosaic_0001>

<bundles_post_ra>
// kernel: tpu_custom_call.1
= control target key start
LH: loop header
LB: loop body
LE: loop exit
PB: predicated region body
PF: predicated region fallthrough
CT: control target
= control target key end

     0   :  { %8 = vsyncpa [#allocation7], 0  ;;  %s18363_s0 = inlined_call_operand.hbm [shape: f32[2,16,512], index: 0, kind: input, shape index: {}]   ;;  %s18364_s1 = inlined_call_operand.hbm [shape: bf16[1536,640], index: 1, kind: input, shape index: {}]   ;;  %s18365_s2 = inlined_call_operand.hbm [shape: bf16[1920,512], index: 2, kind: input, shape index: {}]   ;;  %s18366_s3 = inlined_call_operand.hbm [shape: f32[2,16,512], index: 3, kind: output, shape index: {}]  }
   0x1   :  { %9 = vsyncpa [#allocation10], 0  ;;  %s28_s14 = sshll.u32 %s18364_s1, 4  ;;  %s29_s14 = int_to_ptr.hbm [resolvable:$true] %s28_s14 }
   0x2   :  { %10 = vsyncpa [#allocation8], 0  ;;  %s15668_s15 = smov [#allocation9]   ;;  %s15_s19 = sshll.u32 %s18363_s0, 4  ;;  %s16_s19 = int_to_ptr.hbm [resolvable:$true] %s15_s19 }
   0x3   :  { %s30_s16 = sshll.u32 %s15668_s15, 4  ;;  %s15669_s20 = smov 320   ;;  %s31_s16 = int_to_ptr.vmem [resolvable:$true] %s30_s16 }
   0x4   :  { %s15670_s21 = smov 20   ;;  %s15671_s22 = smov [#allocation6]  }
   0x5   :  { %36 = dma.hbm_to_vmem [thread:$0]  %s29_s14, 61440, %s31_s16, [#allocation10], %s15669_s20, %s15669_s20, %s15670_s21  }
   0x6   :  { %s17_s23 = sshll.u32 %s15671_s22, 4  ;;  %s15672_s24 = smov 512   ;;  %s18_s23 = int_to_ptr.vmem [resolvable:$true] %s17_s23 }
   0x7   :  { %s15673_s25 = smov 32   ;;  %s41_s27 = sshll.u32 %s18365_s2, 4  ;;  %s42_s27 = int_to_ptr.hbm [resolvable:$true] %s41_s27 }
   0x8   :  { %23 = dma.hbm_to_vmem [thread:$0]  %s16_s19, 2048, %s18_s23, [#allocation7], %s15672_s24, %s15672_s24, %s15673_s25  }
   0x9   :  { %s15674_s28 = smov [#allocation11]   ;;  %s15675_s29 = smov 256  }
   0xa   :  { %s43_s0 = sshll.u32 %s15674_s28, 4  ;;  %s15676_s30 = smov 16   ;;  %s44_s0 = int_to_ptr.vmem [resolvable:$true] %s43_s0 }
   0xb   :  { %49 = dma.hbm_to_vmem [thread:$0]  %s42_s27, 61440, %s44_s0, [#allocation10], %s15675_s29, %s15675_s29, %s15676_s30  }
   0xc   :  { %15662 = dma.done.wait [#allocation7], 2048  }
   0xd   :  { %15663 = vsyncadd [#allocation7], 4294965248 }
   0xe   :  { %15664 = dma.done.wait [#allocation10], 122880  }
   0xf   :  { %15665 = vsyncadd [#allocation10], 4294844416  ;;  %vm18367_vm0 = vcmask 1041408   ;;  %vm64_vm1 = vsmask.f32 1280  ;;  %vm66_vm2 = vcmask 1045508  }
  0x10   :  { %vm67_vm3 = vsmask.f32 5376  ;;  %v10713_v0 = vld [vmem:[#allocation9 + $0x118] sm:$0xf]  ;;  %v14598_v1 = vld [vmem:[#allocation9 + $0x128] sm:$0xf0]  ;;  %vm15712_vm4 = vmand %vm18367_vm0, %vm64_vm1 }
  0x11   :  { %v10873_v2 = vld [vmem:[#allocation9 + $0x258] sm:$0xf]  ;;  %v18584_v3 = vmov 0  ;;  %vm15717_vm5 = vmand %vm66_vm2, %vm67_vm3  ;;  %v10714_v5 = vor.u32 %v14598_v1, %v10713_v0  ;;  %v14638_v6 = vld [vmem:[#allocation9 + $0x268] sm:$0xf0]  ;;  %v18589_v48 = vmov 0 }
  0x12   :  { %v18585_v3 = vsel %vm15712_vm4, 4294967295, %v18584_v3  ;;  %v11033_v7 = vld [vmem:[#allocation9 + $0x398] sm:$0xf]  ;;  %v14678_v8 = vld [vmem:[#allocation9 + $0x3a8] sm:$0xf0]  ;;  %v10874_v9 = vor.u32 %v14638_v6, %v10873_v2  ;;  %vm15725_vm6 = vmor %vm15717_vm5, %vm15712_vm4  ;;  %vm169_vm7 = vcmask 1043457  }
  0x13   :  { %18586 = vst [vmem:[#allocation16_spill] sm:$0xff] %v18585_v3  ;;  %v11034_v10 = vor.u32 %v14678_v8, %v11033_v7  ;;  %v11193_v11 = vld [vmem:[#allocation9 + $0x4d8] sm:$0xf]  ;;  %v14718_v12 = vld [vmem:[#allocation9 + $0x4e8] sm:$0xf0]  ;;  %3734 = vmatpush.bf16.msra.mxu0 %v10714_v5  ;;  %v18590_v48 = vsel %vm15725_vm6, 4294967295, %v18589_v48 }
  0x14   :  { %v10693_v13 = vld [vmem:[#allocation9 + $0xf0] sm:$0xf]  ;;  %v11194_v14 = vor.u32 %v14718_v12, %v11193_v11  ;;  %v14593_v15 = vld [vmem:[#allocation9 + $0x100] sm:$0xf0]  ;;  %3757 = vmatpush.bf16.msra.mxu1 %v10874_v9  ;;  %v10673_v25 = vld [vmem:[#allocation9 + $0xc8] sm:$0xf] }
  0x15   :  { %v10853_v16 = vld [vmem:[#allocation9 + $0x230] sm:$0xf]  ;;  %v14633_v17 = vld [vmem:[#allocation9 + $0x240] sm:$0xf0]  ;;  %3780 = vmatpush.bf16.msra.mxu2 %v11034_v10  ;;  %v10694_v18 = vor.u32 %v14593_v15, %v10693_v13  ;;  %v14588_v26 = vld [vmem:[#allocation9 + $0xd8] sm:$0xf0] }
  0x16   :  { %v10854_v19 = vor.u32 %v14633_v17, %v10853_v16  ;;  %v11013_v20 = vld [vmem:[#allocation9 + $0x370] sm:$0xf]  ;;  %v14673_v21 = vld [vmem:[#allocation9 + $0x380] sm:$0xf0]  ;;  %3803 = vmatpush.bf16.msra.mxu3 %v11194_v14  ;;  %v10833_v28 = vld [vmem:[#allocation9 + $0x208] sm:$0xf]  ;;  %v10674_v31 = vor.u32 %v14588_v26, %v10673_v25 }
  0x17   :  { %v11173_v22 = vld [vmem:[#allocation9 + $0x4b0] sm:$0xf]  ;;  %v11014_v23 = vor.u32 %v14673_v21, %v11013_v20  ;;  %v14713_v24 = vld [vmem:[#allocation9 + $0x4c0] sm:$0xf0]  ;;  %v14628_v29 = vld [vmem:[#allocation9 + $0x218] sm:$0xf0]  ;;  %3735 = vmatpush.bf16.msra.mxu0 %v10694_v18 }
  0x18   :  { %v11174_v27 = vor.u32 %v14713_v24, %v11173_v22  ;;  %v10993_v30 = vld [vmem:[#allocation9 + $0x348] sm:$0xf]  ;;  %v14668_v32 = vld [vmem:[#allocation9 + $0x358] sm:$0xf0]  ;;  %3758 = vmatpush.bf16.msra.mxu1 %v10854_v19  ;;  %v10834_v35 = vor.u32 %v14628_v29, %v10833_v28  ;;  %v10653_v37 = vld [vmem:[#allocation9 + $0xa0] sm:$0xf] }
  0x19   :  { %v11153_v33 = vld [vmem:[#allocation9 + $0x488] sm:$0xf]  ;;  %v14708_v34 = vld [vmem:[#allocation9 + $0x498] sm:$0xf0]  ;;  %3781 = vmatpush.bf16.msra.mxu2 %v11014_v23  ;;  %v10994_v36 = vor.u32 %v14668_v32, %v10993_v30  ;;  %v14583_v38 = vld [vmem:[#allocation9 + $0xb0] sm:$0xf0] }
  0x1a   :  { %v10813_v39 = vld [vmem:[#allocation9 + $0x1e0] sm:$0xf]  ;;  %3804 = vmatpush.bf16.msra.mxu3 %v11174_v27  ;;  %v11154_v40 = vor.u32 %v14708_v34, %v11153_v33  ;;  %v14623_v41 = vld [vmem:[#allocation9 + $0x1f0] sm:$0xf0]  ;;  %v10654_v46 = vor.u32 %v14583_v38, %v10653_v37  ;;  %v10633_v47 = vld [vmem:[#allocation9 + $0x78] sm:$0xf] }
  0x1b   :  { %v10973_v42 = vld [vmem:[#allocation9 + $0x320] sm:$0xf]  ;;  %v14663_v43 = vld [vmem:[#allocation9 + $0x330] sm:$0xf0]  ;;  %3736 = vmatpush.bf16.msra.mxu0 %v10674_v31  ;;  %18591 = vst [vmem:[#allocation17_spill] sm:$0xff] %v18590_v48  ;;  %v10814_v49 = vor.u32 %v14623_v41, %v10813_v39  ;;  %v112_v33 = vld [vmem:[#allocation6 + $0x8] sm:$0xff] }
  0x1c   :  { %v11133_v44 = vld [vmem:[#allocation9 + $0x460] sm:$0xf]  ;;  %v14703_v45 = vld [vmem:[#allocation9 + $0x470] sm:$0xf0]  ;;  %3759 = vmatpush.bf16.msra.mxu1 %v10834_v35  ;;  %v10974_v50 = vor.u32 %v14663_v43, %v10973_v42  ;;  %v14578_v51 = vld [vmem:[#allocation9 + $0x88] sm:$0xf0] }
  0x1d   :  { %3782 = vmatpush.bf16.msra.mxu2 %v10994_v36  ;;  %v10793_v52 = vld [vmem:[#allocation9 + $0x1b8] sm:$0xf]  ;;  %v14618_v53 = vld [vmem:[#allocation9 + $0x1c8] sm:$0xf0]  ;;  %v11134_v54 = vor.u32 %v14703_v45, %v11133_v44  ;;  %vm170_vm8 = vsmask.f32 7942  ;;  %v10634_v61 = vor.u32 %v14578_v51, %v10633_v47 }
  0x1e   :  { %3805 = vmatpush.bf16.msra.mxu3 %v11154_v40  ;;  %v10953_v55 = vld [vmem:[#allocation9 + $0x2f8] sm:$0xf]  ;;  %v14658_v56 = vld [vmem:[#allocation9 + $0x308] sm:$0xf0]  ;;  %v10613_v59 = vld [vmem:[#allocation9 + $0x50] sm:$0xf]  ;;  %v10794_v1 = vor.u32 %v14618_v53, %v10793_v52 }
  0x1f   :  { %v11113_v57 = vld [vmem:[#allocation9 + $0x438] sm:$0xf]  ;;  %v14698_v58 = vld [vmem:[#allocation9 + $0x448] sm:$0xf0]  ;;  %v14573_v60 = vld [vmem:[#allocation9 + $0x60] sm:$0xf0]  ;;  %3737 = vmatpush.bf16.msra.mxu0 %v10654_v46  ;;  %v10954_v2 = vor.u32 %v14658_v56, %v10953_v55 }
  0x20   :  { %vm173_vm9 = vsmask.f32 7958  ;;  %v10773_v62 = vld [vmem:[#allocation9 + $0x190] sm:$0xf]  ;;  %v14613_v63 = vld [vmem:[#allocation9 + $0x1a0] sm:$0xf0]  ;;  %3760 = vmatpush.bf16.msra.mxu1 %v10814_v49  ;;  %v11114_v7 = vor.u32 %v14698_v58, %v11113_v57  ;;  %v10614_v14 = vor.u32 %v14573_v60, %v10613_v59  ;;  %vm15781_vm14 = vmand %vm169_vm7, %vm170_vm8 }
  0x21   :  { %v10933_v0 = vld [vmem:[#allocation9 + $0x2d0] sm:$0xf]  ;;  %3783 = vmatpush.bf16.msra.mxu2 %v10974_v50  ;;  %v14653_v4 = vld [vmem:[#allocation9 + $0x2e0] sm:$0xf0]  ;;  %v15729_v8 = vld [vmem:[#allocation9 + $0x28] sm:$0xf]  ;;  %v10774_v18 = vor.u32 %v14613_v63, %v10773_v62 }
  0x22   :  { %v11093_v5 = vld [vmem:[#allocation9 + $0x410] sm:$0xf]  ;;  %v14693_v6 = vld [vmem:[#allocation9 + $0x420] sm:$0xf0]  ;;  %3806 = vmatpush.bf16.msra.mxu3 %v11134_v54  ;;  %v15731_v9 = vld [vmem:[#allocation9 + $0x38] sm:$0xf0]  ;;  %v10934_v19 = vor.u32 %v14653_v4, %v10933_v0 }
  0x23   :  { %v15733_v10 = vld [vmem:[#allocation9 + $0x168] sm:$0xf]  ;;  %v15735_v11 = vld [vmem:[#allocation9 + $0x178] sm:$0xf0]  ;;  %vm123_vm10 = vsmask.f32 5392  ;;  %3738 = vmatpush.bf16.msra.mxu0 %v10634_v61  ;;  %v11094_v23 = vor.u32 %v14693_v6, %v11093_v5  ;;  %v10594_v27 = vor.u32 %v15731_v9, %v15729_v8 }
  0x24   :  { %v15737_v12 = vld [vmem:[#allocation9 + $0x2a8] sm:$0xf]  ;;  %v15739_v13 = vld [vmem:[#allocation9 + $0x2b8] sm:$0xf0]  ;;  %v15745_v17 = vld [vmem:[#allocation9] sm:$0xf]  ;;  %3761 = vmatpush.bf16.msra.mxu1 %v10794_v1  ;;  %v10754_v28 = vor.u32 %v15735_v11, %v15733_v10 }
  0x25   :  { %v15741_v15 = vld [vmem:[#allocation9 + $0x3e8] sm:$0xf]  ;;  %v15743_v16 = vld [vmem:[#allocation9 + $0x3f8] sm:$0xf0]  ;;  %3784 = vmatpush.bf16.msra.mxu2 %v10954_v2  ;;  %v15747_v20 = vld [vmem:[#allocation9 + $0x10] sm:$0xf0]  ;;  %v10914_v34 = vor.u32 %v15739_v13, %v15737_v12 }
  0x26   :  { %v15749_v21 = vld [vmem:[#allocation9 + $0x140] sm:$0xf]  ;;  %v15751_v22 = vld [vmem:[#allocation9 + $0x150] sm:$0xf0]  ;;  %3807 = vmatpush.bf16.msra.mxu3 %v11114_v7  ;;  %vm172_vm11 = vcmask 1047557   ;;  %v11074_v35 = vor.u32 %v15743_v16, %v15741_v15  ;;  %v116_v37 = vld [vmem:[#allocation6 + $0x28] sm:$0xff]  ;;  %v10574_v39 = vor.u32 %v15747_v20, %v15745_v17 }
  0x27   :  { %v15753_v24 = vld [vmem:[#allocation9 + $0x280] sm:$0xf]  ;;  %v15755_v25 = vld [vmem:[#allocation9 + $0x290] sm:$0xf0]  ;;  %3739 = vmatpush.bf16.msra.mxu0 %v10614_v14  ;;  %vm18369_vm12 = vsmask.f32 7938  ;;  %v10734_v40 = vor.u32 %v15751_v22, %v15749_v21  ;;  %vm15789_vm15 = vmand %vm172_vm11, %vm173_vm9 }
  0x28   :  { %v70_v26 = vld [vmem:[#allocation2] sm:$0x33]  ;;  %v15763_v30 = vld [vmem:[#allocation9 + $0x3d0] sm:$0xf0]  ;;  %3762 = vmatpush.bf16.msra.mxu1 %v10774_v18  ;;  %vm18368_vm13 = vsmask.f32 7954  ;;  %v10894_v53 = vor.u32 %v15755_v25, %v15753_v24  ;;  %vm15819_vm7 = vmor %vm15789_vm15, %vm15781_vm14 }
  0x29   :  { %v15761_v29 = vld [vmem:[#allocation9 + $0x3c0] sm:$0xf]  ;;  %v71_v31 = vsel %vm15725_vm6, 0, %v70_v26  ;;  %3785 = vmatpush.bf16.msra.mxu2 %v10934_v19  ;;  %v18592_v42 = vmov 0  ;;  %v5160_v43 = vld [vmem:[#allocation4 + $0x38] sm:$0x3]  ;;  %vm15827_vm8 = vmor %vm64_vm1, %vm123_vm10 }
  0x2a   :  { %v111_v32 = vld [vmem:[#allocation6] sm:$0xff]  ;;  %72 = vst [vmem:[#allocation2] sm:$0x33] %v71_v31  ;;  %v18593_v42 = vsel %vm15781_vm14, 4294967295, %v18592_v42  ;;  %3808 = vmatpush.bf16.msra.mxu3 %v11094_v23  ;;  %v5161_v49 = vsel %vm15712_vm4, 0, %v5160_v43  ;;  %v113_v51 = vld [vmem:[#allocation6 + $0x10] sm:$0xff]  ;;  %v11054_v59 = vor.u32 %v15763_v30, %v15761_v29  ;;  %vm15835_vm9 = vmand %vm18367_vm0, %vm18369_vm12 }
  0x2b   :  { %v115_v36 = vld [vmem:[#allocation6 + $0x20] sm:$0xff]  ;;  %v15771_v38 = vpack.c.bf16 %v112_v33, %v111_v32  ;;  %18594 = vst [vmem:[#allocation18_spill] sm:$0xff] %v18593_v42  ;;  %v114_v52 = vld [vmem:[#allocation6 + $0x18] sm:$0xff]  ;;  %vm18372_vm3 = vcmask 1043458   ;;  %vm18373_vm5 = vsmask.f32 3328  ;;  %3740 = vmatpush.bf16.msra.mxu0 %v10594_v27  ;;  %vm15847_vm1 = vmand %vm66_vm2, %vm18368_vm13 }
  0x2c   :  { %v15777_v41 = vpack.c.bf16 %v116_v37, %v115_v36  ;;  %v73_v44 = vld [vmem:[#allocation2 + $0x8] sm:$0x33]  ;;  %5162 = vst [vmem:[#allocation4 + $0x38] sm:$0x3] %v5161_v49  ;;  %v117_v56 = vld [vmem:[#allocation6 + $0x30] sm:$0xff]  ;;  %v118_v57 = vld [vmem:[#allocation6 + $0x38] sm:$0xff]  ;;  %v15801_v58 = vpack.c.bf16 %v114_v52, %v113_v51  ;;  %3763 = vmatpush.bf16.msra.mxu1 %v10754_v28 }
  0x2d   :  { %v18394_v45 = vshrl.u32 %v15771_v38, 16  ;;  %v18389_v46 = vshll.u32 %v15771_v38, 16  ;;  %v74_v50 = vsel %vm15725_vm6, 0, %v73_v44  ;;  %v15809_v62 = vpack.c.bf16 %v118_v57, %v117_v56  ;;  %v11673_v63 = vld [vmem:[#allocation9 + $0x898] sm:$0xf]  ;;  %3786 = vmatpush.bf16.msra.mxu2 %v10914_v34  ;;  %v314_v30 = vld [vmem:[#allocation6 + $0x40] sm:$0xff]  ;;  %vm15866_vm2 = vmor %vm15847_vm1, %vm15835_vm9 }
  0x2e   :  { %v18393_v54 = vshrl.u32 %v15777_v41, 16  ;;  %v18390_v55 = vshll.u32 %v15777_v41, 16  ;;  %75 = vst [vmem:[#allocation2 + $0x8] sm:$0x33] %v74_v50  ;;  %v18597_v2 = vmov 0  ;;  %v18392_v4 = vshrl.u32 %v15801_v58, 16  ;;  %3809 = vmatpush.bf16.msra.mxu3 %v11074_v35  ;;  %vm15877_vm11 = vmand %vm18372_vm3, %vm18373_vm5 }
  0x2f   :  { %v128_v60 = vrot.slane %v18394_v45, 6  ;;  %v131_v61 = vrot.slane %v18389_v46, 7  ;;  %v18598_v2 = vsel %vm15819_vm7, 4294967295, %v18597_v2  ;;  %v18385_v5 = vshll.u32 %v15801_v58, 16  ;;  %v14838_v6 = vld [vmem:[#allocation9 + $0x8a8] sm:$0xf0]  ;;  %3741 = vmatpush.bf16.msra.mxu0 %v10574_v39 }
  0x30   :  { %v145_v0 = vrot.slane %v18393_v54, 6  ;;  %v148_v1 = vrot.slane %v18390_v55, 7  ;;  %18599 = vst [vmem:[#allocation19_spill] sm:$0xff] %v18598_v2  ;;  %v18391_v9 = vshrl.u32 %v15809_v62, 16  ;;  %v18386_v10 = vshll.u32 %v15809_v62, 16  ;;  %3764 = vmatpush.bf16.msra.mxu1 %v10734_v40  ;;  %v315_v31 = vld [vmem:[#allocation6 + $0x48] sm:$0xff] }
  0x31   :  { %v132_v8 = vor.u32 %v131_v61, %v128_v60  ;;  %v11674_v11 = vor.u32 %v14838_v6, %v11673_v63  ;;  %v11353_v12 = vld [vmem:[#allocation9 + $0x618] sm:$0xf]  ;;  %v14758_v13 = vld [vmem:[#allocation9 + $0x628] sm:$0xf0]  ;;  %v18602_v14 = vmov 0  ;;  %v136_v17 = vrot.slane %v18392_v4, 6  ;;  %3787 = vmatpush.bf16.msra.mxu2 %v10894_v53 }
  0x32   :  { %v18603_v14 = vsel %vm15835_vm9, 4294967295, %v18602_v14  ;;  %v15839_v15 = vor.u32 %v148_v1, %v145_v0  ;;  %v176_v16 = vld [vmem:[#allocation2] sm:$0xee]  ;;  %v139_v18 = vrot.slane %v18385_v5, 7  ;;  %v11354_v19 = vor.u32 %v14758_v13, %v11353_v12  ;;  %v11833_v20 = vld [vmem:[#allocation9 + $0x9d8] sm:$0xf]  ;;  %3810 = vmatpush.bf16.msra.mxu3 %v11054_v59 }
  0x33   :  { %18604 = vst [vmem:[#allocation20_spill] sm:$0xff] %v18603_v14  ;;  %v141_v22 = vrot.slane %v132_v8, 4  ;;  %v177_v23 = vsel %vm15819_vm7, %v132_v8, %v176_v16  ;;  %v155_v24 = vrot.slane %v18391_v9, 6  ;;  %v158_v25 = vrot.slane %v18386_v10, 7  ;;  %v14878_v26 = vld [vmem:[#allocation9 + $0x9e8] sm:$0xf0] }
  0x34   :  { %178 = vst [vmem:[#allocation2] sm:$0xee] %v177_v23  ;;  %v140_v27 = vor.u32 %v139_v18, %v136_v17  ;;  %v11834_v28 = vor.u32 %v14878_v26, %v11833_v20  ;;  %v11513_v29 = vld [vmem:[#allocation9 + $0x758] sm:$0xf]  ;;  %v14798_v34 = vld [vmem:[#allocation9 + $0x768] sm:$0xf0]  ;;  %3826 = vmatpush.bf16.msrb.mxu0 %v11354_v19  ;;  %v15881_v6 = vpack.c.bf16 %v315_v31, %v314_v30 }
  0x35   :  { %v150_v32 = vsel %vm15827_vm8, %v141_v22, %v15839_v15  ;;  %v15860_v33 = vor.u32 %v158_v25, %v155_v24  ;;  %3872 = vmatpush.bf16.msrb.mxu2 %v11674_v11  ;;  %v11653_v35 = vld [vmem:[#allocation9 + $0x870] sm:$0xf]  ;;  %v14833_v36 = vld [vmem:[#allocation9 + $0x880] sm:$0xf0]  ;;  %v11514_v40 = vor.u32 %v14798_v34, %v11513_v29  ;;  %v18607_v47 = vmov 0  ;;  %v319_v1 = vld [vmem:[#allocation6 + $0x68] sm:$0xff] }
  0x36   :  { %182 = vst [vmem:[#allocation2 + $0x30] sm:$0xff] %v150_v32  ;;  %v151_v37 = vrot.slane %v140_v27, 4  ;;  %v179_v39 = vld [vmem:[#allocation2 + $0x8] sm:$0xee]  ;;  %3895 = vmatpush.bf16.msrb.mxu3 %v11834_v28  ;;  %v11654_v43 = vor.u32 %v14833_v36, %v11653_v35  ;;  %v11333_v44 = vld [vmem:[#allocation9 + $0x5f0] sm:$0xf] }
  0x37   :  { %v18608_v47 = vsel %vm15866_vm2, 4294967295, %v18607_v47  ;;  %v180_v49 = vsel %vm15819_vm7, %v140_v27, %v179_v39  ;;  %v14753_v50 = vld [vmem:[#allocation9 + $0x600] sm:$0xf0]  ;;  %v11813_v51 = vld [vmem:[#allocation9 + $0x9b0] sm:$0xf]  ;;  %vm18371_vm10 = vcmask 1047558   ;;  %3849 = vmatpush.bf16.msrb.mxu1 %v11514_v40 }
  0x38   :  { %18609 = vst [vmem:[#allocation21_spill] sm:$0xff] %v18608_v47  ;;  %v160_v52 = vsel %vm15827_vm8, %v151_v37, %v15860_v33  ;;  %v11334_v53 = vor.u32 %v14753_v50, %v11333_v44  ;;  %v14873_v56 = vld [vmem:[#allocation9 + $0x9c0] sm:$0xf0]  ;;  %v11493_v57 = vld [vmem:[#allocation9 + $0x730] sm:$0xf]  ;;  %v18610_v59 = vmov 0 }
  0x39   :  { %181 = vst [vmem:[#allocation2 + $0x8] sm:$0xee] %v180_v49  ;;  %v18611_v59 = vsel %vm15877_vm11, 4294967295, %v18610_v59  ;;  %3873 = vmatpush.bf16.msrb.mxu2 %v11654_v43  ;;  %v11814_v60 = vor.u32 %v14873_v56, %v11813_v51  ;;  %v14793_v61 = vld [vmem:[#allocation9 + $0x740] sm:$0xf0]  ;;  %vm372_vm15 = vcmask 1043459  }
  0x3a   :  { %18612 = vst [vmem:[#allocation22_spill] sm:$0xff] %v18611_v59  ;;  %v11633_v63 = vld [vmem:[#allocation9 + $0x848] sm:$0xf]  ;;  %v318_v0 = vld [vmem:[#allocation6 + $0x60] sm:$0xff]  ;;  %3827 = vmatpush.bf16.msrb.mxu0 %v11334_v53  ;;  %v11494_v7 = vor.u32 %v14793_v61, %v11493_v57  ;;  %v14828_v8 = vld [vmem:[#allocation9 + $0x858] sm:$0xf0] }
  0x3b   :  { %183 = vst [vmem:[#allocation2 + $0x38] sm:$0xff] %v160_v52  ;;  %v11313_v11 = vld [vmem:[#allocation9 + $0x5c8] sm:$0xf]  ;;  %v14748_v12 = vld [vmem:[#allocation9 + $0x5d8] sm:$0xf0]  ;;  %3896 = vmatpush.bf16.msrb.mxu3 %v11814_v60  ;;  %v11634_v17 = vor.u32 %v14828_v8, %v11633_v63  ;;  %v18383_v26 = vshll.u32 %v15881_v6, 16  ;;  %v15899_v32 = vpack.c.bf16 %v319_v1, %v318_v0 }
  0x3c   :  { %v10477_v13 = vld [vmem:[#allocation2] sm:$0xf]  ;;  %v14537_v16 = vld [vmem:[#allocation2 + $0x4] sm:$0xf]  ;;  %v11314_v18 = vor.u32 %v14748_v12, %v11313_v11  ;;  %v11793_v19 = vld [vmem:[#allocation9 + $0x988] sm:$0xf]  ;;  %3850 = vmatpush.bf16.msrb.mxu1 %v11494_v7 }
  0x3d   :  { %v14868_v20 = vld [vmem:[#allocation9 + $0x998] sm:$0xf0]  ;;  %vm18370_vm8 = vsmask.f32 7424  ;;  %v14543_v22 = vld [vmem:[#allocation2 + $0x2c] sm:$0xf0]  ;;  %3874 = vmatpush.bf16.msrb.mxu2 %v11634_v17 }
  0x3e   :  { %v93_v21 = vld [vmem:[#allocation2 + $0x60] sm:$0x33]  ;;  %v10479_v23 = vld [vmem:[#allocation2 + $0x30] sm:$0xf0]  ;;  %v11794_v24 = vor.u32 %v14868_v20, %v11793_v19  ;;  %vm270_vm1 = vmand %vm18371_vm10, %vm18370_vm8  ;;  %v161_v27 = vrot.slane %v15839_v15, 4  ;;  %v15889_v28 = vor.u32 %v14543_v22, %v10477_v13  ;;  %3828 = vmatpush.bf16.msrb.mxu0 %v11314_v18  ;;  %v18613_v30 = vmov 0 }
  0x3f   :  { %v94_v25 = vsel %vm15866_vm2, 0, %v93_v21  ;;  %v15891_v29 = vor.u32 %v14537_v16, %v10479_v23  ;;  %vm15895_vm0 = vmor %vm270_vm1, %vm15877_vm11  ;;  %v272_v31 = vld [vmem:[#allocation2 + $0x60] sm:$0xcc]  ;;  %vm290_vm13 = vsmask.f32 7946  ;;  %v331_v36 = vrot.slane %v18383_v26, 5 }
  0x40   :  { %95 = vst [vmem:[#allocation2 + $0x60] sm:$0x33] %v94_v25  ;;  %v18614_v30 = vsel %vm15895_vm0, 4294967295, %v18613_v30  ;;  %v10485_v34 = vld [vmem:[#allocation2 + $0x8] sm:$0xf]  ;;  %3897 = vmatpush.bf16.msrb.mxu3 %v11794_v24  ;;  %v273_v15 = vsel %vm15895_vm0, 0, %v272_v31  ;;  %3742 = vmatmul.bf16.vlgmr.msra.gmra.mxu0 %v15889_v28 }
  0x41   :  { %18615 = vst [vmem:[#allocation23_spill] sm:$0xff] %v18614_v30  ;;  %v14538_v35 = vld [vmem:[#allocation2 + $0xc] sm:$0xf]  ;;  %3765 = vmatmul.bf16.vlgmr.msra.gmra.mxu1 %v15891_v29  ;;  %vm326_vm12 = vsmask.f32 7440  ;;  %v18384_v49 = vshrl.u32 %v15881_v6, 16 }
  0x42   :  { %v14544_v37 = vld [vmem:[#allocation2 + $0x34] sm:$0xf0]  ;;  %v10487_v39 = vld [vmem:[#allocation2 + $0x38] sm:$0xf0]  ;;  %274 = vst [vmem:[#allocation2 + $0x60] sm:$0xcc] %v273_v15  ;;  %vm15919_vm1 = vmor %vm18373_vm5, %vm326_vm12 }
  0x43   :  { %v15907_v40 = vor.u32 %v14544_v37, %v10485_v34  ;;  %v15909_v43 = vor.u32 %v14538_v35, %v10487_v39  ;;  %v96_v44 = vld [vmem:[#allocation2 + $0x68] sm:$0x33]  ;;  %v18381_v50 = vshll.u32 %v15899_v32, 16  ;;  %v18382_v51 = vshrl.u32 %v15899_v32, 16  ;;  %v316_v52 = vld [vmem:[#allocation6 + $0x50] sm:$0xff]  ;;  %v317_v11 = vld [vmem:[#allocation6 + $0x58] sm:$0xff] }
  0x44   :  { %vm373_vm8 = vsmask.f32 7950  ;;  %vm375_vm10 = vcmask 1047559   ;;  %vm376_vm3 = vsmask.f32 7966  ;;  %v97_v53 = vsel %vm15866_vm2, 0, %v96_v44 }
  0x45   :  { %3788 = vmatmul.bf16.vlgmr.msra.gmra.mxu2 %v15907_v40  ;;  %3811 = vmatmul.bf16.vlgmr.msra.gmra.mxu3 %v15909_v43  ;;  %v275_v56 = vld [vmem:[#allocation2 + $0x68] sm:$0xcc]  ;;  %v18616_v57 = vmov 0  ;;  %v338_v60 = vrot.slane %v18384_v49, 4  ;;  %v344_v61 = vrot.slane %v18381_v50, 5  ;;  %v358_v63 = vrot.slane %v18382_v51, 4  ;;  %vm15934_vm12 = vmand %vm372_vm15, %vm373_vm8 }
  0x46   :  { %v18617_v57 = vsel %vm15919_vm1, 4294967295, %v18616_v57  ;;  %98 = vst [vmem:[#allocation2 + $0x68] sm:$0x33] %v97_v53  ;;  %v276_v0 = vsel %vm15895_vm0, 0, %v275_v56  ;;  %v162_v1 = vrot.slane %v15860_v33, 4  ;;  %v18619_v8 = vmov 0  ;;  %vm377_vm5 = vmand %vm375_vm10, %vm376_vm3 }
  0x47   :  { %18618 = vst [vmem:[#allocation24_spill] sm:$0xff] %v18617_v57  ;;  %v184_v7 = vld [vmem:[#allocation2 + $0x60] sm:$0x33]  ;;  %v18620_v8 = vsel %vm15934_vm12, 4294967295, %v18619_v8  ;;  %v339_v13 = vor.u32 %v338_v60, %v331_v36  ;;  %v359_v16 = vor.u32 %v358_v63, %v344_v61  ;;  %v320_v17 = vld [vmem:[#allocation6 + $0x70] sm:$0xff]  ;;  %v15942_v33 = vpack.c.bf16 %v317_v11, %v316_v52  ;;  %vm15946_vm15 = vmor %vm377_vm5, %vm15934_vm12  ;;  %s15677_s2 = smov [#allocation12]  }
  0x48   :  { %18621 = vst [vmem:[#allocation25_spill] sm:$0xff] %v18620_v8  ;;  %v185_v12 = vsel %vm15725_vm6, %v161_v27, %v184_v7  ;;  %v321_v18 = vld [vmem:[#allocation6 + $0x78] sm:$0xff]  ;;  %v18622_v19 = vmov 0  ;;  %v11473_v22 = vld [vmem:[#allocation9 + $0x708] sm:$0xf]  ;;  %vm18625_vm5 = vcmask 1043458  }
  0x49   :  { %277 = vst [vmem:[#allocation2 + $0x68] sm:$0xcc] %v276_v0  ;;  %v18623_v19 = vsel %vm15946_vm15, 4294967295, %v18622_v19  ;;  %v379_v20 = vld [vmem:[#allocation2 + $0x60] sm:$0x88]  ;;  %v15950_v21 = vpack.c.bf16 %v321_v18, %v320_v17  ;;  %v340_v23 = vrot.slane %v339_v13, 4  ;;  %vm15960_vm10 = vmand %vm18625_vm5, %vm290_vm13 }
  0x4a   :  { %186 = vst [vmem:[#allocation2 + $0x60] sm:$0x33] %v185_v12  ;;  %v380_v24 = vsel %vm15946_vm15, %v331_v36, %v379_v20  ;;  %v18378_v25 = vshll.u32 %v15942_v33, 16  ;;  %v14788_v27 = vld [vmem:[#allocation9 + $0x718] sm:$0xf0]  ;;  %v18379_v31 = vshrl.u32 %v15942_v33, 16 }
  0x4b   :  { %18624 = vst [vmem:[#allocation26_spill] sm:$0xff] %v18623_v19  ;;  %v18376_v34 = vshll.u32 %v15950_v21, 16  ;;  %v18377_v35 = vshrl.u32 %v15950_v21, 16  ;;  %v11474_v15 = vor.u32 %v14788_v27, %v11473_v22  ;;  %v18626_v37 = vmov 0  ;;  %v11613_v52 = vld [vmem:[#allocation9 + $0x820] sm:$0xf] }
  0x4c   :  { %381 = vst [vmem:[#allocation2 + $0x60] sm:$0x88] %v380_v24  ;;  %v18627_v37 = vsel %vm15960_vm10, 4294967295, %v18626_v37  ;;  %v345_v36 = vsel %vm15919_vm1, %v340_v23, %v344_v61  ;;  %v15966_v39 = vrot.slane %v359_v16, 4  ;;  %v335_v44 = vrot.slane %v18378_v25, 5  ;;  %s10459_s4 = sshll.u32 %s15677_s2, 4  ;;  %s10460_s4 = int_to_ptr.vmem [resolvable:$true] %s10459_s4 }
  0x4d   :  { %18628 = vst [vmem:[#allocation27_spill] sm:$0xff] %v18627_v37  ;;  %v14823_v53 = vld [vmem:[#allocation9 + $0x830] sm:$0xf0]  ;;  %vm18629_vm8 = vsmask.f32 7962  ;;  %vm18630_vm3 = vcmask 1047558   ;;  %3851 = vmatpush.bf16.msrb.mxu1 %v11474_v15 }
  0x4e   :  { %vm15972_vm11 = vmand %vm18630_vm3, %vm18629_vm8  ;;  %385 = vst [vmem:[#allocation2 + $0x90] sm:$0xff] %v345_v36  ;;  %v187_v60 = vld [vmem:[#allocation2 + $0x68] sm:$0x33]  ;;  %v348_v63 = vrot.slane %v18379_v31, 4  ;;  %v354_v61 = vrot.slane %v18376_v34, 5  ;;  %v363_v0 = vrot.slane %v18377_v35, 4  ;;  %v11614_v7 = vor.u32 %v14823_v53, %v11613_v52 }
  0x4f   :  { %v188_v11 = vsel %vm15725_vm6, %v162_v1, %v187_v60  ;;  %v11293_v13 = vld [vmem:[#allocation9 + $0x5a0] sm:$0xf]  ;;  %v14743_v16 = vld [vmem:[#allocation9 + $0x5b0] sm:$0xf0]  ;;  %vm15990_vm13 = vmor %vm15972_vm11, %vm15960_vm10  ;;  %v18633_v23 = vmov 0  ;;  %vm18380_vm3 = vcmask 1047556  }
  0x50   :  { %v382_v12 = vld [vmem:[#allocation2 + $0x68] sm:$0x88]  ;;  %189 = vst [vmem:[#allocation2 + $0x68] sm:$0x33] %v188_v11  ;;  %v349_v17 = vor.u32 %v348_v63, %v335_v44  ;;  %3875 = vmatpush.bf16.msrb.mxu2 %v11614_v7  ;;  %v11773_v20 = vld [vmem:[#allocation9 + $0x960] sm:$0xf]  ;;  %v364_v1 = vor.u32 %v363_v0, %v354_v61  ;;  %v11294_v24 = vor.u32 %v14743_v16, %v11293_v13 }
  0x51   :  { %v383_v18 = vsel %vm15946_vm15, %v335_v44, %v382_v12  ;;  %v14863_v22 = vld [vmem:[#allocation9 + $0x970] sm:$0xf0]  ;;  %v18634_v23 = vsel %vm15990_vm13, 4294967295, %v18633_v23  ;;  %v11453_v15 = vld [vmem:[#allocation9 + $0x6e0] sm:$0xf]  ;;  %vm18637_vm8 = vcmask 1043456  }
  0x52   :  { %18635 = vst [vmem:[#allocation28_spill] sm:$0xff] %v18634_v23  ;;  %v11774_v27 = vor.u32 %v14863_v22, %v11773_v20  ;;  %v14783_v36 = vld [vmem:[#allocation9 + $0x6f0] sm:$0xf0]  ;;  %v350_v52 = vrot.slane %v349_v17, 4  ;;  %v11593_v44 = vld [vmem:[#allocation9 + $0x7f8] sm:$0xf]  ;;  %3829 = vmatpush.bf16.msrb.mxu0 %v11294_v24 }
  0x53   :  { %384 = vst [vmem:[#allocation2 + $0x68] sm:$0x88] %v383_v18  ;;  %v11454_v53 = vor.u32 %v14783_v36, %v11453_v15  ;;  %v14818_v60 = vld [vmem:[#allocation9 + $0x808] sm:$0xf0]  ;;  %vm18636_vm5 = vsmask.f32 3328 }
  0x54   :  { %vm15996_vm9 = vmand %vm18637_vm8, %vm18636_vm5  ;;  %v18638_v63 = vmov 0  ;;  %v10525_v56 = vld [vmem:[#allocation2 + $0x60] sm:$0xf]  ;;  %v14549_v7 = vld [vmem:[#allocation2 + $0x64] sm:$0xf]  ;;  %3898 = vmatpush.bf16.msrb.mxu3 %v11774_v27  ;;  %v11594_v0 = vor.u32 %v14818_v60, %v11593_v44  ;;  %v355_v12 = vsel %vm15919_vm1, %v350_v52, %v354_v61  ;;  %v16002_v22 = vrot.slane %v364_v1, 4 }
  0x55   :  { %v18639_v63 = vsel %vm15996_vm9, 4294967295, %v18638_v63  ;;  %v11273_v11 = vld [vmem:[#allocation9 + $0x578] sm:$0xf]  ;;  %3852 = vmatpush.bf16.msrb.mxu1 %v11454_v53  ;;  %v14738_v13 = vld [vmem:[#allocation9 + $0x588] sm:$0xf0]  ;;  %386 = vst [vmem:[#allocation2 + $0x98] sm:$0xff] %v355_v12 }
  0x56   :  { %18640 = vst [vmem:[#allocation29_spill] sm:$0xff] %v18639_v63  ;;  %v11753_v16 = vld [vmem:[#allocation9 + $0x938] sm:$0xf]  ;;  %v14858_v17 = vld [vmem:[#allocation9 + $0x948] sm:$0xf0]  ;;  %3876 = vmatpush.bf16.msrb.mxu2 %v11594_v0  ;;  %v11274_v15 = vor.u32 %v14738_v13, %v11273_v11  ;;  %vm18388_vm8 = vcmask 1040384  }
  0x57   :  { %v14555_v18 = vld [vmem:[#allocation2 + $0x8c] sm:$0xf0]  ;;  %v10527_v20 = vld [vmem:[#allocation2 + $0x90] sm:$0xf0]  ;;  %v11754_v36 = vor.u32 %v14858_v17, %v11753_v16  ;;  %vm18641_vm11 = vsmask.f32 7424 }
  0x58   :  { %vm16006_vm5 = vmand %vm18380_vm3, %vm18641_vm11  ;;  %v16010_v27 = vor.u32 %v14555_v18, %v10525_v56  ;;  %v16012_v61 = vor.u32 %v14549_v7, %v10527_v20  ;;  %v11433_v52 = vld [vmem:[#allocation9 + $0x6b8] sm:$0xf]  ;;  %v14778_v53 = vld [vmem:[#allocation9 + $0x6c8] sm:$0xf0]  ;;  %3830 = vmatpush.bf16.msrb.mxu0 %v11274_v15  ;;  %v18644_v20 = vmov 0  ;;  %s10461_s7 = sshll.u32 %s18366_s3, 4  ;;  %s10462_s7 = int_to_ptr.hbm [resolvable:$true] %s10461_s7 }
  0x59   :  { %v11573_v44 = vld [vmem:[#allocation9 + $0x7d0] sm:$0xf]  ;;  %3899 = vmatpush.bf16.msrb.mxu3 %v11754_v36  ;;  %v11434_v1 = vor.u32 %v14778_v53, %v11433_v52  ;;  %v14813_v60 = vld [vmem:[#allocation9 + $0x7e0] sm:$0xf0]  ;;  %v295_v0 = vld [vmem:[#allocation2 + $0xc0] sm:$0xcc] }
  0x5a   :  { %v298_v11 = vld [vmem:[#allocation2 + $0xc8] sm:$0xcc]  ;;  %3747 = vmatmul.bf16.gmra.mxu0 %v16010_v27  ;;  %3770 = vmatmul.bf16.gmra.mxu1 %v16012_v61  ;;  %v11574_v16 = vor.u32 %v14813_v60, %v11573_v44  ;;  %v296_v56 = vsel %vm15990_vm13, 0, %v295_v0  ;;  %v11253_v17 = vld [vmem:[#allocation9 + $0x550] sm:$0xf]  ;;  %vm16024_vm11 = vmor %vm16006_vm5, %vm15996_vm9  ;;  %vm18387_vm5 = vcmask 1044484  }
  0x5b   :  { %v10533_v12 = vld [vmem:[#allocation2 + $0x68] sm:$0xf]  ;;  %v14550_v13 = vld [vmem:[#allocation2 + $0x6c] sm:$0xf]  ;;  %v299_v7 = vsel %vm15990_vm13, 0, %v298_v11  ;;  %3853 = vmatpush.bf16.msrb.mxu1 %v11434_v1  ;;  %v18645_v20 = vsel %vm16024_vm11, 4294967295, %v18644_v20  ;;  %vm16045_vm3 = vmor %vm18388_vm8, %vm18387_vm5 }
  0x5c   :  { %297 = vst [vmem:[#allocation2 + $0xc0] sm:$0xcc] %v296_v56  ;;  %v14733_v18 = vld [vmem:[#allocation9 + $0x560] sm:$0xf0]  ;;  %3877 = vmatpush.bf16.msrb.mxu2 %v11574_v16  ;;  %v11733_v36 = vld [vmem:[#allocation9 + $0x910] sm:$0xf] }
  0x5d   :  { %18646 = vst [vmem:[#allocation30_spill] sm:$0xff] %v18645_v20  ;;  %v11254_v15 = vor.u32 %v14733_v18, %v11253_v17  ;;  %v14853_v52 = vld [vmem:[#allocation9 + $0x920] sm:$0xf0]  ;;  %v11413_v44 = vld [vmem:[#allocation9 + $0x690] sm:$0xf]  ;;  %vm18398_vm5 = vcmask 1042432  }
  0x5e   :  { %300 = vst [vmem:[#allocation2 + $0xc8] sm:$0xcc] %v299_v7  ;;  %v11734_v53 = vor.u32 %v14853_v52, %v11733_v36  ;;  %v14773_v60 = vld [vmem:[#allocation9 + $0x6a0] sm:$0xf0]  ;;  %v11553_v1 = vld [vmem:[#allocation9 + $0x7a8] sm:$0xf] }
  0x5f   :  { %v14556_v0 = vld [vmem:[#allocation2 + $0x94] sm:$0xf0]  ;;  %v10535_v11 = vld [vmem:[#allocation2 + $0x98] sm:$0xf0]  ;;  %3831 = vmatpush.bf16.msrb.mxu0 %v11254_v15  ;;  %v11414_v16 = vor.u32 %v14773_v60, %v11413_v44  ;;  %v14808_v56 = vld [vmem:[#allocation9 + $0x7b8] sm:$0xf0] }
  0x60   :  { %v16028_v34 = vor.u32 %v14556_v0, %v10533_v12  ;;  %v16030_v24 = vor.u32 %v14550_v13, %v10535_v11  ;;  %3900 = vmatpush.bf16.msrb.mxu3 %v11734_v53  ;;  %v11554_v35 = vor.u32 %v14808_v56, %v11553_v1  ;;  %v11233_v25 = vld [vmem:[#allocation9 + $0x528] sm:$0xf]  ;;  %v14728_v7 = vld [vmem:[#allocation9 + $0x538] sm:$0xf0]  ;;  %v11533_v12 = vld [vmem:[#allocation9 + $0x780] sm:$0xf] }
  0x61   :  { %v11713_v17 = vld [vmem:[#allocation9 + $0x8e8] sm:$0xf]  ;;  %3854 = vmatpush.bf16.msrb.mxu1 %v11414_v16  ;;  %v11234_v18 = vor.u32 %v14728_v7, %v11233_v25  ;;  %v14848_v36 = vld [vmem:[#allocation9 + $0x8f8] sm:$0xf0]  ;;  %v14803_v60 = vld [vmem:[#allocation9 + $0x790] sm:$0xf0] }
  0x62   :  { %18647 = vst [vmem:[#allocation31_spill] sm:$0xff] %v16028_v34  ;;  %v11393_v52 = vld [vmem:[#allocation9 + $0x668] sm:$0xf]  ;;  %v14768_v31 = vld [vmem:[#allocation9 + $0x678] sm:$0xf0]  ;;  %3793 = vmatmul.bf16.gmra.mxu2 %v16028_v34  ;;  %3816 = vmatmul.bf16.gmra.mxu3 %v16030_v24  ;;  %v11714_v15 = vor.u32 %v14848_v36, %v11713_v17  ;;  %v11534_v53 = vor.u32 %v14803_v60, %v11533_v12  ;;  %vm18673_vm9 = vcmask 1047556  }
  0x63   :  { %18648 = vst [vmem:[#allocation32_spill] sm:$0xff] %v16030_v24  ;;  %v11394_v44 = vor.u32 %v14768_v31, %v11393_v52  ;;  %v11213_v13 = vld [vmem:[#allocation9 + $0x500] sm:$0xf]  ;;  %3878 = vmatpush.bf16.msrb.mxu2 %v11554_v35  ;;  %3832 = vmatpush.bf16.msrb.mxu0 %v11234_v18  ;;  %v14723_v1 = vld [vmem:[#allocation9 + $0x510] sm:$0xf0]  ;;  %v197_v31 = vrot.slane %v15771_v38, 7 }
  0x64   :  { %v390_v0 = vld [vmem:[#allocation2 + $0xc0] sm:$0xff]  ;;  %3901 = vmatpush.bf16.msrb.mxu3 %v11714_v15  ;;  %v11214_v56 = vor.u32 %v14723_v1, %v11213_v13  ;;  %v14843_v7 = vld [vmem:[#allocation9 + $0x8d0] sm:$0xf0]  ;;  %v76_v60 = vld [vmem:[#allocation2 + $0x10] sm:$0x33] }
  0x65   :  { %v11693_v11 = vld [vmem:[#allocation9 + $0x8c0] sm:$0xf]  ;;  %v391_v25 = vsel %vm16024_vm11, %v15966_v39, %v390_v0  ;;  %v393_v16 = vld [vmem:[#allocation2 + $0xc8] sm:$0xff]  ;;  %3855 = vmatpush.bf16.msrb.mxu1 %v11394_v44  ;;  %v14763_v12 = vld [vmem:[#allocation9 + $0x650] sm:$0xf0]  ;;  %v77_v15 = vsel %vm15725_vm6, 0, %v76_v60 }
  0x66   :  { %v11373_v17 = vld [vmem:[#allocation9 + $0x640] sm:$0xf]  ;;  %392 = vst [vmem:[#allocation2 + $0xc0] sm:$0xff] %v391_v25  ;;  %v1154_v36 = vunpack.c.l.b16 %v391_v25  ;;  %v1155_v52 = vunpack.c.h.b16 %v391_v25  ;;  %v394_v35 = vsel %vm16024_vm11, %v16002_v22, %v393_v16  ;;  %v11694_v18 = vor.u32 %v14843_v7, %v11693_v11  ;;  %v79_v0 = vld [vmem:[#allocation2 + $0x18] sm:$0x33] }
  0x67   :  { %395 = vst [vmem:[#allocation2 + $0xc8] sm:$0xff] %v394_v35  ;;  %v11374_v39 = vor.u32 %v14763_v12, %v11373_v17  ;;  %v12313_v1 = vld [vmem:[#allocation9 + $0xd98] sm:$0xf]  ;;  %3879 = vmatpush.bf16.msrb.mxu2 %v11534_v53  ;;  %3833 = vmatpush.bf16.msrb.mxu0 %v11214_v56  ;;  %v199_v44 = vrot.slane %v197_v31, 4  ;;  %v200_v11 = vrot.slane %v15777_v41, 7  ;;  %v1156_v7 = vunpack.c.l.b16 %v394_v35 }
  0x68   :  { %v16049_v25 = vpack.c.b16 %v1154_v36, %v1154_v36  ;;  %v16051_v22 = vpack.c.b16 %v1155_v52, %v1155_v52  ;;  %78 = vst [vmem:[#allocation2 + $0x10] sm:$0x33] %v77_v15  ;;  %v14998_v16 = vld [vmem:[#allocation9 + $0xda8] sm:$0xf0]  ;;  %3902 = vmatpush.bf16.msrb.mxu3 %v11694_v18  ;;  %v80_v36 = vsel %vm15725_vm6, 0, %v79_v0  ;;  %v1157_v52 = vunpack.c.h.b16 %v394_v35 }
  0x69   :  { %213 = vst [vmem:[#allocation2 + $0x10] sm:$0xee] %v197_v31  ;;  %3856 = vmatpush.bf16.msrb.mxu1 %v11374_v39  ;;  %v201_v17 = vsel %vm16045_vm3, %v199_v44, %v200_v11  ;;  %v11993_v12 = vld [vmem:[#allocation9 + $0xb18] sm:$0xf]  ;;  %v198_v53 = vrot.slane %v15801_v58, 7  ;;  %v203_v56 = vrot.slane %v15809_v62, 7  ;;  %v12314_v60 = vor.u32 %v14998_v16, %v12313_v1 }
  0x6a   :  { %18651 = vst [vmem:[#allocation33_spill] sm:$0xff] %v16049_v25  ;;  %v14918_v15 = vld [vmem:[#allocation9 + $0xb28] sm:$0xf0]  ;;  %3752 = vmatmul.bf16.gmra.mxu0 %v16049_v25  ;;  %3775 = vmatmul.bf16.gmra.mxu1 %v16051_v22  ;;  %v12473_v18 = vld [vmem:[#allocation9 + $0xed8] sm:$0xf]  ;;  %v16064_v16 = vpack.c.b16 %v1157_v52, %v1157_v52 }
  0x6b   :  { %18652 = vst [vmem:[#allocation34_spill] sm:$0xff] %v16051_v22  ;;  %v11994_v31 = vor.u32 %v14918_v15, %v11993_v12  ;;  %v15038_v39 = vld [vmem:[#allocation9 + $0xee8] sm:$0xf0]  ;;  %v202_v44 = vrot.slane %v198_v53, 4  ;;  %3964 = vmatpush.bf16.msra.mxu2 %v12314_v60  ;;  %v12153_v35 = vld [vmem:[#allocation9 + $0xc58] sm:$0xf] }
  0x6c   :  { %215 = vst [vmem:[#allocation2 + $0x40] sm:$0xff] %v201_v17  ;;  %v12474_v0 = vor.u32 %v15038_v39, %v12473_v18  ;;  %v16062_v17 = vpack.c.b16 %v1156_v7, %v1156_v7  ;;  %v14958_v50 = vld [vmem:[#allocation9 + $0xc68] sm:$0xf0]  ;;  %v12293_v51 = vld [vmem:[#allocation9 + $0xd70] sm:$0xf]  ;;  %v205_v39 = vrot.slane %v200_v11, 4 }
  0x6d   :  { %81 = vst [vmem:[#allocation2 + $0x18] sm:$0x33] %v80_v36  ;;  %3918 = vmatpush.bf16.msra.mxu0 %v11994_v31  ;;  %v14993_v1 = vld [vmem:[#allocation9 + $0xd80] sm:$0xf0]  ;;  %v204_v36 = vsel %vm16045_vm3, %v202_v44, %v203_v56  ;;  %v12154_v12 = vor.u32 %v14958_v50, %v12153_v35  ;;  %v12453_v18 = vld [vmem:[#allocation9 + $0xeb0] sm:$0xf] }
  0x6e   :  { %214 = vst [vmem:[#allocation2 + $0x18] sm:$0xee] %v198_v53  ;;  %3987 = vmatpush.bf16.msra.mxu3 %v12474_v0  ;;  %v12294_v15 = vor.u32 %v14993_v1, %v12293_v51  ;;  %v11973_v53 = vld [vmem:[#allocation9 + $0xaf0] sm:$0xf]  ;;  %v14913_v60 = vld [vmem:[#allocation9 + $0xb00] sm:$0xf0] }
  0x6f   :  { %18653 = vst [vmem:[#allocation35_spill] sm:$0xff] %v16062_v17  ;;  %v11974_v7 = vor.u32 %v14913_v60, %v11973_v53  ;;  %3941 = vmatpush.bf16.msra.mxu1 %v12154_v12  ;;  %v15033_v31 = vld [vmem:[#allocation9 + $0xec0] sm:$0xf0]  ;;  %v12133_v26 = vld [vmem:[#allocation9 + $0xc30] sm:$0xf]  ;;  %vm18399_vm3 = vcmask 1046532  }
  0x70   :  { %18654 = vst [vmem:[#allocation36_spill] sm:$0xff] %v16064_v16  ;;  %3965 = vmatpush.bf16.msra.mxu2 %v12294_v15  ;;  %v14953_v52 = vld [vmem:[#allocation9 + $0xc40] sm:$0xf0]  ;;  %v12454_v49 = vor.u32 %v15033_v31, %v12453_v18  ;;  %v12273_v10 = vld [vmem:[#allocation9 + $0xd48] sm:$0xf]  ;;  %v403_v31 = vrot.slane %v15881_v6, 5  ;;  %vm16079_vm8 = vmor %vm18398_vm5, %vm18399_vm3 }
  0x71   :  { %216 = vst [vmem:[#allocation2 + $0x48] sm:$0xff] %v204_v36  ;;  %3919 = vmatpush.bf16.msra.mxu0 %v11974_v7  ;;  %v12134_v5 = vor.u32 %v14953_v52, %v12133_v26  ;;  %v10493_v50 = vld [vmem:[#allocation2 + $0x10] sm:$0xf]  ;;  %v14539_v51 = vld [vmem:[#allocation2 + $0x14] sm:$0xf] }
  0x72   :  { %3798 = vmatmul.bf16.gmra.mxu2 %v16062_v17  ;;  %3821 = vmatmul.bf16.gmra.mxu3 %v16064_v16  ;;  %v14988_v13 = vld [vmem:[#allocation9 + $0xd58] sm:$0xf0]  ;;  %v11953_v11 = vld [vmem:[#allocation9 + $0xac8] sm:$0xf]  ;;  %v99_v15 = vld [vmem:[#allocation2 + $0x70] sm:$0x33] }
  0x73   :  { %v14908_v44 = vld [vmem:[#allocation9 + $0xad8] sm:$0xf0]  ;;  %v10495_v35 = vld [vmem:[#allocation2 + $0x40] sm:$0xf0]  ;;  %3988 = vmatpush.bf16.msra.mxu3 %v12454_v49  ;;  %v12274_v1 = vor.u32 %v14988_v13, %v12273_v10  ;;  %v12433_v12 = vld [vmem:[#allocation9 + $0xe88] sm:$0xf]  ;;  %3942 = vmatpush.bf16.msra.mxu1 %v12134_v5 }
  0x74   :  { %v14545_v0 = vld [vmem:[#allocation2 + $0x3c] sm:$0xf0]  ;;  %v11954_v36 = vor.u32 %v14908_v44, %v11953_v11  ;;  %v278_v53 = vld [vmem:[#allocation2 + $0x70] sm:$0xcc]  ;;  %v100_v18 = vsel %vm15866_vm2, 0, %v99_v15  ;;  %v16085_v49 = vor.u32 %v14539_v51, %v10495_v35  ;;  %v405_v13 = vrot.slane %v403_v31, 4 }
  0x75   :  { %v15028_v26 = vld [vmem:[#allocation9 + $0xe98] sm:$0xf0]  ;;  %3966 = vmatpush.bf16.msra.mxu2 %v12274_v1  ;;  %v279_v7 = vsel %vm15895_vm0, 0, %v278_v53  ;;  %v102_v52 = vld [vmem:[#allocation2 + $0x78] sm:$0x33]  ;;  %v16083_v10 = vor.u32 %v14545_v0, %v10493_v50  ;;  %v406_v11 = vrot.slane %v15899_v32, 5 }
  0x76   :  { %3920 = vmatpush.bf16.msra.mxu0 %v11954_v36  ;;  %v12434_v60 = vor.u32 %v15028_v26, %v12433_v12  ;;  %101 = vst [vmem:[#allocation2 + $0x70] sm:$0x33] %v100_v18  ;;  %v281_v44 = vld [vmem:[#allocation2 + $0x78] sm:$0xcc]  ;;  %v206_v1 = vrot.slane %v203_v56, 4  ;;  %v103_v36 = vsel %vm15866_vm2, 0, %v102_v52 }
  0x77   :  { %18657 = vst [vmem:[#allocation37_spill] sm:$0xff] %v16083_v10  ;;  %v10501_v12 = vld [vmem:[#allocation2 + $0x18] sm:$0xf]  ;;  %v14540_v15 = vld [vmem:[#allocation2 + $0x1c] sm:$0xf]  ;;  %v407_v51 = vsel %vm16079_vm8, %v405_v13, %v406_v11  ;;  %v409_v0 = vrot.slane %v15950_v21, 5 }
  0x78   :  { %18658 = vst [vmem:[#allocation38_spill] sm:$0xff] %v16085_v49  ;;  %3989 = vmatpush.bf16.msra.mxu3 %v12434_v60  ;;  %v14546_v26 = vld [vmem:[#allocation2 + $0x44] sm:$0xf0]  ;;  %v10503_v50 = vld [vmem:[#allocation2 + $0x48] sm:$0xf0]  ;;  %v282_v56 = vsel %vm15895_vm0, 0, %v281_v44 }
  0x79   :  { %217 = vst [vmem:[#allocation2 + $0x70] sm:$0x11] %v205_v39  ;;  %v404_v39 = vrot.slane %v15942_v33, 5  ;;  %v12113_v35 = vld [vmem:[#allocation9 + $0xc08] sm:$0xf]  ;;  %v16102_v55 = vor.u32 %v14546_v26, %v10501_v12  ;;  %v16104_v9 = vor.u32 %v14540_v15, %v10503_v50 }
  0x7a   :  { %280 = vst [vmem:[#allocation2 + $0x70] sm:$0xcc] %v279_v7  ;;  %v14948_v53 = vld [vmem:[#allocation9 + $0xc18] sm:$0xf0]  ;;  %3834 = vmatmul.bf16.vlgmr.msrb.gmra.mxu0 %v16083_v10  ;;  %3857 = vmatmul.bf16.vlgmr.msrb.gmra.mxu1 %v16085_v49  ;;  %v12253_v7 = vld [vmem:[#allocation9 + $0xd20] sm:$0xf] }
  0x7b   :  { %419 = vst [vmem:[#allocation2 + $0x70] sm:$0x88] %v403_v31  ;;  %v408_v60 = vrot.slane %v404_v39, 4  ;;  %v12114_v18 = vor.u32 %v14948_v53, %v12113_v35  ;;  %v14983_v31 = vld [vmem:[#allocation9 + $0xd30] sm:$0xf0] }
  0x7c   :  { %421 = vst [vmem:[#allocation2 + $0xa0] sm:$0xff] %v407_v51  ;;  %v11933_v52 = vld [vmem:[#allocation9 + $0xaa0] sm:$0xf]  ;;  %v12254_v51 = vor.u32 %v14983_v31, %v12253_v7  ;;  %v14903_v44 = vld [vmem:[#allocation9 + $0xab0] sm:$0xf0] }
  0x7d   :  { %104 = vst [vmem:[#allocation2 + $0x78] sm:$0x33] %v103_v36  ;;  %v410_v13 = vsel %vm16079_vm8, %v408_v60, %v409_v0  ;;  %3943 = vmatpush.bf16.msra.mxu1 %v12114_v18  ;;  %v12413_v46 = vld [vmem:[#allocation9 + $0xe60] sm:$0xf]  ;;  %v11934_v36 = vor.u32 %v14903_v44, %v11933_v52  ;;  %v15023_v4 = vld [vmem:[#allocation9 + $0xe70] sm:$0xf0] }
  0x7e   :  { %218 = vst [vmem:[#allocation2 + $0x78] sm:$0x11] %v206_v1  ;;  %v12093_v35 = vld [vmem:[#allocation9 + $0xbe0] sm:$0xf]  ;;  %3967 = vmatpush.bf16.msra.mxu2 %v12254_v51  ;;  %v12414_v1 = vor.u32 %v15023_v4, %v12413_v46  ;;  %v14943_v53 = vld [vmem:[#allocation9 + $0xbf0] sm:$0xf0] }
  0x7f   :  { %283 = vst [vmem:[#allocation2 + $0x78] sm:$0xcc] %v282_v56  ;;  %v12233_v56 = vld [vmem:[#allocation9 + $0xcf8] sm:$0xf]  ;;  %3921 = vmatpush.bf16.msra.mxu0 %v11934_v36  ;;  %v12094_v5 = vor.u32 %v14943_v53, %v12093_v35  ;;  %v14978_v60 = vld [vmem:[#allocation9 + $0xd08] sm:$0xf0] }
  0x80   :  { %18659 = vst [vmem:[#allocation39_spill] sm:$0xff] %v16102_v55  ;;  %v411_v18 = vrot.slane %v406_v11, 4  ;;  %3990 = vmatpush.bf16.msra.mxu3 %v12414_v1  ;;  %v12234_v7 = vor.u32 %v14978_v60, %v12233_v56  ;;  %v11913_v31 = vld [vmem:[#allocation9 + $0xa78] sm:$0xf]  ;;  %v15018_v46 = vld [vmem:[#allocation9 + $0xe48] sm:$0xf0] }
  0x81   :  { %18660 = vst [vmem:[#allocation40_spill] sm:$0xff] %v16104_v9  ;;  %v12393_v52 = vld [vmem:[#allocation9 + $0xe38] sm:$0xf]  ;;  %3944 = vmatpush.bf16.msra.mxu1 %v12094_v5  ;;  %v14938_v11 = vld [vmem:[#allocation9 + $0xbc8] sm:$0xf0]  ;;  %v412_v56 = vrot.slane %v409_v0, 4 }
  0x82   :  { %420 = vst [vmem:[#allocation2 + $0x78] sm:$0x88] %v404_v39  ;;  %3880 = vmatmul.bf16.vlgmr.msrb.gmra.mxu2 %v16102_v55  ;;  %3903 = vmatmul.bf16.vlgmr.msrb.gmra.mxu3 %v16104_v9  ;;  %v10541_v12 = vld [vmem:[#allocation2 + $0x70] sm:$0xf]  ;;  %v14551_v15 = vld [vmem:[#allocation2 + $0x74] sm:$0xf] }
  0x83   :  { %422 = vst [vmem:[#allocation2 + $0xa8] sm:$0xff] %v410_v13  ;;  %v14557_v26 = vld [vmem:[#allocation2 + $0x9c] sm:$0xf0]  ;;  %v10543_v50 = vld [vmem:[#allocation2 + $0xa0] sm:$0xf0]  ;;  %3968 = vmatpush.bf16.msra.mxu2 %v12234_v7  ;;  %v12394_v13 = vor.u32 %v15018_v46, %v12393_v52  ;;  %vm18667_vm8 = vcmask 1043456  }
  0x84   :  { %v14898_v39 = vld [vmem:[#allocation9 + $0xa88] sm:$0xf0]  ;;  %v12073_v51 = vld [vmem:[#allocation9 + $0xbb8] sm:$0xf]  ;;  %v12213_v44 = vld [vmem:[#allocation9 + $0xcd0] sm:$0xf]  ;;  %v16112_v7 = vor.u32 %v14557_v26, %v10541_v12 }
  0x85   :  { %v11914_v4 = vor.u32 %v14898_v39, %v11913_v31  ;;  %v12074_v36 = vor.u32 %v14938_v11, %v12073_v51  ;;  %v14973_v35 = vld [vmem:[#allocation9 + $0xce0] sm:$0xf0]  ;;  %v301_v1 = vld [vmem:[#allocation2 + $0xd0] sm:$0xcc]  ;;  %v304_v53 = vld [vmem:[#allocation2 + $0xd8] sm:$0xcc]  ;;  %3991 = vmatpush.bf16.msra.mxu3 %v12394_v13  ;;  %v16114_v31 = vor.u32 %v14551_v15, %v10543_v50 }
  0x86   :  { %v12214_v60 = vor.u32 %v14973_v35, %v12213_v44  ;;  %v302_v54 = vsel %vm15990_vm13, 0, %v301_v1  ;;  %v305_v5 = vsel %vm15990_vm13, 0, %v304_v53  ;;  %18661 = vst [vmem:[#allocation41_spill] sm:$0xff] %v16112_v7  ;;  %v11893_v39 = vld [vmem:[#allocation9 + $0xa50] sm:$0xf] }
  0x87   :  { %3922 = vmatpush.bf16.msra.mxu0 %v11914_v4  ;;  %303 = vst [vmem:[#allocation2 + $0xd0] sm:$0xcc] %v302_v54  ;;  %3945 = vmatpush.bf16.msra.mxu1 %v12074_v36  ;;  %v14893_v52 = vld [vmem:[#allocation9 + $0xa60] sm:$0xf0]  ;;  %v12373_v46 = vld [vmem:[#allocation9 + $0xe10] sm:$0xf] }
  0x88   :  { %18662 = vst [vmem:[#allocation42_spill] sm:$0xff] %v16114_v31  ;;  %3969 = vmatpush.bf16.msra.mxu2 %v12214_v60  ;;  %v11894_v0 = vor.u32 %v14893_v52, %v11893_v39  ;;  %v15013_v4 = vld [vmem:[#allocation9 + $0xe20] sm:$0xf0]  ;;  %v12053_v12 = vld [vmem:[#allocation9 + $0xb90] sm:$0xf] }
  0x89   :  { %423 = vst [vmem:[#allocation2 + $0xd0] sm:$0x77] %v411_v18  ;;  %v10549_v13 = vld [vmem:[#allocation2 + $0x78] sm:$0xf]  ;;  %v14552_v11 = vld [vmem:[#allocation2 + $0x7c] sm:$0xf]  ;;  %v12374_v54 = vor.u32 %v15013_v4, %v12373_v46 }
  0x8a   :  { %306 = vst [vmem:[#allocation2 + $0xd8] sm:$0xcc] %v305_v5  ;;  %v14558_v51 = vld [vmem:[#allocation2 + $0xa4] sm:$0xf0]  ;;  %v10551_v44 = vld [vmem:[#allocation2 + $0xa8] sm:$0xf0]  ;;  %3839 = vmatmul.bf16.gmra.mxu0 %v16112_v7  ;;  %3862 = vmatmul.bf16.gmra.mxu1 %v16114_v31 }
  0x8b   :  { %424 = vst [vmem:[#allocation2 + $0xd8] sm:$0x77] %v412_v56  ;;  %v14933_v26 = vld [vmem:[#allocation9 + $0xba0] sm:$0xf0]  ;;  %3923 = vmatpush.bf16.msra.mxu0 %v11894_v0  ;;  %v12193_v50 = vld [vmem:[#allocation9 + $0xca8] sm:$0xf]  ;;  %3992 = vmatpush.bf16.msra.mxu3 %v12374_v54  ;;  %v16118_v45 = vor.u32 %v14558_v51, %v10549_v13  ;;  %v16120_v37 = vor.u32 %v14552_v11, %v10551_v44 }
  0x8c   :  { %v12054_v15 = vor.u32 %v14933_v26, %v12053_v12  ;;  %v14968_v36 = vld [vmem:[#allocation9 + $0xcb8] sm:$0xf0]  ;;  %v11873_v18 = vld [vmem:[#allocation9 + $0xa28] sm:$0xf]  ;;  %v12173_v46 = vld [vmem:[#allocation9 + $0xc80] sm:$0xf] }
  0x8d   :  { %v12194_v35 = vor.u32 %v14968_v36, %v12193_v50  ;;  %v14888_v1 = vld [vmem:[#allocation9 + $0xa38] sm:$0xf0]  ;;  %v12353_v53 = vld [vmem:[#allocation9 + $0xde8] sm:$0xf]  ;;  %v14963_v4 = vld [vmem:[#allocation9 + $0xc90] sm:$0xf0] }
  0x8e   :  { %v15008_v60 = vld [vmem:[#allocation9 + $0xdf8] sm:$0xf0]  ;;  %3946 = vmatpush.bf16.msra.mxu1 %v12054_v15  ;;  %v11874_v5 = vor.u32 %v14888_v1, %v11873_v18  ;;  %v12033_v39 = vld [vmem:[#allocation9 + $0xb68] sm:$0xf]  ;;  %v11853_v12 = vld [vmem:[#allocation9 + $0xa00] sm:$0xf]  ;;  %v12174_v36 = vor.u32 %v14963_v4, %v12173_v46 }
  0x8f   :  { %v12354_v56 = vor.u32 %v15008_v60, %v12353_v53  ;;  %v14928_v52 = vld [vmem:[#allocation9 + $0xb78] sm:$0xf0]  ;;  %3970 = vmatpush.bf16.msra.mxu2 %v12194_v35  ;;  %v14883_v26 = vld [vmem:[#allocation9 + $0xa10] sm:$0xf0]  ;;  %18663 = vst [vmem:[#allocation43_spill] sm:$0xff] %v16118_v45  ;;  %v18665_v15 = vshrl.u32 %v15771_v38, 16 }
  0x90   :  { %v12034_v0 = vor.u32 %v14928_v52, %v12033_v39  ;;  %18664 = vst [vmem:[#allocation44_spill] sm:$0xff] %v16120_v37  ;;  %v496_v50 = vld [vmem:[#allocation2 + $0xd0] sm:$0xff]  ;;  %3924 = vmatpush.bf16.msra.mxu0 %v11874_v5  ;;  %v12333_v59 = vld [vmem:[#allocation9 + $0xdc0] sm:$0xf]  ;;  %v15003_v54 = vld [vmem:[#allocation9 + $0xdd0] sm:$0xf0]  ;;  %v11854_v1 = vor.u32 %v14883_v26, %v11853_v12 }
  0x91   :  { %v222_v18 = vrot.slane %v18665_v15, 7  ;;  %v12013_v53 = vld [vmem:[#allocation9 + $0xb40] sm:$0xf]  ;;  %v14923_v60 = vld [vmem:[#allocation9 + $0xb50] sm:$0xf0]  ;;  %3993 = vmatpush.bf16.msra.mxu3 %v12354_v56  ;;  %v12334_v39 = vor.u32 %v15003_v54, %v12333_v59  ;;  %v1158_v44 = vunpack.c.l.b16 %v496_v50  ;;  %v1159_v5 = vunpack.c.h.b16 %v496_v50 }
  0x92   :  { %v82_v35 = vld [vmem:[#allocation2 + $0x20] sm:$0x33]  ;;  %3947 = vmatpush.bf16.msra.mxu1 %v12034_v0  ;;  %v12014_v13 = vor.u32 %v14923_v60, %v12013_v53  ;;  %v85_v11 = vld [vmem:[#allocation2 + $0x28] sm:$0x33]  ;;  %vm18666_vm3 = vsmask.f32 7938  ;;  %3885 = vmatmul.bf16.gmra.mxu2 %v16118_v45 }
  0x93   :  { %v83_v51 = vsel %vm15725_vm6, 0, %v82_v35  ;;  %3971 = vmatpush.bf16.msra.mxu2 %v12174_v36  ;;  %v226_v52 = vrot.slane %v222_v18, 4  ;;  %vm16128_vm10 = vmand %vm18667_vm8, %vm18666_vm3  ;;  %v18668_v46 = vmov 0  ;;  %3908 = vmatmul.bf16.gmra.mxu3 %v16120_v37  ;;  %v18671_v59 = vshrl.u32 %v15777_v41, 16  ;;  %v14676_v54 = vld [vmem:[#allocation9 + $0x39c] sm:$0xf] }
  0x94   :  { %84 = vst [vmem:[#allocation2 + $0x20] sm:$0x33] %v83_v51  ;;  %v18669_v46 = vsel %vm16128_vm10, 4294967295, %v18668_v46  ;;  %vm18672_vm5 = vsmask.f32 7954  ;;  %v86_v4 = vsel %vm15725_vm6, 0, %v85_v11  ;;  %3925 = vmatpush.bf16.msra.mxu0 %v11854_v1  ;;  %v16174_v3 = vpack.c.b16 %v1158_v44, %v1158_v44 }
  0x95   :  { %18670 = vst [vmem:[#allocation45_spill] sm:$0xff] %v18669_v46  ;;  %v16136_v56 = vrot.slane %v18671_v59, 7  ;;  %vm16140_vm4 = vmand %vm18673_vm9, %vm18672_vm5  ;;  %v18676_v12 = vshrl.u32 %v15801_v58, 16  ;;  %v18677_v50 = vshrl.u32 %v15809_v62, 16  ;;  %vm18678_vm3 = vsmask.f32 4368  ;;  %3994 = vmatpush.bf16.msra.mxu3 %v12334_v39 }
  0x96   :  { %vm18679_vm8 = vsmask.f32 256  ;;  %v18680_v15 = vmov 0  ;;  %vm256_vm9 = vsmask.f32 4352  ;;  %3948 = vmatpush.bf16.msra.mxu1 %v12014_v13  ;;  %v18683_v35 = vshll.u32 %v15777_v41, 16  ;;  %vm16167_vm5 = vmor %vm16140_vm4, %vm16128_vm10 }
  0x97   :  { %v224_v26 = vrot.slane %v18676_v12, 7  ;;  %v16150_v36 = vrot.slane %v18677_v50, 7  ;;  %vm16154_vm12 = vmor %vm18679_vm8, %vm18678_vm3  ;;  %87 = vst [vmem:[#allocation2 + $0x28] sm:$0x33] %v86_v4  ;;  %v11035_v53 = vld [vmem:[#allocation9 + $0x3ac] sm:$0xf0] }
  0x98   :  { %v18681_v15 = vsel %vm16154_vm12, 4294967295, %v18680_v15  ;;  %v14596_v60 = vld [vmem:[#allocation9 + $0x11c] sm:$0xf]  ;;  %v228_v51 = vor.u32 %v16136_v56, %v18683_v35  ;;  %v10715_v59 = vld [vmem:[#allocation9 + $0x12c] sm:$0xf0]  ;;  %v18684_v50 = vshll.u32 %v15771_v38, 16  ;;  %v11038_v13 = vor.u32 %v14676_v54, %v11035_v53  ;;  %vm18692_vm4 = vmmov %vm18679_vm8 }
  0x99   :  { %18682 = vst [vmem:[#allocation46_spill] sm:$0xff] %v18681_v15  ;;  %v230_v11 = vrot.slane %v224_v26, 4  ;;  %v14716_v12 = vld [vmem:[#allocation9 + $0x4dc] sm:$0xf]  ;;  %v18685_v1 = vmov 0  ;;  %v18688_v39 = vshll.u32 %v15809_v62, 16  ;;  %v10718_v4 = vor.u32 %v14596_v60, %v10715_v59 }
  0x9a   :  { %v223_v63 = vor.u32 %v222_v18, %v18684_v50  ;;  %v18686_v1 = vsel %vm16167_vm5, 4294967295, %v18685_v1  ;;  %v11195_v35 = vld [vmem:[#allocation9 + $0x4ec] sm:$0xf0]  ;;  %v14636_v14 = vld [vmem:[#allocation9 + $0x25c] sm:$0xf]  ;;  %18689 = vst [vmem:[#allocation48_spill] sm:$0xff] %v16174_v3  ;;  %v16176_v38 = vpack.c.b16 %v1159_v5, %v1159_v5  ;;  %v229_v18 = vsel %vm16154_vm12, %v226_v52, %v228_v51  ;;  %4056 = vmatpush.bf16.msrb.mxu2 %v11038_v13 }
  0x9b   :  { %18687 = vst [vmem:[#allocation47_spill] sm:$0xff] %v18686_v1  ;;  %v232_v41 = vor.u32 %v16150_v36, %v18688_v39  ;;  %v11198_v0 = vor.u32 %v14716_v12, %v11195_v35  ;;  %v10875_v50 = vld [vmem:[#allocation9 + $0x26c] sm:$0xf0]  ;;  %v14671_v8 = vld [vmem:[#allocation9 + $0x374] sm:$0xf]  ;;  %v18691_v62 = vshll.u32 %v15801_v58, 16  ;;  %4010 = vmatpush.bf16.msrb.mxu0 %v10718_v4 }
  0x9c   :  { %18690 = vst [vmem:[#allocation49_spill] sm:$0xff] %v16176_v38  ;;  %v11015_v46 = vld [vmem:[#allocation9 + $0x384] sm:$0xf0]  ;;  %v497_v42 = vld [vmem:[#allocation2 + $0xd8] sm:$0xff]  ;;  %v10878_v44 = vor.u32 %v14636_v14, %v10875_v50  ;;  %v105_v60 = vld [vmem:[#allocation2 + $0x80] sm:$0x33]  ;;  %3844 = vmatmul.bf16.gmra.mxu0 %v16174_v3  ;;  %3867 = vmatmul.bf16.gmra.mxu1 %v16176_v38 }
  0x9d   :  { %253 = vst [vmem:[#allocation2 + $0x50] sm:$0xff] %v229_v18  ;;  %v225_v39 = vor.u32 %v224_v26, %v18691_v62  ;;  %v233_v54 = vsel %vm16154_vm12, %v230_v11, %v232_v41  ;;  %v14591_v5 = vld [vmem:[#allocation9 + $0xf4] sm:$0xf]  ;;  %v10695_v53 = vld [vmem:[#allocation9 + $0x104] sm:$0xf0]  ;;  %v247_v52 = vld [vmem:[#allocation2 + $0x20] sm:$0xff]  ;;  %4079 = vmatpush.bf16.msrb.mxu3 %v11198_v0  ;;  %v11018_v51 = vor.u32 %v14671_v8, %v11015_v46  ;;  %v1160_v14 = vunpack.c.l.b16 %v497_v42 }
  0x9e   :  { %v284_v59 = vld [vmem:[#allocation2 + $0x80] sm:$0xcc]  ;;  %254 = vst [vmem:[#allocation2 + $0x58] sm:$0xff] %v233_v54  ;;  %v10698_v12 = vor.u32 %v14591_v5, %v10695_v53  ;;  %v14711_v35 = vld [vmem:[#allocation9 + $0x4b4] sm:$0xf]  ;;  %v248_v58 = vsel %vm16167_vm5, %v223_v63, %v247_v52  ;;  %4033 = vmatpush.bf16.msrb.mxu1 %v10878_v44  ;;  %v1161_v4 = vunpack.c.h.b16 %v497_v42  ;;  %v250_v50 = vld [vmem:[#allocation2 + $0x28] sm:$0xff] }
  0x9f   :  { %v11175_v18 = vld [vmem:[#allocation9 + $0x4c4] sm:$0xf0]  ;;  %v14631_v11 = vld [vmem:[#allocation9 + $0x234] sm:$0xf]  ;;  %v14666_v13 = vld [vmem:[#allocation9 + $0x34c] sm:$0xf]  ;;  %v251_v8 = vsel %vm16167_vm5, %v225_v39, %v250_v50  ;;  %4057 = vmatpush.bf16.msrb.mxu2 %v11018_v51 }
  0xa0   :  { %v11178_v26 = vor.u32 %v14711_v35, %v11175_v18  ;;  %v10855_v41 = vld [vmem:[#allocation9 + $0x244] sm:$0xf0]  ;;  %249 = vst [vmem:[#allocation2 + $0x20] sm:$0xff] %v248_v58  ;;  %v10995_v57 = vld [vmem:[#allocation9 + $0x35c] sm:$0xf0]  ;;  %4011 = vmatpush.bf16.msrb.mxu0 %v10698_v12  ;;  %v106_v5 = vsel %vm15866_vm2, 0, %v105_v60  ;;  %v16204_v60 = vpack.c.b16 %v1161_v4, %v1161_v4 }
  0xa1   :  { %v10858_v62 = vor.u32 %v14631_v11, %v10855_v41  ;;  %v14586_v54 = vld [vmem:[#allocation9 + $0xcc] sm:$0xf]  ;;  %v10675_v63 = vld [vmem:[#allocation9 + $0xdc] sm:$0xf0]  ;;  %252 = vst [vmem:[#allocation2 + $0x28] sm:$0xff] %v251_v8  ;;  %v10998_v44 = vor.u32 %v14666_v13, %v10995_v57  ;;  %v285_v53 = vsel %vm15895_vm0, 0, %v284_v59  ;;  %v16202_v57 = vpack.c.b16 %v1160_v14, %v1160_v14 }
  0xa2   :  { %v14706_v46 = vld [vmem:[#allocation9 + $0x48c] sm:$0xf]  ;;  %v11155_v0 = vld [vmem:[#allocation9 + $0x49c] sm:$0xf0]  ;;  %v10678_v42 = vor.u32 %v14586_v54, %v10675_v63  ;;  %vm18693_vm3 = vcmask 1040384   ;;  %v18694_v52 = vmov 0  ;;  %4080 = vmatpush.bf16.msrb.mxu3 %v11178_v26 }
  0xa3   :  { %vm16196_vm8 = vmand %vm18693_vm3, %vm18692_vm4  ;;  %4034 = vmatpush.bf16.msrb.mxu1 %v10858_v62  ;;  %v11158_v39 = vor.u32 %v14706_v46, %v11155_v0  ;;  %107 = vst [vmem:[#allocation2 + $0x80] sm:$0x33] %v106_v5  ;;  %v108_v51 = vld [vmem:[#allocation2 + $0x88] sm:$0x33]  ;;  %vm18697_vm10 = vcmask 1044484   ;;  %v18700_v59 = vshrl.u32 %v15881_v6, 16  ;;  %4058 = vmatpush.bf16.msrb.mxu2 %v10998_v44 }
  0xa4   :  { %v18695_v52 = vsel %vm16196_vm8, 4294967295, %v18694_v52  ;;  %vm257_vm14 = vmand %vm18697_vm10, %vm256_vm9  ;;  %18698 = vst [vmem:[#allocation51_spill] sm:$0xff] %v16202_v57  ;;  %vm425_vm5 = vsmask.f32 2304  ;;  %vm426_vm1 = vsmask.f32 6416  ;;  %4012 = vmatpush.bf16.msrb.mxu0 %v10678_v42  ;;  %3890 = vmatmul.bf16.gmra.mxu2 %v16202_v57 }
  0xa5   :  { %18696 = vst [vmem:[#allocation50_spill] sm:$0xff] %v18695_v52  ;;  %v428_v12 = vrot.slane %v18700_v59, 5  ;;  %v18701_v35 = vshll.u32 %v15881_v6, 16  ;;  %v18702_v58 = vshrl.u32 %v15899_v32, 16  ;;  %v18703_v11 = vshll.u32 %v15899_v32, 16  ;;  %vm16218_vm10 = vmor %vm257_vm14, %vm16196_vm8  ;;  %3913 = vmatmul.bf16.gmra.mxu3 %v16204_v60 }
  0xa6   :  { %18699 = vst [vmem:[#allocation52_spill] sm:$0xff] %v16204_v60  ;;  %v109_v13 = vsel %vm15866_vm2, 0, %v108_v51  ;;  %v287_v14 = vld [vmem:[#allocation2 + $0x88] sm:$0xcc]  ;;  %v18704_v4 = vmov 0  ;;  %v234_v6 = vrot.slane %v16136_v56, 4  ;;  %4081 = vmatpush.bf16.msrb.mxu3 %v11158_v39  ;;  %vm16229_vm14 = vmor %vm425_vm5, %vm426_vm1 }
  0xa7   :  { %286 = vst [vmem:[#allocation2 + $0x80] sm:$0xcc] %v285_v53  ;;  %v429_v18 = vrot.slane %v18701_v35, 6  ;;  %v435_v26 = vrot.slane %v18702_v58, 5  ;;  %v436_v41 = vrot.slane %v18703_v11, 6  ;;  %v18705_v4 = vsel %vm16218_vm10, 4294967295, %v18704_v4 }
  0xa8   :  { %18706 = vst [vmem:[#allocation53_spill] sm:$0xff] %v18705_v4  ;;  %v14547_v50 = vld [vmem:[#allocation2 + $0x4c] sm:$0xf0]  ;;  %v18707_v54 = vshrl.u32 %v15942_v33, 16  ;;  %v10511_v8 = vld [vmem:[#allocation2 + $0x50] sm:$0xf0] }
  0xa9   :  { %v430_v62 = vor.u32 %v429_v18, %v428_v12  ;;  %110 = vst [vmem:[#allocation2 + $0x88] sm:$0x33] %v109_v13  ;;  %v16233_v46 = vor.u32 %v436_v41, %v435_v26  ;;  %v288_v56 = vsel %vm15895_vm0, 0, %v287_v14  ;;  %v14626_v0 = vld [vmem:[#allocation9 + $0x20c] sm:$0xf]  ;;  %v18710_v39 = vshll.u32 %v15942_v33, 16 }
  0xaa   :  { %v431_v32 = vrot.slane %v18707_v54, 5  ;;  %v10835_v44 = vld [vmem:[#allocation9 + $0x21c] sm:$0xf0]  ;;  %vm461_vm9 = vsmask.f32 6400  ;;  %v235_v12 = vrot.slane %v16150_v36, 4 }
  0xab   :  { %v10509_v42 = vld [vmem:[#allocation2 + $0x20] sm:$0xf]  ;;  %v14541_v5 = vld [vmem:[#allocation2 + $0x24] sm:$0xf]  ;;  %v434_v53 = vrot.slane %v430_v62, 4  ;;  %v432_v51 = vrot.slane %v18710_v39, 6  ;;  %v10838_v59 = vor.u32 %v14626_v0, %v10835_v44 }
  0xac   :  { %v259_v35 = vld [vmem:[#allocation2 + $0x80] sm:$0x11]  ;;  %289 = vst [vmem:[#allocation2 + $0x88] sm:$0xcc] %v288_v56  ;;  %v18711_v18 = vshrl.u32 %v15950_v21, 16  ;;  %v18712_v33 = vshll.u32 %v15950_v21, 16  ;;  %v16249_v36 = vor.u32 %v14547_v50, %v10509_v42 }
  0xad   :  { %v260_v26 = vsel %vm16218_vm10, %v234_v6, %v259_v35  ;;  %v438_v11 = vsel %vm16229_vm14, %v434_v53, %v16233_v46  ;;  %v433_v13 = vor.u32 %v432_v51, %v431_v32  ;;  %4035 = vmatpush.bf16.msrb.mxu1 %v10838_v59  ;;  %v14661_v54 = vld [vmem:[#allocation9 + $0x324] sm:$0xf]  ;;  %v10975_v0 = vld [vmem:[#allocation9 + $0x334] sm:$0xf0]  ;;  %v16253_v6 = vor.u32 %v14541_v5, %v10511_v8  ;;  %v14548_v42 = vld [vmem:[#allocation2 + $0x54] sm:$0xf0] }
  0xae   :  { %v440_v58 = vrot.slane %v18711_v18, 5  ;;  %v452_v41 = vld [vmem:[#allocation2 + $0x80] sm:$0xcc]  ;;  %v441_v14 = vrot.slane %v18712_v33, 6  ;;  %261 = vst [vmem:[#allocation2 + $0x80] sm:$0x11] %v260_v26  ;;  %v10978_v32 = vor.u32 %v14661_v54, %v10975_v0  ;;  %3926 = vmatmul.bf16.vlgmr.msra.gmra.mxu0 %v16249_v36 }
  0xaf   :  { %v453_v56 = vsel %vm15990_vm13, %v430_v62, %v452_v41  ;;  %v14581_v44 = vld [vmem:[#allocation9 + $0xa4] sm:$0xf]  ;;  %v439_v39 = vrot.slane %v433_v13, 4  ;;  %v10655_v51 = vld [vmem:[#allocation9 + $0xb4] sm:$0xf0]  ;;  %458 = vst [vmem:[#allocation2 + $0xb0] sm:$0xff] %v438_v11  ;;  %3949 = vmatmul.bf16.vlgmr.msra.gmra.mxu1 %v16253_v6 }
  0xb0   :  { %454 = vst [vmem:[#allocation2 + $0x80] sm:$0xcc] %v453_v56  ;;  %v16255_v53 = vor.u32 %v441_v14, %v440_v58  ;;  %v262_v21 = vld [vmem:[#allocation2 + $0x88] sm:$0x11]  ;;  %v10658_v59 = vor.u32 %v14581_v44, %v10655_v51  ;;  %v10519_v26 = vld [vmem:[#allocation2 + $0x58] sm:$0xf0]  ;;  %4059 = vmatpush.bf16.msrb.mxu2 %v10978_v32 }
  0xb1   :  { %v14701_v35 = vld [vmem:[#allocation9 + $0x464] sm:$0xf]  ;;  %v14542_v18 = vld [vmem:[#allocation2 + $0x2c] sm:$0xf]  ;;  %v263_v62 = vsel %vm16218_vm10, %v235_v12, %v262_v21  ;;  %v11135_v5 = vld [vmem:[#allocation9 + $0x474] sm:$0xf0] }
  0xb2   :  { %v10517_v50 = vld [vmem:[#allocation2 + $0x28] sm:$0xf]  ;;  %v443_v8 = vsel %vm16229_vm14, %v439_v39, %v16255_v53  ;;  %264 = vst [vmem:[#allocation2 + $0x88] sm:$0x11] %v263_v62  ;;  %4013 = vmatpush.bf16.msrb.mxu0 %v10658_v59  ;;  %v11138_v11 = vor.u32 %v14701_v35, %v11135_v5  ;;  %v10815_v41 = vld [vmem:[#allocation9 + $0x1f4] sm:$0xf0]  ;;  %v16274_v62 = vor.u32 %v14542_v18, %v10519_v26 }
  0xb3   :  { %v14621_v58 = vld [vmem:[#allocation9 + $0x1e4] sm:$0xf]  ;;  %v14656_v33 = vld [vmem:[#allocation9 + $0x2fc] sm:$0xf]  ;;  %459 = vst [vmem:[#allocation2 + $0xb8] sm:$0xff] %v443_v8  ;;  %vm18713_vm1 = vcmask 1046532   ;;  %v16272_v35 = vor.u32 %v14548_v42, %v10517_v50 }
  0xb4   :  { %v455_v14 = vld [vmem:[#allocation2 + $0x88] sm:$0xcc]  ;;  %v10818_v54 = vor.u32 %v14621_v58, %v10815_v41  ;;  %v10955_v12 = vld [vmem:[#allocation9 + $0x30c] sm:$0xf0]  ;;  %4082 = vmatpush.bf16.msrb.mxu3 %v11138_v11  ;;  %v14576_v0 = vld [vmem:[#allocation9 + $0x7c] sm:$0xf] }
  0xb5   :  { %v456_v63 = vsel %vm15990_vm13, %v433_v13, %v455_v14  ;;  %v10958_v56 = vor.u32 %v14656_v33, %v10955_v12  ;;  %v10635_v44 = vld [vmem:[#allocation9 + $0x8c] sm:$0xf0]  ;;  %v14696_v39 = vld [vmem:[#allocation9 + $0x43c] sm:$0xf]  ;;  %vm16268_vm4 = vmand %vm18713_vm1, %vm461_vm9  ;;  %18716 = vst [vmem:[#allocation54_spill] sm:$0xff] %v16274_v62  ;;  %v444_v5 = vrot.slane %v16233_v46, 4  ;;  %3972 = vmatmul.bf16.vlgmr.msra.gmra.mxu2 %v16272_v35  ;;  %3995 = vmatmul.bf16.vlgmr.msra.gmra.mxu3 %v16274_v62 }
  0xb6   :  { %457 = vst [vmem:[#allocation2 + $0x88] sm:$0xcc] %v456_v63  ;;  %4036 = vmatpush.bf16.msrb.mxu1 %v10818_v54  ;;  %v10638_v32 = vor.u32 %v14576_v0, %v10635_v44  ;;  %v11115_v51 = vld [vmem:[#allocation9 + $0x44c] sm:$0xf0]  ;;  %v14616_v21 = vld [vmem:[#allocation9 + $0x1bc] sm:$0xf] }
  0xb7   :  { %4060 = vmatpush.bf16.msrb.mxu2 %v10958_v56  ;;  %v11118_v13 = vor.u32 %v14696_v39, %v11115_v51  ;;  %v10795_v8 = vld [vmem:[#allocation9 + $0x1cc] sm:$0xf0]  ;;  %vm18717_vm3 = vcmask 1042432   ;;  %v18718_v58 = vmov 0  ;;  %v14651_v41 = vld [vmem:[#allocation9 + $0x2d4] sm:$0xf] }
  0xb8   :  { %vm16279_vm14 = vmand %vm18717_vm3, %vm425_vm5  ;;  %4014 = vmatpush.bf16.msrb.mxu0 %v10638_v32  ;;  %v10798_v11 = vor.u32 %v14616_v21, %v10795_v8  ;;  %v10935_v33 = vld [vmem:[#allocation9 + $0x2e4] sm:$0xf0]  ;;  %v307_v50 = vld [vmem:[#allocation2 + $0xe0] sm:$0xcc]  ;;  %v445_v18 = vrot.slane %v16255_v53, 4  ;;  %v18721_v53 = vmov 0 }
  0xb9   :  { %v18719_v58 = vsel %vm16279_vm14, 4294967295, %v18718_v58  ;;  %4083 = vmatpush.bf16.msrb.mxu3 %v11118_v13  ;;  %v310_v42 = vld [vmem:[#allocation2 + $0xe8] sm:$0xcc]  ;;  %v10938_v26 = vor.u32 %v14651_v41, %v10935_v33  ;;  %v308_v46 = vsel %vm15990_vm13, 0, %v307_v50  ;;  %v10557_v54 = vld [vmem:[#allocation2 + $0x80] sm:$0xf]  ;;  %vm16294_vm5 = vmor %vm16268_vm4, %vm16279_vm14 }
  0xba   :  { %18720 = vst [vmem:[#allocation55_spill] sm:$0xff] %v18719_v58  ;;  %4037 = vmatpush.bf16.msrb.mxu1 %v10798_v11  ;;  %v311_v14 = vsel %vm15990_vm13, 0, %v310_v42  ;;  %v14553_v12 = vld [vmem:[#allocation2 + $0x84] sm:$0xf]  ;;  %v18722_v53 = vsel %vm16294_vm5, 4294967295, %v18721_v53 }
  0xbb   :  { %309 = vst [vmem:[#allocation2 + $0xe0] sm:$0xcc] %v308_v46  ;;  %4061 = vmatpush.bf16.msrb.mxu2 %v10938_v26  ;;  %v14571_v63 = vld [vmem:[#allocation9 + $0x54] sm:$0xf]  ;;  %v10615_v56 = vld [vmem:[#allocation9 + $0x64] sm:$0xf0] }
  0xbc   :  { %18723 = vst [vmem:[#allocation56_spill] sm:$0xff] %v18722_v53  ;;  %v14559_v0 = vld [vmem:[#allocation2 + $0xac] sm:$0xf0]  ;;  %v10559_v44 = vld [vmem:[#allocation2 + $0xb0] sm:$0xf0]  ;;  %v10618_v39 = vor.u32 %v14571_v63, %v10615_v56 }
  0xbd   :  { %312 = vst [vmem:[#allocation2 + $0xe8] sm:$0xcc] %v311_v14  ;;  %v14691_v32 = vld [vmem:[#allocation9 + $0x414] sm:$0xf]  ;;  %v11095_v51 = vld [vmem:[#allocation9 + $0x424] sm:$0xf0]  ;;  %v16298_v50 = vor.u32 %v14559_v0, %v10557_v54  ;;  %v16300_v42 = vor.u32 %v14553_v12, %v10559_v44 }
  0xbe   :  { %v14611_v21 = vld [vmem:[#allocation9 + $0x194] sm:$0xf]  ;;  %v10775_v13 = vld [vmem:[#allocation9 + $0x1a4] sm:$0xf0]  ;;  %4015 = vmatpush.bf16.msrb.mxu0 %v10618_v39  ;;  %v11098_v8 = vor.u32 %v14691_v32, %v11095_v51  ;;  %v14646_v41 = vld [vmem:[#allocation9 + $0x2ac] sm:$0xf] }
  0xbf   :  { %v10778_v11 = vor.u32 %v14611_v21, %v10775_v13  ;;  %v10915_v59 = vld [vmem:[#allocation9 + $0x2bc] sm:$0xf0]  ;;  %v14566_v33 = vld [vmem:[#allocation9 + $0x2c] sm:$0xf]  ;;  %18724 = vst [vmem:[#allocation57_spill] sm:$0xff] %v16298_v50  ;;  %3931 = vmatmul.bf16.gmra.mxu0 %v16298_v50  ;;  %3954 = vmatmul.bf16.gmra.mxu1 %v16300_v42 }
  0xc0   :  { %18725 = vst [vmem:[#allocation58_spill] sm:$0xff] %v16300_v42  ;;  %v10918_v26 = vor.u32 %v14646_v41, %v10915_v59  ;;  %v10595_v46 = vld [vmem:[#allocation9 + $0x3c] sm:$0xf0]  ;;  %v14686_v14 = vld [vmem:[#allocation9 + $0x3ec] sm:$0xf]  ;;  %4084 = vmatpush.bf16.msrb.mxu3 %v11098_v8 }
  0xc1   :  { %v11075_v58 = vld [vmem:[#allocation9 + $0x3fc] sm:$0xf0]  ;;  %4038 = vmatpush.bf16.msrb.mxu1 %v10778_v11  ;;  %v10598_v63 = vor.u32 %v14566_v33, %v10595_v46  ;;  %v14606_v52 = vld [vmem:[#allocation9 + $0x16c] sm:$0xf]  ;;  %v14641_v39 = vld [vmem:[#allocation9 + $0x284] sm:$0xf] }
  0xc2   :  { %v11078_v56 = vor.u32 %v14686_v14, %v11075_v58  ;;  %v10755_v4 = vld [vmem:[#allocation9 + $0x17c] sm:$0xf0]  ;;  %v10565_v32 = vld [vmem:[#allocation2 + $0x88] sm:$0xf]  ;;  %v14560_v51 = vld [vmem:[#allocation2 + $0xb4] sm:$0xf0]  ;;  %4062 = vmatpush.bf16.msrb.mxu2 %v10918_v26 }
  0xc3   :  { %v14554_v21 = vld [vmem:[#allocation2 + $0x8c] sm:$0xf]  ;;  %v10567_v13 = vld [vmem:[#allocation2 + $0xb8] sm:$0xf0]  ;;  %v464_v1 = vld [vmem:[#allocation2 + $0xe0] sm:$0x77]  ;;  %v10758_v54 = vor.u32 %v14606_v52, %v10755_v4  ;;  %4016 = vmatpush.bf16.msrb.mxu0 %v10598_v63  ;;  %v16308_v46 = vor.u32 %v14560_v51, %v10565_v32 }
  0xc4   :  { %v10895_v12 = vld [vmem:[#allocation9 + $0x294] sm:$0xf0]  ;;  %v14561_v0 = vld [vmem:[#allocation9 + $0x4] sm:$0xf]  ;;  %v465_v44 = vsel %vm16294_vm5, %v444_v5, %v464_v1  ;;  %4085 = vmatpush.bf16.msrb.mxu3 %v11078_v56  ;;  %v16310_v14 = vor.u32 %v14554_v21, %v10567_v13  ;;  %v14836_v63 = vld [vmem:[#allocation9 + $0x89c] sm:$0xf]  ;;  %v3743_v56 = vpop.f32.mrf.mxu0 }
  0xc5   :  { %v467_v41 = vld [vmem:[#allocation2 + $0xe8] sm:$0x77]  ;;  %v10898_v8 = vor.u32 %v14641_v39, %v10895_v12  ;;  %v10575_v11 = vld [vmem:[#allocation9 + $0x14] sm:$0xf0]  ;;  %466 = vst [vmem:[#allocation2 + $0xe0] sm:$0x77] %v465_v44  ;;  %4039 = vmatpush.bf16.msrb.mxu1 %v10758_v54  ;;  %3977 = vmatmul.bf16.gmra.mxu2 %v16308_v46  ;;  %v3766_v54 = vpop.f32.mrf.mxu1 }
  0xc6   :  { %v14681_v58 = vld [vmem:[#allocation9 + $0x3c4] sm:$0xf]  ;;  %v468_v59 = vsel %vm16294_vm5, %v445_v18, %v467_v41  ;;  %v10578_v33 = vor.u32 %v14561_v0, %v10575_v11  ;;  %v11055_v52 = vld [vmem:[#allocation9 + $0x3d4] sm:$0xf0]  ;;  %4000 = vmatmul.bf16.gmra.mxu3 %v16310_v14  ;;  %v11675_v39 = vld [vmem:[#allocation9 + $0x8ac] sm:$0xf0]  ;;  %v3767_v51 = vadd.f32 %v3766_v54, %v3743_v56 }
  0xc7   :  { %v14601_v4 = vld [vmem:[#allocation9 + $0x144] sm:$0xf]  ;;  %469 = vst [vmem:[#allocation2 + $0xe8] sm:$0x77] %v468_v59  ;;  %v11058_v1 = vor.u32 %v14681_v58, %v11055_v52  ;;  %v10735_v5 = vld [vmem:[#allocation9 + $0x154] sm:$0xf0]  ;;  %4063 = vmatpush.bf16.msrb.mxu2 %v10898_v8  ;;  %v11678_v44 = vor.u32 %v14836_v63, %v11675_v39 }
  0xc8   :  { %v10738_v26 = vor.u32 %v14601_v4, %v10735_v5  ;;  %4017 = vmatpush.bf16.msrb.mxu0 %v10578_v33  ;;  %v14756_v41 = vld [vmem:[#allocation9 + $0x61c] sm:$0xf]  ;;  %v11355_v32 = vld [vmem:[#allocation9 + $0x62c] sm:$0xf0]  ;;  %v11335_v63 = vld [vmem:[#allocation9 + $0x604] sm:$0xf0] }
  0xc9   :  { %4086 = vmatpush.bf16.msrb.mxu3 %v11058_v1  ;;  %v11358_v21 = vor.u32 %v14756_v41, %v11355_v32  ;;  %v14876_v13 = vld [vmem:[#allocation9 + $0x9dc] sm:$0xf]  ;;  %v11835_v8 = vld [vmem:[#allocation9 + $0x9ec] sm:$0xf0]  ;;  %v14831_v1 = vld [vmem:[#allocation9 + $0x874] sm:$0xf] }
  0xca   :  { %4040 = vmatpush.bf16.msrb.mxu1 %v10738_v26  ;;  %v11838_v11 = vor.u32 %v14876_v13, %v11835_v8  ;;  %v14796_v52 = vld [vmem:[#allocation9 + $0x75c] sm:$0xf]  ;;  %v11515_v4 = vld [vmem:[#allocation9 + $0x76c] sm:$0xf0]  ;;  %v11655_v26 = vld [vmem:[#allocation9 + $0x884] sm:$0xf0] }
  0xcb   :  { %4148 = vmatpush.bf16.msra.mxu2 %v11678_v44  ;;  %v11518_v5 = vor.u32 %v14796_v52, %v11515_v4  ;;  %v11658_v54 = vor.u32 %v14831_v1, %v11655_v26  ;;  %v14871_v44 = vld [vmem:[#allocation9 + $0x9b4] sm:$0xf]  ;;  %v11815_v32 = vld [vmem:[#allocation9 + $0x9c4] sm:$0xf0]  ;;  %v3812_v52 = vpop.f32.mrf.mxu3  ;;  %v11635_v20 = vld [vmem:[#allocation9 + $0x85c] sm:$0xf0] }
  0xcc   :  { %v498_v18 = vld [vmem:[#allocation2 + $0xe0] sm:$0xff]  ;;  %4102 = vmatpush.bf16.msra.mxu0 %v11358_v21  ;;  %v14791_v21 = vld [vmem:[#allocation9 + $0x734] sm:$0xf]  ;;  %v11818_v13 = vor.u32 %v14871_v44, %v11815_v32  ;;  %v11495_v8 = vld [vmem:[#allocation9 + $0x744] sm:$0xf0] }
  0xcd   :  { %v1162_v12 = vunpack.c.l.b16 %v498_v18  ;;  %v1163_v0 = vunpack.c.h.b16 %v498_v18  ;;  %4171 = vmatpush.bf16.msra.mxu3 %v11838_v11  ;;  %v14751_v18 = vld [vmem:[#allocation9 + $0x5f4] sm:$0xf]  ;;  %v3789_v11 = vpop.f32.mrf.mxu2  ;;  %v11498_v53 = vor.u32 %v14791_v21, %v11495_v8  ;;  %v14746_v44 = vld [vmem:[#allocation9 + $0x5cc] sm:$0xf]  ;;  %v11315_v19 = vld [vmem:[#allocation9 + $0x5dc] sm:$0xf0] }
  0xce   :  { %v499_v33 = vld [vmem:[#allocation2 + $0xe8] sm:$0xff]  ;;  %v11338_v41 = vor.u32 %v14751_v18, %v11335_v63  ;;  %4125 = vmatpush.bf16.msra.mxu1 %v11518_v5  ;;  %v14826_v63 = vld [vmem:[#allocation9 + $0x84c] sm:$0xf]  ;;  %v11615_v21 = vld [vmem:[#allocation9 + $0x834] sm:$0xf0] }
  0xcf   :  { %v16314_v58 = vpack.c.b16 %v1162_v12, %v1162_v12  ;;  %v16316_v59 = vpack.c.b16 %v1163_v0, %v1163_v0  ;;  %v1164_v39 = vunpack.c.l.b16 %v499_v33  ;;  %v1165_v56 = vunpack.c.h.b16 %v499_v33  ;;  %v3745_v12 = vpop.f32.mrf.mxu0  ;;  %v3768_v0 = vpop.f32.mrf.mxu1  ;;  %4149 = vmatpush.bf16.msra.mxu2 %v11658_v54  ;;  %v14866_v23 = vld [vmem:[#allocation9 + $0x98c] sm:$0xf]  ;;  %v11475_v54 = vld [vmem:[#allocation9 + $0x71c] sm:$0xf0]  ;;  %v15016_v48 = vld [vmem:[#allocation9 + $0xe3c] sm:$0xf] }
  0xd0   :  { %v3769_v4 = vadd.f32 %v3768_v0, %v3745_v12  ;;  %v3790_v33 = vadd.f32 %v3789_v11, %v3767_v51  ;;  %4103 = vmatpush.bf16.msra.mxu0 %v11338_v41  ;;  %v11638_v32 = vor.u32 %v14826_v63, %v11635_v20  ;;  %v11795_v12 = vld [vmem:[#allocation9 + $0x99c] sm:$0xf0]  ;;  %v11318_v51 = vor.u32 %v14746_v44, %v11315_v19  ;;  %v14741_v19 = vld [vmem:[#allocation9 + $0x5a4] sm:$0xf]  ;;  %v14846_v15 = vld [vmem:[#allocation9 + $0x8ec] sm:$0xf] }
  0xd1   :  { %3936 = vmatmul.bf16.gmra.mxu0 %v16314_v58  ;;  %3959 = vmatmul.bf16.gmra.mxu1 %v16316_v59  ;;  %v16320_v1 = vpack.c.b16 %v1164_v39, %v1164_v39  ;;  %v16322_v26 = vpack.c.b16 %v1165_v56, %v1165_v56  ;;  %v11798_v5 = vor.u32 %v14866_v23, %v11795_v12  ;;  %v14786_v39 = vld [vmem:[#allocation9 + $0x70c] sm:$0xf]  ;;  %v14821_v56 = vld [vmem:[#allocation9 + $0x824] sm:$0xf]  ;;  %v11295_v23 = vld [vmem:[#allocation9 + $0x5b4] sm:$0xf0] }
  0xd2   :  { %4172 = vmatpush.bf16.msra.mxu3 %v11818_v13  ;;  %v16324_v18 = vadd.f32 %v3812_v52, %v3790_v33  ;;  %4126 = vmatpush.bf16.msra.mxu1 %v11498_v53  ;;  %v11478_v41 = vor.u32 %v14786_v39, %v11475_v54  ;;  %v11618_v0 = vor.u32 %v14821_v56, %v11615_v21  ;;  %v14861_v33 = vld [vmem:[#allocation9 + $0x964] sm:$0xf]  ;;  %v11455_v39 = vld [vmem:[#allocation9 + $0x6f4] sm:$0xf0]  ;;  %v11595_v56 = vld [vmem:[#allocation9 + $0x80c] sm:$0xf0] }
  0xd3   :  { %4150 = vmatpush.bf16.msra.mxu2 %v11638_v32  ;;  %v3814_v13 = vpop.f32.mrf.mxu3  ;;  %v11298_v44 = vor.u32 %v14741_v19, %v11295_v23  ;;  %v11775_v32 = vld [vmem:[#allocation9 + $0x974] sm:$0xf0]  ;;  %v14781_v12 = vld [vmem:[#allocation9 + $0x6e4] sm:$0xf]  ;;  %v11275_v21 = vld [vmem:[#allocation9 + $0x58c] sm:$0xf0] }
  0xd4   :  { %4104 = vmatpush.bf16.msra.mxu0 %v11318_v51  ;;  %v11778_v54 = vor.u32 %v14861_v33, %v11775_v32  ;;  %v11458_v51 = vor.u32 %v14781_v12, %v11455_v39  ;;  %v14811_v19 = vld [vmem:[#allocation9 + $0x7d4] sm:$0xf]  ;;  %v11575_v33 = vld [vmem:[#allocation9 + $0x7e4] sm:$0xf0]  ;;  %v11715_v2 = vld [vmem:[#allocation9 + $0x8fc] sm:$0xf0] }
  0xd5   :  { %3982 = vmatmul.bf16.gmra.mxu2 %v16320_v1  ;;  %v3791_v53 = vpop.f32.mrf.mxu2  ;;  %v11578_v32 = vor.u32 %v14811_v19, %v11575_v33  ;;  %v14806_v33 = vld [vmem:[#allocation9 + $0x7ac] sm:$0xf] }
  0xd6   :  { %4005 = vmatmul.bf16.gmra.mxu3 %v16322_v26  ;;  %v3792_v20 = vadd.f32 %v3791_v53, %v3769_v4  ;;  %4127 = vmatpush.bf16.msra.mxu1 %v11478_v41  ;;  %v14736_v4 = vld [vmem:[#allocation9 + $0x57c] sm:$0xf] }
  0xd7   :  { %4173 = vmatpush.bf16.msra.mxu3 %v11798_v5  ;;  %4151 = vmatpush.bf16.msra.mxu2 %v11618_v0  ;;  %v3748_v11 = vpop.f32.mrf.mxu0  ;;  %v3771_v52 = vpop.f32.mrf.mxu1  ;;  %v14816_v5 = vld [vmem:[#allocation9 + $0x7fc] sm:$0xf]  ;;  %v11755_v0 = vld [vmem:[#allocation9 + $0x94c] sm:$0xf0] }
  0xd8   :  { %v16328_v8 = vadd.f32 %v3814_v13, %v3792_v20  ;;  %v3772_v63 = vadd.f32 %v3771_v52, %v3748_v11  ;;  %v11598_v41 = vor.u32 %v14816_v5, %v11595_v56  ;;  %v14856_v53 = vld [vmem:[#allocation9 + $0x93c] sm:$0xf]  ;;  %4105 = vmatpush.bf16.msra.mxu0 %v11298_v44  ;;  %v11278_v20 = vor.u32 %v14736_v4, %v11275_v21  ;;  %v11435_v52 = vld [vmem:[#allocation9 + $0x6cc] sm:$0xf0]  ;;  %v14731_v44 = vld [vmem:[#allocation9 + $0x554] sm:$0xf] }
  0xd9   :  { %v11758_v13 = vor.u32 %v14856_v53, %v11755_v0  ;;  %v14776_v11 = vld [vmem:[#allocation9 + $0x6bc] sm:$0xf]  ;;  %v11735_v4 = vld [vmem:[#allocation9 + $0x924] sm:$0xf0] }
  0xda   :  { %4128 = vmatpush.bf16.msra.mxu1 %v11458_v51  ;;  %v11438_v23 = vor.u32 %v14776_v11, %v11435_v52  ;;  %v14851_v51 = vld [vmem:[#allocation9 + $0x914] sm:$0xf]  ;;  %v11415_v21 = vld [vmem:[#allocation9 + $0x6a4] sm:$0xf0] }
  0xdb   :  { %4174 = vmatpush.bf16.msra.mxu3 %v11778_v54  ;;  %4152 = vmatpush.bf16.msra.mxu2 %v11598_v41  ;;  %v11255_v54 = vld [vmem:[#allocation9 + $0x564] sm:$0xf0]  ;;  %v14771_v41 = vld [vmem:[#allocation9 + $0x694] sm:$0xf]  ;;  %v11738_v53 = vor.u32 %v14851_v51, %v11735_v4  ;;  %v11718_v4 = vor.u32 %v14846_v15, %v11715_v2  ;;  %v11695_v15 = vld [vmem:[#allocation9 + $0x8d4] sm:$0xf0] }
  0xdc   :  { %4106 = vmatpush.bf16.msra.mxu0 %v11278_v20  ;;  %v11258_v56 = vor.u32 %v14731_v44, %v11255_v54  ;;  %v11418_v0 = vor.u32 %v14771_v41, %v11415_v21  ;;  %v11235_v54 = vld [vmem:[#allocation9 + $0x53c] sm:$0xf0]  ;;  %v14766_v41 = vld [vmem:[#allocation9 + $0x66c] sm:$0xf] }
  0xdd   :  { %v11395_v21 = vld [vmem:[#allocation9 + $0x67c] sm:$0xf0] }
  0xde   :  { %4129 = vmatpush.bf16.msra.mxu1 %v11438_v23 }
  0xdf   :  { %v3750_v12 = vpop.f32.mrf.mxu0  ;;  %v3773_v39 = vpop.f32.mrf.mxu1  ;;  %4175 = vmatpush.bf16.msra.mxu3 %v11758_v13  ;;  %4153 = vmatpush.bf16.msra.mxu2 %v11578_v32  ;;  %v11555_v32 = vld [vmem:[#allocation9 + $0x7bc] sm:$0xf0] }
  0xe0   :  { %v3774_v5 = vadd.f32 %v3773_v39, %v3750_v12  ;;  %4107 = vmatpush.bf16.msra.mxu0 %v11258_v56  ;;  %v14726_v12 = vld [vmem:[#allocation9 + $0x52c] sm:$0xf]  ;;  %v11558_v44 = vor.u32 %v14806_v33, %v11555_v32  ;;  %v14801_v56 = vld [vmem:[#allocation9 + $0x784] sm:$0xf]  ;;  %v11375_v32 = vld [vmem:[#allocation9 + $0x654] sm:$0xf0] }
  0xe1   :  { %4018 = vmatmul.bf16.vlgmr.msrb.gmra.mxu0 %v15889_v28  ;;  %4041 = vmatmul.bf16.vlgmr.msrb.gmra.mxu1 %v15891_v29  ;;  %v11238_v51 = vor.u32 %v14726_v12, %v11235_v54  ;;  %v14761_v33 = vld [vmem:[#allocation9 + $0x644] sm:$0xf] }
  0xe2   :  { %4130 = vmatpush.bf16.msra.mxu1 %v11418_v0  ;;  %v11378_v47 = vor.u32 %v14761_v33, %v11375_v32  ;;  %v12155_v33 = vld [vmem:[#allocation9 + $0xc6c] sm:$0xf0]  ;;  %v14991_v32 = vld [vmem:[#allocation9 + $0xd74] sm:$0xf] }
  0xe3   :  { %4176 = vmatpush.bf16.msra.mxu3 %v11738_v53  ;;  %v11535_v53 = vld [vmem:[#allocation9 + $0x794] sm:$0xf0]  ;;  %4154 = vmatpush.bf16.msra.mxu2 %v11558_v44 }
  0xe4   :  { %4108 = vmatpush.bf16.msra.mxu0 %v11238_v51  ;;  %v11538_v0 = vor.u32 %v14801_v56, %v11535_v53  ;;  %v14996_v51 = vld [vmem:[#allocation9 + $0xd9c] sm:$0xf]  ;;  %v12475_v53 = vld [vmem:[#allocation9 + $0xeec] sm:$0xf0] }
  0xe5   :  { %4064 = vmatmul.bf16.vlgmr.msrb.gmra.mxu2 %v15907_v40  ;;  %v3794_v11 = vpop.f32.mrf.mxu2  ;;  %v3817_v52 = vpop.f32.mrf.mxu3 }
  0xe6   :  { %4087 = vmatmul.bf16.vlgmr.msrb.gmra.mxu3 %v15909_v43  ;;  %v3795_v20 = vadd.f32 %v3794_v11, %v3772_v63  ;;  %v11398_v63 = vor.u32 %v14766_v41, %v11395_v21  ;;  %v14721_v11 = vld [vmem:[#allocation9 + $0x504] sm:$0xf]  ;;  %v14916_v21 = vld [vmem:[#allocation9 + $0xb1c] sm:$0xf] }
  0xe7   :  { %v3753_v19 = vpop.f32.mrf.mxu0  ;;  %v3776_v23 = vpop.f32.mrf.mxu1  ;;  %4177 = vmatpush.bf16.msra.mxu3 %v11718_v4  ;;  %4155 = vmatpush.bf16.msra.mxu2 %v11538_v0  ;;  %v12315_v4 = vld [vmem:[#allocation9 + $0xdac] sm:$0xf0] }
  0xe8   :  { %v16334_v13 = vadd.f32 %v3817_v52, %v3795_v20  ;;  %v3777_v39 = vadd.f32 %v3776_v23, %v3753_v19  ;;  %v11215_v52 = vld [vmem:[#allocation9 + $0x514] sm:$0xf0]  ;;  %v14841_v20 = vld [vmem:[#allocation9 + $0x8c4] sm:$0xf]  ;;  %4131 = vmatpush.bf16.msra.mxu1 %v11398_v63  ;;  %v12318_v56 = vor.u32 %v14996_v51, %v12315_v4  ;;  %v11995_v63 = vld [vmem:[#allocation9 + $0xb2c] sm:$0xf0] }
  0xe9   :  { %v11218_v2 = vor.u32 %v14721_v11, %v11215_v52  ;;  %v11698_v54 = vor.u32 %v14841_v20, %v11695_v15  ;;  %v11998_v11 = vor.u32 %v14916_v21, %v11995_v63  ;;  %v14956_v15 = vld [vmem:[#allocation9 + $0xc5c] sm:$0xf]  ;;  %v15031_v21 = vld [vmem:[#allocation9 + $0xeb4] sm:$0xf] }
  0xeb   :  { %4109 = vmatpush.bf16.msra.mxu0 %v11218_v2  ;;  %4178 = vmatpush.bf16.msra.mxu3 %v11698_v54  ;;  %v12295_v54 = vld [vmem:[#allocation9 + $0xd84] sm:$0xf0] }
  0xec   :  { %4132 = vmatpush.bf16.msra.mxu1 %v11378_v47  ;;  %4240 = vmatpush.bf16.msrb.mxu2 %v12318_v56  ;;  %v12298_v51 = vor.u32 %v14991_v32, %v12295_v54  ;;  %v12455_v56 = vld [vmem:[#allocation9 + $0xec4] sm:$0xf0]  ;;  %v11955_v54 = vld [vmem:[#allocation9 + $0xadc] sm:$0xf0] }
  0xed   :  { %v3796_v19 = vpop.f32.mrf.mxu2  ;;  %v3819_v23 = vpop.f32.mrf.mxu3  ;;  %v12458_v63 = vor.u32 %v15031_v21, %v12455_v56  ;;  %v12115_v21 = vld [vmem:[#allocation9 + $0xc1c] sm:$0xf0]  ;;  %v14981_v56 = vld [vmem:[#allocation9 + $0xd24] sm:$0xf] }
  0xee   :  { %v3797_v12 = vadd.f32 %v3796_v19, %v3774_v5  ;;  %v15036_v5 = vld [vmem:[#allocation9 + $0xedc] sm:$0xf] }
  0xef   :  { %v3755_v41 = vpop.f32.mrf.mxu0  ;;  %v3778_v44 = vpop.f32.mrf.mxu1  ;;  %v12478_v52 = vor.u32 %v15036_v5, %v12475_v53  ;;  %4194 = vmatpush.bf16.msrb.mxu0 %v11998_v11  ;;  %v12135_v5 = vld [vmem:[#allocation9 + $0xc44] sm:$0xf0] }
  0xf0   :  { %v16338_v30 = vadd.f32 %v3819_v23, %v3797_v12  ;;  %v12158_v12 = vor.u32 %v14956_v15, %v12155_v33  ;;  %v14911_v41 = vld [vmem:[#allocation9 + $0xaf4] sm:$0xf]  ;;  %v11975_v44 = vld [vmem:[#allocation9 + $0xb04] sm:$0xf0]  ;;  %4241 = vmatpush.bf16.msrb.mxu2 %v12298_v51  ;;  %v12275_v15 = vld [vmem:[#allocation9 + $0xd5c] sm:$0xf0] }
  0xf1   :  { %4023 = vmatmul.bf16.gmra.mxu0 %v16010_v27  ;;  %4046 = vmatmul.bf16.gmra.mxu1 %v16012_v61  ;;  %v11978_v4 = vor.u32 %v14911_v41, %v11975_v44  ;;  %v14906_v33 = vld [vmem:[#allocation9 + $0xacc] sm:$0xf]  ;;  %v12435_v44 = vld [vmem:[#allocation9 + $0xe9c] sm:$0xf0] }
  0xf2   :  { %4263 = vmatpush.bf16.msrb.mxu3 %v12478_v52  ;;  %4217 = vmatpush.bf16.msrb.mxu1 %v12158_v12  ;;  %v15026_v41 = vld [vmem:[#allocation9 + $0xe8c] sm:$0xf]  ;;  %v11958_v12 = vor.u32 %v14906_v33, %v11955_v54  ;;  %v11935_v33 = vld [vmem:[#allocation9 + $0xab4] sm:$0xf0]  ;;  %v15021_v54 = vld [vmem:[#allocation9 + $0xe64] sm:$0xf] }
  0xf3   :  { %4195 = vmatpush.bf16.msrb.mxu0 %v11978_v4  ;;  %v12438_v51 = vor.u32 %v15026_v41, %v12435_v44  ;;  %v14946_v4 = vld [vmem:[#allocation9 + $0xc0c] sm:$0xf]  ;;  %v14941_v44 = vld [vmem:[#allocation9 + $0xbe4] sm:$0xf] }
  0xf5   :  { %4069 = vmatmul.bf16.gmra.mxu2 %v16028_v34  ;;  %v3799_v20 = vpop.f32.mrf.mxu2  ;;  %v3822_v19 = vpop.f32.mrf.mxu3  ;;  %v14921_v34 = vld [vmem:[#allocation9 + $0xb44] sm:$0xf] }
  0xf6   :  { %4092 = vmatmul.bf16.gmra.mxu3 %v16030_v24  ;;  %v3800_v0 = vadd.f32 %v3799_v20, %v3777_v39  ;;  %v14951_v39 = vld [vmem:[#allocation9 + $0xc34] sm:$0xf] }
  0xf7   :  { %v16344_v23 = vpop.f32.mrf.mxu0  ;;  %v16346_v2 = vpop.f32.mrf.mxu1  ;;  %v12138_v53 = vor.u32 %v14951_v39, %v12135_v5  ;;  %4264 = vmatpush.bf16.msrb.mxu3 %v12458_v63  ;;  %v12118_v39 = vor.u32 %v14946_v4, %v12115_v21  ;;  %v12255_v63 = vld [vmem:[#allocation9 + $0xd34] sm:$0xf0]  ;;  %4196 = vmatpush.bf16.msrb.mxu0 %v11958_v12  ;;  %v14976_v21 = vld [vmem:[#allocation9 + $0xcfc] sm:$0xf] }
  0xf8   :  { %v16342_v47 = vadd.f32 %v3822_v19, %v3800_v0  ;;  %v14986_v0 = vld [vmem:[#allocation9 + $0xd4c] sm:$0xf]  ;;  %v12258_v5 = vor.u32 %v14981_v56, %v12255_v63  ;;  %v12095_v4 = vld [vmem:[#allocation9 + $0xbf4] sm:$0xf0]  ;;  %v12235_v56 = vld [vmem:[#allocation9 + $0xd0c] sm:$0xf0] }
  0xf9   :  { %4218 = vmatpush.bf16.msrb.mxu1 %v12138_v53  ;;  %v12278_v32 = vor.u32 %v14986_v0, %v12275_v15  ;;  %v14901_v15 = vld [vmem:[#allocation9 + $0xaa4] sm:$0xf]  ;;  %v14896_v63 = vld [vmem:[#allocation9 + $0xa7c] sm:$0xf] }
  0xfa   :  { %v11938_v41 = vor.u32 %v14901_v15, %v11935_v33 }
  0xfb   :  { %4242 = vmatpush.bf16.msrb.mxu2 %v12278_v32  ;;  %4265 = vmatpush.bf16.msrb.mxu3 %v12438_v51  ;;  %v12415_v32 = vld [vmem:[#allocation9 + $0xe74] sm:$0xf0]  ;;  %v12098_v51 = vor.u32 %v14941_v44, %v12095_v4  ;;  %v14971_v44 = vld [vmem:[#allocation9 + $0xcd4] sm:$0xf] }
  0xfc   :  { %v12418_v12 = vor.u32 %v15021_v54, %v12415_v32  ;;  %4197 = vmatpush.bf16.msrb.mxu0 %v11938_v41  ;;  %v14936_v54 = vld [vmem:[#allocation9 + $0xbbc] sm:$0xf]  ;;  %v12075_v32 = vld [vmem:[#allocation9 + $0xbcc] sm:$0xf0]  ;;  %v15011_v41 = vld [vmem:[#allocation9 + $0xe14] sm:$0xf] }
  0xfd   :  { %v3801_v11 = vpop.f32.mrf.mxu2  ;;  %v3824_v52 = vpop.f32.mrf.mxu3  ;;  %4219 = vmatpush.bf16.msrb.mxu1 %v12118_v39  ;;  %v12238_v39 = vor.u32 %v14976_v21, %v12235_v56  ;;  %v12078_v4 = vor.u32 %v14936_v54, %v12075_v32 }
  0xff   :  { %v16350_v20 = vpop.f32.mrf.mxu0  ;;  %v16352_v19 = vpop.f32.mrf.mxu1  ;;  %4243 = vmatpush.bf16.msrb.mxu2 %v12258_v5  ;;  %v11915_v5 = vld [vmem:[#allocation9 + $0xa8c] sm:$0xf0]  ;;  %4266 = vmatpush.bf16.msrb.mxu3 %v12418_v12 }
 0x101   :  { %4028 = vmatmul.bf16.gmra.mxu0 %v16049_v25  ;;  %4051 = vmatmul.bf16.gmra.mxu1 %v16051_v22  ;;  %v14881_v25 = vld [vmem:[#allocation9 + $0xa04] sm:$0xf] }
 0x102   :  { %4220 = vmatpush.bf16.msrb.mxu1 %v12098_v51  ;;  %v12375_v51 = vld [vmem:[#allocation9 + $0xe24] sm:$0xf0] }
 0x103   :  { %4244 = vmatpush.bf16.msrb.mxu2 %v12238_v39  ;;  %v12055_v39 = vld [vmem:[#allocation9 + $0xba4] sm:$0xf0] }
 0x105   :  { %4074 = vmatmul.bf16.gmra.mxu2 %v16062_v17  ;;  %v16356_v53 = vpop.f32.mrf.mxu2  ;;  %v16358_v11 = vpop.f32.mrf.mxu3  ;;  %v11918_v17 = vor.u32 %v14896_v63, %v11915_v5  ;;  %v14931_v63 = vld [vmem:[#allocation9 + $0xb94] sm:$0xf] }
 0x106   :  { %4097 = vmatmul.bf16.gmra.mxu3 %v16064_v16  ;;  %v12395_v16 = vld [vmem:[#allocation9 + $0xe4c] sm:$0xf0]  ;;  %4221 = vmatpush.bf16.msrb.mxu1 %v12078_v4  ;;  %v12058_v5 = vor.u32 %v14931_v63, %v12055_v39  ;;  %v14886_v4 = vld [vmem:[#allocation9 + $0xa2c] sm:$0xf]  ;;  %v12035_v39 = vld [vmem:[#allocation9 + $0xb7c] sm:$0xf0] }
 0x107   :  { %v16360_v52 = vpop.f32.mrf.mxu0  ;;  %v16362_v0 = vpop.f32.mrf.mxu1  ;;  %v12398_v15 = vor.u32 %v15016_v48, %v12395_v16  ;;  %4198 = vmatpush.bf16.msrb.mxu0 %v11918_v17  ;;  %v14891_v48 = vld [vmem:[#allocation9 + $0xa54] sm:$0xf]  ;;  %v11895_v16 = vld [vmem:[#allocation9 + $0xa64] sm:$0xf0]  ;;  %v14926_v63 = vld [vmem:[#allocation9 + $0xb6c] sm:$0xf] }
 0x108   :  { %v11898_v12 = vor.u32 %v14891_v48, %v11895_v16  ;;  %v11875_v16 = vld [vmem:[#allocation9 + $0xa3c] sm:$0xf0] }
 0x109   :  { %4267 = vmatpush.bf16.msrb.mxu3 %v12398_v15  ;;  %v14966_v15 = vld [vmem:[#allocation9 + $0xcac] sm:$0xf] }
 0x10a   :  { %4222 = vmatpush.bf16.msrb.mxu1 %v12058_v5  ;;  %v12175_v5 = vld [vmem:[#allocation9 + $0xc94] sm:$0xf0] }
 0x10b   :  { %4199 = vmatpush.bf16.msrb.mxu0 %v11898_v12  ;;  %v12038_v12 = vor.u32 %v14926_v63, %v12035_v39  ;;  %v14679_v39 = vld [vmem:[#allocation9 + $0x3b0] sm:$0xf0] }
 0x10d   :  { %v16366_v33 = vpop.f32.mrf.mxu2  ;;  %v16368_v22 = vpop.f32.mrf.mxu3 }
 0x10e   :  { %4223 = vmatpush.bf16.msrb.mxu1 %v12038_v12  ;;  %v10721_v12 = vld [vmem:[#allocation9 + $0x120] sm:$0xf] }
 0x10f   :  { %v16370_v21 = vpop.f32.mrf.mxu0  ;;  %v16372_v56 = vpop.f32.mrf.mxu1 }
 0x111   :  { %4110 = vmatmul.bf16.vlgmr.msra.gmra.mxu0 %v16083_v10  ;;  %4133 = vmatmul.bf16.vlgmr.msra.gmra.mxu1 %v16085_v49  ;;  %v12215_v10 = vld [vmem:[#allocation9 + $0xce4] sm:$0xf0] }
 0x112   :  { %v12218_v49 = vor.u32 %v14971_v44, %v12215_v10  ;;  %v12378_v10 = vor.u32 %v15011_v41, %v12375_v51  ;;  %v12195_v44 = vld [vmem:[#allocation9 + $0xcbc] sm:$0xf0]  ;;  %v11878_v41 = vor.u32 %v14886_v4, %v11875_v16  ;;  %v12335_v4 = vld [vmem:[#allocation9 + $0xdd4] sm:$0xf0] }
 0x113   :  { %v12198_v48 = vor.u32 %v14966_v15, %v12195_v44 }
 0x114   :  { %4245 = vmatpush.bf16.msrb.mxu2 %v12218_v49  ;;  %4268 = vmatpush.bf16.msrb.mxu3 %v12378_v10  ;;  %v14961_v10 = vld [vmem:[#allocation9 + $0xc84] sm:$0xf] }
 0x115   :  { %4156 = vmatmul.bf16.vlgmr.msra.gmra.mxu2 %v16102_v55  ;;  %v16376_v54 = vpop.f32.mrf.mxu2  ;;  %v12355_v55 = vld [vmem:[#allocation9 + $0xdfc] sm:$0xf0]  ;;  %4200 = vmatpush.bf16.msrb.mxu0 %v11878_v41  ;;  %v12178_v44 = vor.u32 %v14961_v10, %v12175_v5  ;;  %v14599_v5 = vld [vmem:[#allocation9 + $0x130] sm:$0xf0] }
 0x116   :  { %4179 = vmatmul.bf16.vlgmr.msra.gmra.mxu3 %v16104_v9  ;;  %v16378_v32 = vpop.f32.mrf.mxu3  ;;  %v15006_v9 = vld [vmem:[#allocation9 + $0xdec] sm:$0xf] }
 0x117   :  { %v12358_v51 = vor.u32 %v15006_v9, %v12355_v55  ;;  %v11855_v55 = vld [vmem:[#allocation9 + $0xa14] sm:$0xf0]  ;;  %v15001_v9 = vld [vmem:[#allocation9 + $0xdc4] sm:$0xf] }
 0x118   :  { %4246 = vmatpush.bf16.msrb.mxu2 %v12198_v48  ;;  %v11858_v16 = vor.u32 %v14881_v25, %v11855_v55  ;;  %v11201_v25 = vld [vmem:[#allocation9 + $0x4e0] sm:$0xf]  ;;  %v14719_v55 = vld [vmem:[#allocation9 + $0x4f0] sm:$0xf0] }
 0x119   :  { %v16380_v17 = vpop.f32.mrf.mxu0  ;;  %v16382_v49 = vpop.f32.mrf.mxu1  ;;  %4269 = vmatpush.bf16.msrb.mxu3 %v12358_v51  ;;  %v11041_v51 = vld [vmem:[#allocation9 + $0x3a0] sm:$0xf] }
 0x11a   :  { %4201 = vmatpush.bf16.msrb.mxu0 %v11858_v16  ;;  %v11042_v10 = vor.u32 %v14679_v39, %v11041_v51 }
 0x11c   :  { %4247 = vmatpush.bf16.msrb.mxu2 %v12178_v44 }
 0x11d   :  { %v16386_v24 = vpop.f32.mrf.mxu2 }
 0x11e   :  { %v16388_v15 = vpop.f32.mrf.mxu3 }
 0x120   :  { %4332 = vmatpush.bf16.msra.mxu2 %v11042_v10 }
 0x121   :  { %4115 = vmatmul.bf16.gmra.mxu0 %v16112_v7  ;;  %4138 = vmatmul.bf16.gmra.mxu1 %v16114_v31  ;;  %v12338_v7 = vor.u32 %v15001_v9, %v12335_v4  ;;  %v12015_v31 = vld [vmem:[#allocation9 + $0xb54] sm:$0xf0]  ;;  %v3847_v48 = vpop.f32.mrf.mxu0  ;;  %v3870_v41 = vpop.f32.mrf.mxu1  ;;  %v11202_v9 = vor.u32 %v14719_v55, %v11201_v25  ;;  %v14639_v25 = vld [vmem:[#allocation9 + $0x270] sm:$0xf0] }
 0x122   :  { %v12018_v63 = vor.u32 %v14921_v34, %v12015_v31  ;;  %v3836_v34 = vadd.f32 %v16344_v23, %v16324_v18  ;;  %v10722_v31 = vor.u32 %v14599_v5, %v10721_v12  ;;  %v3838_v41 = vadd.f32 %v16350_v20, %v16328_v8  ;;  %v10881_v5 = vld [vmem:[#allocation9 + $0x260] sm:$0xf]  ;;  %v11021_v8 = vld [vmem:[#allocation9 + $0x378] sm:$0xf]  ;;  %v14674_v20 = vld [vmem:[#allocation9 + $0x388] sm:$0xf0] }
 0x123   :  { %4270 = vmatpush.bf16.msrb.mxu3 %v12338_v7  ;;  %v10882_v55 = vor.u32 %v14639_v25, %v10881_v5 }
 0x124   :  { %4224 = vmatpush.bf16.msrb.mxu1 %v12018_v63  ;;  %4286 = vmatpush.bf16.msra.mxu0 %v10722_v31  ;;  %v3859_v4 = vadd.f32 %v16346_v2, %v3836_v34  ;;  %v3861_v39 = vadd.f32 %v16352_v19, %v3838_v41  ;;  %v10701_v34 = vld [vmem:[#allocation9 + $0xf8] sm:$0xf]  ;;  %v11022_v31 = vor.u32 %v14674_v20, %v11021_v8  ;;  %v14714_v19 = vld [vmem:[#allocation9 + $0x4c8] sm:$0xf0]  ;;  %v10681_v8 = vld [vmem:[#allocation9 + $0xd0] sm:$0xf] }
 0x125   :  { %4161 = vmatmul.bf16.gmra.mxu2 %v16118_v45  ;;  %v14589_v20 = vld [vmem:[#allocation9 + $0xe0] sm:$0xf0] }
 0x126   :  { %4184 = vmatmul.bf16.gmra.mxu3 %v16120_v37  ;;  %v3882_v48 = vadd.f32 %v16356_v53, %v3859_v4  ;;  %v3884_v53 = vadd.f32 %v16366_v33, %v3861_v39  ;;  %v3841_v4 = vadd.f32 %v16360_v52, %v16334_v13  ;;  %v10861_v33 = vld [vmem:[#allocation9 + $0x238] sm:$0xf]  ;;  %4333 = vmatpush.bf16.msra.mxu2 %v11022_v31  ;;  %v11161_v52 = vld [vmem:[#allocation9 + $0x490] sm:$0xf] }
 0x127   :  { %v16394_v44 = vpop.f32.mrf.mxu2  ;;  %4355 = vmatpush.bf16.msra.mxu3 %v11202_v9  ;;  %v11181_v9 = vld [vmem:[#allocation9 + $0x4b8] sm:$0xf]  ;;  %v10682_v13 = vor.u32 %v14589_v20, %v10681_v8 }
 0x128   :  { %v16396_v7 = vpop.f32.mrf.mxu3  ;;  %v3905_v51 = vadd.f32 %v16358_v11, %v3882_v48  ;;  %4309 = vmatpush.bf16.msra.mxu1 %v10882_v55  ;;  %v14594_v11 = vld [vmem:[#allocation9 + $0x108] sm:$0xf0]  ;;  %v11182_v41 = vor.u32 %v14714_v19, %v11181_v9  ;;  %v14669_v55 = vld [vmem:[#allocation9 + $0x360] sm:$0xf0]  ;;  %v10981_v9 = vld [vmem:[#allocation9 + $0x328] sm:$0xf] }
 0x129   :  { %v10702_v48 = vor.u32 %v14594_v11, %v10701_v34  ;;  %v14629_v11 = vld [vmem:[#allocation9 + $0x220] sm:$0xf0] }
 0x12b   :  { %v3927_v16 = vpop.f32.mrf.mxu0  ;;  %4287 = vmatpush.bf16.msra.mxu0 %v10702_v48  ;;  %4356 = vmatpush.bf16.msra.mxu3 %v11182_v41  ;;  %v3843_v41 = vadd.f32 %v16370_v21, %v16338_v30 }
 0x12c   :  { %v3950_v63 = vpop.f32.mrf.mxu1  ;;  %v3928_v12 = vadd.f32 %v3927_v16, %v3905_v51  ;;  %v3907_v51 = vadd.f32 %v16368_v22, %v3884_v53  ;;  %v14664_v22 = vld [vmem:[#allocation9 + $0x338] sm:$0xf0]  ;;  %v3864_v53 = vadd.f32 %v16362_v0, %v3841_v4  ;;  %v11141_v4 = vld [vmem:[#allocation9 + $0x468] sm:$0xf] }
 0x12d   :  { %v3866_v30 = vadd.f32 %v16372_v56, %v3843_v41 }
 0x12e   :  { %v3951_v16 = vadd.f32 %v3950_v63, %v3928_v12  ;;  %v14709_v63 = vld [vmem:[#allocation9 + $0x4a0] sm:$0xf0]  ;;  %v10841_v12 = vld [vmem:[#allocation9 + $0x210] sm:$0xf]  ;;  %v3887_v48 = vadd.f32 %v16376_v54, %v3864_v53  ;;  %v14704_v54 = vld [vmem:[#allocation9 + $0x478] sm:$0xf0] }
 0x12f   :  { %v3893_v18 = vpop.f32.mrf.mxu2  ;;  %v11162_v34 = vor.u32 %v14709_v63, %v11161_v52  ;;  %4288 = vmatpush.bf16.msra.mxu0 %v10682_v13  ;;  %v11142_v8 = vor.u32 %v14704_v54, %v11141_v4  ;;  %v10961_v52 = vld [vmem:[#allocation9 + $0x300] sm:$0xf]  ;;  %v14659_v63 = vld [vmem:[#allocation9 + $0x310] sm:$0xf0]  ;;  %v14694_v54 = vld [vmem:[#allocation9 + $0x428] sm:$0xf0] }
 0x130   :  { %v3916_v23 = vpop.f32.mrf.mxu3  ;;  %v14634_v18 = vld [vmem:[#allocation9 + $0x248] sm:$0xf0] }
 0x131   :  { %4120 = vmatmul.bf16.gmra.mxu0 %v16174_v3  ;;  %4143 = vmatmul.bf16.gmra.mxu1 %v16176_v38  ;;  %v11001_v23 = vld [vmem:[#allocation9 + $0x350] sm:$0xf]  ;;  %v10862_v25 = vor.u32 %v14634_v18, %v10861_v33  ;;  %v10842_v38 = vor.u32 %v14629_v11, %v10841_v12  ;;  %v10641_v12 = vld [vmem:[#allocation9 + $0x80] sm:$0xf]  ;;  %v14579_v11 = vld [vmem:[#allocation9 + $0x90] sm:$0xf0] }
 0x132   :  { %4357 = vmatpush.bf16.msra.mxu3 %v11162_v34  ;;  %v10962_v34 = vor.u32 %v14659_v63, %v10961_v52  ;;  %v10642_v56 = vor.u32 %v14579_v11, %v10641_v12  ;;  %v14649_v52 = vld [vmem:[#allocation9 + $0x2c0] sm:$0xf0]  ;;  %v10601_v63 = vld [vmem:[#allocation9 + $0x30] sm:$0xf] }
 0x133   :  { %v3929_v10 = vpop.f32.mrf.mxu0  ;;  %4310 = vmatpush.bf16.msra.mxu1 %v10862_v25  ;;  %v3910_v25 = vadd.f32 %v16378_v32, %v3887_v48  ;;  %v3889_v32 = vadd.f32 %v16386_v24, %v3866_v30  ;;  %v10621_v24 = vld [vmem:[#allocation9 + $0x58] sm:$0xf]  ;;  %v14689_v11 = vld [vmem:[#allocation9 + $0x400] sm:$0xf0] }
 0x134   :  { %v3952_v2 = vpop.f32.mrf.mxu1  ;;  %v3930_v19 = vadd.f32 %v3929_v10, %v3907_v51  ;;  %v14584_v10 = vld [vmem:[#allocation9 + $0xb8] sm:$0xf0] }
 0x135   :  { %4166 = vmatmul.bf16.gmra.mxu2 %v16202_v57  ;;  %v11002_v57 = vor.u32 %v14669_v55, %v11001_v23 }
 0x136   :  { %4189 = vmatmul.bf16.gmra.mxu3 %v16204_v60  ;;  %v3953_v0 = vadd.f32 %v3952_v2, %v3930_v19  ;;  %v14619_v19 = vld [vmem:[#allocation9 + $0x1d0] sm:$0xf0] }
 0x137   :  { %4334 = vmatpush.bf16.msra.mxu2 %v11002_v57  ;;  %4311 = vmatpush.bf16.msra.mxu1 %v10842_v38 }
 0x138   :  { %v3973_v39 = vpop.f32.mrf.mxu2  ;;  %v3996_v5 = vpop.f32.mrf.mxu3  ;;  %4358 = vmatpush.bf16.msra.mxu3 %v11142_v8 }
 0x139   :  { %v3974_v60 = vadd.f32 %v3973_v39, %v3951_v16  ;;  %v10982_v16 = vor.u32 %v14664_v22, %v10981_v9  ;;  %v10821_v39 = vld [vmem:[#allocation9 + $0x1e8] sm:$0xf]  ;;  %v11121_v9 = vld [vmem:[#allocation9 + $0x440] sm:$0xf]  ;;  %v14699_v22 = vld [vmem:[#allocation9 + $0x450] sm:$0xf0] }
 0x13a   :  { %v11122_v53 = vor.u32 %v14699_v22, %v11121_v9  ;;  %v14609_v22 = vld [vmem:[#allocation9 + $0x180] sm:$0xf0] }
 0x13b   :  { %v3997_v31 = vadd.f32 %v3996_v5, %v3974_v60  ;;  %v10661_v60 = vld [vmem:[#allocation9 + $0xa8] sm:$0xf]  ;;  %4335 = vmatpush.bf16.msra.mxu2 %v10982_v16  ;;  %v14624_v5 = vld [vmem:[#allocation9 + $0x1f8] sm:$0xf0]  ;;  %v3846_v16 = vadd.f32 %v16380_v17, %v16342_v47  ;;  %v14614_v47 = vld [vmem:[#allocation9 + $0x1a8] sm:$0xf0] }
 0x13c   :  { %v3932_v33 = vpop.f32.mrf.mxu0  ;;  %v3955_v18 = vpop.f32.mrf.mxu1  ;;  %v10662_v51 = vor.u32 %v14584_v10, %v10661_v60  ;;  %v10822_v20 = vor.u32 %v14624_v5, %v10821_v39  ;;  %v14574_v60 = vld [vmem:[#allocation9 + $0x68] sm:$0xf0]  ;;  %4359 = vmatpush.bf16.msra.mxu3 %v11122_v53  ;;  %v10781_v39 = vld [vmem:[#allocation9 + $0x198] sm:$0xf]  ;;  %v3912_v5 = vadd.f32 %v16388_v15, %v3889_v32  ;;  %v11081_v15 = vld [vmem:[#allocation9 + $0x3f0] sm:$0xf] }
 0x13d   :  { %5114 = vst [vmem:[#allocation3 + $0xb0] sm:$0xff] %v3997_v31  ;;  %v3933_v38 = vadd.f32 %v3932_v33, %v3910_v25  ;;  %v10801_v31 = vld [vmem:[#allocation9 + $0x1c0] sm:$0xf]  ;;  %v10941_v33 = vld [vmem:[#allocation9 + $0x2d8] sm:$0xf]  ;;  %v10782_v17 = vor.u32 %v14614_v47, %v10781_v39 }
 0x13e   :  { %4289 = vmatpush.bf16.msra.mxu0 %v10662_v51  ;;  %4312 = vmatpush.bf16.msra.mxu1 %v10822_v20  ;;  %v10802_v41 = vor.u32 %v14619_v19, %v10801_v31  ;;  %v11101_v51 = vld [vmem:[#allocation9 + $0x418] sm:$0xf]  ;;  %v10901_v53 = vld [vmem:[#allocation9 + $0x288] sm:$0xf]  ;;  %v14644_v31 = vld [vmem:[#allocation9 + $0x298] sm:$0xf0] }
 0x13f   :  { %4336 = vmatpush.bf16.msra.mxu2 %v10962_v34  ;;  %v3956_v48 = vadd.f32 %v3955_v18, %v3933_v38  ;;  %v3869_v18 = vadd.f32 %v16382_v49, %v3846_v16  ;;  %v10921_v38 = vld [vmem:[#allocation9 + $0x2b0] sm:$0xf]  ;;  %v14569_v34 = vld [vmem:[#allocation9 + $0x40] sm:$0xf0]  ;;  %v10581_v16 = vld [vmem:[#allocation9 + $0x8] sm:$0xf] }
 0x140   :  { %v3975_v23 = vpop.f32.mrf.mxu2  ;;  %v3998_v57 = vpop.f32.mrf.mxu3  ;;  %v10922_v12 = vor.u32 %v14649_v52, %v10921_v38  ;;  %v10602_v32 = vor.u32 %v14569_v34, %v10601_v63  ;;  %v10761_v49 = vld [vmem:[#allocation9 + $0x170] sm:$0xf]  ;;  %v14839_v47 = vld [vmem:[#allocation9 + $0x8b0] sm:$0xf0]  ;;  %v11841_v38 = vld [vmem:[#allocation9 + $0x9e0] sm:$0xf] }
 0x141   :  { %4202 = vmatmul.bf16.vlgmr.msrb.gmra.mxu0 %v16249_v36  ;;  %4225 = vmatmul.bf16.vlgmr.msrb.gmra.mxu1 %v16253_v6  ;;  %v3976_v55 = vadd.f32 %v3975_v23, %v3953_v0  ;;  %v14654_v0 = vld [vmem:[#allocation9 + $0x2e8] sm:$0xf0]  ;;  %v3892_v9 = vadd.f32 %v16394_v44, %v3869_v18  ;;  %v14564_v44 = vld [vmem:[#allocation9 + $0x18] sm:$0xf0] }
 0x142   :  { %4290 = vmatpush.bf16.msra.mxu0 %v10642_v56  ;;  %v10942_v23 = vor.u32 %v14654_v0, %v10941_v33  ;;  %4313 = vmatpush.bf16.msra.mxu1 %v10802_v41  ;;  %v11082_v56 = vor.u32 %v14689_v11, %v11081_v15  ;;  %v10902_v33 = vor.u32 %v14644_v31, %v10901_v53  ;;  %v11341_v53 = vld [vmem:[#allocation9 + $0x5f8] sm:$0xf]  ;;  %v14754_v31 = vld [vmem:[#allocation9 + $0x608] sm:$0xf0] }
 0x143   :  { %v3999_v21 = vadd.f32 %v3998_v57, %v3976_v55  ;;  %v10622_v57 = vor.u32 %v14574_v60, %v10621_v24  ;;  %v11102_v55 = vor.u32 %v14694_v54, %v11101_v51  ;;  %v10582_v24 = vor.u32 %v14564_v44, %v10581_v16  ;;  %v14684_v60 = vld [vmem:[#allocation9 + $0x3d8] sm:$0xf0]  ;;  %v11821_v16 = vld [vmem:[#allocation9 + $0x9b8] sm:$0xf]  ;;  %v14874_v44 = vld [vmem:[#allocation9 + $0x9c8] sm:$0xf0] }
 0x144   :  { %v3934_v2 = vpop.f32.mrf.mxu0  ;;  %v16420_v13 = vpop.f32.mrf.mxu1  ;;  %4337 = vmatpush.bf16.msra.mxu2 %v10942_v23  ;;  %v3915_v23 = vadd.f32 %v16396_v7, %v3892_v9  ;;  %v11361_v7 = vld [vmem:[#allocation9 + $0x620] sm:$0xf] }
 0x145   :  { %5119 = vst [vmem:[#allocation3 + $0x28] sm:$0xff] %v3999_v21  ;;  %4248 = vmatmul.bf16.vlgmr.msrb.gmra.mxu2 %v16272_v35  ;;  %v3935_v20 = vadd.f32 %v3934_v2, %v3912_v5  ;;  %4360 = vmatpush.bf16.msra.mxu3 %v11102_v55  ;;  %v10762_v2 = vor.u32 %v14609_v22, %v10761_v49  ;;  %v11681_v55 = vld [vmem:[#allocation9 + $0x8a0] sm:$0xf]  ;;  %v11661_v49 = vld [vmem:[#allocation9 + $0x878] sm:$0xf] }
 0x146   :  { %4271 = vmatmul.bf16.vlgmr.msrb.gmra.mxu3 %v16274_v62  ;;  %4291 = vmatpush.bf16.msra.mxu0 %v10622_v57 }
 0x147   :  { %4314 = vmatpush.bf16.msra.mxu1 %v10782_v17  ;;  %v3958_v19 = vadd.f32 %v16420_v13, %v3935_v20  ;;  %v14759_v17 = vld [vmem:[#allocation9 + $0x630] sm:$0xf0] }
 0x148   :  { %v3978_v10 = vpop.f32.mrf.mxu2  ;;  %4338 = vmatpush.bf16.msra.mxu2 %v10922_v12  ;;  %v11362_v20 = vor.u32 %v14759_v17, %v11361_v7  ;;  %v11481_v7 = vld [vmem:[#allocation9 + $0x710] sm:$0xf] }
 0x149   :  { %v4001_v4 = vpop.f32.mrf.mxu3  ;;  %v3979_v25 = vadd.f32 %v3978_v10, %v3956_v48  ;;  %v11061_v48 = vld [vmem:[#allocation9 + $0x3c8] sm:$0xf]  ;;  %4361 = vmatpush.bf16.msra.mxu3 %v11082_v56  ;;  %v14799_v56 = vld [vmem:[#allocation9 + $0x770] sm:$0xf0] }
 0x14a   :  { %4292 = vmatpush.bf16.msra.mxu0 %v10602_v32  ;;  %v10741_v10 = vld [vmem:[#allocation9 + $0x148] sm:$0xf]  ;;  %v11062_v51 = vor.u32 %v14684_v60, %v11061_v48  ;;  %v11521_v32 = vld [vmem:[#allocation9 + $0x760] sm:$0xf]  ;;  %v11822_v48 = vor.u32 %v14874_v44, %v11821_v16  ;;  %v14819_v44 = vld [vmem:[#allocation9 + $0x810] sm:$0xf0] }
 0x14b   :  { %v4002_v8 = vadd.f32 %v4001_v4, %v3979_v25  ;;  %v14604_v4 = vld [vmem:[#allocation9 + $0x158] sm:$0xf0]  ;;  %4315 = vmatpush.bf16.msra.mxu1 %v10762_v2  ;;  %v11522_v2 = vor.u32 %v14799_v56, %v11521_v32  ;;  %v11781_v56 = vld [vmem:[#allocation9 + $0x968] sm:$0xf]  ;;  %v11601_v16 = vld [vmem:[#allocation9 + $0x800] sm:$0xf] }
 0x14c   :  { %v10742_v54 = vor.u32 %v14604_v4, %v10741_v10  ;;  %4339 = vmatpush.bf16.msra.mxu2 %v10902_v33  ;;  %v11342_v33 = vor.u32 %v14754_v31, %v11341_v53  ;;  %v14744_v32 = vld [vmem:[#allocation9 + $0x5b8] sm:$0xf0]  ;;  %v11461_v53 = vld [vmem:[#allocation9 + $0x6e8] sm:$0xf] }
 0x14d   :  { %5124 = vst [vmem:[#allocation3 + $0xb8] sm:$0xff] %v4002_v8  ;;  %4362 = vmatpush.bf16.msra.mxu3 %v11062_v51  ;;  %v11682_v8 = vor.u32 %v14839_v47, %v11681_v55  ;;  %v14829_v51 = vld [vmem:[#allocation9 + $0x860] sm:$0xf0]  ;;  %v14784_v31 = vld [vmem:[#allocation9 + $0x6f8] sm:$0xf0] }
 0x14e   :  { %v3937_v30 = vpop.f32.mrf.mxu0  ;;  %v3960_v21 = vpop.f32.mrf.mxu1  ;;  %4293 = vmatpush.bf16.msra.mxu0 %v10582_v24  ;;  %v14869_v47 = vld [vmem:[#allocation9 + $0x9a0] sm:$0xf0] }
 0x14f   :  { %v3938_v39 = vadd.f32 %v3937_v30, %v3915_v23  ;;  %4316 = vmatpush.bf16.msra.mxu1 %v10742_v54  ;;  %v14879_v30 = vld [vmem:[#allocation9 + $0x9f0] sm:$0xf0]  ;;  %v11321_v54 = vld [vmem:[#allocation9 + $0x5d0] sm:$0xf] }
 0x150   :  { %v3980_v41 = vpop.f32.mrf.mxu2  ;;  %v11842_v12 = vor.u32 %v14879_v30, %v11841_v38  ;;  %4424 = vmatpush.bf16.msrb.mxu2 %v11682_v8  ;;  %v11621_v8 = vld [vmem:[#allocation9 + $0x828] sm:$0xf] }
 0x151   :  { %4207 = vmatmul.bf16.gmra.mxu0 %v16298_v50  ;;  %4230 = vmatmul.bf16.gmra.mxu1 %v16300_v42  ;;  %v4003_v0 = vpop.f32.mrf.mxu3  ;;  %v3981_v57 = vadd.f32 %v3980_v41, %v3958_v19  ;;  %v3961_v18 = vadd.f32 %v3960_v21, %v3938_v39  ;;  %v14834_v21 = vld [vmem:[#allocation9 + $0x888] sm:$0xf0]  ;;  %v11501_v41 = vld [vmem:[#allocation9 + $0x738] sm:$0xf] }
 0x152   :  { %4378 = vmatpush.bf16.msrb.mxu0 %v11362_v20  ;;  %4447 = vmatpush.bf16.msrb.mxu3 %v11842_v12  ;;  %v11662_v19 = vor.u32 %v14834_v21, %v11661_v49  ;;  %v14824_v20 = vld [vmem:[#allocation9 + $0x838] sm:$0xf0] }
 0x153   :  { %v4004_v13 = vadd.f32 %v4003_v0, %v3981_v57  ;;  %v14794_v0 = vld [vmem:[#allocation9 + $0x748] sm:$0xf0]  ;;  %4401 = vmatpush.bf16.msrb.mxu1 %v11522_v2  ;;  %v11641_v57 = vld [vmem:[#allocation9 + $0x850] sm:$0xf]  ;;  %v11622_v30 = vor.u32 %v14824_v20, %v11621_v8  ;;  %v14864_v21 = vld [vmem:[#allocation9 + $0x978] sm:$0xf0] }
 0x154   :  { %4425 = vmatpush.bf16.msrb.mxu2 %v11662_v19  ;;  %v11502_v24 = vor.u32 %v14794_v0, %v11501_v41  ;;  %v11642_v39 = vor.u32 %v14829_v51, %v11641_v57  ;;  %v11782_v19 = vor.u32 %v14864_v21, %v11781_v56  ;;  %v14739_v41 = vld [vmem:[#allocation9 + $0x590] sm:$0xf0]  ;;  %v11761_v0 = vld [vmem:[#allocation9 + $0x940] sm:$0xf]  ;;  %v11261_v8 = vld [vmem:[#allocation9 + $0x558] sm:$0xf] }
 0x155   :  { %5129 = vst [vmem:[#allocation3 + $0xa0] sm:$0xff] %v4004_v13  ;;  %4253 = vmatmul.bf16.gmra.mxu2 %v16308_v46  ;;  %v11441_v57 = vld [vmem:[#allocation9 + $0x6c0] sm:$0xf]  ;;  %v14779_v51 = vld [vmem:[#allocation9 + $0x6d0] sm:$0xf0] }
 0x156   :  { %v3939_v5 = vpop.f32.mrf.mxu0  ;;  %v3962_v25 = vpop.f32.mrf.mxu1  ;;  %4276 = vmatmul.bf16.gmra.mxu3 %v16310_v14  ;;  %4379 = vmatpush.bf16.msrb.mxu0 %v11342_v33  ;;  %v11462_v33 = vor.u32 %v14784_v31, %v11461_v53  ;;  %v14734_v20 = vld [vmem:[#allocation9 + $0x568] sm:$0xf0]  ;;  %v11561_v53 = vld [vmem:[#allocation9 + $0x7b0] sm:$0xf]  ;;  %v14809_v31 = vld [vmem:[#allocation9 + $0x7c0] sm:$0xf0] }
 0x157   :  { %4448 = vmatpush.bf16.msrb.mxu3 %v11822_v48  ;;  %4402 = vmatpush.bf16.msrb.mxu1 %v11502_v24  ;;  %v14749_v5 = vld [vmem:[#allocation9 + $0x5e0] sm:$0xf0]  ;;  %v11801_v25 = vld [vmem:[#allocation9 + $0x990] sm:$0xf]  ;;  %v11281_v48 = vld [vmem:[#allocation9 + $0x580] sm:$0xf] }
 0x158   :  { %v3983_v52 = vpop.f32.mrf.mxu2  ;;  %v11322_v55 = vor.u32 %v14749_v5, %v11321_v54  ;;  %4426 = vmatpush.bf16.msrb.mxu2 %v11642_v39  ;;  %v11802_v17 = vor.u32 %v14869_v47, %v11801_v25  ;;  %v14859_v24 = vld [vmem:[#allocation9 + $0x950] sm:$0xf0]  ;;  %v11581_v54 = vld [vmem:[#allocation9 + $0x7d8] sm:$0xf]  ;;  %v11442_v5 = vor.u32 %v14779_v51, %v11441_v57  ;;  %v14814_v25 = vld [vmem:[#allocation9 + $0x7e8] sm:$0xf0] }
 0x159   :  { %v4006_v63 = vpop.f32.mrf.mxu3  ;;  %v3984_v34 = vadd.f32 %v3983_v52, %v3961_v18  ;;  %v14789_v18 = vld [vmem:[#allocation9 + $0x720] sm:$0xf0]  ;;  %v11221_v57 = vld [vmem:[#allocation9 + $0x508] sm:$0xf]  ;;  %v14724_v51 = vld [vmem:[#allocation9 + $0x518] sm:$0xf0] }
 0x15a   :  { %4380 = vmatpush.bf16.msrb.mxu0 %v11322_v55  ;;  %v11482_v38 = vor.u32 %v14789_v18, %v11481_v7  ;;  %v11582_v55 = vor.u32 %v14814_v25, %v11581_v54  ;;  %v11701_v54 = vld [vmem:[#allocation9 + $0x8c8] sm:$0xf]  ;;  %v11222_v25 = vor.u32 %v14724_v51, %v11221_v57 }
 0x15b   :  { %v4007_v15 = vadd.f32 %v4006_v63, %v3984_v34  ;;  %4449 = vmatpush.bf16.msrb.mxu3 %v11802_v17 }
 0x15c   :  { %4403 = vmatpush.bf16.msrb.mxu1 %v11482_v38  ;;  %4427 = vmatpush.bf16.msrb.mxu2 %v11622_v30  ;;  %v11741_v38 = vld [vmem:[#allocation9 + $0x918] sm:$0xf]  ;;  %v14854_v30 = vld [vmem:[#allocation9 + $0x928] sm:$0xf0] }
 0x15d   :  { %5134 = vst [vmem:[#allocation3 + $0x58] sm:$0xff] %v4007_v15 }
 0x15e   :  { %v4019_v11 = vpop.f32.mrf.mxu0  ;;  %v4042_v9 = vpop.f32.mrf.mxu1 }
 0x15f   :  { %v4043_v22 = vadd.f32 %v4042_v9, %v4019_v11  ;;  %v11301_v9 = vld [vmem:[#allocation9 + $0x5a8] sm:$0xf]  ;;  %4450 = vmatpush.bf16.msrb.mxu3 %v11782_v19  ;;  %v11241_v19 = vld [vmem:[#allocation9 + $0x530] sm:$0xf] }
 0x160   :  { %v3985_v60 = vpop.f32.mrf.mxu2  ;;  %v11302_v2 = vor.u32 %v14744_v32, %v11301_v9  ;;  %4404 = vmatpush.bf16.msrb.mxu1 %v11462_v33 }
 0x161   :  { %4212 = vmatmul.bf16.gmra.mxu0 %v16314_v58  ;;  %4235 = vmatmul.bf16.gmra.mxu1 %v16316_v59  ;;  %v4008_v10 = vpop.f32.mrf.mxu3  ;;  %v11282_v60 = vor.u32 %v14739_v41, %v11281_v48  ;;  %v11721_v48 = vld [vmem:[#allocation9 + $0x8f0] sm:$0xf] }
 0x162   :  { %4381 = vmatpush.bf16.msrb.mxu0 %v11302_v2  ;;  %v11762_v10 = vor.u32 %v14859_v24, %v11761_v0  ;;  %v11401_v24 = vld [vmem:[#allocation9 + $0x670] sm:$0xf] }
 0x164   :  { %4451 = vmatpush.bf16.msrb.mxu3 %v11762_v10  ;;  %4405 = vmatpush.bf16.msrb.mxu1 %v11442_v5  ;;  %v11541_v10 = vld [vmem:[#allocation9 + $0x788] sm:$0xf] }
 0x165   :  { %4258 = vmatmul.bf16.gmra.mxu2 %v16320_v1 }
 0x166   :  { %v4021_v4 = vpop.f32.mrf.mxu0  ;;  %v4044_v23 = vpop.f32.mrf.mxu1  ;;  %4281 = vmatmul.bf16.gmra.mxu3 %v16322_v26  ;;  %4382 = vmatpush.bf16.msrb.mxu0 %v11282_v60  ;;  %v14769_v60 = vld [vmem:[#allocation9 + $0x680] sm:$0xf0] }
 0x167   :  { %v4045_v13 = vadd.f32 %v4044_v23, %v4021_v4 }
 0x168   :  { %v4065_v52 = vpop.f32.mrf.mxu2 }
 0x169   :  { %v4088_v63 = vpop.f32.mrf.mxu3  ;;  %v4066_v12 = vadd.f32 %v4065_v52, %v4043_v22  ;;  %v11602_v22 = vor.u32 %v14819_v44, %v11601_v16  ;;  %v11421_v52 = vld [vmem:[#allocation9 + $0x698] sm:$0xf]  ;;  %v11562_v16 = vor.u32 %v14809_v31, %v11561_v53  ;;  %v14729_v44 = vld [vmem:[#allocation9 + $0x540] sm:$0xf0] }
 0x16a   :  { %v11242_v41 = vor.u32 %v14729_v44, %v11241_v19 }
 0x16b   :  { %v16440_v34 = vadd.f32 %v4088_v63, %v4066_v12  ;;  %4428 = vmatpush.bf16.msrb.mxu2 %v11602_v22  ;;  %v14774_v63 = vld [vmem:[#allocation9 + $0x6a8] sm:$0xf0]  ;;  %v11742_v12 = vor.u32 %v14854_v30, %v11741_v38  ;;  %v14849_v22 = vld [vmem:[#allocation9 + $0x900] sm:$0xf0] }
 0x16c   :  { %v11722_v0 = vor.u32 %v14849_v22, %v11721_v48 }
 0x16d   :  { %4452 = vmatpush.bf16.msrb.mxu3 %v11742_v12  ;;  %v18727_v12 = vld [vmem:[#allocation32_spill] sm:$0xff] }
 0x16e   :  { %v4024_v15 = vpop.f32.mrf.mxu0  ;;  %v4047_v11 = vpop.f32.mrf.mxu1 }
 0x16f   :  { %v4048_v49 = vadd.f32 %v4047_v11, %v4024_v15  ;;  %4429 = vmatpush.bf16.msrb.mxu2 %v11582_v55  ;;  %v11422_v15 = vor.u32 %v14774_v63, %v11421_v52  ;;  %v14844_v55 = vld [vmem:[#allocation9 + $0x8d8] sm:$0xf0] }
 0x170   :  { %v4067_v4 = vpop.f32.mrf.mxu2  ;;  %v18726_v63 = vld [vmem:[#allocation31_spill] sm:$0xff] }
 0x171   :  { %4294 = vmatmul.bf16.vlgmr.msra.gmra.mxu0 %v15889_v28  ;;  %4317 = vmatmul.bf16.vlgmr.msra.gmra.mxu1 %v15891_v29  ;;  %v4090_v23 = vpop.f32.mrf.mxu3  ;;  %v4068_v39 = vadd.f32 %v4067_v4, %v4045_v13  ;;  %v11262_v13 = vor.u32 %v14734_v20, %v11261_v8  ;;  %v14804_v4 = vld [vmem:[#allocation9 + $0x798] sm:$0xf0]  ;;  %v11702_v20 = vor.u32 %v14844_v55, %v11701_v54  ;;  %v12461_v54 = vld [vmem:[#allocation9 + $0xeb8] sm:$0xf] }
 0x172   :  { %4406 = vmatpush.bf16.msrb.mxu1 %v11422_v15  ;;  %4453 = vmatpush.bf16.msrb.mxu3 %v11722_v0  ;;  %v12321_v15 = vld [vmem:[#allocation9 + $0xda0] sm:$0xf] }
 0x173   :  { %v16444_v47 = vadd.f32 %v4090_v23, %v4068_v39  ;;  %4383 = vmatpush.bf16.msrb.mxu0 %v11262_v13  ;;  %4430 = vmatpush.bf16.msrb.mxu2 %v11562_v16  ;;  %v11542_v23 = vor.u32 %v14804_v4, %v11541_v10  ;;  %v12161_v0 = vld [vmem:[#allocation9 + $0xc60] sm:$0xf]  ;;  %v11981_v4 = vld [vmem:[#allocation9 + $0xaf8] sm:$0xf] }
 0x175   :  { %4340 = vmatmul.bf16.vlgmr.msra.gmra.mxu2 %v15907_v40 }
 0x176   :  { %v4026_v7 = vpop.f32.mrf.mxu0  ;;  %v4049_v17 = vpop.f32.mrf.mxu1  ;;  %4363 = vmatmul.bf16.vlgmr.msra.gmra.mxu3 %v15909_v43 }
 0x177   :  { %v4050_v18 = vadd.f32 %v4049_v17, %v4026_v7  ;;  %4384 = vmatpush.bf16.msrb.mxu0 %v11242_v41  ;;  %v11381_v7 = vld [vmem:[#allocation9 + $0x648] sm:$0xf]  ;;  %v14764_v17 = vld [vmem:[#allocation9 + $0x658] sm:$0xf0]  ;;  %4431 = vmatpush.bf16.msrb.mxu2 %v11542_v23  ;;  %v14914_v23 = vld [vmem:[#allocation9 + $0xb08] sm:$0xf0] }
 0x178   :  { %v4070_v11 = vpop.f32.mrf.mxu2  ;;  %v11382_v38 = vor.u32 %v14764_v17, %v11381_v7  ;;  %4454 = vmatpush.bf16.msrb.mxu3 %v11702_v20  ;;  %v11982_v51 = vor.u32 %v14914_v23, %v11981_v4  ;;  %v14954_v7 = vld [vmem:[#allocation9 + $0xc48] sm:$0xf0] }
 0x179   :  { %v4093_v9 = vpop.f32.mrf.mxu3  ;;  %v4071_v32 = vadd.f32 %v4070_v11, %v4048_v49  ;;  %v11402_v49 = vor.u32 %v14769_v60, %v11401_v24  ;;  %v14999_v11 = vld [vmem:[#allocation9 + $0xdb0] sm:$0xf0]  ;;  %v12301_v60 = vld [vmem:[#allocation9 + $0xd78] sm:$0xf] }
 0x17a   :  { %v14959_v24 = vld [vmem:[#allocation9 + $0xc70] sm:$0xf0] }
 0x17b   :  { %v16448_v56 = vadd.f32 %v4093_v9, %v4071_v32  ;;  %4407 = vmatpush.bf16.msrb.mxu1 %v11402_v49  ;;  %4385 = vmatpush.bf16.msrb.mxu0 %v11222_v25  ;;  %v12001_v9 = vld [vmem:[#allocation9 + $0xb20] sm:$0xf]  ;;  %v12322_v32 = vor.u32 %v14999_v11, %v12321_v15  ;;  %v12162_v10 = vor.u32 %v14959_v24, %v12161_v0  ;;  %v14994_v49 = vld [vmem:[#allocation9 + $0xd88] sm:$0xf0]  ;;  %v18729_v25 = vld [vmem:[#allocation34_spill] sm:$0xff] }
 0x17c   :  { %v12302_v57 = vor.u32 %v14994_v49, %v12301_v60  ;;  %v14989_v15 = vld [vmem:[#allocation9 + $0xd60] sm:$0xf0]  ;;  %v11961_v11 = vld [vmem:[#allocation9 + $0xad0] sm:$0xf]  ;;  %v12261_v0 = vld [vmem:[#allocation9 + $0xd28] sm:$0xf] }
 0x17d   :  { %4516 = vmatpush.bf16.msra.mxu2 %v12322_v32  ;;  %v14909_v32 = vld [vmem:[#allocation9 + $0xae0] sm:$0xf0]  ;;  %v14984_v60 = vld [vmem:[#allocation9 + $0xd38] sm:$0xf0] }
 0x17e   :  { %v4029_v2 = vpop.f32.mrf.mxu0  ;;  %v4052_v21 = vpop.f32.mrf.mxu1 }
 0x17f   :  { %v4053_v33 = vadd.f32 %v4052_v21, %v4029_v2  ;;  %4408 = vmatpush.bf16.msrb.mxu1 %v11382_v38  ;;  %v14919_v2 = vld [vmem:[#allocation9 + $0xb30] sm:$0xf0] }
 0x180   :  { %v4072_v39 = vpop.f32.mrf.mxu2  ;;  %v15039_v21 = vld [vmem:[#allocation9 + $0xef0] sm:$0xf0]  ;;  %v12002_v53 = vor.u32 %v14919_v2, %v12001_v9  ;;  %v12441_v2 = vld [vmem:[#allocation9 + $0xe90] sm:$0xf] }
 0x181   :  { %4299 = vmatmul.bf16.gmra.mxu0 %v16010_v27  ;;  %4322 = vmatmul.bf16.gmra.mxu1 %v16012_v61  ;;  %v4095_v5 = vpop.f32.mrf.mxu3  ;;  %v4073_v8 = vadd.f32 %v4072_v39, %v4050_v18  ;;  %v12481_v18 = vld [vmem:[#allocation9 + $0xee0] sm:$0xf]  ;;  %v15034_v39 = vld [vmem:[#allocation9 + $0xec8] sm:$0xf0] }
 0x182   :  { %v12482_v31 = vor.u32 %v15039_v21, %v12481_v18  ;;  %4470 = vmatpush.bf16.msra.mxu0 %v12002_v53  ;;  %v12462_v55 = vor.u32 %v15034_v39, %v12461_v54  ;;  %4517 = vmatpush.bf16.msra.mxu2 %v12302_v57  ;;  %v15029_v18 = vld [vmem:[#allocation9 + $0xea0] sm:$0xf0]  ;;  %v18730_v21 = vld [vmem:[#allocation35_spill] sm:$0xff]  ;;  %v12421_v39 = vld [vmem:[#allocation9 + $0xe68] sm:$0xf] }
 0x183   :  { %v16452_v13 = vadd.f32 %v4095_v5, %v4073_v8  ;;  %v18728_v5 = vld [vmem:[#allocation33_spill] sm:$0xff]  ;;  %4493 = vmatpush.bf16.msra.mxu1 %v12162_v10  ;;  %v18731_v53 = vld [vmem:[#allocation36_spill] sm:$0xff]  ;;  %v12262_v10 = vor.u32 %v14984_v60, %v12261_v0  ;;  %v14904_v54 = vld [vmem:[#allocation9 + $0xab8] sm:$0xf0] }
 0x184   :  { %4539 = vmatpush.bf16.msra.mxu3 %v12482_v31  ;;  %v11962_v31 = vor.u32 %v14909_v32, %v11961_v11  ;;  %v11921_v11 = vld [vmem:[#allocation9 + $0xa80] sm:$0xf]  ;;  %v18733_v32 = vld [vmem:[#allocation38_spill] sm:$0xff] }
 0x185   :  { %4345 = vmatmul.bf16.gmra.mxu2 %v18726_v63  ;;  %v12081_v60 = vld [vmem:[#allocation9 + $0xbc0] sm:$0xf] }
 0x186   :  { %v4031_v30 = vpop.f32.mrf.mxu0  ;;  %v4054_v52 = vpop.f32.mrf.mxu1  ;;  %4368 = vmatmul.bf16.gmra.mxu3 %v18727_v12  ;;  %4471 = vmatpush.bf16.msra.mxu0 %v11982_v51  ;;  %v11941_v51 = vld [vmem:[#allocation9 + $0xaa8] sm:$0xf] }
 0x187   :  { %v12281_v52 = vld [vmem:[#allocation9 + $0xd50] sm:$0xf] }
 0x188   :  { %v4075_v19 = vpop.f32.mrf.mxu2  ;;  %4540 = vmatpush.bf16.msra.mxu3 %v12462_v55  ;;  %v12282_v9 = vor.u32 %v14989_v15, %v12281_v52  ;;  %v15024_v55 = vld [vmem:[#allocation9 + $0xe78] sm:$0xf0]  ;;  %v12241_v52 = vld [vmem:[#allocation9 + $0xd00] sm:$0xf]  ;;  %v14979_v15 = vld [vmem:[#allocation9 + $0xd10] sm:$0xf0] }
 0x189   :  { %v4098_v16 = vpop.f32.mrf.mxu3  ;;  %v4076_v44 = vadd.f32 %v4075_v19, %v4053_v33  ;;  %v12141_v33 = vld [vmem:[#allocation9 + $0xc38] sm:$0xf]  ;;  %v12442_v19 = vor.u32 %v15029_v18, %v12441_v2  ;;  %v12242_v2 = vor.u32 %v14979_v15, %v12241_v52  ;;  %v14899_v18 = vld [vmem:[#allocation9 + $0xa90] sm:$0xf0]  ;;  %v14894_v52 = vld [vmem:[#allocation9 + $0xa68] sm:$0xf0] }
 0x18a   :  { %v12142_v17 = vor.u32 %v14954_v7, %v12141_v33  ;;  %4518 = vmatpush.bf16.msra.mxu2 %v12282_v9  ;;  %4472 = vmatpush.bf16.msra.mxu0 %v11962_v31  ;;  %v11942_v33 = vor.u32 %v14904_v54, %v11941_v51  ;;  %v12101_v7 = vld [vmem:[#allocation9 + $0xbe8] sm:$0xf]  ;;  %v12401_v31 = vld [vmem:[#allocation9 + $0xe40] sm:$0xf]  ;;  %v12221_v51 = vld [vmem:[#allocation9 + $0xcd8] sm:$0xf] }
 0x18b   :  { %v16456_v48 = vadd.f32 %v4098_v16, %v4076_v44  ;;  %v12121_v16 = vld [vmem:[#allocation9 + $0xc10] sm:$0xf]  ;;  %v14949_v44 = vld [vmem:[#allocation9 + $0xc20] sm:$0xf0]  ;;  %v18732_v9 = vld [vmem:[#allocation37_spill] sm:$0xff] }
 0x18c   :  { %4494 = vmatpush.bf16.msra.mxu1 %v12142_v17  ;;  %v12122_v24 = vor.u32 %v14949_v44, %v12121_v16  ;;  %4541 = vmatpush.bf16.msra.mxu3 %v12442_v19  ;;  %v14944_v17 = vld [vmem:[#allocation9 + $0xbf8] sm:$0xf0]  ;;  %v15019_v19 = vld [vmem:[#allocation9 + $0xe50] sm:$0xf0]  ;;  %v11922_v16 = vor.u32 %v14899_v18, %v11921_v11  ;;  %v12381_v15 = vld [vmem:[#allocation9 + $0xe18] sm:$0xf] }
 0x18d   :  { %v12402_v44 = vor.u32 %v15019_v19, %v12401_v31  ;;  %v12061_v18 = vld [vmem:[#allocation9 + $0xb98] sm:$0xf]  ;;  %v14934_v31 = vld [vmem:[#allocation9 + $0xba8] sm:$0xf0] }
 0x18e   :  { %v16458_v22 = vpop.f32.mrf.mxu0  ;;  %v16460_v41 = vpop.f32.mrf.mxu1  ;;  %4519 = vmatpush.bf16.msra.mxu2 %v12262_v10  ;;  %4473 = vmatpush.bf16.msra.mxu0 %v11942_v33  ;;  %v14939_v10 = vld [vmem:[#allocation9 + $0xbd0] sm:$0xf0]  ;;  %v18734_v33 = vld [vmem:[#allocation39_spill] sm:$0xff] }
 0x18f   :  { %v12082_v54 = vor.u32 %v14939_v10, %v12081_v60  ;;  %v12062_v60 = vor.u32 %v14934_v31, %v12061_v18  ;;  %v12041_v18 = vld [vmem:[#allocation9 + $0xb70] sm:$0xf]  ;;  %v14929_v31 = vld [vmem:[#allocation9 + $0xb80] sm:$0xf0] }
 0x190   :  { %v4077_v8 = vpop.f32.mrf.mxu2  ;;  %4495 = vmatpush.bf16.msra.mxu1 %v12122_v24 }
 0x191   :  { %4304 = vmatmul.bf16.gmra.mxu0 %v18728_v5  ;;  %4327 = vmatmul.bf16.gmra.mxu1 %v18729_v25  ;;  %v4100_v20 = vpop.f32.mrf.mxu3  ;;  %v12422_v8 = vor.u32 %v15024_v55, %v12421_v39  ;;  %v14974_v39 = vld [vmem:[#allocation9 + $0xce8] sm:$0xf0]  ;;  %v14924_v25 = vld [vmem:[#allocation9 + $0xb58] sm:$0xf0] }
 0x192   :  { %v12102_v20 = vor.u32 %v14944_v17, %v12101_v7  ;;  %4520 = vmatpush.bf16.msra.mxu2 %v12242_v2  ;;  %v12222_v55 = vor.u32 %v14974_v39, %v12221_v51  ;;  %4474 = vmatpush.bf16.msra.mxu0 %v11922_v16  ;;  %v15014_v2 = vld [vmem:[#allocation9 + $0xe28] sm:$0xf0]  ;;  %v14969_v39 = vld [vmem:[#allocation9 + $0xcc0] sm:$0xf0] }
 0x193   :  { %4542 = vmatpush.bf16.msra.mxu3 %v12422_v8  ;;  %v18735_v8 = vld [vmem:[#allocation40_spill] sm:$0xff]  ;;  %v12382_v19 = vor.u32 %v15014_v2, %v12381_v15 }
 0x194   :  { %4496 = vmatpush.bf16.msra.mxu1 %v12102_v20  ;;  %v11901_v20 = vld [vmem:[#allocation9 + $0xa58] sm:$0xf] }
 0x195   :  { %4350 = vmatmul.bf16.gmra.mxu2 %v18730_v21  ;;  %v11902_v11 = vor.u32 %v14894_v52, %v11901_v20  ;;  %v14889_v52 = vld [vmem:[#allocation9 + $0xa40] sm:$0xf0] }
 0x196   :  { %v16464_v38 = vpop.f32.mrf.mxu0  ;;  %v16466_v30 = vpop.f32.mrf.mxu1  ;;  %4373 = vmatmul.bf16.gmra.mxu3 %v18731_v53  ;;  %4521 = vmatpush.bf16.msra.mxu2 %v12222_v55  ;;  %v11881_v55 = vld [vmem:[#allocation9 + $0xa30] sm:$0xf] }
 0x197   :  { %4543 = vmatpush.bf16.msra.mxu3 %v12402_v44  ;;  %4475 = vmatpush.bf16.msra.mxu0 %v11902_v11  ;;  %v11882_v15 = vor.u32 %v14889_v52, %v11881_v55  ;;  %v18737_v11 = vld [vmem:[#allocation42_spill] sm:$0xff]  ;;  %v15004_v52 = vld [vmem:[#allocation9 + $0xdd8] sm:$0xf0] }
 0x198   :  { %v16470_v49 = vpop.f32.mrf.mxu2  ;;  %4497 = vmatpush.bf16.msra.mxu1 %v12082_v54  ;;  %v12201_v54 = vld [vmem:[#allocation9 + $0xcb0] sm:$0xf] }
 0x199   :  { %v16472_v4 = vpop.f32.mrf.mxu3  ;;  %v12202_v20 = vor.u32 %v14969_v39, %v12201_v54  ;;  %v11861_v39 = vld [vmem:[#allocation9 + $0xa08] sm:$0xf] }
 0x19b   :  { %4544 = vmatpush.bf16.msra.mxu3 %v12382_v19  ;;  %v12042_v19 = vor.u32 %v14929_v31, %v12041_v18  ;;  %4522 = vmatpush.bf16.msra.mxu2 %v12202_v20 }
 0x19c   :  { %4498 = vmatpush.bf16.msra.mxu1 %v12062_v60  ;;  %4476 = vmatpush.bf16.msra.mxu0 %v11882_v15  ;;  %v12181_v60 = vld [vmem:[#allocation9 + $0xc88] sm:$0xf] }
 0x19e   :  { %v16474_v23 = vpop.f32.mrf.mxu0  ;;  %v16476_v57 = vpop.f32.mrf.mxu1 }
 0x1a0   :  { %v16480_v0 = vpop.f32.mrf.mxu2  ;;  %4499 = vmatpush.bf16.msra.mxu1 %v12042_v19 }
 0x1a1   :  { %4386 = vmatmul.bf16.vlgmr.msrb.gmra.mxu0 %v18732_v9  ;;  %4409 = vmatmul.bf16.vlgmr.msrb.gmra.mxu1 %v18733_v32  ;;  %v16482_v24 = vpop.f32.mrf.mxu3  ;;  %v18736_v32 = vld [vmem:[#allocation41_spill] sm:$0xff]  ;;  %v14964_v9 = vld [vmem:[#allocation9 + $0xc98] sm:$0xf0] }
 0x1a2   :  { %v12182_v54 = vor.u32 %v14964_v9, %v12181_v60  ;;  %v4112_v9 = vadd.f32 %v16458_v22, %v16440_v34  ;;  %v4114_v34 = vadd.f32 %v16464_v38, %v16444_v47  ;;  %v5148_v47 = vld [vmem:[#allocation4 + $0x18] sm:$0x33] }
 0x1a4   :  { %4523 = vmatpush.bf16.msra.mxu2 %v12182_v54 }
 0x1a5   :  { %4432 = vmatmul.bf16.vlgmr.msrb.gmra.mxu2 %v18734_v33  ;;  %v15009_v33 = vld [vmem:[#allocation9 + $0xe00] sm:$0xf0] }
 0x1a6   :  { %v16484_v7 = vpop.f32.mrf.mxu0  ;;  %v16486_v17 = vpop.f32.mrf.mxu1  ;;  %4455 = vmatmul.bf16.vlgmr.msrb.gmra.mxu3 %v18735_v8  ;;  %v12361_v8 = vld [vmem:[#allocation9 + $0xdf0] sm:$0xf] }
 0x1a7   :  { %v12362_v2 = vor.u32 %v15009_v33, %v12361_v8  ;;  %v14884_v33 = vld [vmem:[#allocation9 + $0xa18] sm:$0xf0]  ;;  %v12341_v8 = vld [vmem:[#allocation9 + $0xdc8] sm:$0xf] }
 0x1a8   :  { %v16490_v10 = vpop.f32.mrf.mxu2  ;;  %v11862_v55 = vor.u32 %v14884_v33, %v11861_v39  ;;  %v18739_v33 = vld [vmem:[#allocation49_spill] sm:$0xff] }
 0x1a9   :  { %v16492_v51 = vpop.f32.mrf.mxu3  ;;  %4545 = vmatpush.bf16.msra.mxu3 %v12362_v2  ;;  %v5139_v2 = vld [vmem:[#allocation4] sm:$0x33] }
 0x1aa   :  { %4477 = vmatpush.bf16.msra.mxu0 %v11862_v55 }
 0x1ae   :  { %v16494_v16 = vpop.f32.mrf.mxu0  ;;  %v16496_v44 = vpop.f32.mrf.mxu1 }
 0x1b0   :  { %v16500_v53 = vpop.f32.mrf.mxu2 }
 0x1b1   :  { %4391 = vmatmul.bf16.gmra.mxu0 %v18736_v32  ;;  %4414 = vmatmul.bf16.gmra.mxu1 %v18737_v11  ;;  %v16502_v21 = vpop.f32.mrf.mxu3  ;;  %v12021_v32 = vld [vmem:[#allocation9 + $0xb48] sm:$0xf]  ;;  %v12342_v11 = vor.u32 %v15004_v52, %v12341_v8  ;;  %v14677_v52 = vld [vmem:[#allocation9 + $0x3a4] sm:$0xf] }
 0x1b2   :  { %v12022_v18 = vor.u32 %v14924_v25, %v12021_v32  ;;  %v5140_v25 = vsel %vm15725_vm6, 0, %v5139_v2  ;;  %v4135_v32 = vadd.f32 %v16460_v41, %v4112_v9  ;;  %v10723_v41 = vld [vmem:[#allocation9 + $0x134] sm:$0xf0]  ;;  %v14717_v9 = vld [vmem:[#allocation9 + $0x4e4] sm:$0xf] }
 0x1b3   :  { %4546 = vmatpush.bf16.msra.mxu3 %v12342_v11  ;;  %5141 = vst [vmem:[#allocation4] sm:$0x33] %v5140_v25  ;;  %v11203_v2 = vld [vmem:[#allocation9 + $0x4f4] sm:$0xf0] }
 0x1b4   :  { %4500 = vmatpush.bf16.msra.mxu1 %v12022_v18  ;;  %v4158_v39 = vadd.f32 %v16470_v49, %v4135_v32  ;;  %v11043_v18 = vld [vmem:[#allocation9 + $0x3b4] sm:$0xf0]  ;;  %v4137_v49 = vadd.f32 %v16466_v30, %v4114_v34  ;;  %v14637_v30 = vld [vmem:[#allocation9 + $0x264] sm:$0xf] }
 0x1b5   :  { %4437 = vmatmul.bf16.gmra.mxu2 %v16118_v45  ;;  %v5145_v45 = vld [vmem:[#allocation4 + $0x10] sm:$0x33] }
 0x1b6   :  { %v4123_v20 = vpop.f32.mrf.mxu0  ;;  %v4146_v15 = vpop.f32.mrf.mxu1  ;;  %4460 = vmatmul.bf16.gmra.mxu3 %v16120_v37  ;;  %v4181_v55 = vadd.f32 %v16472_v4, %v4158_v39  ;;  %v11206_v37 = vor.u32 %v14717_v9, %v11203_v2  ;;  %v5146_v38 = vsel %vm15725_vm6, 0, %v5145_v45  ;;  %v5149_v4 = vsel %vm15725_vm6, 0, %v5148_v47  ;;  %v14592_v9 = vld [vmem:[#allocation9 + $0xfc] sm:$0xf] }
 0x1b7   :  { %v14597_v20 = vld [vmem:[#allocation9 + $0x124] sm:$0xf]  ;;  %v11046_v15 = vor.u32 %v14677_v52, %v11043_v18  ;;  %v4160_v39 = vadd.f32 %v16480_v0, %v4137_v49  ;;  %5147 = vst [vmem:[#allocation4 + $0x10] sm:$0x33] %v5146_v38  ;;  %v4117_v45 = vadd.f32 %v16474_v23, %v16448_v56  ;;  %v10703_v49 = vld [vmem:[#allocation9 + $0x10c] sm:$0xf0] }
 0x1b8   :  { %v16508_v31 = vpop.f32.mrf.mxu2  ;;  %4631 = vmatpush.bf16.msrb.mxu3 %v11206_v37  ;;  %5150 = vst [vmem:[#allocation4 + $0x18] sm:$0x33] %v5149_v4  ;;  %v14712_v47 = vld [vmem:[#allocation9 + $0x4bc] sm:$0xf] }
 0x1b9   :  { %v16510_v19 = vpop.f32.mrf.mxu3  ;;  %4608 = vmatpush.bf16.msrb.mxu2 %v11046_v15  ;;  %v4183_v0 = vadd.f32 %v16482_v24, %v4160_v39  ;;  %v14672_v15 = vld [vmem:[#allocation9 + $0x37c] sm:$0xf]  ;;  %v4140_v24 = vadd.f32 %v16476_v57, %v4117_v45  ;;  %v14587_v45 = vld [vmem:[#allocation9 + $0xd4] sm:$0xf] }
 0x1ba   :  { %v14632_v23 = vld [vmem:[#allocation9 + $0x23c] sm:$0xf] }
 0x1be   :  { %v4203_v11 = vpop.f32.mrf.mxu0  ;;  %v4226_v54 = vpop.f32.mrf.mxu1 }
 0x1bf   :  { %v4204_v25 = vadd.f32 %v4203_v11, %v4181_v55  ;;  %v10883_v11 = vld [vmem:[#allocation9 + $0x274] sm:$0xf0] }
 0x1c0   :  { %v4169_v22 = vpop.f32.mrf.mxu2  ;;  %v10886_v34 = vor.u32 %v14637_v30, %v10883_v11  ;;  %v10863_v30 = vld [vmem:[#allocation9 + $0x24c] sm:$0xf0] }
 0x1c1   :  { %4396 = vmatmul.bf16.gmra.mxu0 %v16174_v3  ;;  %4419 = vmatmul.bf16.gmra.mxu1 %v18739_v33  ;;  %v4192_v8 = vpop.f32.mrf.mxu3  ;;  %v10726_v33 = vor.u32 %v14597_v20, %v10723_v41  ;;  %v18740_v22 = vld [vmem:[#allocation51_spill] sm:$0xff]  ;;  %v4227_v55 = vadd.f32 %v4226_v54, %v4204_v25  ;;  %v11023_v41 = vld [vmem:[#allocation9 + $0x38c] sm:$0xf0]  ;;  %v10706_v25 = vor.u32 %v14592_v9, %v10703_v49  ;;  %v14627_v49 = vld [vmem:[#allocation9 + $0x214] sm:$0xf] }
 0x1c2   :  { %v18741_v8 = vld [vmem:[#allocation52_spill] sm:$0xff]  ;;  %4585 = vmatpush.bf16.msrb.mxu1 %v10886_v34  ;;  %v11026_v2 = vor.u32 %v14672_v15, %v11023_v41  ;;  %v5409_v11 = vld [vmem:[#allocation4 + $0x78] sm:$0xcc]  ;;  %v10866_v39 = vor.u32 %v14632_v23, %v10863_v30  ;;  %v14667_v34 = vld [vmem:[#allocation9 + $0x354] sm:$0xf] }
 0x1c3   :  { %4562 = vmatpush.bf16.msrb.mxu0 %v10726_v33  ;;  %v11183_v33 = vld [vmem:[#allocation9 + $0x4cc] sm:$0xf0]  ;;  %v14707_v15 = vld [vmem:[#allocation9 + $0x494] sm:$0xf]  ;;  %v14662_v23 = vld [vmem:[#allocation9 + $0x32c] sm:$0xf] }
 0x1c4   :  { %v11186_v56 = vor.u32 %v14712_v47, %v11183_v33  ;;  %4609 = vmatpush.bf16.msrb.mxu2 %v11026_v2  ;;  %v11163_v2 = vld [vmem:[#allocation9 + $0x4a4] sm:$0xf0]  ;;  %v5187_v33 = vld [vmem:[#allocation3 + $0xb0] sm:$0xfc] }
 0x1c5   :  { %4442 = vmatmul.bf16.gmra.mxu2 %v18740_v22  ;;  %v10843_v47 = vld [vmem:[#allocation9 + $0x224] sm:$0xf0]  ;;  %v10983_v30 = vld [vmem:[#allocation9 + $0x33c] sm:$0xf0] }
 0x1c6   :  { %v4205_v32 = vpop.f32.mrf.mxu0  ;;  %v4228_v3 = vpop.f32.mrf.mxu1  ;;  %4465 = vmatmul.bf16.gmra.mxu3 %v18741_v8  ;;  %4586 = vmatpush.bf16.msrb.mxu1 %v10866_v39  ;;  %v10663_v39 = vld [vmem:[#allocation9 + $0xbc] sm:$0xf0] }
 0x1c7   :  { %v4206_v38 = vadd.f32 %v4205_v32, %v4183_v0  ;;  %4563 = vmatpush.bf16.msrb.mxu0 %v10706_v25  ;;  %4632 = vmatpush.bf16.msrb.mxu3 %v11186_v56  ;;  %v5410_v32 = vsel %vm15895_vm0, 0, %v5409_v11  ;;  %v4119_v0 = vadd.f32 %v16484_v7, %v16452_v13  ;;  %v11166_v25 = vor.u32 %v14707_v15, %v11163_v2  ;;  %v5163_v7 = vld [vmem:[#allocation4 + $0x78] sm:$0x33] }
 0x1c8   :  { %v4249_v52 = vpop.f32.mrf.mxu2  ;;  %v10846_v13 = vor.u32 %v14627_v49, %v10843_v47  ;;  %5411 = vst [vmem:[#allocation4 + $0x78] sm:$0xcc] %v5410_v32  ;;  %v14582_v11 = vld [vmem:[#allocation9 + $0xac] sm:$0xf]  ;;  %v5164_v49 = vsel %vm15866_vm2, 0, %v5163_v7 }
 0x1c9   :  { %v4272_v18 = vpop.f32.mrf.mxu3  ;;  %v4250_v20 = vadd.f32 %v4249_v52, %v4227_v55  ;;  %v11003_v55 = vld [vmem:[#allocation9 + $0x364] sm:$0xf0]  ;;  %v4229_v41 = vadd.f32 %v4228_v3, %v4206_v38  ;;  %v4142_v38 = vadd.f32 %v16486_v17, %v4119_v0  ;;  %v10666_v32 = vor.u32 %v14582_v11, %v10663_v39  ;;  %5165 = vst [vmem:[#allocation4 + $0x78] sm:$0x33] %v5164_v49  ;;  %v14657_v7 = vld [vmem:[#allocation9 + $0x304] sm:$0xf] }
 0x1ca   :  { %v11006_v57 = vor.u32 %v14667_v34, %v11003_v55  ;;  %v14702_v34 = vld [vmem:[#allocation9 + $0x46c] sm:$0xf]  ;;  %v11143_v55 = vld [vmem:[#allocation9 + $0x47c] sm:$0xf0]  ;;  %4587 = vmatpush.bf16.msrb.mxu1 %v10846_v13  ;;  %v4122_v17 = vadd.f32 %v16494_v16, %v16456_v48  ;;  %v14577_v48 = vld [vmem:[#allocation9 + $0x84] sm:$0xf] }
 0x1cb   :  { %v4273_v37 = vadd.f32 %v4272_v18, %v4250_v20  ;;  %v4163_v18 = vadd.f32 %v16490_v10, %v4140_v24  ;;  %v10683_v20 = vld [vmem:[#allocation9 + $0xe4] sm:$0xf0]  ;;  %4633 = vmatpush.bf16.msrb.mxu3 %v11166_v25  ;;  %v10986_v24 = vor.u32 %v14662_v23, %v10983_v30  ;;  %v11146_v15 = vor.u32 %v14702_v34, %v11143_v55  ;;  %v10643_v16 = vld [vmem:[#allocation9 + $0x94] sm:$0xf0]  ;;  %v16563_v49 = vld [vmem:[#allocation3 + $0xb8] sm:$0x3] }
 0x1cc   :  { %v10686_v9 = vor.u32 %v14587_v45, %v10683_v20  ;;  %4610 = vmatpush.bf16.msrb.mxu2 %v11006_v57  ;;  %v4165_v25 = vadd.f32 %v16500_v53, %v4142_v38  ;;  %v10646_v11 = vor.u32 %v14577_v48, %v10643_v16  ;;  %v14697_v53 = vld [vmem:[#allocation9 + $0x444] sm:$0xf]  ;;  %v11083_v48 = vld [vmem:[#allocation9 + $0x404] sm:$0xf0] }
 0x1cd   :  { %5115 = vst [vmem:[#allocation3] sm:$0xff] %v4273_v37  ;;  %v4186_v3 = vadd.f32 %v16492_v51, %v4163_v18  ;;  %v5202_v51 = vmax.f32 %v5187_v33, 0.0  ;;  %v10963_v33 = vld [vmem:[#allocation9 + $0x314] sm:$0xf0]  ;;  %v14617_v38 = vld [vmem:[#allocation9 + $0x1c4] sm:$0xf] }
 0x1ce   :  { %v4208_v4 = vpop.f32.mrf.mxu0  ;;  %v16532_v54 = vpop.f32.mrf.mxu1  ;;  %4564 = vmatpush.bf16.msrb.mxu0 %v10686_v9  ;;  %v10823_v9 = vld [vmem:[#allocation9 + $0x1fc] sm:$0xf0]  ;;  %v10966_v30 = vor.u32 %v14657_v7, %v10963_v33  ;;  %v14692_v7 = vld [vmem:[#allocation9 + $0x41c] sm:$0xf]  ;;  %v11103_v33 = vld [vmem:[#allocation9 + $0x42c] sm:$0xf0] }
 0x1cf   :  { %v4209_v0 = vadd.f32 %v4208_v4, %v4186_v3  ;;  %4634 = vmatpush.bf16.msrb.mxu3 %v11146_v15  ;;  %v11123_v3 = vld [vmem:[#allocation9 + $0x454] sm:$0xf0]  ;;  %v4188_v15 = vadd.f32 %v16502_v21, %v4165_v25  ;;  %v10943_v25 = vld [vmem:[#allocation9 + $0x2ec] sm:$0xf0] }
 0x1d0   :  { %v4251_v37 = vpop.f32.mrf.mxu2  ;;  %4611 = vmatpush.bf16.msrb.mxu2 %v10986_v24  ;;  %v4145_v24 = vadd.f32 %v16496_v44, %v4122_v17  ;;  %v14652_v17 = vld [vmem:[#allocation9 + $0x2dc] sm:$0xf] }
 0x1d1   :  { %4478 = vmatmul.bf16.vlgmr.msra.gmra.mxu0 %v16249_v36  ;;  %4501 = vmatmul.bf16.vlgmr.msra.gmra.mxu1 %v16253_v6  ;;  %v4274_v10 = vpop.f32.mrf.mxu3  ;;  %v4252_v56 = vadd.f32 %v4251_v37, %v4229_v41  ;;  %v14622_v41 = vld [vmem:[#allocation9 + $0x1ec] sm:$0xf]  ;;  %v15561_v37 = vld [vmem:[#allocation3 + $0x28] sm:$0xff]  ;;  %v4232_v39 = vadd.f32 %v16532_v54, %v4209_v0 }
 0x1d2   :  { %v10826_v47 = vor.u32 %v14622_v41, %v10823_v9  ;;  %4565 = vmatpush.bf16.msrb.mxu0 %v10666_v32  ;;  %v10803_v32 = vld [vmem:[#allocation9 + $0x1d4] sm:$0xf0] }
 0x1d3   :  { %v4275_v45 = vadd.f32 %v4274_v10, %v4252_v56  ;;  %v5207_v10 = vmax.f32 %v15561_v37, 0.0  ;;  %v10806_v54 = vor.u32 %v14617_v38, %v10803_v32  ;;  %v14647_v38 = vld [vmem:[#allocation9 + $0x2b4] sm:$0xf]  ;;  %v10923_v32 = vld [vmem:[#allocation9 + $0x2c4] sm:$0xf0] }
 0x1d4   :  { %v5188_v18 = vld [vmem:[#allocation3] sm:$0xfc]  ;;  %4588 = vmatpush.bf16.msrb.mxu1 %v10826_v47  ;;  %4612 = vmatpush.bf16.msrb.mxu2 %v10966_v30  ;;  %v14612_v30 = vld [vmem:[#allocation9 + $0x19c] sm:$0xf] }
 0x1d5   :  { %v5203_v13 = vmax.f32 %v5188_v18, 0.0  ;;  %v5208_v56 = vmax.f32 %v4275_v45, 0.0  ;;  %4524 = vmatmul.bf16.vlgmr.msra.gmra.mxu2 %v16272_v35  ;;  %v11126_v45 = vor.u32 %v14697_v53, %v11123_v3  ;;  %v16566_v18 = vld [vmem:[#allocation3 + $0xb8] sm:$0xc0] }
 0x1d6   :  { %v4210_v57 = vpop.f32.mrf.mxu0  ;;  %v16544_v20 = vpop.f32.mrf.mxu1  ;;  %4547 = vmatmul.bf16.vlgmr.msra.gmra.mxu3 %v16274_v62  ;;  %4566 = vmatpush.bf16.msrb.mxu0 %v10646_v11  ;;  %v10783_v11 = vld [vmem:[#allocation9 + $0x1ac] sm:$0xf0] }
 0x1d7   :  { %v16553_v4 = vpack.c.bf16 %v5203_v13, %v5202_v51  ;;  %v16555_v23 = vpack.c.bf16 %v5208_v56, %v5207_v10  ;;  %v4168_v51 = vadd.f32 %v16508_v31, %v4145_v24  ;;  %4635 = vmatpush.bf16.msrb.mxu3 %v11126_v45  ;;  %v4211_v47 = vadd.f32 %v4210_v57, %v4188_v15  ;;  %v14572_v13 = vld [vmem:[#allocation9 + $0x5c] sm:$0xf]  ;;  %v10623_v56 = vld [vmem:[#allocation9 + $0x6c] sm:$0xf0]  ;;  %v5310_v24 = vld [vmem:[#allocation4] sm:$0xee] }
 0x1d8   :  { %v4254_v34 = vpop.f32.mrf.mxu2  ;;  %4589 = vmatpush.bf16.msrb.mxu1 %v10806_v54  ;;  %v11106_v45 = vor.u32 %v14692_v7, %v11103_v33  ;;  %v10603_v15 = vld [vmem:[#allocation9 + $0x44] sm:$0xf0]  ;;  %v14642_v33 = vld [vmem:[#allocation9 + $0x28c] sm:$0xf] }
 0x1d9   :  { %v4277_v55 = vpop.f32.mrf.mxu3  ;;  %v18481_v41 = vshrl.u32 %v16553_v4, 16  ;;  %v18479_v9 = vshrl.u32 %v16555_v23, 16  ;;  %5334 = vst [vmem:[#allocation4 + $0x50] sm:$0xff] %v16555_v23  ;;  %v4255_v44 = vadd.f32 %v4254_v34, %v4232_v39  ;;  %v18480_v0 = vshll.u32 %v16553_v4, 16 }
 0x1da   :  { %v4191_v57 = vadd.f32 %v16510_v19, %v4168_v51  ;;  %v4234_v39 = vadd.f32 %v16544_v20, %v4211_v47  ;;  %v10946_v34 = vor.u32 %v14652_v17, %v10943_v25  ;;  %v14567_v19 = vld [vmem:[#allocation9 + $0x34] sm:$0xf]  ;;  %v5472_v51 = vmax.f32 %v16566_v18, 0.0  ;;  %5331 = vst [vmem:[#allocation4 + $0x14] sm:$0xee] %v16553_v4 }
 0x1db   :  { %v16570_v21 = vrot.slane %v18481_v41, 7  ;;  %v4278_v31 = vadd.f32 %v4277_v55, %v4255_v44  ;;  %v16578_v16 = vrot.slane %v18479_v9, 7  ;;  %v10626_v55 = vor.u32 %v14572_v13, %v10623_v56  ;;  %v15562_v44 = vld [vmem:[#allocation3 + $0xa0] sm:$0xff]  ;;  %v14687_v41 = vld [vmem:[#allocation9 + $0x3f4] sm:$0xf]  ;;  %4636 = vmatpush.bf16.msrb.mxu3 %v11106_v45 }
 0x1dc   :  { %v5477_v54 = vmax.f32 %v15562_v44, 0.0  ;;  %v18744_v20 = vshll.u32 %v16555_v23, 16  ;;  %4613 = vmatpush.bf16.msrb.mxu2 %v10946_v34  ;;  %v14607_v13 = vld [vmem:[#allocation9 + $0x174] sm:$0xf]  ;;  %v10763_v56 = vld [vmem:[#allocation9 + $0x184] sm:$0xf0]  ;;  %v10926_v18 = vor.u32 %v14647_v38, %v10923_v32  ;;  %v10606_v7 = vor.u32 %v14567_v19, %v10603_v15 }
 0x1dd   :  { %v5232_v53 = vor.u32 %v18480_v0, %v16570_v21  ;;  %5125 = vst [vmem:[#allocation3 + $0x70] sm:$0xff] %v4278_v31  ;;  %v10786_v0 = vor.u32 %v14612_v30, %v10783_v11  ;;  %v5247_v3 = vrot.slane %v16570_v21, 4  ;;  %4567 = vmatpush.bf16.msrb.mxu0 %v10626_v55  ;;  %v10903_v30 = vld [vmem:[#allocation9 + $0x29c] sm:$0xf0]  ;;  %v14562_v11 = vld [vmem:[#allocation9 + $0xc] sm:$0xf] }
 0x1de   :  { %v4213_v37 = vpop.f32.mrf.mxu0  ;;  %v16573_v10 = vpop.f32.mrf.mxu1  ;;  %v5254_v17 = vor.u32 %v18744_v20, %v16578_v16  ;;  %v11086_v20 = vor.u32 %v14687_v41, %v11083_v48  ;;  %v14602_v34 = vld [vmem:[#allocation9 + $0x14c] sm:$0xf]  ;;  %v10743_v55 = vld [vmem:[#allocation9 + $0x15c] sm:$0xf0]  ;;  %v10906_v48 = vor.u32 %v14642_v33, %v10903_v30  ;;  %v14837_v19 = vld [vmem:[#allocation9 + $0x8a4] sm:$0xf] }
 0x1df   :  { %v4214_v25 = vadd.f32 %v4213_v37, %v4191_v57  ;;  %4590 = vmatpush.bf16.msrb.mxu1 %v10786_v0  ;;  %v5311_v21 = vsel %vm15819_vm7, %v5232_v53, %v5310_v24  ;;  %v10583_v37 = vld [vmem:[#allocation9 + $0x1c] sm:$0xf0]  ;;  %v14682_v57 = vld [vmem:[#allocation9 + $0x3cc] sm:$0xf]  ;;  %v11683_v15 = vld [vmem:[#allocation9 + $0x8b4] sm:$0xf0] }
 0x1e0   :  { %v4256_v9 = vpop.f32.mrf.mxu2  ;;  %5312 = vst [vmem:[#allocation4] sm:$0xee] %v5311_v21  ;;  %4614 = vmatpush.bf16.msrb.mxu2 %v10926_v18  ;;  %v10586_v24 = vor.u32 %v14562_v11, %v10583_v37  ;;  %4637 = vmatpush.bf16.msrb.mxu3 %v11086_v20  ;;  %v11686_v33 = vor.u32 %v14837_v19, %v11683_v15  ;;  %v11843_v11 = vld [vmem:[#allocation9 + $0x9f4] sm:$0xf0]  ;;  %v14887_v53 = vld [vmem:[#allocation9 + $0xa34] sm:$0xf] }
 0x1e1   :  { %4483 = vmatmul.bf16.gmra.mxu0 %v16298_v50  ;;  %4506 = vmatmul.bf16.gmra.mxu1 %v16300_v42  ;;  %v4279_v31 = vpop.f32.mrf.mxu3  ;;  %v4257_v47 = vadd.f32 %v4256_v9, %v4234_v39  ;;  %v10766_v9 = vor.u32 %v14607_v13, %v10763_v56  ;;  %v11063_v39 = vld [vmem:[#allocation9 + $0x3dc] sm:$0xf0]  ;;  %v4237_v32 = vadd.f32 %v16573_v10, %v4214_v25  ;;  %v11363_v25 = vld [vmem:[#allocation9 + $0x634] sm:$0xf0]  ;;  %v14877_v13 = vld [vmem:[#allocation9 + $0x9e4] sm:$0xf] }
 0x1e2   :  { %4568 = vmatpush.bf16.msrb.mxu0 %v10606_v7  ;;  %v10746_v10 = vor.u32 %v14602_v34, %v10743_v55  ;;  %v18747_v56 = vmax.f32 %v16563_v49, 0.0  ;;  %v11846_v20 = vor.u32 %v14877_v13, %v11843_v11 }
 0x1e3   :  { %v4280_v42 = vadd.f32 %v4279_v31, %v4257_v47  ;;  %4591 = vmatpush.bf16.msrb.mxu1 %v10766_v9  ;;  %v14757_v47 = vld [vmem:[#allocation9 + $0x624] sm:$0xf] }
 0x1e4   :  { %v5198_v0 = vld [vmem:[#allocation3 + $0x70] sm:$0x3]  ;;  %v5458_v38 = vld [vmem:[#allocation3 + $0x70] sm:$0xc0]  ;;  %v11366_v30 = vor.u32 %v14757_v47, %v11363_v25  ;;  %4615 = vmatpush.bf16.msrb.mxu2 %v10906_v48  ;;  %v11343_v47 = vld [vmem:[#allocation9 + $0x60c] sm:$0xf0] }
 0x1e5   :  { %v5478_v45 = vmax.f32 %v4280_v42, 0.0  ;;  %4529 = vmatmul.bf16.gmra.mxu2 %v16308_v46  ;;  %v5473_v41 = vmax.f32 %v5458_v38, 0.0  ;;  %v11066_v42 = vor.u32 %v14682_v57, %v11063_v39  ;;  %v14797_v39 = vld [vmem:[#allocation9 + $0x764] sm:$0xf]  ;;  %v14832_v48 = vld [vmem:[#allocation9 + $0x87c] sm:$0xf] }
 0x1e6   :  { %v4215_v50 = vpop.f32.mrf.mxu0  ;;  %v4238_v62 = vpop.f32.mrf.mxu1  ;;  %4552 = vmatmul.bf16.gmra.mxu3 %v16310_v14  ;;  %4569 = vmatpush.bf16.msrb.mxu0 %v10586_v24  ;;  %v16626_v24 = vld [vmem:[#allocation4 + $0xf0] sm:$0xcc] }
 0x1e7   :  { %v5255_v62 = vsel %vm16154_vm12, %v5247_v3, %v5254_v17  ;;  %v5213_v50 = vmax.f32 %v5198_v0, 0.0  ;;  %v16600_v31 = vpack.c.bf16 %v5478_v45, %v5477_v54  ;;  %v16606_v17 = vpack.c.bf16 %v5473_v41, %v5472_v51  ;;  %4638 = vmatpush.bf16.msrb.mxu3 %v11066_v42  ;;  %4592 = vmatpush.bf16.msrb.mxu1 %v10746_v10  ;;  %v11523_v45 = vld [vmem:[#allocation9 + $0x774] sm:$0xf0]  ;;  %v14752_v10 = vld [vmem:[#allocation9 + $0x5fc] sm:$0xf] }
 0x1e8   :  { %v4259_v18 = vpop.f32.mrf.mxu2  ;;  %5319 = vst [vmem:[#allocation4 + $0x3c] sm:$0xff] %v5255_v62  ;;  %4700 = vmatpush.bf16.msra.mxu2 %v11686_v33  ;;  %v16621_v62 = vld [vmem:[#allocation3 + $0x58] sm:$0x3f]  ;;  %v11526_v42 = vor.u32 %v14797_v39, %v11523_v45  ;;  %v11346_v13 = vor.u32 %v14752_v10, %v11343_v47  ;;  %v14827_v10 = vld [vmem:[#allocation9 + $0x854] sm:$0xf] }
 0x1e9   :  { %v16604_v3 = vpack.c.bf16 %v5213_v50, %v18747_v56  ;;  %v4282_v7 = vpop.f32.mrf.mxu3  ;;  %v5510_v54 = vshrl.u32 %v16600_v31, 16  ;;  %5601 = vst [vmem:[#allocation4 + $0xc8] sm:$0xff] %v16600_v31  ;;  %v4260_v21 = vadd.f32 %v4259_v18, %v4237_v32  ;;  %v5505_v0 = vshrl.u32 %v16606_v17, 16  ;;  %v5322_v32 = vld [vmem:[#allocation4 + $0x78] sm:$0x33] }
 0x1ea   :  { %v5513_v38 = vshll.u32 %v16600_v31, 16  ;;  %4654 = vmatpush.bf16.msra.mxu0 %v11366_v30  ;;  %v5274_v50 = vrot.slane %v16578_v16, 4  ;;  %v11663_v16 = vld [vmem:[#allocation9 + $0x88c] sm:$0xf0]  ;;  %v14872_v56 = vld [vmem:[#allocation9 + $0x9bc] sm:$0xf] }
 0x1eb   :  { %v18488_v9 = vshrl.u32 %v16604_v3, 16  ;;  %v16614_v49 = vrot.slane %v5510_v54, 7  ;;  %v4283_v51 = vadd.f32 %v4282_v7, %v4260_v21  ;;  %v5279_v55 = vshll.u32 %v16604_v3, 16  ;;  %4723 = vmatpush.bf16.msra.mxu3 %v11846_v20  ;;  %v11823_v18 = vld [vmem:[#allocation9 + $0x9cc] sm:$0xf0]  ;;  %4677 = vmatpush.bf16.msra.mxu1 %v11526_v42 }
 0x1ec   :  { %v11666_v25 = vor.u32 %v14832_v48, %v11663_v16  ;;  %v14792_v7 = vld [vmem:[#allocation9 + $0x73c] sm:$0xf]  ;;  %v18491_v30 = vshll.u32 %v16606_v17, 16  ;;  %v12494_v11 = vrot.slane %v5505_v0, 11  ;;  %v5482_v45 = vmax.f32 %v16621_v62, 0.0 }
 0x1ed   :  { %v5278_v34 = vrot.slane %v18488_v9, 7  ;;  %5135 = vst [vmem:[#allocation3 + $0x50] sm:$0xff] %v4283_v51  ;;  %v5515_v15 = vor.u32 %v5513_v38, %v16614_v49  ;;  %v11826_v51 = vor.u32 %v14872_v56, %v11823_v18  ;;  %v11643_v47 = vld [vmem:[#allocation9 + $0x864] sm:$0xf0]  ;;  %v14867_v18 = vld [vmem:[#allocation9 + $0x994] sm:$0xf] }
 0x1ee   :  { %v4295_v37 = vpop.f32.mrf.mxu0  ;;  %v4318_v57 = vpop.f32.mrf.mxu1  ;;  %4701 = vmatpush.bf16.msra.mxu2 %v11666_v25  ;;  %4655 = vmatpush.bf16.msra.mxu0 %v11346_v13  ;;  %v14747_v25 = vld [vmem:[#allocation9 + $0x5d4] sm:$0xf]  ;;  %v11323_v62 = vld [vmem:[#allocation9 + $0x5e4] sm:$0xf0] }
 0x1ef   :  { %v16624_v41 = vadd.f32 %v4318_v57, %v4295_v37  ;;  %v5281_v19 = vor.u32 %v5279_v55, %v5278_v34  ;;  %v11503_v37 = vld [vmem:[#allocation9 + $0x74c] sm:$0xf0]  ;;  %4724 = vmatpush.bf16.msra.mxu3 %v11826_v51  ;;  %v11483_v51 = vld [vmem:[#allocation9 + $0x724] sm:$0xf0] }
 0x1f0   :  { %v4261_v21 = vpop.f32.mrf.mxu2  ;;  %v11506_v57 = vor.u32 %v14792_v7, %v11503_v37  ;;  %v5577_v34 = vld [vmem:[#allocation4 + $0x78] sm:$0x88] }
 0x1f1   :  { %4488 = vmatmul.bf16.gmra.mxu0 %v16314_v58  ;;  %4511 = vmatmul.bf16.gmra.mxu1 %v16316_v59  ;;  %v5282_v33 = vsel %vm16154_vm12, %v5274_v50, %v5281_v19  ;;  %v4284_v20 = vpop.f32.mrf.mxu3  ;;  %v5516_v50 = vsel %vm16154_vm12, %v12494_v11, %v5515_v15  ;;  %v5434_v19 = vsel %vm15990_vm13, 0, %v16626_v24  ;;  %v5578_v15 = vsel %vm15946_vm15, %v18491_v30, %v5577_v34  ;;  %v11803_v11 = vld [vmem:[#allocation9 + $0x9a4] sm:$0xf0]  ;;  %v14787_v21 = vld [vmem:[#allocation9 + $0x714] sm:$0xf] }
 0x1f2   :  { %v5323_v39 = vsel %vm15725_vm6, %v5282_v33, %v5322_v32  ;;  %4678 = vmatpush.bf16.msra.mxu1 %v11506_v57  ;;  %v11646_v32 = vor.u32 %v14827_v10, %v11643_v47  ;;  %v11326_v24 = vor.u32 %v14747_v25, %v11323_v62  ;;  %5586 = vst [vmem:[#allocation4 + $0xb4] sm:$0xff] %v5516_v50  ;;  %v14822_v37 = vld [vmem:[#allocation9 + $0x82c] sm:$0xf]  ;;  %v11623_v57 = vld [vmem:[#allocation9 + $0x83c] sm:$0xf0] }
 0x1f3   :  { %5324 = vst [vmem:[#allocation4 + $0x78] sm:$0x33] %v5323_v39  ;;  %v11806_v20 = vor.u32 %v14867_v18, %v11803_v11  ;;  %v5169_v47 = vld [vmem:[#allocation4 + $0x88] sm:$0x33]  ;;  %v12223_v30 = vld [vmem:[#allocation9 + $0xcec] sm:$0xf0] }
 0x1f4   :  { %v5468_v13 = vld [vmem:[#allocation3 + $0x50] sm:$0x3f]  ;;  %4702 = vmatpush.bf16.msra.mxu2 %v11646_v32  ;;  %4656 = vmatpush.bf16.msra.mxu0 %v11326_v24  ;;  %5579 = vst [vmem:[#allocation4 + $0x78] sm:$0x88] %v5578_v15  ;;  %v5172_v24 = vld [vmem:[#allocation4 + $0x90] sm:$0x33] }
 0x1f5   :  { %v5483_v33 = vmax.f32 %v5468_v13, 0.0  ;;  %4534 = vmatmul.bf16.gmra.mxu2 %v16320_v1  ;;  %4725 = vmatpush.bf16.msra.mxu3 %v11806_v20  ;;  %5435 = vst [vmem:[#allocation4 + $0xf0] sm:$0xcc] %v5434_v19  ;;  %v5170_v13 = vsel %vm15866_vm2, 0, %v5169_v47  ;;  %v11303_v11 = vld [vmem:[#allocation9 + $0x5bc] sm:$0xf0] }
 0x1f6   :  { %v4297_v42 = vpop.f32.mrf.mxu0  ;;  %v4320_v16 = vpop.f32.mrf.mxu1  ;;  %4557 = vmatmul.bf16.gmra.mxu3 %v16322_v26  ;;  %5171 = vst [vmem:[#allocation4 + $0x88] sm:$0x33] %v5170_v13  ;;  %v11783_v20 = vld [vmem:[#allocation9 + $0x97c] sm:$0xf0]  ;;  %v14737_v47 = vld [vmem:[#allocation9 + $0x584] sm:$0xf] }
 0x1f7   :  { %v16648_v56 = vadd.f32 %v4320_v16, %v4297_v42  ;;  %v16656_v39 = vpack.c.bf16 %v5483_v33, %v5482_v45  ;;  %v11486_v42 = vor.u32 %v14787_v21, %v11483_v51  ;;  %v11626_v16 = vor.u32 %v14822_v37, %v11623_v57  ;;  %v14742_v33 = vld [vmem:[#allocation9 + $0x5ac] sm:$0xf] }
 0x1f8   :  { %v4341_v34 = vpop.f32.mrf.mxu2  ;;  %v5541_v45 = vrot.slane %v16614_v49, 4  ;;  %v14862_v21 = vld [vmem:[#allocation9 + $0x96c] sm:$0xf]  ;;  %v11306_v51 = vor.u32 %v14742_v33, %v11303_v11  ;;  %v11763_v33 = vld [vmem:[#allocation9 + $0x954] sm:$0xf0] }
 0x1f9   :  { %v4364_v10 = vpop.f32.mrf.mxu3  ;;  %v18489_v25 = vshrl.u32 %v16656_v39, 16  ;;  %v4342_v50 = vadd.f32 %v4341_v34, %v16624_v41  ;;  %4679 = vmatpush.bf16.msra.mxu1 %v11486_v42  ;;  %4703 = vmatpush.bf16.msra.mxu2 %v11626_v16  ;;  %v18490_v62 = vshll.u32 %v16656_v39, 16  ;;  %v11786_v37 = vor.u32 %v14862_v21, %v11783_v20  ;;  %v14782_v57 = vld [vmem:[#allocation9 + $0x6ec] sm:$0xf]  ;;  %v11463_v42 = vld [vmem:[#allocation9 + $0x6fc] sm:$0xf0] }
 0x1fa   :  { %v14817_v16 = vld [vmem:[#allocation9 + $0x804] sm:$0xf]  ;;  %v11466_v34 = vor.u32 %v14782_v57, %v11463_v42  ;;  %4657 = vmatpush.bf16.msra.mxu0 %v11306_v51  ;;  %v5173_v21 = vsel %vm15866_vm2, 0, %v5172_v24 }
 0x1fb   :  { %v5545_v32 = vrot.slane %v18489_v25, 7  ;;  %v16666_v18 = vadd.f32 %v4364_v10, %v4342_v50  ;;  %v11603_v10 = vld [vmem:[#allocation9 + $0x814] sm:$0xf0]  ;;  %4726 = vmatpush.bf16.msra.mxu3 %v11786_v37  ;;  %v14777_v42 = vld [vmem:[#allocation9 + $0x6c4] sm:$0xf] }
 0x1fc   :  { %v11283_v50 = vld [vmem:[#allocation9 + $0x594] sm:$0xf0]  ;;  %v5589_v11 = vld [vmem:[#allocation4 + $0xf0] sm:$0xff]  ;;  %v11583_v37 = vld [vmem:[#allocation9 + $0x7ec] sm:$0xf0] }
 0x1fd   :  { %v5548_v49 = vor.u32 %v18490_v62, %v5545_v32  ;;  %v11286_v32 = vor.u32 %v14737_v47, %v11283_v50  ;;  %4680 = vmatpush.bf16.msra.mxu1 %v11466_v34  ;;  %v11443_v25 = vld [vmem:[#allocation9 + $0x6d4] sm:$0xf0]  ;;  %v14812_v62 = vld [vmem:[#allocation9 + $0x7dc] sm:$0xf]  ;;  %v18751_v47 = vshrl.u32 %v16553_v4, 16  ;;  %v18752_v34 = vshll.u32 %v16553_v4, 16 }
 0x1fe   :  { %v4300_v19 = vpop.f32.mrf.mxu0  ;;  %v4323_v15 = vpop.f32.mrf.mxu1  ;;  %v11446_v51 = vor.u32 %v14777_v42, %v11443_v25  ;;  %v11586_v50 = vor.u32 %v14812_v62, %v11583_v37  ;;  %5174 = vst [vmem:[#allocation4 + $0x90] sm:$0x33] %v5173_v21  ;;  %v5439_v42 = vld [vmem:[#allocation4 + $0x100] sm:$0xcc]  ;;  %v14852_v21 = vld [vmem:[#allocation9 + $0x91c] sm:$0xf] }
 0x1ff   :  { %v16668_v41 = vadd.f32 %v4323_v15, %v4300_v19  ;;  %v5549_v13 = vsel %vm16154_vm12, %v5541_v45, %v5548_v49  ;;  %v11606_v19 = vor.u32 %v14817_v16, %v11603_v10  ;;  %v14857_v15 = vld [vmem:[#allocation9 + $0x944] sm:$0xf]  ;;  %v5415_v16 = vld [vmem:[#allocation4 + $0x88] sm:$0xcc]  ;;  %v16683_v24 = vrot.slane %v18751_v47, 4  ;;  %4658 = vmatpush.bf16.msra.mxu0 %v11286_v32 }
 0x200   :  { %v4343_v20 = vpop.f32.mrf.mxu2  ;;  %v11766_v57 = vor.u32 %v14857_v15, %v11763_v33  ;;  %v5590_v45 = vsel %vm16024_vm11, %v5549_v13, %v5589_v11  ;;  %v5418_v10 = vld [vmem:[#allocation4 + $0x90] sm:$0xcc]  ;;  %v16687_v15 = vrot.slane %v18752_v34, 5  ;;  %v18753_v33 = vshll.u32 %v16555_v23, 16  ;;  %5337 = vst [vmem:[#allocation4 + $0x8c] sm:$0x11] %v16604_v3 }
 0x201   :  { %4570 = vmatmul.bf16.vlgmr.msrb.gmra.mxu0 %v15889_v28  ;;  %4593 = vmatmul.bf16.vlgmr.msrb.gmra.mxu1 %v15891_v29  ;;  %v4366_v9 = vpop.f32.mrf.mxu3  ;;  %v4344_v49 = vadd.f32 %v4343_v20, %v16648_v56  ;;  %5591 = vst [vmem:[#allocation4 + $0xf0] sm:$0xff] %v5590_v45  ;;  %v18754_v56 = vshrl.u32 %v16555_v23, 16  ;;  %v5416_v4 = vsel %vm15895_vm0, 0, %v5415_v16  ;;  %v5419_v23 = vsel %vm15895_vm0, 0, %v5418_v10  ;;  %v16706_v45 = vld [vmem:[#allocation4 + $0x28] sm:$0x33] }
 0x202   :  { %4704 = vmatpush.bf16.msra.mxu2 %v11606_v19  ;;  %v16691_v13 = vrot.slane %v18753_v33, 5  ;;  %4727 = vmatpush.bf16.msra.mxu3 %v11766_v57  ;;  %v11263_v32 = vld [vmem:[#allocation9 + $0x56c] sm:$0xf0]  ;;  %5417 = vst [vmem:[#allocation4 + $0x88] sm:$0xcc] %v5416_v4  ;;  %v5440_v10 = vsel %vm15990_vm13, 0, %v5439_v42  ;;  %v5342_v33 = vor.u32 %v16687_v15, %v16683_v24 }
 0x203   :  { %v16695_v25 = vrot.slane %v18754_v56, 4  ;;  %v16697_v19 = vadd.f32 %v4366_v9, %v4344_v49  ;;  %4681 = vmatpush.bf16.msra.mxu1 %v11446_v51  ;;  %v14732_v9 = vld [vmem:[#allocation9 + $0x55c] sm:$0xf]  ;;  %v11743_v49 = vld [vmem:[#allocation9 + $0x92c] sm:$0xf0]  ;;  %v5155_v4 = vsel %vm15725_vm6, 0, %v16706_v45 }
 0x204   :  { %v11266_v57 = vor.u32 %v14732_v9, %v11263_v32  ;;  %v14772_v51 = vld [vmem:[#allocation9 + $0x69c] sm:$0xf]  ;;  %v11423_v37 = vld [vmem:[#allocation9 + $0x6ac] sm:$0xf0]  ;;  %v11746_v47 = vor.u32 %v14852_v21, %v11743_v49  ;;  %5420 = vst [vmem:[#allocation4 + $0x90] sm:$0xcc] %v5419_v23 }
 0x205   :  { %4616 = vmatmul.bf16.vlgmr.msrb.gmra.mxu2 %v15907_v40  ;;  %v11426_v16 = vor.u32 %v14772_v51, %v11423_v37  ;;  %v5442_v34 = vld [vmem:[#allocation4 + $0x108] sm:$0xcc]  ;;  %5598 = vst [vmem:[#allocation4 + $0x8c] sm:$0x88] %v16606_v17  ;;  %v5361_v24 = vrot.slane %v5279_v55, 5  ;;  %v16725_v15 = vrot.slane %v5513_v38, 5 }
 0x206   :  { %v4302_v11 = vpop.f32.mrf.mxu0  ;;  %v4325_v20 = vpop.f32.mrf.mxu1  ;;  %4639 = vmatmul.bf16.vlgmr.msrb.gmra.mxu3 %v15909_v43  ;;  %4705 = vmatpush.bf16.msra.mxu2 %v11586_v50  ;;  %v5359_v50 = vor.u32 %v16695_v25, %v16691_v13  ;;  %v5625_v25 = vrot.slane %v5510_v54, 4  ;;  %5441 = vst [vmem:[#allocation4 + $0x100] sm:$0xcc] %v5440_v10  ;;  %v14807_v32 = vld [vmem:[#allocation9 + $0x7b4] sm:$0xf] }
 0x207   :  { %v16699_v62 = vadd.f32 %v4325_v20, %v4302_v11  ;;  %4659 = vmatpush.bf16.msra.mxu0 %v11266_v57  ;;  %4728 = vmatpush.bf16.msra.mxu3 %v11746_v47  ;;  %v11563_v45 = vld [vmem:[#allocation9 + $0x7c4] sm:$0xf0]  ;;  %v14727_v21 = vld [vmem:[#allocation9 + $0x534] sm:$0xf]  ;;  %v14802_v10 = vld [vmem:[#allocation9 + $0x78c] sm:$0xf] }
 0x208   :  { %v4346_v56 = vpop.f32.mrf.mxu2  ;;  %4682 = vmatpush.bf16.msra.mxu1 %v11426_v16  ;;  %v5178_v57 = vld [vmem:[#allocation4 + $0xa0] sm:$0x33]  ;;  %v11566_v49 = vor.u32 %v14807_v32, %v11563_v45  ;;  %v11243_v38 = vld [vmem:[#allocation9 + $0x544] sm:$0xf0]  ;;  %5156 = vst [vmem:[#allocation4 + $0x28] sm:$0x33] %v5155_v4 }
 0x209   :  { %v4369_v11 = vpop.f32.mrf.mxu3  ;;  %v4347_v20 = vadd.f32 %v4346_v56, %v16668_v41  ;;  %v5443_v41 = vsel %vm15990_vm13, 0, %v5442_v34  ;;  %v14847_v51 = vld [vmem:[#allocation9 + $0x8f4] sm:$0xf]  ;;  %v11723_v37 = vld [vmem:[#allocation9 + $0x904] sm:$0xf0]  ;;  %v11246_v31 = vor.u32 %v14727_v21, %v11243_v38  ;;  %v16735_v34 = vrot.slane %v5342_v33, 4 }
 0x20a   :  { %v11726_v54 = vor.u32 %v14847_v51, %v11723_v37  ;;  %v14767_v47 = vld [vmem:[#allocation9 + $0x674] sm:$0xf]  ;;  %v11403_v16 = vld [vmem:[#allocation9 + $0x684] sm:$0xf0]  ;;  %v5360_v56 = vrot.slane %v5359_v50, 4  ;;  %4706 = vmatpush.bf16.msra.mxu2 %v11566_v49  ;;  %v5626_v33 = vor.u32 %v5625_v25, %v16725_v15  ;;  %v18756_v50 = vshll.u32 %v16656_v39, 16 }
 0x20b   :  { %v16731_v23 = vadd.f32 %v4369_v11, %v4347_v20  ;;  %v11406_v11 = vor.u32 %v14767_v47, %v11403_v16  ;;  %v11543_v20 = vld [vmem:[#allocation9 + $0x79c] sm:$0xf0]  ;;  %5444 = vst [vmem:[#allocation4 + $0x108] sm:$0xcc] %v5443_v41  ;;  %4660 = vmatpush.bf16.msra.mxu0 %v11246_v31  ;;  %v5179_v41 = vsel %vm15866_vm2, 0, %v5178_v57 }
 0x20c   :  { %v11546_v45 = vor.u32 %v14802_v10, %v11543_v20  ;;  %5604 = vst [vmem:[#allocation4 + $0x104] sm:$0x77] %v16656_v39  ;;  %v16747_v21 = vrot.slane %v18756_v50, 5  ;;  %4729 = vmatpush.bf16.msra.mxu3 %v11726_v54  ;;  %v5424_v49 = vld [vmem:[#allocation4 + $0xa0] sm:$0xcc] }
 0x20d   :  { %4683 = vmatpush.bf16.msra.mxu1 %v11406_v11  ;;  %v14722_v31 = vld [vmem:[#allocation9 + $0x50c] sm:$0xf]  ;;  %v11223_v25 = vld [vmem:[#allocation9 + $0x51c] sm:$0xf0]  ;;  %5180 = vst [vmem:[#allocation4 + $0xa0] sm:$0x33] %v5179_v41 }
 0x20e   :  { %v4305_v42 = vpop.f32.mrf.mxu0  ;;  %v4328_v9 = vpop.f32.mrf.mxu1  ;;  %v14842_v47 = vld [vmem:[#allocation9 + $0x8cc] sm:$0xf]  ;;  %v11226_v16 = vor.u32 %v14722_v31, %v11223_v25  ;;  %v11703_v10 = vld [vmem:[#allocation9 + $0x8dc] sm:$0xf0]  ;;  %4707 = vmatpush.bf16.msra.mxu2 %v11546_v45  ;;  %v14997_v45 = vld [vmem:[#allocation9 + $0xda4] sm:$0xf] }
 0x20f   :  { %v16733_v55 = vadd.f32 %v4328_v9, %v4305_v42  ;;  %v5607_v42 = vrot.slane %v5505_v0, 4  ;;  %v18755_v9 = vshll.u32 %v16606_v17, 16  ;;  %v18757_v0 = vld [vmem:[#allocation24_spill] sm:$0xff]  ;;  %v14762_v20 = vld [vmem:[#allocation9 + $0x64c] sm:$0xf]  ;;  %v11706_v11 = vor.u32 %v14842_v47, %v11703_v10 }
 0x210   :  { %v4348_v38 = vpop.f32.mrf.mxu2  ;;  %vm18758_vm9 = vnez %v18757_v0  ;;  %4661 = vmatpush.bf16.msra.mxu0 %v11226_v16  ;;  %v15037_v41 = vld [vmem:[#allocation9 + $0xee4] sm:$0xf]  ;;  %v18759_v31 = vshrl.u32 %v16656_v39, 16  ;;  %v5388_v47 = vld [vmem:[#allocation4 + $0x28] sm:$0xff] }
 0x211   :  { %4575 = vmatmul.bf16.gmra.mxu0 %v16010_v27  ;;  %4598 = vmatmul.bf16.gmra.mxu1 %v16012_v61  ;;  %v5608_v32 = vrot.slane %v18755_v9, 5  ;;  %v4371_v51 = vpop.f32.mrf.mxu3  ;;  %v5362_v17 = vsel %vm18758_vm9, %v5360_v56, %v5361_v24  ;;  %v4349_v37 = vadd.f32 %v4348_v38, %v16699_v62  ;;  %v11383_v9 = vld [vmem:[#allocation9 + $0x65c] sm:$0xf0]  ;;  %v5627_v56 = vrot.slane %v5626_v33, 4  ;;  %v5448_v38 = vld [vmem:[#allocation4 + $0x118] sm:$0xcc] }
 0x212   :  { %v11386_v24 = vor.u32 %v14762_v20, %v11383_v9  ;;  %5397 = vst [vmem:[#allocation4 + $0x64] sm:$0xff] %v5362_v17  ;;  %v5425_v62 = vsel %vm15895_vm0, 0, %v5424_v49  ;;  %v14917_v17 = vld [vmem:[#allocation9 + $0xb24] sm:$0xf]  ;;  %4730 = vmatpush.bf16.msra.mxu3 %v11706_v11  ;;  %v12003_v33 = vld [vmem:[#allocation9 + $0xb34] sm:$0xf0] }
 0x213   :  { %v16754_v50 = vadd.f32 %v4371_v51, %v4349_v37  ;;  %v5609_v57 = vor.u32 %v5608_v32, %v5607_v42  ;;  %v5345_v51 = vsel %vm18758_vm9, %v16735_v34, %v16691_v13  ;;  %v12323_v37 = vld [vmem:[#allocation9 + $0xdb4] sm:$0xf0]  ;;  %v5629_v42 = vsel %vm18758_vm9, %v5627_v56, %v16747_v21  ;;  %5426 = vst [vmem:[#allocation4 + $0xa0] sm:$0xcc] %v5425_v62  ;;  %v14957_v62 = vld [vmem:[#allocation9 + $0xc64] sm:$0xf] }
 0x214   :  { %4684 = vmatpush.bf16.msra.mxu1 %v11386_v24  ;;  %v12326_v32 = vor.u32 %v14997_v45, %v12323_v37  ;;  %v12483_v49 = vld [vmem:[#allocation9 + $0xef4] sm:$0xf0]  ;;  %v5640_v13 = vrot.slane %v18759_v31, 4  ;;  %v12006_v34 = vor.u32 %v14917_v17, %v12003_v33  ;;  %v5449_v16 = vsel %vm15990_vm13, 0, %v5448_v38  ;;  %5667 = vst [vmem:[#allocation4 + $0xdc] sm:$0xff] %v5629_v42  ;;  %v18762_v31 = vld [vmem:[#allocation34_spill] sm:$0xff] }
 0x215   :  { %4621 = vmatmul.bf16.gmra.mxu2 %v18726_v63  ;;  %v12486_v25 = vor.u32 %v15037_v41, %v12483_v49  ;;  %v5610_v10 = vrot.slane %v5609_v57, 4  ;;  %5450 = vst [vmem:[#allocation4 + $0x118] sm:$0xcc] %v5449_v16  ;;  %v12163_v38 = vld [vmem:[#allocation9 + $0xc74] sm:$0xf0] }
 0x216   :  { %v4307_v54 = vpop.f32.mrf.mxu0  ;;  %v4330_v4 = vpop.f32.mrf.mxu1  ;;  %4644 = vmatmul.bf16.gmra.mxu3 %v18727_v12  ;;  %4792 = vmatpush.bf16.msrb.mxu2 %v12326_v32  ;;  %v5641_v39 = vor.u32 %v5640_v13, %v16747_v21  ;;  %v14992_v45 = vld [vmem:[#allocation9 + $0xd7c] sm:$0xf]  ;;  %v12166_v37 = vor.u32 %v14957_v62, %v12163_v38  ;;  %v11983_v42 = vld [vmem:[#allocation9 + $0xb0c] sm:$0xf0] }
 0x217   :  { %v18760_v54 = vld [vmem:[#allocation47_spill] sm:$0xff]  ;;  %4746 = vmatpush.bf16.msrb.mxu0 %v12006_v34  ;;  %4815 = vmatpush.bf16.msrb.mxu3 %v12486_v25  ;;  %v12463_v41 = vld [vmem:[#allocation9 + $0xecc] sm:$0xf0] }
 0x218   :  { %v4351_v20 = vpop.f32.mrf.mxu2  ;;  %vm18761_vm1 = vnez %v18760_v54  ;;  %v14912_v17 = vld [vmem:[#allocation9 + $0xafc] sm:$0xf]  ;;  %v12143_v34 = vld [vmem:[#allocation9 + $0xc4c] sm:$0xf0]  ;;  %v5400_v25 = vld [vmem:[#allocation4 + $0xa0] sm:$0x11]  ;;  %4769 = vmatpush.bf16.msrb.mxu1 %v12166_v37 }
 0x219   :  { %v4374_v9 = vpop.f32.mrf.mxu3  ;;  %v5389_v4 = vsel %vm18761_vm1, %v5345_v51, %v5388_v47  ;;  %v4352_v11 = vadd.f32 %v4351_v20, %v16733_v55  ;;  %v12303_v51 = vld [vmem:[#allocation9 + $0xd8c] sm:$0xf0]  ;;  %v5612_v55 = vsel %vm18758_vm9, %v5610_v10, %v16725_v15  ;;  %v11986_v33 = vor.u32 %v14912_v17, %v11983_v42  ;;  %v15032_v21 = vld [vmem:[#allocation9 + $0xebc] sm:$0xf]  ;;  %v14987_v37 = vld [vmem:[#allocation9 + $0xd54] sm:$0xf] }
 0x21a   :  { %5390 = vst [vmem:[#allocation4 + $0x28] sm:$0xff] %v5389_v4  ;;  %v12306_v32 = vor.u32 %v14992_v45, %v12303_v51  ;;  %v14952_v49 = vld [vmem:[#allocation9 + $0xc3c] sm:$0xf]  ;;  %v12466_v13 = vor.u32 %v15032_v21, %v12463_v41  ;;  %v5658_v47 = vld [vmem:[#allocation4 + $0xa0] sm:$0xcc]  ;;  %v5642_v16 = vrot.slane %v5641_v39, 4 }
 0x21b   :  { %v16775_v24 = vadd.f32 %v4374_v9, %v4352_v11  ;;  %v12146_v20 = vor.u32 %v14952_v49, %v12143_v34  ;;  %v18763_v9 = vshrl.u32 %v16604_v3, 16  ;;  %v5659_v4 = vsel %vm15990_vm13, %v5612_v55, %v5658_v47  ;;  %4747 = vmatpush.bf16.msrb.mxu0 %v11986_v33  ;;  %v12283_v3 = vld [vmem:[#allocation9 + $0xd64] sm:$0xf0]  ;;  %v14907_v51 = vld [vmem:[#allocation9 + $0xad4] sm:$0xf]  ;;  %v18766_v33 = vld [vmem:[#allocation35_spill] sm:$0xff] }
 0x21c   :  { %4793 = vmatpush.bf16.msrb.mxu2 %v12306_v32  ;;  %4816 = vmatpush.bf16.msrb.mxu3 %v12466_v13  ;;  %5660 = vst [vmem:[#allocation4 + $0xa0] sm:$0xcc] %v5659_v4  ;;  %v5670_v38 = vld [vmem:[#allocation4 + $0x118] sm:$0x77]  ;;  %v12286_v32 = vor.u32 %v14987_v37, %v12283_v3  ;;  %v11963_v55 = vld [vmem:[#allocation9 + $0xae4] sm:$0xf0] }
 0x21d   :  { %v5401_v10 = vsel %vm16218_vm10, %v18763_v9, %v5400_v25  ;;  %4770 = vmatpush.bf16.msrb.mxu1 %v12146_v20  ;;  %v5671_v42 = vsel %vm16294_vm5, %v5642_v16, %v5670_v38  ;;  %v15027_v21 = vld [vmem:[#allocation9 + $0xe94] sm:$0xf]  ;;  %v12443_v41 = vld [vmem:[#allocation9 + $0xea4] sm:$0xf0]  ;;  %v18767_v49 = vld [vmem:[#allocation36_spill] sm:$0xff]  ;;  %v11966_v13 = vor.u32 %v14907_v51, %v11963_v55 }
 0x21e   :  { %v16777_v56 = vpop.f32.mrf.mxu0  ;;  %v16779_v57 = vpop.f32.mrf.mxu1  ;;  %5402 = vst [vmem:[#allocation4 + $0xa0] sm:$0x11] %v5401_v10  ;;  %v12446_v34 = vor.u32 %v15027_v21, %v12443_v41  ;;  %v14947_v25 = vld [vmem:[#allocation9 + $0xc14] sm:$0xf]  ;;  %v12123_v47 = vld [vmem:[#allocation9 + $0xc24] sm:$0xf0] }
 0x21f   :  { %v14982_v9 = vld [vmem:[#allocation9 + $0xd2c] sm:$0xf]  ;;  %v12126_v20 = vor.u32 %v14947_v25, %v12123_v47  ;;  %v12263_v10 = vld [vmem:[#allocation9 + $0xd3c] sm:$0xf0]  ;;  %5672 = vst [vmem:[#allocation4 + $0x118] sm:$0x77] %v5671_v42  ;;  %4748 = vmatpush.bf16.msrb.mxu0 %v11966_v13 }
 0x220   :  { %v4353_v11 = vpop.f32.mrf.mxu2  ;;  %4794 = vmatpush.bf16.msrb.mxu2 %v12286_v32  ;;  %4817 = vmatpush.bf16.msrb.mxu3 %v12446_v34  ;;  %v12266_v16 = vor.u32 %v14982_v9, %v12263_v10  ;;  %v14902_v37 = vld [vmem:[#allocation9 + $0xaac] sm:$0xf]  ;;  %v11943_v3 = vld [vmem:[#allocation9 + $0xabc] sm:$0xf0]  ;;  %v14977_v34 = vld [vmem:[#allocation9 + $0xd04] sm:$0xf] }
 0x221   :  { %4580 = vmatmul.bf16.gmra.mxu0 %v18728_v5  ;;  %4603 = vmatmul.bf16.gmra.mxu1 %v18762_v31  ;;  %v4376_v62 = vpop.f32.mrf.mxu3  ;;  %v15022_v51 = vld [vmem:[#allocation9 + $0xe6c] sm:$0xf]  ;;  %v11946_v32 = vor.u32 %v14902_v37, %v11943_v3  ;;  %v12423_v55 = vld [vmem:[#allocation9 + $0xe7c] sm:$0xf0]  ;;  %v12243_v25 = vld [vmem:[#allocation9 + $0xd14] sm:$0xf0] }
 0x222   :  { %4771 = vmatpush.bf16.msrb.mxu1 %v12126_v20  ;;  %v14942_v21 = vld [vmem:[#allocation9 + $0xbec] sm:$0xf]  ;;  %v12103_v42 = vld [vmem:[#allocation9 + $0xbfc] sm:$0xf0]  ;;  %v12426_v41 = vor.u32 %v15022_v51, %v12423_v55  ;;  %v14897_v47 = vld [vmem:[#allocation9 + $0xa84] sm:$0xf]  ;;  %v12246_v10 = vor.u32 %v14977_v34, %v12243_v25 }
 0x223   :  { %v12106_v13 = vor.u32 %v14942_v21, %v12103_v42  ;;  %v18768_v9 = vld [vmem:[#allocation37_spill] sm:$0xff]  ;;  %v18769_v20 = vld [vmem:[#allocation38_spill] sm:$0xff]  ;;  %v15017_v17 = vld [vmem:[#allocation9 + $0xe44] sm:$0xf]  ;;  %4749 = vmatpush.bf16.msrb.mxu0 %v11946_v32 }
 0x224   :  { %4795 = vmatpush.bf16.msrb.mxu2 %v12266_v16  ;;  %v11923_v16 = vld [vmem:[#allocation9 + $0xa94] sm:$0xf0]  ;;  %4818 = vmatpush.bf16.msrb.mxu3 %v12426_v41  ;;  %v14937_v51 = vld [vmem:[#allocation9 + $0xbc4] sm:$0xf]  ;;  %v14972_v21 = vld [vmem:[#allocation9 + $0xcdc] sm:$0xf] }
 0x225   :  { %4626 = vmatmul.bf16.gmra.mxu2 %v18766_v33  ;;  %v12403_v15 = vld [vmem:[#allocation9 + $0xe54] sm:$0xf0]  ;;  %v11926_v54 = vor.u32 %v14897_v47, %v11923_v16  ;;  %v12226_v7 = vor.u32 %v14972_v21, %v12223_v30  ;;  %v14892_v32 = vld [vmem:[#allocation9 + $0xa5c] sm:$0xf]  ;;  %v11903_v41 = vld [vmem:[#allocation9 + $0xa6c] sm:$0xf0] }
 0x226   :  { %v16792_v45 = vpop.f32.mrf.mxu0  ;;  %v16794_v39 = vpop.f32.mrf.mxu1  ;;  %4649 = vmatmul.bf16.gmra.mxu3 %v18767_v49  ;;  %v12406_v37 = vor.u32 %v15017_v17, %v12403_v15  ;;  %4772 = vmatpush.bf16.msrb.mxu1 %v12106_v13  ;;  %v12083_v55 = vld [vmem:[#allocation9 + $0xbd4] sm:$0xf0]  ;;  %v18771_v17 = vld [vmem:[#allocation40_spill] sm:$0xff]  ;;  %v15012_v13 = vld [vmem:[#allocation9 + $0xe1c] sm:$0xf]  ;;  %v11906_v47 = vor.u32 %v14892_v32, %v11903_v41 }
 0x227   :  { %v12086_v42 = vor.u32 %v14937_v51, %v12083_v55  ;;  %4750 = vmatpush.bf16.msrb.mxu0 %v11926_v54  ;;  %v18770_v15 = vld [vmem:[#allocation39_spill] sm:$0xff]  ;;  %v12063_v51 = vld [vmem:[#allocation9 + $0xbac] sm:$0xf0]  ;;  %v18772_v32 = vld [vmem:[#allocation41_spill] sm:$0xff] }
 0x228   :  { %v16800_v4 = vpop.f32.mrf.mxu2  ;;  %4796 = vmatpush.bf16.msrb.mxu2 %v12246_v10  ;;  %4819 = vmatpush.bf16.msrb.mxu3 %v12406_v37  ;;  %v12383_v10 = vld [vmem:[#allocation9 + $0xe2c] sm:$0xf0]  ;;  %v14932_v16 = vld [vmem:[#allocation9 + $0xb9c] sm:$0xf]  ;;  %v14967_v37 = vld [vmem:[#allocation9 + $0xcb4] sm:$0xf] }
 0x229   :  { %v16802_v11 = vpop.f32.mrf.mxu3  ;;  %v12386_v30 = vor.u32 %v15012_v13, %v12383_v10  ;;  %v12066_v55 = vor.u32 %v14932_v16, %v12063_v51  ;;  %v18773_v41 = vld [vmem:[#allocation42_spill] sm:$0xff]  ;;  %v11883_v10 = vld [vmem:[#allocation9 + $0xa44] sm:$0xf0]  ;;  %v12023_v49 = vld [vmem:[#allocation9 + $0xb5c] sm:$0xf0] }
 0x22a   :  { %4773 = vmatpush.bf16.msrb.mxu1 %v12086_v42  ;;  %v12203_v42 = vld [vmem:[#allocation9 + $0xcc4] sm:$0xf0]  ;;  %v15007_v16 = vld [vmem:[#allocation9 + $0xdf4] sm:$0xf]  ;;  %v11886_v44 = vor.u32 %v14887_v53, %v11883_v10 }
 0x22b   :  { %4751 = vmatpush.bf16.msrb.mxu0 %v11906_v47  ;;  %v12206_v13 = vor.u32 %v14967_v37, %v12203_v42  ;;  %v12363_v51 = vld [vmem:[#allocation9 + $0xe04] sm:$0xf0]  ;;  %v14927_v47 = vld [vmem:[#allocation9 + $0xb74] sm:$0xf]  ;;  %v11863_v42 = vld [vmem:[#allocation9 + $0xa1c] sm:$0xf0] }
 0x22c   :  { %4797 = vmatpush.bf16.msrb.mxu2 %v12226_v7  ;;  %4820 = vmatpush.bf16.msrb.mxu3 %v12386_v30  ;;  %v12366_v2 = vor.u32 %v15007_v16, %v12363_v51  ;;  %v12043_v30 = vld [vmem:[#allocation9 + $0xb84] sm:$0xf0] }
 0x22d   :  { %v12046_v60 = vor.u32 %v14927_v47, %v12043_v30  ;;  %v14680_v47 = vld [vmem:[#allocation9 + $0x3b8] sm:$0xf0]  ;;  %v10729_v30 = vld [vmem:[#allocation9 + $0x128] sm:$0xf] }
 0x22e   :  { %v16804_v62 = vpop.f32.mrf.mxu0  ;;  %v16806_v38 = vpop.f32.mrf.mxu1  ;;  %4774 = vmatpush.bf16.msrb.mxu1 %v12066_v55 }
 0x22f   :  { %4752 = vmatpush.bf16.msrb.mxu0 %v11886_v44  ;;  %v18775_v44 = vld [vmem:[#allocation44_spill] sm:$0xff] }
 0x230   :  { %v16810_v3 = vpop.f32.mrf.mxu2  ;;  %4798 = vmatpush.bf16.msrb.mxu2 %v12206_v13  ;;  %4821 = vmatpush.bf16.msrb.mxu3 %v12366_v2  ;;  %v18774_v13 = vld [vmem:[#allocation43_spill] sm:$0xff]  ;;  %v11049_v2 = vld [vmem:[#allocation9 + $0x3a8] sm:$0xf] }
 0x231   :  { %4662 = vmatmul.bf16.vlgmr.msra.gmra.mxu0 %v18768_v9  ;;  %4685 = vmatmul.bf16.vlgmr.msra.gmra.mxu1 %v18769_v20  ;;  %v16812_v0 = vpop.f32.mrf.mxu3  ;;  %v12343_v20 = vld [vmem:[#allocation9 + $0xddc] sm:$0xf0]  ;;  %v14922_v9 = vld [vmem:[#allocation9 + $0xb4c] sm:$0xf] }
 0x232   :  { %4775 = vmatpush.bf16.msrb.mxu1 %v12046_v60  ;;  %v12026_v33 = vor.u32 %v14922_v9, %v12023_v49  ;;  %v11050_v60 = vor.u32 %v14680_v47, %v11049_v2 }
 0x235   :  { %4708 = vmatmul.bf16.vlgmr.msra.gmra.mxu2 %v18770_v15  ;;  %v14882_v15 = vld [vmem:[#allocation9 + $0xa0c] sm:$0xf] }
 0x236   :  { %v16814_v34 = vpop.f32.mrf.mxu0  ;;  %v16816_v25 = vpop.f32.mrf.mxu1  ;;  %4731 = vmatmul.bf16.vlgmr.msra.gmra.mxu3 %v18771_v17  ;;  %v14962_v17 = vld [vmem:[#allocation9 + $0xc8c] sm:$0xf]  ;;  %v11866_v16 = vor.u32 %v14882_v15, %v11863_v42  ;;  %4776 = vmatpush.bf16.msrb.mxu1 %v12026_v33 }
 0x238   :  { %v16820_v21 = vpop.f32.mrf.mxu2  ;;  %4753 = vmatpush.bf16.msrb.mxu0 %v11866_v16 }
 0x239   :  { %v16822_v48 = vpop.f32.mrf.mxu3 }
 0x23e   :  { %v16824_v7 = vpop.f32.mrf.mxu0  ;;  %v16826_v54 = vpop.f32.mrf.mxu1 }
 0x240   :  { %v16830_v55 = vpop.f32.mrf.mxu2 }
 0x241   :  { %4667 = vmatmul.bf16.gmra.mxu0 %v18772_v32  ;;  %4690 = vmatmul.bf16.gmra.mxu1 %v18773_v41  ;;  %v16832_v52 = vpop.f32.mrf.mxu3  ;;  %v12183_v32 = vld [vmem:[#allocation9 + $0xc9c] sm:$0xf0]  ;;  %v15002_v41 = vld [vmem:[#allocation9 + $0xdcc] sm:$0xf] }
 0x242   :  { %v12186_v37 = vor.u32 %v14962_v17, %v12183_v32  ;;  %v12346_v51 = vor.u32 %v15002_v41, %v12343_v20  ;;  %v14600_v17 = vld [vmem:[#allocation9 + $0x138] sm:$0xf0]  ;;  %v11209_v32 = vld [vmem:[#allocation9 + $0x4e8] sm:$0xf]  ;;  %v4388_v20 = vadd.f32 %v16777_v56, %v16666_v18  ;;  %v18776_v18 = vld [vmem:[#allocation48_spill] sm:$0xff] }
 0x243   :  { %v10730_v15 = vor.u32 %v14600_v17, %v10729_v30  ;;  %v18777_v56 = vld [vmem:[#allocation49_spill] sm:$0xff] }
 0x244   :  { %4799 = vmatpush.bf16.msrb.mxu2 %v12186_v37  ;;  %4822 = vmatpush.bf16.msrb.mxu3 %v12346_v51  ;;  %v4411_v37 = vadd.f32 %v16779_v57, %v4388_v20  ;;  %v4390_v51 = vadd.f32 %v16792_v45, %v16697_v19  ;;  %v10889_v19 = vld [vmem:[#allocation9 + $0x268] sm:$0xf]  ;;  %v14640_v45 = vld [vmem:[#allocation9 + $0x278] sm:$0xf0]  ;;  %v14675_v20 = vld [vmem:[#allocation9 + $0x390] sm:$0xf0] }
 0x245   :  { %4713 = vmatmul.bf16.gmra.mxu2 %v18774_v13  ;;  %4838 = vmatpush.bf16.msra.mxu0 %v10730_v15  ;;  %v10709_v15 = vld [vmem:[#allocation9 + $0x100] sm:$0xf] }
 0x246   :  { %v4399_v53 = vpop.f32.mrf.mxu0  ;;  %v4422_v10 = vpop.f32.mrf.mxu1  ;;  %4736 = vmatmul.bf16.gmra.mxu3 %v18775_v44  ;;  %v4434_v16 = vadd.f32 %v16800_v4, %v4411_v37  ;;  %v4413_v30 = vadd.f32 %v16794_v39, %v4390_v51  ;;  %v11029_v4 = vld [vmem:[#allocation9 + $0x380] sm:$0xf]  ;;  %v14715_v51 = vld [vmem:[#allocation9 + $0x4d0] sm:$0xf0] }
 0x247   :  { %v14720_v53 = vld [vmem:[#allocation9 + $0x4f8] sm:$0xf0]  ;;  %v11030_v37 = vor.u32 %v14675_v20, %v11029_v4  ;;  %v14710_v20 = vld [vmem:[#allocation9 + $0x4a8] sm:$0xf0] }
 0x248   :  { %v11210_v41 = vor.u32 %v14720_v53, %v11209_v32  ;;  %v16838_v49 = vpop.f32.mrf.mxu2  ;;  %4884 = vmatpush.bf16.msra.mxu2 %v11050_v60  ;;  %v4457_v47 = vadd.f32 %v16802_v11, %v4434_v16  ;;  %v4436_v32 = vadd.f32 %v16810_v3, %v4413_v30  ;;  %v10890_v53 = vor.u32 %v14640_v45, %v10889_v19  ;;  %v11189_v16 = vld [vmem:[#allocation9 + $0x4c0] sm:$0xf]  ;;  %v11009_v19 = vld [vmem:[#allocation9 + $0x358] sm:$0xf]  ;;  %v14670_v45 = vld [vmem:[#allocation9 + $0x368] sm:$0xf0] }
 0x249   :  { %v16840_v9 = vpop.f32.mrf.mxu3  ;;  %v4393_v11 = vadd.f32 %v16804_v62, %v16731_v23  ;;  %v10869_v3 = vld [vmem:[#allocation9 + $0x240] sm:$0xf]  ;;  %v11190_v30 = vor.u32 %v14715_v51, %v11189_v16  ;;  %v11010_v23 = vor.u32 %v14670_v45, %v11009_v19  ;;  %v10689_v62 = vld [vmem:[#allocation9 + $0xd8] sm:$0xf]  ;;  %v14625_v45 = vld [vmem:[#allocation9 + $0x200] sm:$0xf0] }
 0x24a   :  { %4907 = vmatpush.bf16.msra.mxu3 %v11210_v41  ;;  %v14595_v41 = vld [vmem:[#allocation9 + $0x110] sm:$0xf0]  ;;  %4861 = vmatpush.bf16.msra.mxu1 %v10890_v53 }
 0x24c   :  { %4885 = vmatpush.bf16.msra.mxu2 %v11030_v37  ;;  %v14665_v37 = vld [vmem:[#allocation9 + $0x340] sm:$0xf0] }
 0x24e   :  { %v4479_v42 = vpop.f32.mrf.mxu0  ;;  %v4502_v10 = vpop.f32.mrf.mxu1  ;;  %4908 = vmatpush.bf16.msra.mxu3 %v11190_v30 }
 0x24f   :  { %v4480_v60 = vadd.f32 %v4479_v42, %v4457_v47  ;;  %v10710_v42 = vor.u32 %v14595_v41, %v10709_v15  ;;  %v10849_v15 = vld [vmem:[#allocation9 + $0x218] sm:$0xf] }
 0x250   :  { %v4445_v33 = vpop.f32.mrf.mxu2  ;;  %4886 = vmatpush.bf16.msra.mxu2 %v11010_v23 }
 0x251   :  { %4672 = vmatmul.bf16.gmra.mxu0 %v18776_v18  ;;  %4695 = vmatmul.bf16.gmra.mxu1 %v18777_v56  ;;  %v4468_v2 = vpop.f32.mrf.mxu3  ;;  %v4503_v39 = vadd.f32 %v4502_v10, %v4480_v60  ;;  %v4459_v33 = vadd.f32 %v16812_v0, %v4436_v32  ;;  %v14590_v10 = vld [vmem:[#allocation9 + $0xe8] sm:$0xf0]  ;;  %v11169_v60 = vld [vmem:[#allocation9 + $0x498] sm:$0xf]  ;;  %v4416_v32 = vadd.f32 %v16806_v38, %v4393_v11 }
 0x252   :  { %4839 = vmatpush.bf16.msra.mxu0 %v10710_v42  ;;  %v10690_v4 = vor.u32 %v14590_v10, %v10689_v62  ;;  %v14630_v0 = vld [vmem:[#allocation9 + $0x228] sm:$0xf0]  ;;  %v11170_v18 = vor.u32 %v14710_v20, %v11169_v60  ;;  %v4398_v20 = vadd.f32 %v16824_v7, %v16775_v24 }
 0x253   :  { %v4439_v42 = vadd.f32 %v16820_v21, %v4416_v32  ;;  %v10669_v21 = vld [vmem:[#allocation9 + $0xb0] sm:$0xf]  ;;  %v14580_v32 = vld [vmem:[#allocation9 + $0x98] sm:$0xf0] }
 0x254   :  { %4909 = vmatpush.bf16.msra.mxu3 %v11170_v18 }
 0x255   :  { %4718 = vmatmul.bf16.gmra.mxu2 %v18740_v22 }
 0x256   :  { %v4481_v17 = vpop.f32.mrf.mxu0  ;;  %v4504_v57 = vpop.f32.mrf.mxu1  ;;  %4741 = vmatmul.bf16.gmra.mxu3 %v18741_v8  ;;  %v14635_v8 = vld [vmem:[#allocation9 + $0x250] sm:$0xf0]  ;;  %4840 = vmatpush.bf16.msra.mxu0 %v10690_v4 }
 0x257   :  { %v10870_v56 = vor.u32 %v14635_v8, %v10869_v3  ;;  %v4482_v41 = vadd.f32 %v4481_v17, %v4459_v33  ;;  %v10850_v8 = vor.u32 %v14630_v0, %v10849_v15  ;;  %v14585_v33 = vld [vmem:[#allocation9 + $0xc0] sm:$0xf0]  ;;  %v18778_v4 = vld [vmem:[#allocation54_spill] sm:$0xff]  ;;  %v14660_v15 = vld [vmem:[#allocation9 + $0x318] sm:$0xf0] }
 0x258   :  { %v4525_v2 = vpop.f32.mrf.mxu2  ;;  %v10670_v19 = vor.u32 %v14585_v33, %v10669_v21  ;;  %v10649_v0 = vld [vmem:[#allocation9 + $0x88] sm:$0xf]  ;;  %v11109_v21 = vld [vmem:[#allocation9 + $0x420] sm:$0xf]  ;;  %v4421_v33 = vadd.f32 %v16826_v54, %v4398_v20  ;;  %v14690_v54 = vld [vmem:[#allocation9 + $0x408] sm:$0xf0] }
 0x259   :  { %v4548_v47 = vpop.f32.mrf.mxu3  ;;  %v4526_v22 = vadd.f32 %v4525_v2, %v4503_v39  ;;  %v10989_v39 = vld [vmem:[#allocation9 + $0x330] sm:$0xf]  ;;  %4862 = vmatpush.bf16.msra.mxu1 %v10870_v56  ;;  %v4395_v2 = vadd.f32 %v16814_v34, %v16754_v50  ;;  %v4462_v56 = vadd.f32 %v16822_v48, %v4439_v42  ;;  %v14705_v50 = vld [vmem:[#allocation9 + $0x480] sm:$0xf0] }
 0x25a   :  { %v10990_v3 = vor.u32 %v14665_v37, %v10989_v39  ;;  %v10829_v34 = vld [vmem:[#allocation9 + $0x1f0] sm:$0xf]  ;;  %4841 = vmatpush.bf16.msra.mxu0 %v10670_v19  ;;  %v11129_v39 = vld [vmem:[#allocation9 + $0x448] sm:$0xf]  ;;  %v14615_v19 = vld [vmem:[#allocation9 + $0x1b0] sm:$0xf0] }
 0x25b   :  { %v4549_v53 = vadd.f32 %v4548_v47, %v4526_v22  ;;  %v4505_v22 = vadd.f32 %v4504_v57, %v4482_v41  ;;  %v11149_v47 = vld [vmem:[#allocation9 + $0x470] sm:$0xf]  ;;  %v4418_v30 = vadd.f32 %v16816_v25, %v4395_v2  ;;  %v10830_v60 = vor.u32 %v14625_v45, %v10829_v34  ;;  %v10969_v25 = vld [vmem:[#allocation9 + $0x308] sm:$0xf] }
 0x25c   :  { %4887 = vmatpush.bf16.msra.mxu2 %v10990_v3  ;;  %v11150_v10 = vor.u32 %v14705_v50, %v11149_v47  ;;  %v10970_v41 = vor.u32 %v14660_v15, %v10969_v25  ;;  %v10809_v37 = vld [vmem:[#allocation9 + $0x1c8] sm:$0xf]  ;;  %v10609_v25 = vld [vmem:[#allocation9 + $0x38] sm:$0xf]  ;;  %v4444_v15 = vadd.f32 %v16838_v49, %v4421_v33  ;;  %v14605_v33 = vld [vmem:[#allocation9 + $0x160] sm:$0xf0] }
 0x25d   :  { %5116 = vst [vmem:[#allocation3 + $0x10] sm:$0xff] %v4549_v53  ;;  %4863 = vmatpush.bf16.msra.mxu1 %v10850_v8  ;;  %v4441_v48 = vadd.f32 %v16830_v55, %v4418_v30  ;;  %v14700_v55 = vld [vmem:[#allocation9 + $0x458] sm:$0xf0]  ;;  %v14695_v30 = vld [vmem:[#allocation9 + $0x430] sm:$0xf0] }
 0x25e   :  { %v4484_v16 = vpop.f32.mrf.mxu0  ;;  %v4507_v51 = vpop.f32.mrf.mxu1  ;;  %4910 = vmatpush.bf16.msra.mxu3 %v11150_v10  ;;  %v11130_v2 = vor.u32 %v14700_v55, %v11129_v39  ;;  %v18780_v39 = vld [vmem:[#allocation58_spill] sm:$0xff] }
 0x25f   :  { %v4485_v62 = vadd.f32 %v4484_v16, %v4462_v56  ;;  %v10650_v16 = vor.u32 %v14580_v32, %v10649_v0  ;;  %v4464_v8 = vadd.f32 %v16832_v52, %v4441_v48  ;;  %v10789_v52 = vld [vmem:[#allocation9 + $0x1a0] sm:$0xf]  ;;  %v14650_v48 = vld [vmem:[#allocation9 + $0x2c8] sm:$0xf0]  ;;  %v11089_v32 = vld [vmem:[#allocation9 + $0x3f8] sm:$0xf] }
 0x260   :  { %v4527_v38 = vpop.f32.mrf.mxu2  ;;  %4888 = vmatpush.bf16.msra.mxu2 %v10970_v41  ;;  %v10790_v10 = vor.u32 %v14615_v19, %v10789_v52  ;;  %v14570_v0 = vld [vmem:[#allocation9 + $0x48] sm:$0xf0]  ;;  %v10769_v41 = vld [vmem:[#allocation9 + $0x178] sm:$0xf] }
 0x261   :  { %4754 = vmatmul.bf16.vlgmr.msrb.gmra.mxu0 %v16249_v36  ;;  %4777 = vmatmul.bf16.vlgmr.msrb.gmra.mxu1 %v16253_v6  ;;  %v4550_v17 = vpop.f32.mrf.mxu3  ;;  %v4528_v11 = vadd.f32 %v4527_v38, %v4505_v22  ;;  %v4508_v53 = vadd.f32 %v4507_v51, %v4485_v62  ;;  %v14620_v22 = vld [vmem:[#allocation9 + $0x1d8] sm:$0xf0]  ;;  %v10949_v38 = vld [vmem:[#allocation9 + $0x2e0] sm:$0xf]  ;;  %v14575_v51 = vld [vmem:[#allocation9 + $0x70] sm:$0xf0]  ;;  %v11110_v62 = vor.u32 %v14695_v30, %v11109_v21 }
 0x262   :  { %4864 = vmatpush.bf16.msra.mxu1 %v10830_v60  ;;  %4842 = vmatpush.bf16.msra.mxu0 %v10650_v16  ;;  %v10810_v7 = vor.u32 %v14620_v22, %v10809_v37  ;;  %v10929_v60 = vld [vmem:[#allocation9 + $0x2b8] sm:$0xf]  ;;  %v18779_v16 = vld [vmem:[#allocation57_spill] sm:$0xff]  ;;  %v11090_v37 = vor.u32 %v14690_v54, %v11089_v32  ;;  %v10749_v21 = vld [vmem:[#allocation9 + $0x150] sm:$0xf] }
 0x263   :  { %v4551_v23 = vadd.f32 %v4550_v17, %v4528_v11  ;;  %v14655_v17 = vld [vmem:[#allocation9 + $0x2f0] sm:$0xf0]  ;;  %v10629_v11 = vld [vmem:[#allocation9 + $0x60] sm:$0xf]  ;;  %4911 = vmatpush.bf16.msra.mxu3 %v11130_v2  ;;  %v10930_v20 = vor.u32 %v14650_v48, %v10929_v60  ;;  %v10750_v19 = vor.u32 %v14605_v33, %v10749_v21 }
 0x264   :  { %v10950_v56 = vor.u32 %v14655_v17, %v10949_v38  ;;  %v10630_v47 = vor.u32 %v14575_v51, %v10629_v11  ;;  %v10589_v17 = vld [vmem:[#allocation9 + $0x10] sm:$0xf] }
 0x265   :  { %5121 = vst [vmem:[#allocation3 + $0x78] sm:$0xff] %v4551_v23  ;;  %4800 = vmatmul.bf16.vlgmr.msrb.gmra.mxu2 %v16272_v35 }
 0x266   :  { %v4486_v57 = vpop.f32.mrf.mxu0  ;;  %v16864_v18 = vpop.f32.mrf.mxu1  ;;  %4823 = vmatmul.bf16.vlgmr.msrb.gmra.mxu3 %v18778_v4  ;;  %4865 = vmatpush.bf16.msra.mxu1 %v10810_v7  ;;  %v11069_v7 = vld [vmem:[#allocation9 + $0x3d0] sm:$0xf] }
 0x267   :  { %v4487_v34 = vadd.f32 %v4486_v57, %v4464_v8  ;;  %4889 = vmatpush.bf16.msra.mxu2 %v10950_v56  ;;  %4843 = vmatpush.bf16.msra.mxu0 %v10630_v47  ;;  %v14610_v57 = vld [vmem:[#allocation9 + $0x188] sm:$0xf0]  ;;  %v10909_v8 = vld [vmem:[#allocation9 + $0x290] sm:$0xf] }
 0x268   :  { %v4530_v42 = vpop.f32.mrf.mxu2  ;;  %4912 = vmatpush.bf16.msra.mxu3 %v11110_v62  ;;  %v10770_v49 = vor.u32 %v14610_v57, %v10769_v41  ;;  %v14760_v62 = vld [vmem:[#allocation9 + $0x638] sm:$0xf0] }
 0x269   :  { %v4553_v3 = vpop.f32.mrf.mxu3  ;;  %v4531_v24 = vadd.f32 %v4530_v42, %v4508_v53  ;;  %v10610_v53 = vor.u32 %v14570_v0, %v10609_v25  ;;  %v4510_v55 = vadd.f32 %v16864_v18, %v4487_v34  ;;  %v14645_v42 = vld [vmem:[#allocation9 + $0x2a0] sm:$0xf0]  ;;  %v14840_v34 = vld [vmem:[#allocation9 + $0x8b8] sm:$0xf0]  ;;  %v11849_v25 = vld [vmem:[#allocation9 + $0x9e8] sm:$0xf] }
 0x26a   :  { %4866 = vmatpush.bf16.msra.mxu1 %v10790_v10  ;;  %v10910_v11 = vor.u32 %v14645_v42, %v10909_v8  ;;  %v14685_v18 = vld [vmem:[#allocation9 + $0x3e0] sm:$0xf0]  ;;  %v14835_v42 = vld [vmem:[#allocation9 + $0x890] sm:$0xf0] }
 0x26b   :  { %v4554_v50 = vadd.f32 %v4553_v3, %v4531_v24  ;;  %v4467_v3 = vadd.f32 %v16840_v9, %v4444_v15  ;;  %4890 = vmatpush.bf16.msra.mxu2 %v10930_v20  ;;  %4844 = vmatpush.bf16.msra.mxu0 %v10610_v53  ;;  %v14565_v24 = vld [vmem:[#allocation9 + $0x20] sm:$0xf0]  ;;  %v11070_v9 = vor.u32 %v14685_v18, %v11069_v7  ;;  %v14880_v15 = vld [vmem:[#allocation9 + $0x9f8] sm:$0xf0] }
 0x26c   :  { %v10590_v51 = vor.u32 %v14565_v24, %v10589_v17  ;;  %4913 = vmatpush.bf16.msra.mxu3 %v11090_v37  ;;  %v11850_v54 = vor.u32 %v14880_v15, %v11849_v25  ;;  %v14800_v37 = vld [vmem:[#allocation9 + $0x778] sm:$0xf0]  ;;  %v11829_v17 = vld [vmem:[#allocation9 + $0x9c0] sm:$0xf]  ;;  %v14875_v24 = vld [vmem:[#allocation9 + $0x9d0] sm:$0xf0] }
 0x26d   :  { %5126 = vst [vmem:[#allocation3 + $0x18] sm:$0xff] %v4554_v50  ;;  %v11689_v50 = vld [vmem:[#allocation9 + $0x8a8] sm:$0xf]  ;;  %v11830_v7 = vor.u32 %v14875_v24, %v11829_v17  ;;  %v14790_v25 = vld [vmem:[#allocation9 + $0x728] sm:$0xf0] }
 0x26e   :  { %v4489_v45 = vpop.f32.mrf.mxu0  ;;  %v4512_v23 = vpop.f32.mrf.mxu1  ;;  %4867 = vmatpush.bf16.msra.mxu1 %v10770_v49  ;;  %v11690_v60 = vor.u32 %v14840_v34, %v11689_v50  ;;  %v11669_v49 = vld [vmem:[#allocation9 + $0x880] sm:$0xf]  ;;  %v14750_v34 = vld [vmem:[#allocation9 + $0x5e8] sm:$0xf0]  ;;  %v11629_v15 = vld [vmem:[#allocation9 + $0x830] sm:$0xf] }
 0x26f   :  { %v4490_v56 = vadd.f32 %v4489_v45, %v4467_v3  ;;  %4891 = vmatpush.bf16.msra.mxu2 %v10910_v11  ;;  %4845 = vmatpush.bf16.msra.mxu0 %v10590_v51  ;;  %v11369_v45 = vld [vmem:[#allocation9 + $0x628] sm:$0xf]  ;;  %v11349_v3 = vld [vmem:[#allocation9 + $0x600] sm:$0xf]  ;;  %v14795_v11 = vld [vmem:[#allocation9 + $0x750] sm:$0xf0] }
 0x270   :  { %v4532_v2 = vpop.f32.mrf.mxu2  ;;  %4914 = vmatpush.bf16.msra.mxu3 %v11070_v9  ;;  %v11370_v48 = vor.u32 %v14760_v62, %v11369_v45  ;;  %v11329_v9 = vld [vmem:[#allocation9 + $0x5d8] sm:$0xf]  ;;  %v14785_v17 = vld [vmem:[#allocation9 + $0x700] sm:$0xf0] }
 0x271   :  { %4759 = vmatmul.bf16.gmra.mxu0 %v18779_v16  ;;  %4782 = vmatmul.bf16.gmra.mxu1 %v18780_v39  ;;  %v4555_v22 = vpop.f32.mrf.mxu3  ;;  %v4533_v38 = vadd.f32 %v4532_v2, %v4510_v55  ;;  %v4513_v10 = vadd.f32 %v4512_v23, %v4490_v56  ;;  %v11529_v55 = vld [vmem:[#allocation9 + $0x768] sm:$0xf]  ;;  %v14755_v2 = vld [vmem:[#allocation9 + $0x610] sm:$0xf0]  ;;  %v11509_v56 = vld [vmem:[#allocation9 + $0x740] sm:$0xf]  ;;  %v11330_v62 = vor.u32 %v14750_v34, %v11329_v9 }
 0x272   :  { %4868 = vmatpush.bf16.msra.mxu1 %v10750_v19  ;;  %v11530_v8 = vor.u32 %v14800_v37, %v11529_v55  ;;  %v11510_v51 = vor.u32 %v14795_v11, %v11509_v56  ;;  %v11809_v45 = vld [vmem:[#allocation9 + $0x998] sm:$0xf]  ;;  %v11609_v56 = vld [vmem:[#allocation9 + $0x808] sm:$0xf]  ;;  %v14820_v11 = vld [vmem:[#allocation9 + $0x818] sm:$0xf0] }
 0x273   :  { %v4556_v47 = vadd.f32 %v4555_v22, %v4533_v38  ;;  %4976 = vmatpush.bf16.msrb.mxu2 %v11690_v60  ;;  %4930 = vmatpush.bf16.msrb.mxu0 %v11370_v48  ;;  %v11670_v22 = vor.u32 %v14835_v42, %v11669_v49  ;;  %v11350_v38 = vor.u32 %v14755_v2, %v11349_v3  ;;  %v11489_v60 = vld [vmem:[#allocation9 + $0x718] sm:$0xf]  ;;  %v11309_v49 = vld [vmem:[#allocation9 + $0x5b0] sm:$0xf]  ;;  %v14780_v34 = vld [vmem:[#allocation9 + $0x6d8] sm:$0xf0] }
 0x274   :  { %4999 = vmatpush.bf16.msrb.mxu3 %v11850_v54  ;;  %v11789_v42 = vld [vmem:[#allocation9 + $0x970] sm:$0xf] }
 0x275   :  { %5131 = vst [vmem:[#allocation3 + $0x30] sm:$0xff] %v4556_v47  ;;  %4805 = vmatmul.bf16.gmra.mxu2 %v16308_v46 }
 0x276   :  { %v4491_v30 = vpop.f32.mrf.mxu0  ;;  %v4514_v52 = vpop.f32.mrf.mxu1  ;;  %4828 = vmatmul.bf16.gmra.mxu3 %v16310_v14  ;;  %4953 = vmatpush.bf16.msrb.mxu1 %v11530_v8  ;;  %v14745_v8 = vld [vmem:[#allocation9 + $0x5c0] sm:$0xf0] }
 0x277   :  { %4977 = vmatpush.bf16.msrb.mxu2 %v11670_v22  ;;  %4931 = vmatpush.bf16.msrb.mxu0 %v11350_v38  ;;  %v11649_v30 = vld [vmem:[#allocation9 + $0x858] sm:$0xf]  ;;  %v14830_v52 = vld [vmem:[#allocation9 + $0x868] sm:$0xf0]  ;;  %v11310_v2 = vor.u32 %v14745_v8, %v11309_v49  ;;  %v14865_v22 = vld [vmem:[#allocation9 + $0x980] sm:$0xf0] }
 0x278   :  { %v4535_v0 = vpop.f32.mrf.mxu2  ;;  %5000 = vmatpush.bf16.msrb.mxu3 %v11830_v7  ;;  %v11650_v50 = vor.u32 %v14830_v52, %v11649_v30  ;;  %v11469_v38 = vld [vmem:[#allocation9 + $0x6f0] sm:$0xf]  ;;  %v11790_v24 = vor.u32 %v14865_v22, %v11789_v42 }
 0x279   :  { %v4558_v32 = vpop.f32.mrf.mxu3  ;;  %v4536_v20 = vadd.f32 %v4535_v0, %v4513_v10  ;;  %v14870_v10 = vld [vmem:[#allocation9 + $0x9a8] sm:$0xf0]  ;;  %v14825_v0 = vld [vmem:[#allocation9 + $0x840] sm:$0xf0]  ;;  %v11470_v7 = vor.u32 %v14785_v17, %v11469_v38  ;;  %v11249_v17 = vld [vmem:[#allocation9 + $0x538] sm:$0xf] }
 0x27a   :  { %4954 = vmatpush.bf16.msrb.mxu1 %v11510_v51  ;;  %v11810_v48 = vor.u32 %v14870_v10, %v11809_v45  ;;  %v11630_v54 = vor.u32 %v14825_v0, %v11629_v15  ;;  %v11289_v51 = vld [vmem:[#allocation9 + $0x588] sm:$0xf]  ;;  %v11589_v45 = vld [vmem:[#allocation9 + $0x7e0] sm:$0xf]  ;;  %v14810_v38 = vld [vmem:[#allocation9 + $0x7c8] sm:$0xf0] }
 0x27b   :  { %v4559_v53 = vadd.f32 %v4558_v32, %v4536_v20  ;;  %4978 = vmatpush.bf16.msrb.mxu2 %v11650_v50  ;;  %4932 = vmatpush.bf16.msrb.mxu0 %v11330_v62  ;;  %v11490_v32 = vor.u32 %v14790_v25, %v11489_v60  ;;  %v11449_v50 = vld [vmem:[#allocation9 + $0x6c8] sm:$0xf]  ;;  %v11269_v0 = vld [vmem:[#allocation9 + $0x560] sm:$0xf] }
 0x27c   :  { %5001 = vmatpush.bf16.msrb.mxu3 %v11810_v48  ;;  %v11450_v10 = vor.u32 %v14780_v34, %v11449_v50 }
 0x27d   :  { %5136 = vst [vmem:[#allocation3 + $0x8] sm:$0xff] %v4559_v53 }
 0x27e   :  { %v4571_v41 = vpop.f32.mrf.mxu0  ;;  %v4594_v57 = vpop.f32.mrf.mxu1  ;;  %4955 = vmatpush.bf16.msrb.mxu1 %v11490_v32  ;;  %v14735_v32 = vld [vmem:[#allocation9 + $0x570] sm:$0xf0] }
 0x27f   :  { %v4595_v23 = vadd.f32 %v4594_v57, %v4571_v41  ;;  %4979 = vmatpush.bf16.msrb.mxu2 %v11630_v54  ;;  %4933 = vmatpush.bf16.msrb.mxu0 %v11310_v2  ;;  %v11749_v54 = vld [vmem:[#allocation9 + $0x920] sm:$0xf] }
 0x280   :  { %v4537_v18 = vpop.f32.mrf.mxu2  ;;  %5002 = vmatpush.bf16.msrb.mxu3 %v11790_v24 }
 0x281   :  { %4764 = vmatmul.bf16.gmra.mxu0 %v16314_v58  ;;  %4787 = vmatmul.bf16.gmra.mxu1 %v16316_v59  ;;  %v4560_v21 = vpop.f32.mrf.mxu3  ;;  %v14740_v18 = vld [vmem:[#allocation9 + $0x598] sm:$0xf0] }
 0x282   :  { %v11769_v21 = vld [vmem:[#allocation9 + $0x948] sm:$0xf]  ;;  %4956 = vmatpush.bf16.msrb.mxu1 %v11470_v7 }
 0x285   :  { %4810 = vmatmul.bf16.gmra.mxu2 %v16320_v1 }
 0x286   :  { %v4573_v33 = vpop.f32.mrf.mxu0  ;;  %v4596_v47 = vpop.f32.mrf.mxu1  ;;  %4833 = vmatmul.bf16.gmra.mxu3 %v16322_v26  ;;  %4957 = vmatpush.bf16.msrb.mxu1 %v11450_v10  ;;  %v11709_v10 = vld [vmem:[#allocation9 + $0x8d0] sm:$0xf] }
 0x287   :  { %v4597_v19 = vadd.f32 %v4596_v47, %v4573_v33  ;;  %v14860_v33 = vld [vmem:[#allocation9 + $0x958] sm:$0xf0]  ;;  %v11290_v47 = vor.u32 %v14740_v18, %v11289_v51  ;;  %v14850_v51 = vld [vmem:[#allocation9 + $0x908] sm:$0xf0] }
 0x288   :  { %v4617_v20 = vpop.f32.mrf.mxu2  ;;  %v11770_v30 = vor.u32 %v14860_v33, %v11769_v21  ;;  %v11409_v21 = vld [vmem:[#allocation9 + $0x678] sm:$0xf]  ;;  %v14770_v33 = vld [vmem:[#allocation9 + $0x688] sm:$0xf0] }
 0x289   :  { %v4640_v53 = vpop.f32.mrf.mxu3  ;;  %v4618_v41 = vadd.f32 %v4617_v20, %v4595_v23  ;;  %v11610_v23 = vor.u32 %v14820_v11, %v11609_v56  ;;  %4934 = vmatpush.bf16.msrb.mxu0 %v11290_v47  ;;  %v14855_v20 = vld [vmem:[#allocation9 + $0x930] sm:$0xf0]  ;;  %v14730_v56 = vld [vmem:[#allocation9 + $0x548] sm:$0xf0]  ;;  %v11729_v11 = vld [vmem:[#allocation9 + $0x8f8] sm:$0xf] }
 0x28a   :  { %5003 = vmatpush.bf16.msrb.mxu3 %v11770_v30  ;;  %v11730_v18 = vor.u32 %v14850_v51, %v11729_v11  ;;  %v11549_v47 = vld [vmem:[#allocation9 + $0x790] sm:$0xf]  ;;  %v14805_v30 = vld [vmem:[#allocation9 + $0x7a0] sm:$0xf0]  ;;  %v14995_v11 = vld [vmem:[#allocation9 + $0xd90] sm:$0xf0] }
 0x28b   :  { %v16884_v57 = vadd.f32 %v4640_v53, %v4618_v41  ;;  %4980 = vmatpush.bf16.msrb.mxu2 %v11610_v23  ;;  %v11429_v53 = vld [vmem:[#allocation9 + $0x6a0] sm:$0xf]  ;;  %v14775_v41 = vld [vmem:[#allocation9 + $0x6b0] sm:$0xf0]  ;;  %v11250_v23 = vor.u32 %v14730_v56, %v11249_v17  ;;  %v14960_v17 = vld [vmem:[#allocation9 + $0xc78] sm:$0xf0] }
 0x28c   :  { %v11989_v51 = vld [vmem:[#allocation9 + $0xb00] sm:$0xf] }
 0x28e   :  { %v4576_v55 = vpop.f32.mrf.mxu0  ;;  %v4599_v37 = vpop.f32.mrf.mxu1 }
 0x28f   :  { %v4600_v3 = vadd.f32 %v4599_v37, %v4576_v55  ;;  %v11750_v55 = vor.u32 %v14855_v20, %v11749_v54  ;;  %v11430_v37 = vor.u32 %v14775_v41, %v11429_v53  ;;  %v12009_v20 = vld [vmem:[#allocation9 + $0xb28] sm:$0xf]  ;;  %v14920_v41 = vld [vmem:[#allocation9 + $0xb38] sm:$0xf0] }
 0x290   :  { %v4619_v52 = vpop.f32.mrf.mxu2 }
 0x291   :  { %4846 = vmatmul.bf16.vlgmr.msra.gmra.mxu0 %v15889_v28  ;;  %4869 = vmatmul.bf16.vlgmr.msra.gmra.mxu1 %v15891_v29  ;;  %v4642_v9 = vpop.f32.mrf.mxu3  ;;  %v4620_v62 = vadd.f32 %v4619_v52, %v4597_v19  ;;  %v14815_v28 = vld [vmem:[#allocation9 + $0x7f0] sm:$0xf0]  ;;  %v11270_v19 = vor.u32 %v14735_v32, %v11269_v0  ;;  %v11550_v52 = vor.u32 %v14805_v30, %v11549_v47 }
 0x292   :  { %v11590_v60 = vor.u32 %v14815_v28, %v11589_v45  ;;  %5004 = vmatpush.bf16.msrb.mxu3 %v11750_v55  ;;  %4958 = vmatpush.bf16.msrb.mxu1 %v11430_v37  ;;  %v11229_v45 = vld [vmem:[#allocation9 + $0x510] sm:$0xf]  ;;  %v12489_v55 = vld [vmem:[#allocation9 + $0xee8] sm:$0xf]  ;;  %v15040_v37 = vld [vmem:[#allocation9 + $0xef8] sm:$0xf0] }
 0x293   :  { %v16888_v29 = vadd.f32 %v4642_v9, %v4620_v62  ;;  %4935 = vmatpush.bf16.msrb.mxu0 %v11270_v19  ;;  %v14725_v62 = vld [vmem:[#allocation9 + $0x520] sm:$0xf0]  ;;  %v15000_v19 = vld [vmem:[#allocation9 + $0xdb8] sm:$0xf0]  ;;  %v15035_v47 = vld [vmem:[#allocation9 + $0xed0] sm:$0xf0] }
 0x294   :  { %4981 = vmatpush.bf16.msrb.mxu2 %v11590_v60  ;;  %v11230_v28 = vor.u32 %v14725_v62, %v11229_v45  ;;  %v14845_v60 = vld [vmem:[#allocation9 + $0x8e0] sm:$0xf0]  ;;  %v14955_v30 = vld [vmem:[#allocation9 + $0xc50] sm:$0xf0]  ;;  %v12289_v62 = vld [vmem:[#allocation9 + $0xd58] sm:$0xf] }
 0x295   :  { %4892 = vmatmul.bf16.vlgmr.msra.gmra.mxu2 %v15907_v40  ;;  %v11710_v32 = vor.u32 %v14845_v60, %v11709_v10  ;;  %v14990_v10 = vld [vmem:[#allocation9 + $0xd68] sm:$0xf0] }
 0x296   :  { %v4578_v48 = vpop.f32.mrf.mxu0  ;;  %v4601_v25 = vpop.f32.mrf.mxu1  ;;  %4915 = vmatmul.bf16.vlgmr.msra.gmra.mxu3 %v15909_v43  ;;  %v11569_v43 = vld [vmem:[#allocation9 + $0x7b8] sm:$0xf]  ;;  %v14910_v60 = vld [vmem:[#allocation9 + $0xae8] sm:$0xf0] }
 0x297   :  { %v4602_v15 = vadd.f32 %v4601_v25, %v4578_v48  ;;  %v11570_v7 = vor.u32 %v14810_v38, %v11569_v43  ;;  %4936 = vmatpush.bf16.msrb.mxu0 %v11250_v23  ;;  %5005 = vmatpush.bf16.msrb.mxu3 %v11730_v18  ;;  %v11389_v48 = vld [vmem:[#allocation9 + $0x650] sm:$0xf]  ;;  %v14765_v25 = vld [vmem:[#allocation9 + $0x660] sm:$0xf0]  ;;  %v12169_v38 = vld [vmem:[#allocation9 + $0xc68] sm:$0xf] }
 0x298   :  { %v4622_v49 = vpop.f32.mrf.mxu2  ;;  %v11390_v54 = vor.u32 %v14765_v25, %v11389_v48  ;;  %v12170_v56 = vor.u32 %v14960_v17, %v12169_v38  ;;  %v14915_v23 = vld [vmem:[#allocation9 + $0xb10] sm:$0xf0]  ;;  %v15030_v48 = vld [vmem:[#allocation9 + $0xea8] sm:$0xf0]  ;;  %v18781_v25 = vld [vmem:[#allocation35_spill] sm:$0xff] }
 0x299   :  { %v4645_v8 = vpop.f32.mrf.mxu3  ;;  %v4623_v42 = vadd.f32 %v4622_v49, %v4600_v3  ;;  %v11410_v3 = vor.u32 %v14770_v33, %v11409_v21  ;;  %4982 = vmatpush.bf16.msrb.mxu2 %v11570_v7  ;;  %v12010_v49 = vor.u32 %v14920_v41, %v12009_v20  ;;  %v12309_v7 = vld [vmem:[#allocation9 + $0xd80] sm:$0xf]  ;;  %v11990_v21 = vor.u32 %v14915_v23, %v11989_v51  ;;  %v15025_v17 = vld [vmem:[#allocation9 + $0xe80] sm:$0xf0]  ;;  %v12249_v23 = vld [vmem:[#allocation9 + $0xd08] sm:$0xf] }
 0x29a   :  { %v12310_v18 = vor.u32 %v14995_v11, %v12309_v7  ;;  %v12469_v33 = vld [vmem:[#allocation9 + $0xec0] sm:$0xf]  ;;  %v12109_v7 = vld [vmem:[#allocation9 + $0xbf0] sm:$0xf] }
 0x29b   :  { %v16892_v2 = vadd.f32 %v4645_v8, %v4623_v42  ;;  %4959 = vmatpush.bf16.msrb.mxu1 %v11410_v3  ;;  %4937 = vmatpush.bf16.msrb.mxu0 %v11230_v28  ;;  %v12490_v8 = vor.u32 %v15040_v37, %v12489_v55  ;;  %v12470_v3 = vor.u32 %v15035_v47, %v12469_v33  ;;  %v11969_v28 = vld [vmem:[#allocation9 + $0xad8] sm:$0xf]  ;;  %v18783_v33 = vld [vmem:[#allocation37_spill] sm:$0xff]  ;;  %v18784_v47 = vld [vmem:[#allocation38_spill] sm:$0xff] }
 0x29c   :  { %5006 = vmatpush.bf16.msrb.mxu3 %v11710_v32 }
 0x29d   :  { %4983 = vmatpush.bf16.msrb.mxu2 %v11550_v52 }
 0x29e   :  { %v4581_v40 = vpop.f32.mrf.mxu0  ;;  %v4604_v22 = vpop.f32.mrf.mxu1 }
 0x29f   :  { %v4605_v24 = vadd.f32 %v4604_v22, %v4581_v40  ;;  %4960 = vmatpush.bf16.msrb.mxu1 %v11390_v54  ;;  %5022 = vmatpush.bf16.msra.mxu0 %v12010_v49  ;;  %v12129_v54 = vld [vmem:[#allocation9 + $0xc18] sm:$0xf] }
 0x2a0   :  { %v4624_v9 = vpop.f32.mrf.mxu2  ;;  %5091 = vmatpush.bf16.msra.mxu3 %v12490_v8 }
 0x2a1   :  { %4851 = vmatmul.bf16.gmra.mxu0 %v16010_v27  ;;  %4874 = vmatmul.bf16.gmra.mxu1 %v16012_v61  ;;  %v4647_v50 = vpop.f32.mrf.mxu3  ;;  %v4625_v34 = vadd.f32 %v4624_v9, %v4602_v15  ;;  %v12329_v15 = vld [vmem:[#allocation9 + $0xda8] sm:$0xf] }
 0x2a2   :  { %v12330_v53 = vor.u32 %v15000_v19, %v12329_v15  ;;  %v14950_v15 = vld [vmem:[#allocation9 + $0xc28] sm:$0xf0]  ;;  %v12269_v19 = vld [vmem:[#allocation9 + $0xd30] sm:$0xf] }
 0x2a3   :  { %v16896_v27 = vadd.f32 %v4647_v50, %v4625_v34  ;;  %5045 = vmatpush.bf16.msra.mxu1 %v12170_v56  ;;  %5023 = vmatpush.bf16.msra.mxu0 %v11990_v21  ;;  %v12130_v20 = vor.u32 %v14950_v15, %v12129_v54  ;;  %v14945_v56 = vld [vmem:[#allocation9 + $0xc00] sm:$0xf0]  ;;  %v11929_v21 = vld [vmem:[#allocation9 + $0xa88] sm:$0xf]  ;;  %v11909_v15 = vld [vmem:[#allocation9 + $0xa60] sm:$0xf] }
 0x2a4   :  { %5068 = vmatpush.bf16.msra.mxu2 %v12330_v53  ;;  %5092 = vmatpush.bf16.msra.mxu3 %v12470_v3  ;;  %v14985_v53 = vld [vmem:[#allocation9 + $0xd40] sm:$0xf0]  ;;  %v12110_v51 = vor.u32 %v14945_v56, %v12109_v7  ;;  %v14900_v3 = vld [vmem:[#allocation9 + $0xa98] sm:$0xf0] }
 0x2a5   :  { %4897 = vmatmul.bf16.gmra.mxu2 %v18726_v63  ;;  %v12270_v41 = vor.u32 %v14985_v53, %v12269_v19  ;;  %v18786_v54 = vld [vmem:[#allocation40_spill] sm:$0xff]  ;;  %v14895_v19 = vld [vmem:[#allocation9 + $0xa70] sm:$0xf0] }
 0x2a6   :  { %v4583_v61 = vpop.f32.mrf.mxu0  ;;  %v4606_v0 = vpop.f32.mrf.mxu1  ;;  %4920 = vmatmul.bf16.gmra.mxu3 %v18727_v12  ;;  %v11910_v53 = vor.u32 %v14895_v19, %v11909_v15  ;;  %v14885_v15 = vld [vmem:[#allocation9 + $0xa20] sm:$0xf0]  ;;  %v12349_v19 = vld [vmem:[#allocation9 + $0xdd0] sm:$0xf] }
 0x2a7   :  { %v18782_v61 = vld [vmem:[#allocation36_spill] sm:$0xff]  ;;  %v11970_v0 = vor.u32 %v14910_v60, %v11969_v28  ;;  %v12089_v28 = vld [vmem:[#allocation9 + $0xbc8] sm:$0xf] }
 0x2a8   :  { %v4627_v42 = vpop.f32.mrf.mxu2  ;;  %5069 = vmatpush.bf16.msra.mxu2 %v12310_v18  ;;  %v14980_v18 = vld [vmem:[#allocation9 + $0xd18] sm:$0xf0]  ;;  %v12229_v60 = vld [vmem:[#allocation9 + $0xce0] sm:$0xf] }
 0x2a9   :  { %v4650_v40 = vpop.f32.mrf.mxu3  ;;  %v4628_v22 = vadd.f32 %v4627_v42, %v4605_v24  ;;  %v12149_v24 = vld [vmem:[#allocation9 + $0xc40] sm:$0xf]  ;;  %5024 = vmatpush.bf16.msra.mxu0 %v11970_v0  ;;  %v11949_v42 = vld [vmem:[#allocation9 + $0xab0] sm:$0xf] }
 0x2aa   :  { %v12150_v52 = vor.u32 %v14955_v30, %v12149_v24  ;;  %v12250_v24 = vor.u32 %v14980_v18, %v12249_v23  ;;  %v12409_v30 = vld [vmem:[#allocation9 + $0xe48] sm:$0xf]  ;;  %v14970_v23 = vld [vmem:[#allocation9 + $0xcc8] sm:$0xf0]  ;;  %v11889_v18 = vld [vmem:[#allocation9 + $0xa38] sm:$0xf] }
 0x2ab   :  { %v16900_v63 = vadd.f32 %v4650_v40, %v4628_v22  ;;  %v14905_v40 = vld [vmem:[#allocation9 + $0xac0] sm:$0xf0]  ;;  %v12429_v22 = vld [vmem:[#allocation9 + $0xe70] sm:$0xf] }
 0x2ac   :  { %5046 = vmatpush.bf16.msra.mxu1 %v12150_v52  ;;  %v11950_v38 = vor.u32 %v14905_v40, %v11949_v42  ;;  %v12430_v11 = vor.u32 %v15025_v17, %v12429_v22  ;;  %v15020_v52 = vld [vmem:[#allocation9 + $0xe58] sm:$0xf0]  ;;  %v12069_v42 = vld [vmem:[#allocation9 + $0xba0] sm:$0xf]  ;;  %v14935_v40 = vld [vmem:[#allocation9 + $0xbb0] sm:$0xf0] }
 0x2ae   :  { %v16902_v12 = vpop.f32.mrf.mxu0  ;;  %v16904_v43 = vpop.f32.mrf.mxu1  ;;  %5025 = vmatpush.bf16.msra.mxu0 %v11950_v38  ;;  %v12070_v38 = vor.u32 %v14935_v40, %v12069_v42 }
 0x2b0   :  { %v4629_v9 = vpop.f32.mrf.mxu2  ;;  %5047 = vmatpush.bf16.msra.mxu1 %v12130_v20  ;;  %v12389_v20 = vld [vmem:[#allocation9 + $0xe20] sm:$0xf] }
 0x2b1   :  { %4856 = vmatmul.bf16.gmra.mxu0 %v18728_v5  ;;  %4879 = vmatmul.bf16.gmra.mxu1 %v18762_v31  ;;  %v4652_v50 = vpop.f32.mrf.mxu3  ;;  %v12290_v5 = vor.u32 %v14990_v10, %v12289_v62  ;;  %v12449_v31 = vld [vmem:[#allocation9 + $0xe98] sm:$0xf]  ;;  %v11930_v9 = vor.u32 %v14900_v3, %v11929_v21  ;;  %v18787_v21 = vld [vmem:[#allocation41_spill] sm:$0xff] }
 0x2b2   :  { %v12450_v32 = vor.u32 %v15030_v48, %v12449_v31  ;;  %v12410_v50 = vor.u32 %v15020_v52, %v12409_v30  ;;  %v14975_v48 = vld [vmem:[#allocation9 + $0xcf0] sm:$0xf0]  ;;  %v12369_v3 = vld [vmem:[#allocation9 + $0xdf8] sm:$0xf]  ;;  %v15010_v30 = vld [vmem:[#allocation9 + $0xe08] sm:$0xf0] }
 0x2b3   :  { %5070 = vmatpush.bf16.msra.mxu2 %v12290_v5  ;;  %v14940_v5 = vld [vmem:[#allocation9 + $0xbd8] sm:$0xf0]  ;;  %5026 = vmatpush.bf16.msra.mxu0 %v11930_v9  ;;  %v12370_v9 = vor.u32 %v15010_v30, %v12369_v3  ;;  %v18789_v30 = vld [vmem:[#allocation48_spill] sm:$0xff] }
 0x2b4   :  { %5093 = vmatpush.bf16.msra.mxu3 %v12450_v32  ;;  %5048 = vmatpush.bf16.msra.mxu1 %v12110_v51  ;;  %v12090_v31 = vor.u32 %v14940_v5, %v12089_v28  ;;  %v18785_v32 = vld [vmem:[#allocation39_spill] sm:$0xff]  ;;  %v14930_v28 = vld [vmem:[#allocation9 + $0xb88] sm:$0xf0] }
 0x2b5   :  { %4902 = vmatmul.bf16.gmra.mxu2 %v18781_v25  ;;  %v12230_v25 = vor.u32 %v14975_v48, %v12229_v60  ;;  %v12209_v51 = vld [vmem:[#allocation9 + $0xcb8] sm:$0xf]  ;;  %v12189_v48 = vld [vmem:[#allocation9 + $0xc90] sm:$0xf] }
 0x2b6   :  { %v16908_v34 = vpop.f32.mrf.mxu0  ;;  %v16910_v45 = vpop.f32.mrf.mxu1  ;;  %4925 = vmatmul.bf16.gmra.mxu3 %v18782_v61 }
 0x2b7   :  { %5071 = vmatpush.bf16.msra.mxu2 %v12270_v41  ;;  %v15015_v41 = vld [vmem:[#allocation9 + $0xe30] sm:$0xf0]  ;;  %5027 = vmatpush.bf16.msra.mxu0 %v11910_v53 }
 0x2b8   :  { %v16914_v55 = vpop.f32.mrf.mxu2  ;;  %5094 = vmatpush.bf16.msra.mxu3 %v12430_v11  ;;  %5049 = vmatpush.bf16.msra.mxu1 %v12090_v31  ;;  %v12390_v22 = vor.u32 %v15015_v41, %v12389_v20  ;;  %v15005_v20 = vld [vmem:[#allocation9 + $0xde0] sm:$0xf0] }
 0x2b9   :  { %v16916_v37 = vpop.f32.mrf.mxu3  ;;  %v12350_v40 = vor.u32 %v15005_v20, %v12349_v19  ;;  %v15133_v20 = vld [vmem:[#allocation11 + $0x1ec] sm:$0xf0] }
 0x2bb   :  { %5072 = vmatpush.bf16.msra.mxu2 %v12250_v24  ;;  %v14890_v24 = vld [vmem:[#allocation9 + $0xa48] sm:$0xf0] }
 0x2bc   :  { %5095 = vmatpush.bf16.msra.mxu3 %v12410_v50  ;;  %5050 = vmatpush.bf16.msra.mxu1 %v12070_v38  ;;  %v11890_v52 = vor.u32 %v14890_v24, %v11889_v18  ;;  %v12049_v50 = vld [vmem:[#allocation9 + $0xb78] sm:$0xf]  ;;  %v14925_v38 = vld [vmem:[#allocation9 + $0xb60] sm:$0xf0] }
 0x2bd   :  { %v12050_v31 = vor.u32 %v14930_v28, %v12049_v50 }
 0x2be   :  { %v16918_v49 = vpop.f32.mrf.mxu0  ;;  %v16920_v8 = vpop.f32.mrf.mxu1  ;;  %5028 = vmatpush.bf16.msra.mxu0 %v11890_v52  ;;  %v5142_v52 = vld [vmem:[#allocation4 + $0x8] sm:$0x33] }
 0x2bf   :  { %5073 = vmatpush.bf16.msra.mxu2 %v12230_v25  ;;  %v14965_v25 = vld [vmem:[#allocation9 + $0xca0] sm:$0xf0]  ;;  %v5143_v50 = vsel %vm15725_vm6, 0, %v5142_v52  ;;  %v12971_v52 = vld [vmem:[#allocation11 + $0x2c0] sm:$0xf] }
 0x2c0   :  { %v16924_v62 = vpop.f32.mrf.mxu2  ;;  %5096 = vmatpush.bf16.msra.mxu3 %v12390_v22  ;;  %5051 = vmatpush.bf16.msra.mxu1 %v12050_v31  ;;  %v12029_v22 = vld [vmem:[#allocation9 + $0xb50] sm:$0xf]  ;;  %5144 = vst [vmem:[#allocation4 + $0x8] sm:$0x33] %v5143_v50 }
 0x2c1   :  { %4938 = vmatmul.bf16.vlgmr.msrb.gmra.mxu0 %v18783_v33  ;;  %4961 = vmatmul.bf16.vlgmr.msrb.gmra.mxu1 %v18784_v47  ;;  %v16926_v10 = vpop.f32.mrf.mxu3  ;;  %v18788_v33 = vld [vmem:[#allocation42_spill] sm:$0xff]  ;;  %v12210_v47 = vor.u32 %v14970_v23, %v12209_v51  ;;  %v12030_v51 = vor.u32 %v14925_v38, %v12029_v22  ;;  %v4664_v23 = vadd.f32 %v16902_v12, %v16884_v57 }
 0x2c2   :  { %v15197_v22 = vld [vmem:[#allocation11 + $0x3ec] sm:$0xf0]  ;;  %v4669_v38 = vadd.f32 %v16918_v49, %v16892_v2 }
 0x2c3   :  { %5074 = vmatpush.bf16.msra.mxu2 %v12210_v47 }
 0x2c4   :  { %5097 = vmatpush.bf16.msra.mxu3 %v12370_v9  ;;  %5052 = vmatpush.bf16.msra.mxu1 %v12030_v51 }
 0x2c5   :  { %4984 = vmatmul.bf16.vlgmr.msrb.gmra.mxu2 %v18785_v32  ;;  %v11869_v32 = vld [vmem:[#allocation9 + $0xa10] sm:$0xf] }
 0x2c6   :  { %v16928_v61 = vpop.f32.mrf.mxu0  ;;  %v16930_v0 = vpop.f32.mrf.mxu1  ;;  %5007 = vmatmul.bf16.vlgmr.msrb.gmra.mxu3 %v18786_v54  ;;  %v12190_v54 = vor.u32 %v14965_v25, %v12189_v48  ;;  %v11870_v42 = vor.u32 %v14885_v15, %v11869_v32  ;;  %v18792_v32 = vld [vmem:[#allocation51_spill] sm:$0xff]  ;;  %v12859_v15 = vld [vmem:[#allocation11 + $0x1e0] sm:$0xf] }
 0x2c8   :  { %v16934_v17 = vpop.f32.mrf.mxu2  ;;  %5075 = vmatpush.bf16.msra.mxu2 %v12190_v54  ;;  %5029 = vmatpush.bf16.msra.mxu0 %v11870_v42  ;;  %v18793_v54 = vld [vmem:[#allocation52_spill] sm:$0xff]  ;;  %v12860_v42 = vor.u32 %v15133_v20, %v12859_v15 }
 0x2c9   :  { %v16936_v7 = vpop.f32.mrf.mxu3  ;;  %5098 = vmatpush.bf16.msra.mxu3 %v12350_v40 }
 0x2ca   :  { %8827 = vmatpush.bf16.msrb.mxu1 %v12860_v42  ;;  %v12955_v42 = vld [vmem:[#allocation11 + $0x2a0] sm:$0xf] }
 0x2ce   :  { %v16938_v56 = vpop.f32.mrf.mxu0  ;;  %v16940_v11 = vpop.f32.mrf.mxu1 }
 0x2d0   :  { %v16944_v5 = vpop.f32.mrf.mxu2 }
 0x2d1   :  { %4943 = vmatmul.bf16.gmra.mxu0 %v18787_v21  ;;  %4966 = vmatmul.bf16.gmra.mxu1 %v18788_v33  ;;  %v16946_v60 = vpop.f32.mrf.mxu3  ;;  %v4687_v33 = vadd.f32 %v16904_v43, %v4664_v23 }
 0x2d3   :  { %v4710_v3 = vadd.f32 %v16914_v55, %v4687_v33 }
 0x2d5   :  { %4989 = vmatmul.bf16.gmra.mxu2 %v18774_v13  ;;  %v18790_v13 = vld [vmem:[#allocation49_spill] sm:$0xff]  ;;  %v4733_v28 = vadd.f32 %v16916_v37, %v4710_v3  ;;  %v12715_v3 = vld [vmem:[#allocation11 + $0xc0] sm:$0xf] }
 0x2d6   :  { %v4675_v53 = vpop.f32.mrf.mxu0  ;;  %v4698_v41 = vpop.f32.mrf.mxu1  ;;  %5012 = vmatmul.bf16.gmra.mxu3 %v18775_v44  ;;  %v4666_v44 = vadd.f32 %v16908_v34, %v16888_v29  ;;  %v12731_v29 = vld [vmem:[#allocation11 + $0xe0] sm:$0xf]  ;;  %v15101_v34 = vld [vmem:[#allocation11 + $0xec] sm:$0xf0] }
 0x2d7   :  { %v12732_v19 = vor.u32 %v15101_v34, %v12731_v29  ;;  %v12987_v53 = vld [vmem:[#allocation11 + $0x2e0] sm:$0xf]  ;;  %v15165_v41 = vld [vmem:[#allocation11 + $0x2ec] sm:$0xf0]  ;;  %v5412_v29 = vld [vmem:[#allocation4 + $0x80] sm:$0xcc] }
 0x2d8   :  { %v16952_v18 = vpop.f32.mrf.mxu2  ;;  %v4689_v43 = vadd.f32 %v16910_v45, %v4666_v44  ;;  %v12988_v40 = vor.u32 %v15165_v41, %v12987_v53  ;;  %v13115_v45 = vld [vmem:[#allocation11 + $0x3e0] sm:$0xf]  ;;  %v15129_v44 = vld [vmem:[#allocation11 + $0x1cc] sm:$0xf0]  ;;  %v4671_v53 = vadd.f32 %v16928_v61, %v16896_v27 }
 0x2d9   :  { %v16954_v21 = vpop.f32.mrf.mxu3  ;;  %8804 = vmatpush.bf16.msrb.mxu0 %v12732_v19  ;;  %v13116_v23 = vor.u32 %v15197_v22, %v13115_v45  ;;  %v12699_v34 = vld [vmem:[#allocation11 + $0xa0] sm:$0xf]  ;;  %v5413_v19 = vsel %vm15895_vm0, 0, %v5412_v29  ;;  %v15157_v22 = vld [vmem:[#allocation11 + $0x2ac] sm:$0xf0] }
 0x2da   :  { %v4712_v25 = vadd.f32 %v16924_v62, %v4689_v43  ;;  %8850 = vmatpush.bf16.msrb.mxu2 %v12988_v40  ;;  %v12827_v41 = vld [vmem:[#allocation11 + $0x1a0] sm:$0xf]  ;;  %v12956_v27 = vor.u32 %v15157_v22, %v12955_v42  ;;  %5414 = vst [vmem:[#allocation4 + $0x80] sm:$0xcc] %v5413_v19 }
 0x2db   :  { %8873 = vmatpush.bf16.msrb.mxu3 %v13116_v23  ;;  %v13563_v19 = vld [vmem:[#allocation11 + $0x760] sm:$0xf] }
 0x2dc   :  { %v4735_v33 = vadd.f32 %v16926_v10, %v4712_v25  ;;  %v13099_v10 = vld [vmem:[#allocation11 + $0x3c0] sm:$0xf] }
 0x2dd   :  { %v16976_v25 = vld [vmem:[#allocation3 + $0x10] sm:$0xfc] }
 0x2de   :  { %v4755_v47 = vpop.f32.mrf.mxu0  ;;  %v4778_v24 = vpop.f32.mrf.mxu1 }
 0x2df   :  { %v4756_v31 = vadd.f32 %v4755_v47, %v4733_v28 }
 0x2e0   :  { %v4721_v57 = vpop.f32.mrf.mxu2 }
 0x2e1   :  { %4948 = vmatmul.bf16.gmra.mxu0 %v18789_v30  ;;  %4971 = vmatmul.bf16.gmra.mxu1 %v18790_v13  ;;  %v4744_v12 = vpop.f32.mrf.mxu3  ;;  %v4779_v37 = vadd.f32 %v4778_v24, %v4756_v31  ;;  %v15097_v30 = vld [vmem:[#allocation11 + $0xcc] sm:$0xf0]  ;;  %v12843_v13 = vld [vmem:[#allocation11 + $0x1c0] sm:$0xf] }
 0x2e2   :  { %v12716_v24 = vor.u32 %v15097_v30, %v12715_v3  ;;  %v15161_v57 = vld [vmem:[#allocation11 + $0x2cc] sm:$0xf0]  ;;  %v12844_v28 = vor.u32 %v15129_v44, %v12843_v13  ;;  %v4694_v3 = vadd.f32 %v16930_v0, %v4671_v53  ;;  %v4674_v30 = vadd.f32 %v16938_v56, %v16900_v63  ;;  %v12939_v44 = vld [vmem:[#allocation11 + $0x280] sm:$0xf] }
 0x2e3   :  { %v12972_v43 = vor.u32 %v15161_v57, %v12971_v52  ;;  %v15193_v31 = vld [vmem:[#allocation11 + $0x3cc] sm:$0xf0] }
 0x2e4   :  { %8805 = vmatpush.bf16.msrb.mxu0 %v12716_v24  ;;  %8828 = vmatpush.bf16.msrb.mxu1 %v12844_v28  ;;  %v15121_v24 = vld [vmem:[#allocation11 + $0x18c] sm:$0xf0]  ;;  %v4697_v53 = vadd.f32 %v16940_v11, %v4674_v30 }
 0x2e5   :  { %4994 = vmatmul.bf16.gmra.mxu2 %v18792_v32  ;;  %v4692_v32 = vadd.f32 %v16920_v8, %v4669_v38  ;;  %v13083_v38 = vld [vmem:[#allocation11 + $0x3a0] sm:$0xf]  ;;  %v15153_v52 = vld [vmem:[#allocation11 + $0x28c] sm:$0xf0] }
 0x2e6   :  { %v4757_v55 = vpop.f32.mrf.mxu0  ;;  %v4780_v48 = vpop.f32.mrf.mxu1  ;;  %5017 = vmatmul.bf16.gmra.mxu3 %v18793_v54  ;;  %v13100_v54 = vor.u32 %v15193_v31, %v13099_v10  ;;  %8851 = vmatpush.bf16.msrb.mxu2 %v12972_v43  ;;  %v12940_v43 = vor.u32 %v15153_v52, %v12939_v44  ;;  %v13067_v10 = vld [vmem:[#allocation11 + $0x380] sm:$0xf]  ;;  %v15185_v31 = vld [vmem:[#allocation11 + $0x38c] sm:$0xf0] }
 0x2e7   :  { %v4758_v50 = vadd.f32 %v4757_v55, %v4735_v33  ;;  %v15093_v55 = vld [vmem:[#allocation11 + $0xac] sm:$0xf0]  ;;  %v4715_v20 = vadd.f32 %v16934_v17, %v4692_v32  ;;  %v4717_v32 = vadd.f32 %v16944_v5, %v4694_v3  ;;  %v12779_v44 = vld [vmem:[#allocation11 + $0x140] sm:$0xf] }
 0x2e8   :  { %v4801_v62 = vpop.f32.mrf.mxu2  ;;  %v12700_v8 = vor.u32 %v15093_v55, %v12699_v34  ;;  %8874 = vmatpush.bf16.msrb.mxu3 %v13100_v54  ;;  %v15089_v33 = vld [vmem:[#allocation11 + $0x8c] sm:$0xf0]  ;;  %v13068_v54 = vor.u32 %v15185_v31, %v13067_v10  ;;  %v12667_v55 = vld [vmem:[#allocation11 + $0x60] sm:$0xf] }
 0x2e9   :  { %v4824_v51 = vpop.f32.mrf.mxu3  ;;  %v4802_v47 = vadd.f32 %v4801_v62, %v4779_v37  ;;  %v15125_v37 = vld [vmem:[#allocation11 + $0x1ac] sm:$0xf0]  ;;  %v4781_v40 = vadd.f32 %v4780_v48, %v4758_v50  ;;  %v4738_v48 = vadd.f32 %v16936_v7, %v4715_v20  ;;  %v5166_v7 = vld [vmem:[#allocation4 + $0x80] sm:$0x33]  ;;  %v4740_v22 = vadd.f32 %v16946_v60, %v4717_v32  ;;  %v13035_v31 = vld [vmem:[#allocation11 + $0x340] sm:$0xf] }
 0x2ea   :  { %v12828_v45 = vor.u32 %v15125_v37, %v12827_v41  ;;  %v15189_v62 = vld [vmem:[#allocation11 + $0x3ac] sm:$0xf0]  ;;  %8806 = vmatpush.bf16.msrb.mxu0 %v12700_v8  ;;  %8852 = vmatpush.bf16.msrb.mxu2 %v12956_v27  ;;  %v5167_v20 = vsel %vm15866_vm2, 0, %v5166_v7  ;;  %v12795_v8 = vld [vmem:[#allocation11 + $0x160] sm:$0xf] }
 0x2eb   :  { %v4825_v12 = vadd.f32 %v4824_v51, %v4802_v47  ;;  %v5204_v51 = vmax.f32 %v16976_v25, 0.0  ;;  %v13084_v61 = vor.u32 %v15189_v62, %v13083_v38  ;;  %v12811_v47 = vld [vmem:[#allocation11 + $0x180] sm:$0xf]  ;;  %v15563_v25 = vld [vmem:[#allocation3 + $0x78] sm:$0xff]  ;;  %v15085_v5 = vld [vmem:[#allocation11 + $0x6c] sm:$0xf0] }
 0x2ec   :  { %8829 = vmatpush.bf16.msrb.mxu1 %v12828_v45  ;;  %v12812_v28 = vor.u32 %v15121_v24, %v12811_v47  ;;  %v5209_v0 = vmax.f32 %v15563_v25, 0.0  ;;  %v15117_v41 = vld [vmem:[#allocation11 + $0x16c] sm:$0xf0]  ;;  %v12668_v42 = vor.u32 %v15085_v5, %v12667_v55  ;;  %v13051_v45 = vld [vmem:[#allocation11 + $0x360] sm:$0xf] }
 0x2ed   :  { %5117 = vst [vmem:[#allocation3 + $0x48] sm:$0xff] %v4825_v12  ;;  %8875 = vmatpush.bf16.msrb.mxu3 %v13084_v61  ;;  %v17011_v47 = vld [vmem:[#allocation3 + $0x18] sm:$0x3]  ;;  %v15081_v24 = vld [vmem:[#allocation11 + $0x4c] sm:$0xf0] }
 0x2ee   :  { %v16972_v2 = vpop.f32.mrf.mxu0  ;;  %v16974_v49 = vpop.f32.mrf.mxu1  ;;  %8853 = vmatpush.bf16.msrb.mxu2 %v12940_v43  ;;  %5168 = vst [vmem:[#allocation4 + $0x80] sm:$0x33] %v5167_v20  ;;  %v15177_v7 = vld [vmem:[#allocation11 + $0x34c] sm:$0xf0]  ;;  %v5313_v25 = vld [vmem:[#allocation4 + $0x8] sm:$0xee] }
 0x2ef   :  { %v4761_v56 = vadd.f32 %v16972_v2, %v4738_v48  ;;  %v17013_v48 = vld [vmem:[#allocation3 + $0x18] sm:$0xc0]  ;;  %v15077_v20 = vld [vmem:[#allocation11 + $0x2c] sm:$0xf0] }
 0x2f0   :  { %v4803_v17 = vpop.f32.mrf.mxu2  ;;  %8830 = vmatpush.bf16.msrb.mxu1 %v12812_v28  ;;  %v15145_v28 = vld [vmem:[#allocation11 + $0x24c] sm:$0xf0] }
 0x2f1   :  { %5030 = vmatmul.bf16.vlgmr.msra.gmra.mxu0 %v16249_v36  ;;  %5053 = vmatmul.bf16.vlgmr.msra.gmra.mxu1 %v16253_v6  ;;  %v4826_v23 = vpop.f32.mrf.mxu3  ;;  %v4804_v36 = vadd.f32 %v4803_v17, %v4781_v40  ;;  %v12683_v6 = vld [vmem:[#allocation11 + $0x80] sm:$0xf]  ;;  %v4784_v38 = vadd.f32 %v16974_v49, %v4761_v56  ;;  %v15109_v5 = vld [vmem:[#allocation11 + $0x12c] sm:$0xf0] }
 0x2f2   :  { %v12684_v13 = vor.u32 %v15089_v33, %v12683_v6  ;;  %8876 = vmatpush.bf16.msrb.mxu3 %v13068_v54  ;;  %v12923_v40 = vld [vmem:[#allocation11 + $0x260] sm:$0xf] }
 0x2f3   :  { %v4827_v57 = vadd.f32 %v4826_v23, %v4804_v36  ;;  %v15181_v23 = vld [vmem:[#allocation11 + $0x36c] sm:$0xf0]  ;;  %v12651_v33 = vld [vmem:[#allocation11 + $0x40] sm:$0xf] }
 0x2f4   :  { %v5190_v63 = vld [vmem:[#allocation3 + $0x48] sm:$0xfc]  ;;  %8807 = vmatpush.bf16.msrb.mxu0 %v12684_v13  ;;  %v13052_v49 = vor.u32 %v15181_v23, %v13051_v45  ;;  %v12635_v56 = vld [vmem:[#allocation11 + $0x20] sm:$0xf] }
 0x2f5   :  { %v5205_v29 = vmax.f32 %v5190_v63, 0.0  ;;  %v5210_v34 = vmax.f32 %v4827_v57, 0.0  ;;  %5076 = vmatmul.bf16.vlgmr.msra.gmra.mxu2 %v16272_v35  ;;  %v12796_v35 = vor.u32 %v15117_v41, %v12795_v8  ;;  %v15113_v57 = vld [vmem:[#allocation11 + $0x14c] sm:$0xf0]  ;;  %v5214_v8 = vmax.f32 %v17011_v47, 0.0 }
 0x2f6   :  { %v4762_v12 = vpop.f32.mrf.mxu0  ;;  %v16991_v50 = vpop.f32.mrf.mxu1  ;;  %5099 = vmatmul.bf16.vlgmr.msra.gmra.mxu3 %v18778_v4  ;;  %v15149_v4 = vld [vmem:[#allocation11 + $0x26c] sm:$0xf0] }
 0x2f7   :  { %v17000_v2 = vpack.c.bf16 %v5205_v29, %v5204_v51  ;;  %v17002_v37 = vpack.c.bf16 %v5210_v34, %v5209_v0  ;;  %v12924_v17 = vor.u32 %v15149_v4, %v12923_v40  ;;  %v4720_v51 = vadd.f32 %v16952_v18, %v4697_v53  ;;  %8831 = vmatpush.bf16.msrb.mxu1 %v12796_v35  ;;  %v12763_v53 = vld [vmem:[#allocation11 + $0x120] sm:$0xf]  ;;  %v15141_v35 = vld [vmem:[#allocation11 + $0x22c] sm:$0xf0] }
 0x2f8   :  { %v4806_v11 = vpop.f32.mrf.mxu2  ;;  %8808 = vmatpush.bf16.msrb.mxu0 %v12668_v42  ;;  %v4763_v60 = vadd.f32 %v4762_v12, %v4740_v22  ;;  %8877 = vmatpush.bf16.msrb.mxu3 %v13052_v49  ;;  %v12907_v12 = vld [vmem:[#allocation11 + $0x240] sm:$0xf]  ;;  %v12652_v29 = vor.u32 %v15081_v24, %v12651_v33  ;;  %v12780_v34 = vor.u32 %v15113_v57, %v12779_v44  ;;  %v15105_v44 = vld [vmem:[#allocation11 + $0x10c] sm:$0xf0] }
 0x2f9   :  { %v4829_v62 = vpop.f32.mrf.mxu3  ;;  %v5234_v27 = vshrl.u32 %v17000_v2, 16  ;;  %v5258_v61 = vshrl.u32 %v17002_v37, 16  ;;  %5335 = vst [vmem:[#allocation4 + $0x58] sm:$0xff] %v17002_v37  ;;  %v5237_v36 = vshll.u32 %v17000_v2, 16  ;;  %v4807_v6 = vadd.f32 %v4806_v11, %v4784_v38  ;;  %8854 = vmatpush.bf16.msrb.mxu2 %v12924_v17  ;;  %v12891_v42 = vld [vmem:[#allocation11 + $0x220] sm:$0xf] }
 0x2fa   :  { %v4743_v43 = vadd.f32 %v16954_v21, %v4720_v51  ;;  %v5261_v10 = vshll.u32 %v17002_v37, 16  ;;  %v4786_v63 = vadd.f32 %v16991_v50, %v4763_v60  ;;  %v17034_v21 = vld [vmem:[#allocation4 + $0x20] sm:$0x33]  ;;  %v12908_v55 = vor.u32 %v15145_v28, %v12907_v12  ;;  %v15564_v40 = vld [vmem:[#allocation3 + $0x30] sm:$0xff]  ;;  %v15173_v11 = vld [vmem:[#allocation11 + $0x32c] sm:$0xf0] }
 0x2fb   :  { %v17017_v18 = vrot.slane %v5234_v27, 7  ;;  %v17021_v3 = vrot.slane %v5258_v61, 7  ;;  %v4830_v52 = vadd.f32 %v4829_v62, %v4807_v6  ;;  %v5474_v50 = vmax.f32 %v17013_v48, 0.0  ;;  %8832 = vmatpush.bf16.msrb.mxu1 %v12780_v34  ;;  %v13019_v38 = vld [vmem:[#allocation11 + $0x320] sm:$0xf] }
 0x2fc   :  { %v5479_v4 = vmax.f32 %v15564_v40, 0.0  ;;  %8809 = vmatpush.bf16.msrb.mxu0 %v12652_v29  ;;  %v5152_v62 = vsel %vm15725_vm6, 0, %v17034_v21  ;;  %v12636_v17 = vor.u32 %v15077_v20, %v12635_v56  ;;  %v12764_v23 = vor.u32 %v15109_v5, %v12763_v53  ;;  %v12619_v51 = vld [vmem:[#allocation11] sm:$0xf]  ;;  %v15073_v6 = vld [vmem:[#allocation11 + $0xc] sm:$0xf0] }
 0x2fd   :  { %v5239_v0 = vor.u32 %v5237_v36, %v17017_v18  ;;  %v5256_v32 = vrot.slane %v17017_v18, 4  ;;  %5127 = vst [vmem:[#allocation3 + $0x68] sm:$0xff] %v4830_v52  ;;  %v5263_v54 = vor.u32 %v5261_v10, %v17021_v3  ;;  %8855 = vmatpush.bf16.msrb.mxu2 %v12908_v55  ;;  %v12747_v60 = vld [vmem:[#allocation11 + $0x100] sm:$0xf]  ;;  %v13020_v24 = vor.u32 %v15173_v11, %v13019_v38  ;;  %v15137_v57 = vld [vmem:[#allocation11 + $0x20c] sm:$0xf0] }
 0x2fe   :  { %v4765_v30 = vpop.f32.mrf.mxu0  ;;  %v17023_v13 = vpop.f32.mrf.mxu1  ;;  %v12875_v52 = vld [vmem:[#allocation11 + $0x200] sm:$0xf]  ;;  %v12748_v34 = vor.u32 %v15105_v44, %v12747_v60  ;;  %5153 = vst [vmem:[#allocation4 + $0x20] sm:$0x33] %v5152_v62  ;;  %v5580_v11 = vld [vmem:[#allocation4 + $0x80] sm:$0x88] }
 0x2ff   :  { %v4766_v22 = vadd.f32 %v4765_v30, %v4743_v43  ;;  %v5314_v33 = vsel %vm15819_vm7, %v5239_v0, %v5313_v25  ;;  %v12892_v30 = vor.u32 %v15141_v35, %v12891_v42  ;;  %v5264_v28 = vsel %vm16154_vm12, %v5256_v32, %v5263_v54  ;;  %v13003_v43 = vld [vmem:[#allocation11 + $0x300] sm:$0xf]  ;;  %8833 = vmatpush.bf16.msrb.mxu1 %v12764_v23  ;;  %v5436_v32 = vld [vmem:[#allocation4 + $0xf8] sm:$0xcc] }
 0x300   :  { %5315 = vst [vmem:[#allocation4 + $0x8] sm:$0xee] %v5314_v33  ;;  %v12620_v25 = vor.u32 %v15073_v6, %v12619_v51  ;;  %8810 = vmatpush.bf16.msrb.mxu0 %v12636_v17  ;;  %v12876_v55 = vor.u32 %v15137_v57, %v12875_v52  ;;  %v5421_v49 = vld [vmem:[#allocation4 + $0x98] sm:$0xcc]  ;;  %v5283_v33 = vrot.slane %v17021_v3, 4 }
 0x301   :  { %5035 = vmatmul.bf16.gmra.mxu0 %v18779_v16  ;;  %5058 = vmatmul.bf16.gmra.mxu1 %v18780_v39  ;;  %v4808_v16 = vpop.f32.mrf.mxu2  ;;  %v4831_v41 = vpop.f32.mrf.mxu3  ;;  %v13036_v39 = vor.u32 %v15177_v7, %v13035_v31  ;;  %v15169_v31 = vld [vmem:[#allocation11 + $0x30c] sm:$0xf0]  ;;  %v4789_v21 = vadd.f32 %v17023_v13, %v4766_v22  ;;  %5320 = vst [vmem:[#allocation4 + $0x44] sm:$0xff] %v5264_v28  ;;  %v5437_v13 = vsel %vm15990_vm13, 0, %v5436_v32  ;;  %v5346_v28 = vrot.slane %v5234_v27, 4 }
 0x302   :  { %v4809_v45 = vadd.f32 %v4808_v16, %v4786_v63  ;;  %8856 = vmatpush.bf16.msrb.mxu2 %v12892_v30  ;;  %v13004_v20 = vor.u32 %v15169_v31, %v13003_v43  ;;  %5438 = vst [vmem:[#allocation4 + $0xf8] sm:$0xcc] %v5437_v13  ;;  %v5347_v43 = vrot.slane %v5237_v36, 5  ;;  %v17104_v31 = vrot.slane %v5261_v10, 5  ;;  %v5157_v27 = vld [vmem:[#allocation4 + $0x30] sm:$0x33] }
 0x303   :  { %8878 = vmatpush.bf16.msrb.mxu3 %v13036_v39  ;;  %8834 = vmatpush.bf16.msrb.mxu1 %v12748_v34  ;;  %5332 = vst [vmem:[#allocation4 + $0x1c] sm:$0xee] %v17000_v2  ;;  %v13371_v36 = vld [vmem:[#allocation11 + $0x5e0] sm:$0xf]  ;;  %v15261_v10 = vld [vmem:[#allocation11 + $0x5ec] sm:$0xf0] }
 0x304   :  { %v4832_v47 = vadd.f32 %v4831_v41, %v4809_v45  ;;  %v5200_v7 = vld [vmem:[#allocation3 + $0x68] sm:$0x3]  ;;  %v5460_v63 = vld [vmem:[#allocation3 + $0x68] sm:$0xc0]  ;;  %v5175_v41 = vld [vmem:[#allocation4 + $0x98] sm:$0x33]  ;;  %8811 = vmatpush.bf16.msrb.mxu0 %v12620_v25  ;;  %v5348_v37 = vor.u32 %v5347_v43, %v5346_v28 }
 0x305   :  { %5081 = vmatmul.bf16.gmra.mxu2 %v16308_v46  ;;  %v5215_v0 = vmax.f32 %v5200_v7, 0.0  ;;  %v5475_v29 = vmax.f32 %v5460_v63, 0.0  ;;  %v5176_v62 = vsel %vm15866_vm2, 0, %v5175_v41  ;;  %v5363_v7 = vrot.slane %v5258_v61, 4  ;;  %v15293_v34 = vld [vmem:[#allocation11 + $0x6ec] sm:$0xf0] }
 0x306   :  { %v4767_v48 = vpop.f32.mrf.mxu0  ;;  %v4790_v18 = vpop.f32.mrf.mxu1  ;;  %v5480_v56 = vmax.f32 %v4832_v47, 0.0  ;;  %5104 = vmatmul.bf16.gmra.mxu3 %v16310_v14  ;;  %8857 = vmatpush.bf16.msrb.mxu2 %v12876_v55  ;;  %5177 = vst [vmem:[#allocation4 + $0x98] sm:$0x33] %v5176_v62  ;;  %v13627_v55 = vld [vmem:[#allocation11 + $0x7e0] sm:$0xf] }
 0x307   :  { %8879 = vmatpush.bf16.msrb.mxu3 %v13020_v24  ;;  %v17055_v46 = vpack.c.bf16 %v5215_v0, %v5214_v8  ;;  %v17057_v14 = vpack.c.bf16 %v5475_v29, %v5474_v50  ;;  %v5325_v48 = vld [vmem:[#allocation4 + $0x80] sm:$0x33]  ;;  %v5364_v61 = vor.u32 %v5363_v7, %v17104_v31  ;;  %v13372_v0 = vor.u32 %v15261_v10, %v13371_v36  ;;  %v13499_v29 = vld [vmem:[#allocation11 + $0x6e0] sm:$0xf]  ;;  %v15325_v13 = vld [vmem:[#allocation11 + $0x7ec] sm:$0xf0] }
 0x308   :  { %v17051_v54 = vpack.c.bf16 %v5480_v56, %v5479_v4  ;;  %v12499_v41 = vld [vmem:[#allocation4] sm:$0xf]  ;;  %v13355_v18 = vld [vmem:[#allocation11 + $0x5c0] sm:$0xf]  ;;  %v15049_v28 = vld [vmem:[#allocation4 + $0x40] sm:$0xf0] }
 0x309   :  { %v4811_v5 = vpop.f32.mrf.mxu2  ;;  %v4834_v16 = vpop.f32.mrf.mxu3  ;;  %v5285_v35 = vshrl.u32 %v17055_v46, 16  ;;  %v5500_v40 = vshll.u32 %v17057_v14, 16  ;;  %v5517_v4 = vshrl.u32 %v17057_v14, 16  ;;  %v5288_v23 = vshll.u32 %v17055_v46, 16  ;;  %5338 = vst [vmem:[#allocation4 + $0x94] sm:$0x11] %v17055_v46  ;;  %8919 = vmatpush.bf16.msra.mxu1 %v13372_v0 }
 0x30a   :  { %v5522_v39 = vshrl.u32 %v17051_v54, 16  ;;  %5602 = vst [vmem:[#allocation4 + $0xd0] sm:$0xff] %v17051_v54  ;;  %v4812_v42 = vadd.f32 %v4811_v5, %v4789_v21  ;;  %v5525_v50 = vshll.u32 %v17051_v54, 16  ;;  %v5158_v5 = vsel %vm15725_vm6, 0, %v5157_v27  ;;  %v12501_v62 = vld [vmem:[#allocation4 + $0x3c] sm:$0xf0] }
 0x30b   :  { %8880 = vmatpush.bf16.msrb.mxu3 %v13004_v20  ;;  %v5287_v17 = vrot.slane %v5285_v35, 7  ;;  %v12495_v51 = vrot.slane %v5517_v4, 11  ;;  %v5581_v30 = vsel %vm15946_vm15, %v5500_v40, %v5580_v11  ;;  %v13500_v20 = vor.u32 %v15293_v34, %v13499_v29  ;;  %v15041_v11 = vld [vmem:[#allocation4 + $0x4] sm:$0xf]  ;;  %5159 = vst [vmem:[#allocation4 + $0x30] sm:$0x33] %v5158_v5 }
 0x30c   :  { %v17067_v8 = vrot.slane %v5522_v39, 7  ;;  %v4835_v45 = vadd.f32 %v4834_v16, %v4812_v42  ;;  %5582 = vst [vmem:[#allocation4 + $0x80] sm:$0x88] %v5581_v30  ;;  %v13628_v42 = vor.u32 %v15325_v13, %v13627_v55  ;;  %v17129_v9 = vrot.slane %v5288_v23, 5  ;;  %v5592_v30 = vld [vmem:[#allocation4 + $0xf8] sm:$0xff] }
 0x30d   :  { %v5290_v47 = vor.u32 %v5288_v23, %v5287_v17  ;;  %8942 = vmatpush.bf16.msra.mxu2 %v13500_v20  ;;  %v17123_v17 = vrot.slane %v5348_v37, 4  ;;  %v15042_v43 = vld [vmem:[#allocation4 + $0xc] sm:$0xf]  ;;  %v12509_v7 = vld [vmem:[#allocation4 + $0x44] sm:$0xf0] }
 0x30e   :  { %v4847_v22 = vpop.f32.mrf.mxu0  ;;  %v4870_v38 = vpop.f32.mrf.mxu1  ;;  %v5527_v6 = vor.u32 %v5525_v50, %v17067_v8  ;;  %5137 = vst [vmem:[#allocation3 + $0xa8] sm:$0xff] %v4835_v45  ;;  %v17120_v45 = vld [vmem:[#allocation4 + $0x110] sm:$0xcc]  ;;  %v13339_v36 = vld [vmem:[#allocation11 + $0x5a0] sm:$0xf] }
 0x30f   :  { %v4871_v60 = vadd.f32 %v4870_v38, %v4847_v22  ;;  %v5291_v3 = vsel %vm16154_vm12, %v5283_v33, %v5290_v47  ;;  %8965 = vmatpush.bf16.msra.mxu3 %v13628_v42  ;;  %v5446_v23 = vsel %vm15990_vm13, 0, %v17120_v45  ;;  %v13467_v0 = vld [vmem:[#allocation11 + $0x6a0] sm:$0xf]  ;;  %v15285_v29 = vld [vmem:[#allocation11 + $0x6ac] sm:$0xf0] }
 0x310   :  { %v5528_v24 = vsel %vm16154_vm12, %v12495_v51, %v5527_v6  ;;  %v5326_v57 = vsel %vm15725_vm6, %v5291_v3, %v5325_v48  ;;  %v17125_v51 = vrot.slane %v5364_v61, 4  ;;  %v5550_v6 = vrot.slane %v17067_v8, 4  ;;  %v15253_v61 = vld [vmem:[#allocation11 + $0x5ac] sm:$0xf0]  ;;  %v13595_v13 = vld [vmem:[#allocation11 + $0x7a0] sm:$0xf] }
 0x311   :  { %5040 = vmatmul.bf16.gmra.mxu0 %v16314_v58  ;;  %5063 = vmatmul.bf16.gmra.mxu1 %v16316_v59  ;;  %v4813_v44 = vpop.f32.mrf.mxu2  ;;  %v4836_v52 = vpop.f32.mrf.mxu3  ;;  %5587 = vst [vmem:[#allocation4 + $0xbc] sm:$0xff] %v5528_v24  ;;  %v5422_v58 = vsel %vm15895_vm0, 0, %v5421_v49  ;;  %v5469_v59 = vld [vmem:[#allocation3 + $0x8] sm:$0x3f]  ;;  %v17144_v3 = vor.u32 %v15041_v11, %v12501_v62  ;;  %v13340_v55 = vor.u32 %v15253_v61, %v13339_v36  ;;  %v15317_v5 = vld [vmem:[#allocation11 + $0x7ac] sm:$0xf0] }
 0x312   :  { %5327 = vst [vmem:[#allocation4 + $0x80] sm:$0x33] %v5326_v57  ;;  %v5484_v25 = vmax.f32 %v5469_v59, 0.0  ;;  %v15257_v44 = vld [vmem:[#allocation11 + $0x5cc] sm:$0xf0]  ;;  %v13468_v20 = vor.u32 %v15285_v29, %v13467_v0  ;;  %v5351_v62 = vsel %vm18758_vm9, %v17123_v17, %v17104_v31 }
 0x313   :  { %5423 = vst [vmem:[#allocation4 + $0x98] sm:$0xcc] %v5422_v58  ;;  %v13483_v52 = vld [vmem:[#allocation11 + $0x6c0] sm:$0xf]  ;;  %v15289_v58 = vld [vmem:[#allocation11 + $0x6cc] sm:$0xf0] }
 0x314   :  { %5599 = vst [vmem:[#allocation4 + $0x94] sm:$0x88] %v17057_v14  ;;  %v12507_v57 = vld [vmem:[#allocation4 + $0x8] sm:$0xf]  ;;  %v13484_v27 = vor.u32 %v15289_v58, %v13483_v52  ;;  %v13451_v42 = vld [vmem:[#allocation11 + $0x680] sm:$0xf]  ;;  %v17168_v58 = vor.u32 %v15042_v43, %v12509_v7 }
 0x315   :  { %v5470_v21 = vld [vmem:[#allocation3 + $0xa8] sm:$0x3f]  ;;  %5086 = vmatmul.bf16.gmra.mxu2 %v16320_v1  ;;  %v17166_v52 = vor.u32 %v15049_v28, %v12507_v57  ;;  %5447 = vst [vmem:[#allocation4 + $0x110] sm:$0xcc] %v5446_v23  ;;  %v5427_v57 = vld [vmem:[#allocation4 + $0xa8] sm:$0xcc]  ;;  %v5367_v23 = vsel %vm18758_vm9, %v17125_v51, %v17129_v9 }
 0x316   :  { %v17108_v63 = vpop.f32.mrf.mxu0  ;;  %v17110_v56 = vpop.f32.mrf.mxu1  ;;  %v5485_v2 = vmax.f32 %v5470_v21, 0.0  ;;  %5109 = vmatmul.bf16.gmra.mxu3 %v16322_v26  ;;  %v15048_v26 = vld [vmem:[#allocation4 + $0x38] sm:$0xf0]  ;;  %v13356_v21 = vor.u32 %v15257_v44, %v13355_v18  ;;  %8943 = vmatpush.bf16.msra.mxu2 %v13484_v27  ;;  %v5613_v18 = vrot.slane %v5517_v4, 4  ;;  %v5614_v44 = vrot.slane %v5500_v40, 5  ;;  %18804 = vst [vmem:[#allocation33_spill] sm:$0xff] %v17168_v58 }
 0x317   :  { %v17142_v8 = vor.u32 %v15048_v26, %v12499_v41  ;;  %v4873_v10 = vadd.f32 %v17110_v56, %v17108_v63  ;;  %v13596_v56 = vor.u32 %v15317_v5, %v13595_v13  ;;  %v13323_v41 = vld [vmem:[#allocation11 + $0x580] sm:$0xf]  ;;  %v15249_v26 = vld [vmem:[#allocation11 + $0x58c] sm:$0xf0]  ;;  %18803 = vst [vmem:[#allocation32_spill] sm:$0xff] %v17166_v52  ;;  %v5428_v29 = vsel %vm15895_vm0, 0, %v5427_v57 }
 0x318   :  { %v17116_v32 = vpack.c.bf16 %v5485_v2, %v5484_v25  ;;  %v13611_v25 = vld [vmem:[#allocation11 + $0x7c0] sm:$0xf]  ;;  %v15321_v2 = vld [vmem:[#allocation11 + $0x7cc] sm:$0xf0]  ;;  %8920 = vmatpush.bf16.msra.mxu1 %v13356_v21  ;;  %v13324_v21 = vor.u32 %v15249_v26, %v13323_v41  ;;  %5398 = vst [vmem:[#allocation4 + $0x6c] sm:$0xff] %v5367_v23  ;;  %v5617_v13 = vrot.slane %v5525_v50, 5 }
 0x319   :  { %v4893_v16 = vpop.f32.mrf.mxu2  ;;  %v4916_v1 = vpop.f32.mrf.mxu3  ;;  %18800 = vst [vmem:[#allocation31_spill] sm:$0xff] %v17142_v8  ;;  %v13612_v37 = vor.u32 %v15321_v2, %v13611_v25  ;;  %v13307_v28 = vld [vmem:[#allocation11 + $0x560] sm:$0xf]  ;;  %v15245_v43 = vld [vmem:[#allocation11 + $0x56c] sm:$0xf0]  ;;  %v5615_v2 = vor.u32 %v5614_v44, %v5613_v18  ;;  %v5630_v5 = vrot.slane %v5522_v39, 4 }
 0x31a   :  { %v5552_v22 = vshrl.u32 %v17116_v32, 16  ;;  %v4894_v38 = vadd.f32 %v4893_v16, %v4871_v60  ;;  %v5555_v60 = vshll.u32 %v17116_v32, 16  ;;  %v5181_v16 = vld [vmem:[#allocation4 + $0xa8] sm:$0x33]  ;;  %8944 = vmatpush.bf16.msra.mxu2 %v13468_v20  ;;  %5605 = vst [vmem:[#allocation4 + $0x10c] sm:$0x77] %v17116_v32  ;;  %v13308_v61 = vor.u32 %v15245_v43, %v13307_v28 }
 0x31b   :  { %8966 = vmatpush.bf16.msra.mxu3 %v13612_v37  ;;  %v5182_v40 = vsel %vm15866_vm2, 0, %v5181_v16  ;;  %v13435_v7 = vld [vmem:[#allocation11 + $0x660] sm:$0xf]  ;;  %v15277_v36 = vld [vmem:[#allocation11 + $0x66c] sm:$0xf0] }
 0x31c   :  { %v5554_v49 = vrot.slane %v5552_v22, 7  ;;  %v17135_v33 = vadd.f32 %v4916_v1, %v4894_v38  ;;  %8921 = vmatpush.bf16.msra.mxu1 %v13340_v55  ;;  %v12559_v37 = vld [vmem:[#allocation4 + $0x78] sm:$0xf]  ;;  %v13436_v0 = vor.u32 %v15277_v36, %v13435_v7  ;;  %v15063_v20 = vld [vmem:[#allocation4 + $0xb0] sm:$0xf0]  ;;  %v5633_v28 = vrot.slane %v5555_v60, 5 }
 0x31d   :  { %v15056_v51 = vld [vmem:[#allocation4 + $0x7c] sm:$0xf]  ;;  %5183 = vst [vmem:[#allocation4 + $0xa8] sm:$0x33] %v5182_v40  ;;  %v13291_v26 = vld [vmem:[#allocation11 + $0x540] sm:$0xf]  ;;  %v17199_v50 = vor.u32 %v15063_v20, %v12559_v37 }
 0x31e   :  { %v4852_v47 = vpop.f32.mrf.mxu0  ;;  %v4875_v48 = vpop.f32.mrf.mxu1  ;;  %v5557_v59 = vor.u32 %v5555_v60, %v5554_v49  ;;  %v15281_v49 = vld [vmem:[#allocation11 + $0x68c] sm:$0xf0]  ;;  %5429 = vst [vmem:[#allocation4 + $0xa8] sm:$0xcc] %v5428_v29  ;;  %v13419_v45 = vld [vmem:[#allocation11 + $0x640] sm:$0xf] }
 0x31f   :  { %v17140_v24 = vadd.f32 %v4875_v48, %v4852_v47  ;;  %v13579_v47 = vld [vmem:[#allocation11 + $0x780] sm:$0xf]  ;;  %v15313_v48 = vld [vmem:[#allocation11 + $0x78c] sm:$0xf0]  ;;  %v13452_v4 = vor.u32 %v15281_v49, %v13451_v42  ;;  %8967 = vmatpush.bf16.msra.mxu3 %v13596_v56  ;;  %18806 = vst [vmem:[#allocation34_spill] sm:$0xff] %v17199_v50 }
 0x320   :  { %v5558_v34 = vsel %vm16154_vm12, %v5550_v6, %v5557_v59  ;;  %v13580_v14 = vor.u32 %v15313_v48, %v13579_v47  ;;  %8922 = vmatpush.bf16.msra.mxu1 %v13324_v21  ;;  %v15241_v42 = vld [vmem:[#allocation11 + $0x54c] sm:$0xf0]  ;;  %v13275_v18 = vld [vmem:[#allocation11 + $0x520] sm:$0xf]  ;;  %v5631_v21 = vor.u32 %v5630_v5, %v5617_v13  ;;  %v12567_v43 = vld [vmem:[#allocation4 + $0x80] sm:$0xf] }
 0x321   :  { %8812 = vmatmul.bf16.vlgmr.msrb.gmra.mxu0 %v17142_v8  ;;  %8835 = vmatmul.bf16.vlgmr.msrb.gmra.mxu1 %v17144_v3  ;;  %v4895_v1 = vpop.f32.mrf.mxu2  ;;  %v4918_v63 = vpop.f32.mrf.mxu3  ;;  %v17156_v38 = vsel %vm16024_vm11, %v5558_v34, %v5592_v30  ;;  %v5391_v30 = vld [vmem:[#allocation4 + $0x30] sm:$0xff]  ;;  %v13292_v39 = vor.u32 %v15241_v42, %v13291_v26  ;;  %v15305_v49 = vld [vmem:[#allocation11 + $0x74c] sm:$0xf0]  ;;  %v13531_v40 = vld [vmem:[#allocation11 + $0x720] sm:$0xf] }
 0x322   :  { %v4896_v6 = vadd.f32 %v4895_v1, %v4873_v10  ;;  %5594 = vst [vmem:[#allocation4 + $0xf8] sm:$0xff] %v17156_v38  ;;  %v5392_v25 = vsel %vm18761_vm1, %v5351_v62, %v5391_v30  ;;  %v15309_v10 = vld [vmem:[#allocation11 + $0x76c] sm:$0xf0]  ;;  %8945 = vmatpush.bf16.msra.mxu2 %v13452_v4  ;;  %v12561_v1 = vld [vmem:[#allocation4 + $0xb4] sm:$0xf0] }
 0x323   :  { %5393 = vst [vmem:[#allocation4 + $0x30] sm:$0xff] %v5392_v25  ;;  %8968 = vmatpush.bf16.msra.mxu3 %v13580_v14  ;;  %v13564_v9 = vor.u32 %v15309_v10, %v13563_v19  ;;  %v17201_v54 = vor.u32 %v15056_v51, %v12561_v1  ;;  %v15237_v44 = vld [vmem:[#allocation11 + $0x52c] sm:$0xf0]  ;;  %v13403_v30 = vld [vmem:[#allocation11 + $0x620] sm:$0xf] }
 0x324   :  { %v17171_v59 = vadd.f32 %v4918_v63, %v4896_v6  ;;  %v5616_v63 = vrot.slane %v5615_v2, 4  ;;  %8923 = vmatpush.bf16.msra.mxu1 %v13308_v61  ;;  %v13547_v6 = vld [vmem:[#allocation11 + $0x740] sm:$0xf]  ;;  %v15269_v14 = vld [vmem:[#allocation11 + $0x62c] sm:$0xf0]  ;;  %v13276_v23 = vor.u32 %v15237_v44, %v13275_v18 }
 0x325   :  { %8858 = vmatmul.bf16.vlgmr.msrb.gmra.mxu2 %v17166_v52  ;;  %v13548_v48 = vor.u32 %v15305_v49, %v13547_v6  ;;  %v15301_v57 = vld [vmem:[#allocation11 + $0x72c] sm:$0xf0]  ;;  %v13404_v27 = vor.u32 %v15269_v14, %v13403_v30  ;;  %v15057_v2 = vld [vmem:[#allocation4 + $0x84] sm:$0xf]  ;;  %v12569_v36 = vld [vmem:[#allocation4 + $0xbc] sm:$0xf0] }
 0x326   :  { %v17173_v31 = vpop.f32.mrf.mxu0  ;;  %v17175_v17 = vpop.f32.mrf.mxu1  ;;  %8881 = vmatmul.bf16.vlgmr.msrb.gmra.mxu3 %v17168_v58  ;;  %8946 = vmatpush.bf16.msra.mxu2 %v13436_v0  ;;  %v15064_v7 = vld [vmem:[#allocation4 + $0xb8] sm:$0xf0]  ;;  %v5618_v25 = vsel %vm18758_vm9, %v5616_v63, %v5617_v13  ;;  %v13532_v19 = vor.u32 %v15301_v57, %v13531_v40  ;;  %v5403_v10 = vld [vmem:[#allocation4 + $0xa8] sm:$0x11]  ;;  %v5632_v0 = vrot.slane %v5631_v21, 4  ;;  %v17225_v46 = vor.u32 %v15057_v2, %v12569_v36  ;;  %v15565_v6 = vld [vmem:[#allocation4 + $0xf0] sm:$0xff] }
 0x327   :  { %8969 = vmatpush.bf16.msra.mxu3 %v13564_v9  ;;  %v4878_v4 = vadd.f32 %v17175_v17, %v17173_v31  ;;  %v5404_v61 = vsel %vm16218_vm10, %v5285_v35, %v5403_v10  ;;  %v5661_v29 = vld [vmem:[#allocation4 + $0xa8] sm:$0xcc]  ;;  %v17217_v20 = vor.u32 %v15064_v7, %v12567_v43  ;;  %v15233_v32 = vld [vmem:[#allocation11 + $0x50c] sm:$0xf0]  ;;  %v6299_v49 = vunpack.c.l.b16 %v15565_v6  ;;  %v15187_v11 = vld [vmem:[#allocation11 + $0x3a4] sm:$0xf] }
 0x328   :  { %8924 = vmatpush.bf16.msra.mxu1 %v13292_v39  ;;  %5405 = vst [vmem:[#allocation4 + $0xa8] sm:$0x11] %v5404_v61  ;;  %v5662_v51 = vsel %vm15990_vm13, %v5618_v25, %v5661_v29  ;;  %v5634_v1 = vsel %vm18758_vm9, %v5632_v0, %v5633_v28  ;;  %v15297_v53 = vld [vmem:[#allocation11 + $0x70c] sm:$0xf0]  ;;  %v6301_v57 = vunpack.c.l.b16 %v17156_v38  ;;  %v14011_v2 = vld [vmem:[#allocation11 + $0xae0] sm:$0xf] }
 0x329   :  { %v4898_v34 = vpop.f32.mrf.mxu2  ;;  %v4921_v55 = vpop.f32.mrf.mxu3  ;;  %18808 = vst [vmem:[#allocation43_spill] sm:$0xff] %v17217_v20  ;;  %v14139_v36 = vld [vmem:[#allocation11 + $0xbe0] sm:$0xf]  ;;  %v15453_v10 = vld [vmem:[#allocation11 + $0xbec] sm:$0xf0]  ;;  %vm10293_vm10 = vcmask 1045504  }
 0x32a   :  { %v4899_v16 = vadd.f32 %v4898_v34, %v17140_v24  ;;  %v15273_v24 = vld [vmem:[#allocation11 + $0x64c] sm:$0xf0]  ;;  %v5451_v34 = vld [vmem:[#allocation4 + $0x120] sm:$0xcc]  ;;  %18809 = vst [vmem:[#allocation44_spill] sm:$0xff] %v17225_v46 }
 0x32b   :  { %v13420_v47 = vor.u32 %v15273_v24, %v13419_v45  ;;  %8970 = vmatpush.bf16.msra.mxu3 %v13548_v48  ;;  %v5452_v9 = vsel %vm15990_vm13, 0, %v5451_v34  ;;  %5663 = vst [vmem:[#allocation4 + $0xa8] sm:$0xcc] %v5662_v51  ;;  %v15043_v0 = vld [vmem:[#allocation4 + $0x14] sm:$0xf] }
 0x32c   :  { %v17195_v15 = vadd.f32 %v4921_v55, %v4899_v16  ;;  %v5643_v55 = vrot.slane %v5552_v22, 4  ;;  %8925 = vmatpush.bf16.msra.mxu1 %v13276_v23  ;;  %v13259_v16 = vld [vmem:[#allocation11 + $0x500] sm:$0xf]  ;;  %5668 = vst [vmem:[#allocation4 + $0xe4] sm:$0xff] %v5634_v1  ;;  %v12517_v29 = vld [vmem:[#allocation4 + $0x4c] sm:$0xf0] }
 0x32d   :  { %8947 = vmatpush.bf16.msra.mxu2 %v13420_v47  ;;  %v13387_v22 = vld [vmem:[#allocation11 + $0x600] sm:$0xf]  ;;  %v13260_v63 = vor.u32 %v15233_v32, %v13259_v16  ;;  %5453 = vst [vmem:[#allocation4 + $0x120] sm:$0xcc] %v5452_v9  ;;  %v6300_v47 = vunpack.c.h.b16 %v15565_v6  ;;  %v15417_v9 = vld [vmem:[#allocation11 + $0xacc] sm:$0xf0] }
 0x32e   :  { %v4857_v56 = vpop.f32.mrf.mxu0  ;;  %v4880_v41 = vpop.f32.mrf.mxu1  ;;  %v5644_v45 = vor.u32 %v5643_v55, %v5633_v28  ;;  %v13995_v51 = vld [vmem:[#allocation11 + $0xac0] sm:$0xf]  ;;  %v15449_v32 = vld [vmem:[#allocation11 + $0xbcc] sm:$0xf0] }
 0x32f   :  { %v17197_v62 = vadd.f32 %v4880_v41, %v4857_v56  ;;  %8971 = vmatpush.bf16.msra.mxu3 %v13532_v19  ;;  %v15265_v56 = vld [vmem:[#allocation11 + $0x60c] sm:$0xf0]  ;;  %v13515_v41 = vld [vmem:[#allocation11 + $0x700] sm:$0xf]  ;;  %v17240_v14 = vpack.c.b16 %v6300_v47, %v6300_v47  ;;  %v13996_v16 = vor.u32 %v15417_v9, %v13995_v51 }
 0x330   :  { %v13388_v26 = vor.u32 %v15265_v56, %v13387_v22  ;;  %v13516_v42 = vor.u32 %v15297_v53, %v13515_v41  ;;  %8926 = vmatpush.bf16.msra.mxu1 %v13260_v63  ;;  %v5645_v18 = vrot.slane %v5644_v45, 4  ;;  %v13979_v22 = vld [vmem:[#allocation11 + $0xaa0] sm:$0xf]  ;;  %v15413_v1 = vld [vmem:[#allocation11 + $0xaac] sm:$0xf0] }
 0x331   :  { %8817 = vmatmul.bf16.gmra.mxu0 %v17199_v50  ;;  %8840 = vmatmul.bf16.gmra.mxu1 %v17201_v54  ;;  %v4900_v31 = vpop.f32.mrf.mxu2  ;;  %v4923_v17 = vpop.f32.mrf.mxu3  ;;  %v14107_v56 = vld [vmem:[#allocation11 + $0xba0] sm:$0xf]  ;;  %v15445_v41 = vld [vmem:[#allocation11 + $0xbac] sm:$0xf0]  ;;  %v12523_v53 = vld [vmem:[#allocation4 + $0x18] sm:$0xf] }
 0x332   :  { %v4901_v37 = vadd.f32 %v4900_v31, %v4878_v4  ;;  %8948 = vmatpush.bf16.msra.mxu2 %v13404_v27  ;;  %v17238_v4 = vpack.c.b16 %v6299_v49, %v6299_v49  ;;  %v17248_v27 = vpack.c.b16 %v6301_v57, %v6301_v57  ;;  %v15044_v45 = vld [vmem:[#allocation4 + $0x1c] sm:$0xf]  ;;  %v13243_v47 = vld [vmem:[#allocation11 + $0x4e0] sm:$0xf] }
 0x333   :  { %8972 = vmatpush.bf16.msra.mxu3 %v13516_v42  ;;  %v15051_v42 = vld [vmem:[#allocation4 + $0x50] sm:$0xf0]  ;;  %v15409_v57 = vld [vmem:[#allocation11 + $0xa8c] sm:$0xf0] }
 0x334   :  { %v17223_v13 = vadd.f32 %v4923_v17, %v4901_v37  ;;  %18810 = vst [vmem:[#allocation54_spill] sm:$0xff] %v17238_v4  ;;  %v5673_v40 = vld [vmem:[#allocation4 + $0x120] sm:$0x77]  ;;  %v14140_v37 = vor.u32 %v15453_v10, %v14139_v36  ;;  %v15441_v28 = vld [vmem:[#allocation11 + $0xb8c] sm:$0xf0] }
 0x335   :  { %8863 = vmatmul.bf16.gmra.mxu2 %v17217_v20  ;;  %v5674_v43 = vsel %vm16294_vm5, %v5645_v18, %v5673_v40  ;;  %18812 = vst [vmem:[#allocation57_spill] sm:$0xff] %v17248_v27  ;;  %v13963_v18 = vld [vmem:[#allocation11 + $0xa80] sm:$0xf]  ;;  %v15405_v10 = vld [vmem:[#allocation11 + $0xa6c] sm:$0xf0] }
 0x336   :  { %v4859_v35 = vpop.f32.mrf.mxu0  ;;  %v4882_v5 = vpop.f32.mrf.mxu1  ;;  %8886 = vmatmul.bf16.gmra.mxu3 %v17225_v46  ;;  %8949 = vmatpush.bf16.msra.mxu2 %v13388_v26  ;;  %5675 = vst [vmem:[#allocation4 + $0x120] sm:$0x77] %v5674_v43  ;;  %v13980_v26 = vor.u32 %v15413_v1, %v13979_v22  ;;  %v13964_v43 = vor.u32 %v15409_v57, %v13963_v18 }
 0x337   :  { %9057 = vmatpush.bf16.msrb.mxu3 %v14140_v37  ;;  %v14123_v35 = vld [vmem:[#allocation11 + $0xbc0] sm:$0xf]  ;;  %v17266_v5 = vor.u32 %v15043_v0, %v12517_v29  ;;  %v15437_v29 = vld [vmem:[#allocation11 + $0xb6c] sm:$0xf0] }
 0x338   :  { %v14124_v63 = vor.u32 %v15449_v32, %v14123_v35  ;;  %v14075_v37 = vld [vmem:[#allocation11 + $0xb60] sm:$0xf]  ;;  %v12577_v32 = vld [vmem:[#allocation4 + $0xc4] sm:$0xf0] }
 0x339   :  { %v4903_v39 = vpop.f32.mrf.mxu2  ;;  %v4926_v24 = vpop.f32.mrf.mxu3  ;;  %v14076_v51 = vor.u32 %v15437_v29, %v14075_v37 }
 0x33a   :  { %v4904_v48 = vadd.f32 %v4903_v39, %v17197_v62  ;;  %v6302_v62 = vunpack.c.h.b16 %v17156_v38  ;;  %v15421_v38 = vld [vmem:[#allocation11 + $0xaec] sm:$0xf0]  ;;  %v12525_v39 = vld [vmem:[#allocation4 + $0x54] sm:$0xf0] }
 0x33b   :  { %v14012_v19 = vor.u32 %v15421_v38, %v14011_v2  ;;  %9058 = vmatpush.bf16.msrb.mxu3 %v14124_v63 }
 0x33c   :  { %v17232_v44 = vadd.f32 %v4926_v24, %v4904_v48  ;;  %v17250_v25 = vpack.c.b16 %v6302_v62, %v6302_v62  ;;  %v14108_v24 = vor.u32 %v15445_v41, %v14107_v56  ;;  %v15229_v48 = vld [vmem:[#allocation11 + $0x4ec] sm:$0xf0]  ;;  %v14091_v62 = vld [vmem:[#allocation11 + $0xb80] sm:$0xf] }
 0x33d   :  { %9034 = vmatpush.bf16.msrb.mxu2 %v14012_v19  ;;  %v13244_v40 = vor.u32 %v15229_v48, %v13243_v47  ;;  %v14092_v36 = vor.u32 %v15441_v28, %v14091_v62  ;;  %v13947_v19 = vld [vmem:[#allocation11 + $0xa60] sm:$0xf] }
 0x33e   :  { %v17234_v30 = vpop.f32.mrf.mxu0  ;;  %v17236_v21 = vpop.f32.mrf.mxu1  ;;  %18813 = vst [vmem:[#allocation58_spill] sm:$0xff] %v17250_v25  ;;  %v13948_v0 = vor.u32 %v15405_v10, %v13947_v19  ;;  %v15066_v56 = vld [vmem:[#allocation4 + $0xc8] sm:$0xf0] }
 0x33f   :  { %9059 = vmatpush.bf16.msrb.mxu3 %v14108_v24  ;;  %8896 = vmatpush.bf16.msra.mxu0 %v13244_v40  ;;  %v4940_v18 = vadd.f32 %v17234_v30, %v17135_v33  ;;  %v15225_v33 = vld [vmem:[#allocation11 + $0x4cc] sm:$0xf0]  ;;  %v13931_v30 = vld [vmem:[#allocation11 + $0xa40] sm:$0xf] }
 0x341   :  { %8822 = vmatmul.bf16.gmra.mxu0 %v17238_v4  ;;  %8845 = vmatmul.bf16.gmra.mxu1 %v17240_v14  ;;  %v4905_v7 = vpop.f32.mrf.mxu2  ;;  %v4928_v23 = vpop.f32.mrf.mxu3  ;;  %v4963_v62 = vadd.f32 %v17236_v21, %v4940_v18  ;;  %v14059_v21 = vld [vmem:[#allocation11 + $0xb40] sm:$0xf]  ;;  %v15221_v18 = vld [vmem:[#allocation11 + $0x4ac] sm:$0xf0] }
 0x342   :  { %9035 = vmatpush.bf16.msrb.mxu2 %v13996_v16  ;;  %v17273_v7 = vor.u32 %v15051_v42, %v12523_v53  ;;  %v17275_v23 = vor.u32 %v15044_v45, %v12525_v39  ;;  %v15058_v16 = vld [vmem:[#allocation4 + $0x8c] sm:$0xf]  ;;  %v15059_v42 = vld [vmem:[#allocation4 + $0x94] sm:$0xf]  ;;  %v12585_v45 = vld [vmem:[#allocation4 + $0xcc] sm:$0xf0] }
 0x343   :  { %9060 = vmatpush.bf16.msrb.mxu3 %v14092_v36  ;;  %v17291_v63 = vor.u32 %v15058_v16, %v12577_v32  ;;  %v17300_v24 = vor.u32 %v15059_v42, %v12585_v45  ;;  %v5714_v36 = vld [vmem:[#allocation4 + $0x108] sm:$0xff]  ;;  %v15433_v42 = vld [vmem:[#allocation11 + $0xb4c] sm:$0xf0] }
 0x344   :  { %18814 = vst [vmem:[#allocation35_spill] sm:$0xff] %v17273_v7  ;;  %v6305_v10 = vunpack.c.l.b16 %v5714_v36  ;;  %v13227_v16 = vld [vmem:[#allocation11 + $0x4c0] sm:$0xf] }
 0x345   :  { %8868 = vmatmul.bf16.gmra.mxu2 %v17248_v27  ;;  %18815 = vst [vmem:[#allocation36_spill] sm:$0xff] %v17275_v23 }
 0x346   :  { %v17252_v31 = vpop.f32.mrf.mxu0  ;;  %v17254_v17 = vpop.f32.mrf.mxu1  ;;  %8891 = vmatmul.bf16.gmra.mxu3 %v17250_v25  ;;  %9036 = vmatpush.bf16.msrb.mxu2 %v13980_v26  ;;  %18816 = vst [vmem:[#allocation37_spill] sm:$0xff] %v17291_v63  ;;  %v12583_v26 = vld [vmem:[#allocation4 + $0x90] sm:$0xf]  ;;  %v17315_v45 = vpack.c.b16 %v6305_v10, %v6305_v10 }
 0x347   :  { %9061 = vmatpush.bf16.msrb.mxu3 %v14076_v51  ;;  %v17298_v39 = vor.u32 %v15066_v56, %v12583_v26  ;;  %18818 = vst [vmem:[#allocation39_spill] sm:$0xff] %v17300_v24  ;;  %v4942_v37 = vadd.f32 %v17252_v31, %v17171_v59  ;;  %v13228_v56 = vor.u32 %v15225_v33, %v13227_v16  ;;  %v15401_v26 = vld [vmem:[#allocation11 + $0xa4c] sm:$0xf0]  ;;  %v14043_v16 = vld [vmem:[#allocation11 + $0xb20] sm:$0xf] }
 0x348   :  { %18819 = vst [vmem:[#allocation40_spill] sm:$0xff] %v17315_v45  ;;  %v15429_v33 = vld [vmem:[#allocation11 + $0xb2c] sm:$0xf0] }
 0x349   :  { %v17258_v60 = vpop.f32.mrf.mxu2  ;;  %v17260_v61 = vpop.f32.mrf.mxu3  ;;  %18817 = vst [vmem:[#allocation38_spill] sm:$0xff] %v17298_v39  ;;  %v4965_v59 = vadd.f32 %v17254_v17, %v4942_v37  ;;  %8897 = vmatpush.bf16.msra.mxu0 %v13228_v56  ;;  %v14027_v17 = vld [vmem:[#allocation11 + $0xb00] sm:$0xf] }
 0x34a   :  { %9037 = vmatpush.bf16.msrb.mxu2 %v13964_v43  ;;  %v4986_v19 = vadd.f32 %v17258_v60, %v4963_v62  ;;  %v14060_v60 = vor.u32 %v15433_v42, %v14059_v21  ;;  %v13915_v62 = vld [vmem:[#allocation11 + $0xa20] sm:$0xf]  ;;  %v15393_v21 = vld [vmem:[#allocation11 + $0xa0c] sm:$0xf0] }
 0x34b   :  { %v13195_v37 = vld [vmem:[#allocation11 + $0x480] sm:$0xf] }
 0x34c   :  { %v5009_v32 = vadd.f32 %v17260_v61, %v4986_v19  ;;  %v15397_v19 = vld [vmem:[#allocation11 + $0xa2c] sm:$0xf0]  ;;  %9062 = vmatpush.bf16.msrb.mxu3 %v14060_v60 }
 0x34d   :  { %v13916_v10 = vor.u32 %v15397_v19, %v13915_v62 }
 0x34e   :  { %v17262_v34 = vpop.f32.mrf.mxu0  ;;  %v17264_v55 = vpop.f32.mrf.mxu1  ;;  %9038 = vmatpush.bf16.msrb.mxu2 %v13948_v0  ;;  %v6306_v0 = vunpack.c.h.b16 %v5714_v36 }
 0x350   :  { %v17318_v36 = vpack.c.b16 %v6306_v0, %v6306_v0  ;;  %v15217_v0 = vld [vmem:[#allocation11 + $0x48c] sm:$0xf0] }
 0x351   :  { %8927 = vmatmul.bf16.vlgmr.msra.gmra.mxu1 %v17266_v5  ;;  %v17269_v6 = vpop.f32.mrf.mxu2  ;;  %v17271_v49 = vpop.f32.mrf.mxu3  ;;  %v13196_v56 = vor.u32 %v15217_v0, %v13195_v37 }
 0x352   :  { %18820 = vst [vmem:[#allocation41_spill] sm:$0xff] %v17318_v36  ;;  %v4988_v42 = vadd.f32 %v17269_v6, %v4965_v59 }
 0x354   :  { %v5011_v62 = vadd.f32 %v17271_v49, %v4988_v42  ;;  %v15053_v49 = vld [vmem:[#allocation4 + $0x60] sm:$0xf0] }
 0x355   :  { %8950 = vmatmul.bf16.vlgmr.msra.gmra.mxu2 %v17273_v7 }
 0x356   :  { %v17277_v2 = vpop.f32.mrf.mxu0  ;;  %v17279_v38 = vpop.f32.mrf.mxu1  ;;  %8973 = vmatmul.bf16.vlgmr.msra.gmra.mxu3 %v17275_v23 }
 0x359   :  { %v17283_v9 = vpop.f32.mrf.mxu2  ;;  %v17285_v35 = vpop.f32.mrf.mxu3 }
 0x35e   :  { %v17287_v22 = vpop.f32.mrf.mxu0  ;;  %v17289_v1 = vpop.f32.mrf.mxu1 }
 0x361   :  { %8932 = vmatmul.bf16.gmra.mxu1 %v17291_v63  ;;  %v17294_v41 = vpop.f32.mrf.mxu2  ;;  %v17296_v53 = vpop.f32.mrf.mxu3 }
 0x365   :  { %8955 = vmatmul.bf16.gmra.mxu2 %v17298_v39 }
 0x366   :  { %v4951_v47 = vpop.f32.mrf.mxu0  ;;  %v4974_v48 = vpop.f32.mrf.mxu1  ;;  %8978 = vmatmul.bf16.gmra.mxu3 %v17300_v24 }
 0x367   :  { %v13932_v47 = vor.u32 %v15401_v26, %v13931_v30  ;;  %v13211_v48 = vld [vmem:[#allocation11 + $0x4a0] sm:$0xf]  ;;  %v14044_v30 = vor.u32 %v15429_v33, %v14043_v16 }
 0x368   :  { %v13212_v61 = vor.u32 %v15221_v18, %v13211_v48  ;;  %v13899_v26 = vld [vmem:[#allocation11 + $0xa00] sm:$0xf] }
 0x369   :  { %v17306_v40 = vpop.f32.mrf.mxu2  ;;  %v17308_v57 = vpop.f32.mrf.mxu3  ;;  %9039 = vmatpush.bf16.msrb.mxu2 %v13932_v47  ;;  %v4945_v47 = vadd.f32 %v17262_v34, %v17195_v15  ;;  %9063 = vmatpush.bf16.msrb.mxu3 %v14044_v30  ;;  %v13900_v18 = vor.u32 %v15393_v21, %v13899_v26  ;;  %v4947_v34 = vadd.f32 %v17277_v2, %v17223_v13  ;;  %v12541_v30 = vld [vmem:[#allocation4 + $0x64] sm:$0xf0]  ;;  %v15213_v21 = vld [vmem:[#allocation11 + $0x46c] sm:$0xf0] }
 0x36a   :  { %8898 = vmatpush.bf16.msra.mxu0 %v13212_v61 }
 0x36d   :  { %9040 = vmatpush.bf16.msrb.mxu2 %v13916_v10 }
 0x36e   :  { %v5031_v28 = vpop.f32.mrf.mxu0  ;;  %v5054_v43 = vpop.f32.mrf.mxu1  ;;  %8899 = vmatpush.bf16.msra.mxu0 %v13196_v56  ;;  %v15209_v56 = vld [vmem:[#allocation11 + $0x44c] sm:$0xf0] }
 0x36f   :  { %v5032_v31 = vadd.f32 %v5031_v28, %v5009_v32  ;;  %v15425_v28 = vld [vmem:[#allocation11 + $0xb0c] sm:$0xf0] }
 0x370   :  { %v14028_v6 = vor.u32 %v15425_v28, %v14027_v17  ;;  %v12539_v17 = vld [vmem:[#allocation4 + $0x28] sm:$0xf]  ;;  %v15046_v28 = vld [vmem:[#allocation4 + $0x2c] sm:$0xf] }
 0x371   :  { %v4997_v29 = vpop.f32.mrf.mxu2  ;;  %v5020_v51 = vpop.f32.mrf.mxu3  ;;  %v5055_v32 = vadd.f32 %v5054_v43, %v5032_v31  ;;  %v4968_v43 = vadd.f32 %v17264_v55, %v4945_v47  ;;  %9041 = vmatpush.bf16.msrb.mxu2 %v13900_v18  ;;  %v4970_v55 = vadd.f32 %v17279_v38, %v4947_v34  ;;  %v13147_v47 = vld [vmem:[#allocation11 + $0x420] sm:$0xf]  ;;  %v15205_v38 = vld [vmem:[#allocation11 + $0x42c] sm:$0xf0]  ;;  %v12733_v34 = vld [vmem:[#allocation11 + $0xf0] sm:$0xf0] }
 0x372   :  { %9064 = vmatpush.bf16.msrb.mxu3 %v14028_v6  ;;  %v14523_v6 = vld [vmem:[#allocation11 + $0xee0] sm:$0xf] }
 0x373   :  { %v4991_v15 = vadd.f32 %v17283_v9, %v4968_v43  ;;  %v17332_v9 = vor.u32 %v15053_v49, %v12539_v17 }
 0x375   :  { %8960 = vmatmul.bf16.gmra.mxu2 %v17315_v45  ;;  %v5014_v42 = vadd.f32 %v17285_v35, %v4991_v15  ;;  %18821 = vst [vmem:[#allocation42_spill] sm:$0xff] %v17332_v9  ;;  %v15099_v15 = vld [vmem:[#allocation11 + $0xe4] sm:$0xf] }
 0x376   :  { %v5033_v29 = vpop.f32.mrf.mxu0  ;;  %v5056_v51 = vpop.f32.mrf.mxu1  ;;  %8983 = vmatmul.bf16.gmra.mxu3 %v17318_v36 }
 0x377   :  { %v5034_v16 = vadd.f32 %v5033_v29, %v5011_v62  ;;  %v13179_v29 = vld [vmem:[#allocation11 + $0x460] sm:$0xf] }
 0x378   :  { %v13180_v37 = vor.u32 %v15213_v21, %v13179_v29 }
 0x379   :  { %v5077_v60 = vpop.f32.mrf.mxu2  ;;  %v5100_v48 = vpop.f32.mrf.mxu3  ;;  %v5057_v31 = vadd.f32 %v5056_v51, %v5034_v16  ;;  %v13163_v51 = vld [vmem:[#allocation11 + $0x440] sm:$0xf]  ;;  %v4950_v16 = vadd.f32 %v17287_v22, %v17232_v44 }
 0x37a   :  { %v5078_v59 = vadd.f32 %v5077_v60, %v5055_v32  ;;  %v17334_v32 = vor.u32 %v15046_v28, %v12541_v30  ;;  %v4993_v60 = vadd.f32 %v17294_v41, %v4970_v55  ;;  %8900 = vmatpush.bf16.msra.mxu0 %v13180_v37  ;;  %v13164_v35 = vor.u32 %v15209_v56, %v13163_v51 }
 0x37b   :  { %v4973_v44 = vadd.f32 %v17289_v1, %v4950_v16  ;;  %v5394_v16 = vld [vmem:[#allocation4 + $0x38] sm:$0xf] }
 0x37c   :  { %v5101_v19 = vadd.f32 %v5100_v48, %v5078_v59  ;;  %18822 = vst [vmem:[#allocation48_spill] sm:$0xff] %v17334_v32 }
 0x37d   :  { %v4996_v56 = vadd.f32 %v17306_v40, %v4973_v44  ;;  %v12599_v40 = vld [vmem:[#allocation4 + $0xa0] sm:$0xf] }
 0x37e   :  { %v5036_v33 = vpop.f32.mrf.mxu0  ;;  %v5059_v45 = vpop.f32.mrf.mxu1  ;;  %5118 = vst [vmem:[#allocation3 + $0x60] sm:$0xff] %v5101_v19  ;;  %v15549_v19 = vld [vmem:[#allocation11 + $0xeec] sm:$0xf0]  ;;  %8901 = vmatpush.bf16.msra.mxu0 %v13164_v35 }
 0x37f   :  { %v5037_v18 = vadd.f32 %v5036_v33, %v5014_v42  ;;  %v14524_v43 = vor.u32 %v15549_v19, %v14523_v6  ;;  %v12736_v33 = vor.u32 %v15099_v15, %v12733_v34  ;;  %v18823_v6 = vld [vmem:[#allocation18_spill] sm:$0xff] }
 0x380   :  { %vm18824_vm0 = vnez %v18823_v6  ;;  %v13755_v6 = vld [vmem:[#allocation11 + $0x8e0] sm:$0xf] }
 0x381   :  { %v5079_v61 = vpop.f32.mrf.mxu2  ;;  %v5102_v10 = vpop.f32.mrf.mxu3  ;;  %9126 = vmatpush.bf16.msra.mxu2 %v14524_v43  ;;  %9149 = vmatpush.bf16.msra.mxu3 %v12736_v33  ;;  %v14507_v33 = vld [vmem:[#allocation11 + $0xec0] sm:$0xf] }
 0x382   :  { %v5080_v26 = vadd.f32 %v5079_v61, %v5057_v31  ;;  %v5016_v61 = vadd.f32 %v17296_v53, %v4993_v60 }
 0x384   :  { %v5103_v0 = vadd.f32 %v5102_v10, %v5080_v26  ;;  %v5060_v10 = vadd.f32 %v5059_v45, %v5037_v18  ;;  %v13148_v26 = vor.u32 %v15205_v38, %v13147_v47  ;;  %v5316_v47 = vld [vmem:[#allocation4 + $0x10] sm:$0xe]  ;;  %v12601_v38 = vld [vmem:[#allocation4 + $0xdc] sm:$0xf0] }
 0x385   :  { %v5191_v48 = vld [vmem:[#allocation3 + $0x60] sm:$0xfc]  ;;  %9042 = vmatmul.bf16.vlgmr.msrb.gmra.mxu2 %v17332_v9 }
 0x386   :  { %v5038_v13 = vpop.f32.mrf.mxu0  ;;  %v5061_v2 = vpop.f32.mrf.mxu1  ;;  %v5206_v62 = vmax.f32 %v5191_v48, 0.0  ;;  %v5211_v59 = vmax.f32 %v5103_v0, 0.0  ;;  %9065 = vmatmul.bf16.vlgmr.msrb.gmra.mxu3 %v17334_v32  ;;  %8902 = vmatpush.bf16.msra.mxu0 %v13148_v26  ;;  %v15095_v26 = vld [vmem:[#allocation11 + $0xc4] sm:$0xf] }
 0x387   :  { %v5039_v17 = vadd.f32 %v5038_v13, %v5016_v61  ;;  %v15068_v13 = vld [vmem:[#allocation4 + $0xd8] sm:$0xf0]  ;;  %v5019_v61 = vadd.f32 %v17308_v57, %v4996_v56 }
 0x388   :  { %v5219_v41 = vpack.c.bf16 %v5206_v62, %v5206_v62  ;;  %v5222_v31 = vpack.c.bf16 %v5211_v59, %v5211_v59  ;;  %v17363_v44 = vor.u32 %v15068_v13, %v12599_v40  ;;  %v15201_v57 = vld [vmem:[#allocation11 + $0x40c] sm:$0xf0]  ;;  %v12701_v13 = vld [vmem:[#allocation11 + $0xb0] sm:$0xf0] }
 0x389   :  { %v5082_v49 = vpop.f32.mrf.mxu2  ;;  %v5105_v30 = vpop.f32.mrf.mxu3  ;;  %v5062_v43 = vadd.f32 %v5061_v2, %v5039_v17  ;;  %v13131_v17 = vld [vmem:[#allocation11 + $0x400] sm:$0xf]  ;;  %v15357_v40 = vld [vmem:[#allocation11 + $0x8ec] sm:$0xf0] }
 0x38a   :  { %v5241_v29 = vshrl.u32 %v5219_v41, 16  ;;  %v5244_v21 = vshll.u32 %v5219_v41, 16  ;;  %5333 = vst [vmem:[#allocation4 + $0x24] sm:$0xe] %v5219_v41  ;;  %v5267_v42 = vshrl.u32 %v5222_v31, 16  ;;  %v5270_v22 = vshll.u32 %v5222_v31, 16 }
 0x38b   :  { %5336 = vst [vmem:[#allocation4 + $0x60] sm:$0xf] %v5222_v31  ;;  %v5083_v55 = vadd.f32 %v5082_v49, %v5060_v10  ;;  %v15061_v31 = vld [vmem:[#allocation4 + $0xa4] sm:$0xf] }
 0x38c   :  { %v5243_v28 = vrot.slane %v5241_v29, 7  ;;  %v5352_v37 = vrot.slane %v5241_v29, 4  ;;  %v5353_v53 = vrot.slane %v5244_v21, 5  ;;  %v17343_v45 = vrot.slane %v5267_v42, 7  ;;  %v12717_v29 = vld [vmem:[#allocation11 + $0xd0] sm:$0xf0] }
 0x38d   :  { %v5106_v60 = vadd.f32 %v5105_v30, %v5083_v55  ;;  %v17351_v19 = vrot.slane %v5270_v22, 5  ;;  %v17353_v15 = vrot.slane %v5267_v42, 4  ;;  %v15545_v30 = vld [vmem:[#allocation11 + $0xecc] sm:$0xf0]  ;;  %18827 = vst [vmem:[#allocation49_spill] sm:$0xff] %v17363_v44  ;;  %v12720_v55 = vor.u32 %v15095_v26, %v12717_v29 }
 0x38e   :  { %v5041_v0 = vpop.f32.mrf.mxu0  ;;  %v17345_v51 = vpop.f32.mrf.mxu1  ;;  %v5246_v48 = vor.u32 %v5244_v21, %v5243_v28  ;;  %v5265_v18 = vrot.slane %v5243_v28, 4  ;;  %v5354_v1 = vor.u32 %v5353_v53, %v5352_v37  ;;  %v5272_v35 = vor.u32 %v5270_v22, %v17343_v45  ;;  %v18825_v21 = vld [vmem:[#allocation45_spill] sm:$0xff]  ;;  %v14491_v28 = vld [vmem:[#allocation11 + $0xea0] sm:$0xf]  ;;  %v5583_v26 = vld [vmem:[#allocation4 + $0x88] sm:$0x8] }
 0x38f   :  { %5128 = vst [vmem:[#allocation3 + $0x98] sm:$0xff] %v5106_v60  ;;  %vm18826_vm6 = vnez %v18825_v21  ;;  %v14508_v22 = vor.u32 %v15545_v30, %v14507_v33  ;;  %v5042_v53 = vadd.f32 %v5041_v0, %v5019_v61  ;;  %v17365_v56 = vor.u32 %v15061_v31, %v12601_v38  ;;  %9150 = vmatpush.bf16.msra.mxu3 %v12720_v55  ;;  %v15537_v61 = vld [vmem:[#allocation11 + $0xe8c] sm:$0xf0] }
 0x390   :  { %v5317_v62 = vsel %vm18824_vm0, %v5246_v48, %v5316_v47  ;;  %v5355_v59 = vrot.slane %v5354_v1, 4  ;;  %v5273_v2 = vsel %vm16154_vm12, %v5265_v18, %v5272_v35  ;;  %v13132_v48 = vor.u32 %v15201_v57, %v13131_v17  ;;  %v15541_v1 = vld [vmem:[#allocation11 + $0xeac] sm:$0xf0]  ;;  %v15091_v18 = vld [vmem:[#allocation11 + $0xa4] sm:$0xf] }
 0x391   :  { %5318 = vst [vmem:[#allocation4 + $0x10] sm:$0xe] %v5317_v62  ;;  %v5084_v34 = vpop.f32.mrf.mxu2  ;;  %v5107_v41 = vpop.f32.mrf.mxu3  ;;  %9127 = vmatpush.bf16.msra.mxu2 %v14508_v22  ;;  %v14492_v35 = vor.u32 %v15541_v1, %v14491_v28  ;;  %v12704_v0 = vor.u32 %v15091_v18, %v12701_v13  ;;  %v5065_v31 = vadd.f32 %v17345_v51, %v5042_v53  ;;  %v17374_v57 = vld [vmem:[#allocation4 + $0x118] sm:$0xff] }
 0x392   :  { %v5357_v10 = vsel %vm18758_vm9, %v5355_v59, %v17351_v19  ;;  %v5085_v49 = vadd.f32 %v5084_v34, %v5062_v43  ;;  %18828 = vst [vmem:[#allocation17_spill] sm:$0xff] %v17365_v56  ;;  %8903 = vmatpush.bf16.msra.mxu0 %v13132_v48  ;;  %v14475_v34 = vld [vmem:[#allocation11 + $0xe80] sm:$0xf]  ;;  %v13756_v33 = vor.u32 %v15357_v40, %v13755_v6 }
 0x393   :  { %v5395_v42 = vsel %vm18826_vm6, %v5357_v10, %v5394_v16  ;;  %5321 = vst [vmem:[#allocation4 + $0x4c] sm:$0xf] %v5273_v2  ;;  %v15087_v10 = vld [vmem:[#allocation11 + $0x84] sm:$0xf]  ;;  %9151 = vmatpush.bf16.msra.mxu3 %v12704_v0  ;;  %v14476_v21 = vor.u32 %v15537_v61, %v14475_v34  ;;  %v5369_v28 = vor.u32 %v17353_v15, %v17351_v19  ;;  %v18829_v19 = vld [vmem:[#allocation25_spill] sm:$0xff] }
 0x394   :  { %5396 = vst [vmem:[#allocation4 + $0x38] sm:$0xf] %v5395_v42  ;;  %v5108_v37 = vadd.f32 %v5107_v41, %v5085_v49  ;;  %v12685_v42 = vld [vmem:[#allocation11 + $0x90] sm:$0xf0]  ;;  %vm18830_vm7 = vnez %v18829_v19  ;;  %v15083_v61 = vld [vmem:[#allocation11 + $0x64] sm:$0xf] }
 0x395   :  { %9047 = vmatmul.bf16.gmra.mxu2 %v17363_v44  ;;  %v12688_v51 = vor.u32 %v15087_v10, %v12685_v42  ;;  %v17394_v40 = vrot.slane %v5369_v28, 4  ;;  %v15353_v42 = vld [vmem:[#allocation11 + $0x8cc] sm:$0xf0] }
 0x396   :  { %v5043_v47 = vpop.f32.mrf.mxu0  ;;  %v5066_v60 = vpop.f32.mrf.mxu1  ;;  %v5201_v62 = vld [vmem:[#allocation3 + $0x98] sm:$0x3]  ;;  %v5461_v59 = vld [vmem:[#allocation3 + $0x98] sm:$0xc0]  ;;  %v5481_v16 = vmax.f32 %v5108_v37, 0.0  ;;  %9070 = vmatmul.bf16.gmra.mxu3 %v17365_v56  ;;  %9128 = vmatpush.bf16.msra.mxu2 %v14492_v35 }
 0x397   :  { %v5216_v38 = vmax.f32 %v5201_v62, 0.0  ;;  %v5476_v43 = vmax.f32 %v5461_v59, 0.0  ;;  %8988 = vmatpush.bf16.msrb.mxu0 %v13756_v33  ;;  %v13883_v47 = vld [vmem:[#allocation11 + $0x9e0] sm:$0xf]  ;;  %v15389_v35 = vld [vmem:[#allocation11 + $0x9ec] sm:$0xf0]  ;;  %9152 = vmatpush.bf16.msra.mxu3 %v12688_v51 }
 0x398   :  { %v5492_v41 = vpack.c.bf16 %v5481_v16, %v5481_v16  ;;  %v12515_v17 = vld [vmem:[#allocation4 + $0x10] sm:$0xf]  ;;  %v14459_v59 = vld [vmem:[#allocation11 + $0xe60] sm:$0xf]  ;;  %v5292_v16 = vrot.slane %v17343_v45, 4 }
 0x399   :  { %v17370_v49 = vpack.c.bf16 %v5216_v38, %v5216_v38  ;;  %v17372_v30 = vpack.c.bf16 %v5476_v43, %v5476_v43  ;;  %v5087_v29 = vpop.f32.mrf.mxu2  ;;  %v5110_v2 = vpop.f32.mrf.mxu3  ;;  %v6309_v43 = vunpack.c.l.b16 %v17374_v57  ;;  %v15533_v33 = vld [vmem:[#allocation11 + $0xe6c] sm:$0xf0] }
 0x39a   :  { %v5534_v22 = vshrl.u32 %v5492_v41, 16  ;;  %5603 = vst [vmem:[#allocation4 + $0xd8] sm:$0xf] %v5492_v41  ;;  %v5088_v55 = vadd.f32 %v5087_v29, %v5065_v31  ;;  %v5537_v6 = vshll.u32 %v5492_v41, 16  ;;  %v15050_v62 = vld [vmem:[#allocation4 + $0x48] sm:$0xf0]  ;;  %9129 = vmatpush.bf16.msra.mxu2 %v14476_v21  ;;  %v6310_v41 = vunpack.c.h.b16 %v17374_v57 }
 0x39b   :  { %v5294_v37 = vshrl.u32 %v17370_v49, 16  ;;  %v5503_v53 = vshll.u32 %v17372_v30, 16  ;;  %5339 = vst [vmem:[#allocation4 + $0x9c] sm:$0x1] %v17370_v49  ;;  %v5297_v0 = vshll.u32 %v17370_v49, 16  ;;  %v5529_v38 = vshrl.u32 %v17372_v30, 16 }
 0x39c   :  { %5600 = vst [vmem:[#allocation4 + $0x9c] sm:$0x8] %v17372_v30  ;;  %v17382_v60 = vrot.slane %v5534_v22, 7  ;;  %v5111_v48 = vadd.f32 %v5110_v2, %v5088_v55  ;;  %v17398_v31 = vor.u32 %v15050_v62, %v12515_v17  ;;  %v14460_v29 = vor.u32 %v15533_v33, %v14459_v59  ;;  %v12669_v2 = vld [vmem:[#allocation11 + $0x70] sm:$0xf0] }
 0x39d   :  { %v5296_v13 = vrot.slane %v5294_v37, 7  ;;  %v5584_v15 = vsel %vm18830_vm7, %v5503_v53, %v5583_v26  ;;  %v13884_v26 = vor.u32 %v15389_v35, %v13883_v47  ;;  %v13739_v21 = vld [vmem:[#allocation11 + $0x8c0] sm:$0xf]  ;;  %v17402_v55 = vrot.slane %v5537_v6, 5  ;;  %v15529_v35 = vld [vmem:[#allocation11 + $0xe4c] sm:$0xf0] }
 0x39e   :  { %v8813_v1 = vpop.f32.mrf.mxu0  ;;  %v8836_v18 = vpop.f32.mrf.mxu1  ;;  %5585 = vst [vmem:[#allocation4 + $0x88] sm:$0x8] %v5584_v15  ;;  %v5539_v45 = vor.u32 %v5537_v6, %v17382_v60  ;;  %v17404_v51 = vrot.slane %v5534_v22, 4  ;;  %8904 = vmatmul.bf16.vlgmr.msra.gmra.mxu0 %v17398_v31  ;;  %v12672_v17 = vor.u32 %v15083_v61, %v12669_v2  ;;  %v13740_v57 = vor.u32 %v15353_v42, %v13739_v21  ;;  %v14443_v47 = vld [vmem:[#allocation11 + $0xe40] sm:$0xf] }
 0x39f   :  { %5138 = vst [vmem:[#allocation3 + $0xc0] sm:$0xff] %v5111_v48  ;;  %v17396_v34 = vadd.f32 %v8836_v18, %v8813_v1  ;;  %v5299_v10 = vor.u32 %v5297_v0, %v5296_v13  ;;  %v13867_v1 = vld [vmem:[#allocation11 + $0x9c0] sm:$0xf]  ;;  %v15385_v18 = vld [vmem:[#allocation11 + $0x9cc] sm:$0xf0]  ;;  %v5371_v13 = vrot.slane %v5297_v0, 5  ;;  %9011 = vmatpush.bf16.msrb.mxu1 %v13884_v26  ;;  %9130 = vmatpush.bf16.msra.mxu2 %v14460_v29 }
 0x3a0   :  { %18831 = vst [vmem:[#allocation51_spill] sm:$0xff] %v17398_v31  ;;  %v12496_v19 = vrot.slane %v5529_v38, 11  ;;  %v17407_v15 = vpack.c.b16 %v6309_v43, %v6309_v43  ;;  %9153 = vmatpush.bf16.msra.mxu3 %v12672_v17  ;;  %8989 = vmatpush.bf16.msrb.mxu0 %v13740_v57  ;;  %v13868_v22 = vor.u32 %v15385_v18, %v13867_v1  ;;  %v15079_v62 = vld [vmem:[#allocation11 + $0x44] sm:$0xf]  ;;  %v12653_v59 = vld [vmem:[#allocation11 + $0x50] sm:$0xf0] }
 0x3a1   :  { %v5089_v28 = vpop.f32.mrf.mxu2  ;;  %v5112_v48 = vpop.f32.mrf.mxu3  ;;  %v14444_v6 = vor.u32 %v15529_v35, %v14443_v47  ;;  %v13723_v33 = vld [vmem:[#allocation11 + $0x8a0] sm:$0xf]  ;;  %v5300_v61 = vsel %vm16154_vm12, %v5292_v16, %v5299_v10  ;;  %v17411_v2 = vpack.c.b16 %v6310_v41, %v6310_v41  ;;  %v12656_v29 = vor.u32 %v15079_v62, %v12653_v59  ;;  %v15349_v21 = vld [vmem:[#allocation11 + $0x8ac] sm:$0xf0]  ;;  %v15075_v17 = vld [vmem:[#allocation11 + $0x24] sm:$0xf] }
 0x3a2   :  { %18832 = vst [vmem:[#allocation52_spill] sm:$0xff] %v17407_v15  ;;  %v14427_v43 = vld [vmem:[#allocation11 + $0xe20] sm:$0xf]  ;;  %v15525_v42 = vld [vmem:[#allocation11 + $0xe2c] sm:$0xf0]  ;;  %v5540_v28 = vsel %vm16154_vm12, %v12496_v19, %v5539_v45  ;;  %v13724_v48 = vor.u32 %v15349_v21, %v13723_v33  ;;  %v5372_v47 = vsel %vm18758_vm9, %v17394_v40, %v5371_v13  ;;  %v17424_v35 = vrot.slane %v5529_v38, 4 }
 0x3a3   :  { %18833 = vst [vmem:[#allocation23_spill] sm:$0xff] %v17411_v2  ;;  %v12637_v57 = vld [vmem:[#allocation11 + $0x30] sm:$0xf0]  ;;  %v13851_v1 = vld [vmem:[#allocation11 + $0x9a0] sm:$0xf]  ;;  %v14428_v16 = vor.u32 %v15525_v42, %v14427_v43  ;;  %9012 = vmatpush.bf16.msrb.mxu1 %v13868_v22  ;;  %9131 = vmatpush.bf16.msra.mxu2 %v14444_v6  ;;  %v5636_v40 = vor.u32 %v17404_v51, %v17402_v55 }
 0x3a4   :  { %v15381_v41 = vld [vmem:[#allocation11 + $0x9ac] sm:$0xf0]  ;;  %v5328_v10 = vld [vmem:[#allocation4 + $0x88] sm:$0x3]  ;;  %v18834_v19 = vld [vmem:[#allocation16_spill] sm:$0xff]  ;;  %9154 = vmatpush.bf16.msra.mxu3 %v12656_v29  ;;  %8990 = vmatpush.bf16.msrb.mxu0 %v13724_v48  ;;  %v12640_v21 = vor.u32 %v15075_v17, %v12637_v57  ;;  %v5559_v29 = vrot.slane %v17382_v60, 4 }
 0x3a5   :  { %9052 = vmatmul.bf16.gmra.mxu2 %v17407_v15  ;;  %v13852_v45 = vor.u32 %v15381_v41, %v13851_v1  ;;  %vm18835_vm2 = vnez %v18834_v19  ;;  %5588 = vst [vmem:[#allocation4 + $0xc4] sm:$0xf] %v5540_v28  ;;  %v14411_v33 = vld [vmem:[#allocation11 + $0xe00] sm:$0xf]  ;;  %v15521_v43 = vld [vmem:[#allocation11 + $0xe0c] sm:$0xf0] }
 0x3a6   :  { %v17413_v0 = vpop.f32.mrf.mxu0  ;;  %v17415_v26 = vpop.f32.mrf.mxu1  ;;  %v5471_v18 = vld [vmem:[#allocation3 + $0xc0] sm:$0x3f]  ;;  %9075 = vmatmul.bf16.gmra.mxu3 %v17411_v2  ;;  %v5329_v59 = vsel %vm18835_vm2, %v5300_v61, %v5328_v10  ;;  %v15071_v42 = vld [vmem:[#allocation11 + $0x4] sm:$0xf]  ;;  %v12621_v6 = vld [vmem:[#allocation11 + $0x10] sm:$0xf0]  ;;  %v14412_v41 = vor.u32 %v15521_v43, %v14411_v33 }
 0x3a7   :  { %v5486_v62 = vmax.f32 %v5471_v18, 0.0  ;;  %5330 = vst [vmem:[#allocation4 + $0x88] sm:$0x3] %v5329_v59  ;;  %v13707_v1 = vld [vmem:[#allocation11 + $0x880] sm:$0xf]  ;;  %v5620_v61 = vrot.slane %v5503_v53, 5  ;;  %9132 = vmatpush.bf16.msra.mxu2 %v14428_v16  ;;  %9013 = vmatpush.bf16.msrb.mxu1 %v13852_v45  ;;  %v12624_v60 = vor.u32 %v15071_v42, %v12621_v6 }
 0x3a8   :  { %v15345_v18 = vld [vmem:[#allocation11 + $0x88c] sm:$0xf0]  ;;  %5399 = vst [vmem:[#allocation4 + $0x74] sm:$0xf] %v5372_v47  ;;  %v13835_v17 = vld [vmem:[#allocation11 + $0x980] sm:$0xf]  ;;  %9155 = vmatpush.bf16.msra.mxu3 %v12640_v21 }
 0x3a9   :  { %v17430_v38 = vpack.c.bf16 %v5486_v62, %v5486_v62  ;;  %v8859_v13 = vpop.f32.mrf.mxu2  ;;  %v8882_v22 = vpop.f32.mrf.mxu3  ;;  %v13708_v48 = vor.u32 %v15345_v18, %v13707_v1  ;;  %v15377_v10 = vld [vmem:[#allocation11 + $0x98c] sm:$0xf0]  ;;  %v13691_v47 = vld [vmem:[#allocation11 + $0x860] sm:$0xf]  ;;  %v5621_v33 = vor.u32 %v5620_v61, %v17424_v35 }
 0x3aa   :  { %v8860_v28 = vadd.f32 %v8859_v13, %v17396_v34  ;;  %v13836_v34 = vor.u32 %v15377_v10, %v13835_v17  ;;  %v15341_v19 = vld [vmem:[#allocation11 + $0x86c] sm:$0xf0]  ;;  %v13819_v59 = vld [vmem:[#allocation11 + $0x960] sm:$0xf]  ;;  %v5637_v13 = vrot.slane %v5636_v40, 4 }
 0x3ab   :  { %v5561_v57 = vshrl.u32 %v17430_v38, 16  ;;  %v5564_v51 = vshll.u32 %v17430_v38, 16  ;;  %5606 = vst [vmem:[#allocation4 + $0x114] sm:$0x7] %v17430_v38  ;;  %8991 = vmatpush.bf16.msrb.mxu0 %v13708_v48  ;;  %v15373_v45 = vld [vmem:[#allocation11 + $0x96c] sm:$0xf0]  ;;  %v13692_v43 = vor.u32 %v15341_v19, %v13691_v47  ;;  %9133 = vmatpush.bf16.msra.mxu2 %v14412_v41 }
 0x3ac   :  { %v17439_v62 = vadd.f32 %v8882_v22, %v8860_v28  ;;  %v15065_v21 = vld [vmem:[#allocation4 + $0xc0] sm:$0xf0]  ;;  %v5595_v22 = vld [vmem:[#allocation4 + $0x100] sm:$0xf]  ;;  %v13675_v42 = vld [vmem:[#allocation11 + $0x840] sm:$0xf]  ;;  %9014 = vmatpush.bf16.msrb.mxu1 %v13836_v34  ;;  %v13820_v48 = vor.u32 %v15373_v45, %v13819_v59  ;;  %9156 = vmatpush.bf16.msra.mxu3 %v12624_v60 }
 0x3ad   :  { %v5563_v1 = vrot.slane %v5561_v57, 7  ;;  %v17443_v18 = vrot.slane %v5564_v51, 5  ;;  %v15337_v40 = vld [vmem:[#allocation11 + $0x84c] sm:$0xf0]  ;;  %v13803_v17 = vld [vmem:[#allocation11 + $0x940] sm:$0xf] }
 0x3ae   :  { %v8818_v30 = vpop.f32.mrf.mxu0  ;;  %v8841_v53 = vpop.f32.mrf.mxu1  ;;  %v12575_v28 = vld [vmem:[#allocation4 + $0x88] sm:$0xf]  ;;  %v13676_v35 = vor.u32 %v15337_v40, %v13675_v42  ;;  %v15369_v61 = vld [vmem:[#allocation11 + $0x94c] sm:$0xf0]  ;;  %v5430_v47 = vld [vmem:[#allocation4 + $0xb0] sm:$0xc] }
 0x3af   :  { %v17445_v16 = vadd.f32 %v8841_v53, %v8818_v30  ;;  %v5566_v6 = vor.u32 %v5564_v51, %v5563_v1  ;;  %v5639_v10 = vsel %vm18758_vm9, %v5637_v13, %v17443_v18  ;;  %v8839_v30 = vadd.f32 %v17415_v26, %v17413_v0  ;;  %8992 = vmatpush.bf16.msrb.mxu0 %v13692_v43  ;;  %v5184_v51 = vld [vmem:[#allocation4 + $0xb0] sm:$0x3]  ;;  %v12555_v59 = vld [vmem:[#allocation4 + $0x38] sm:$0xf]  ;;  %v15055_v1 = vld [vmem:[#allocation4 + $0x70] sm:$0xf0] }
 0x3b0   :  { %v17453_v53 = vor.u32 %v15065_v21, %v12575_v28  ;;  %v18837_v45 = vld [vmem:[#allocation20_spill] sm:$0xff]  ;;  %5669 = vst [vmem:[#allocation4 + $0xec] sm:$0xf] %v5639_v10  ;;  %v17459_v0 = vrot.slane %v5621_v33, 4  ;;  %v18839_v60 = vld [vmem:[#allocation29_spill] sm:$0xff]  ;;  %v18841_v43 = vld [vmem:[#allocation22_spill] sm:$0xff]  ;;  %9015 = vmatpush.bf16.msrb.mxu1 %v13820_v48  ;;  %v13804_v42 = vor.u32 %v15369_v61, %v13803_v17  ;;  %v17468_v33 = vor.u32 %v15055_v1, %v12555_v59 }
 0x3b1   :  { %v5567_v41 = vsel %vm16154_vm12, %v5559_v29, %v5566_v6  ;;  %v8861_v34 = vpop.f32.mrf.mxu2  ;;  %v8884_v19 = vpop.f32.mrf.mxu3  ;;  %vm18838_vm15 = vnez %v18837_v45  ;;  %vm18840_vm13 = vnez %v18839_v60  ;;  %vm18842_vm11 = vnez %v18841_v43  ;;  %v13659_v29 = vld [vmem:[#allocation11 + $0x820] sm:$0xf]  ;;  %v15333_v6 = vld [vmem:[#allocation11 + $0x82c] sm:$0xf0]  ;;  %v13245_v48 = vld [vmem:[#allocation11 + $0x4f0] sm:$0xf0] }
 0x3b2   :  { %18836 = vst [vmem:[#allocation21_spill] sm:$0xff] %v17453_v53  ;;  %v5185_v13 = vsel %vm18838_vm15, 0, %v5184_v51  ;;  %v8862_v26 = vadd.f32 %v8861_v34, %v8839_v30  ;;  %8909 = vmatmul.bf16.gmra.mxu0 %v17453_v53  ;;  %v5596_v21 = vsel %vm18840_vm13, %v5567_v41, %v5595_v22  ;;  %v5431_v12 = vsel %vm18842_vm11, 0, %v5430_v47  ;;  %v13787_v28 = vld [vmem:[#allocation11 + $0x920] sm:$0xf] }
 0x3b3   :  { %5186 = vst [vmem:[#allocation4 + $0xb0] sm:$0x3] %v5185_v13  ;;  %8993 = vmatpush.bf16.msrb.mxu0 %v13676_v35  ;;  %v13660_v22 = vor.u32 %v15333_v6, %v13659_v29  ;;  %v15365_v51 = vld [vmem:[#allocation11 + $0x92c] sm:$0xf0]  ;;  %v15195_v41 = vld [vmem:[#allocation11 + $0x3e4] sm:$0xf] }
 0x3b4   :  { %5597 = vst [vmem:[#allocation4 + $0x100] sm:$0xf] %v5596_v21  ;;  %v17466_v40 = vadd.f32 %v8884_v19, %v8862_v26  ;;  %v13117_v47 = vld [vmem:[#allocation11 + $0x3f0] sm:$0xf0]  ;;  %v15227_v34 = vld [vmem:[#allocation11 + $0x4e4] sm:$0xf]  ;;  %9016 = vmatpush.bf16.msrb.mxu1 %v13804_v42  ;;  %v13788_v1 = vor.u32 %v15365_v51, %v13787_v28 }
 0x3b5   :  { %18843 = vst [vmem:[#allocation19_spill] sm:$0xff] %v17468_v33  ;;  %9134 = vmatmul.bf16.vlgmr.msra.gmra.mxu2 %v17468_v33  ;;  %v13120_v17 = vor.u32 %v15195_v41, %v13117_v47  ;;  %v13248_v61 = vor.u32 %v15227_v34, %v13245_v48  ;;  %v13771_v19 = vld [vmem:[#allocation11 + $0x900] sm:$0xf]  ;;  %v15191_v59 = vld [vmem:[#allocation11 + $0x3c4] sm:$0xf]  ;;  %v17482_v51 = vrot.slane %v5561_v57, 4 }
 0x3b6   :  { %v17470_v10 = vpop.f32.mrf.mxu0  ;;  %v17472_v30 = vpop.f32.mrf.mxu1  ;;  %5432 = vst [vmem:[#allocation4 + $0xb0] sm:$0xc] %v5431_v12  ;;  %9157 = vmatmul.bf16.vlgmr.msra.gmra.mxu3 %v17142_v8  ;;  %v13101_v45 = vld [vmem:[#allocation11 + $0x3d0] sm:$0xf0]  ;;  %v15223_v13 = vld [vmem:[#allocation11 + $0x4c4] sm:$0xf]  ;;  %v5624_v12 = vsel %vm18758_vm9, %v17459_v0, %v17402_v55 }
 0x3b7   :  { %v13229_v35 = vld [vmem:[#allocation11 + $0x4d0] sm:$0xf0]  ;;  %8994 = vmatpush.bf16.msrb.mxu0 %v13660_v22  ;;  %9218 = vmatpush.bf16.msrb.mxu2 %v13120_v17  ;;  %v15361_v26 = vld [vmem:[#allocation11 + $0x90c] sm:$0xf0]  ;;  %v13104_v60 = vor.u32 %v15191_v59, %v13101_v45  ;;  %v13643_v21 = vld [vmem:[#allocation11 + $0x800] sm:$0xf] }
 0x3b8   :  { %v15329_v43 = vld [vmem:[#allocation11 + $0x80c] sm:$0xf0]  ;;  %9241 = vmatpush.bf16.msrb.mxu3 %v13248_v61  ;;  %v13232_v42 = vor.u32 %v15223_v13, %v13229_v35  ;;  %v13085_v55 = vld [vmem:[#allocation11 + $0x3b0] sm:$0xf0]  ;;  %9017 = vmatpush.bf16.msrb.mxu1 %v13788_v1  ;;  %v13772_v59 = vor.u32 %v15361_v26, %v13771_v19  ;;  %v15219_v45 = vld [vmem:[#allocation11 + $0x4a4] sm:$0xf] }
 0x3b9   :  { %v8864_v29 = vpop.f32.mrf.mxu2  ;;  %v8887_v6 = vpop.f32.mrf.mxu3  ;;  %v13644_v28 = vor.u32 %v15329_v43, %v13643_v21  ;;  %v13088_v49 = vor.u32 %v15187_v11, %v13085_v55  ;;  %v14267_v21 = vld [vmem:[#allocation11 + $0xce0] sm:$0xf]  ;;  %v15485_v43 = vld [vmem:[#allocation11 + $0xcec] sm:$0xf0]  ;;  %v15183_v19 = vld [vmem:[#allocation11 + $0x384] sm:$0xf] }
 0x3ba   :  { %v5406_v41 = vld [vmem:[#allocation4 + $0xb0] sm:$0x1]  ;;  %v8865_v22 = vadd.f32 %v8864_v29, %v17445_v16  ;;  %v18845_v16 = vld [vmem:[#allocation27_spill] sm:$0xff]  ;;  %v13069_v1 = vld [vmem:[#allocation11 + $0x390] sm:$0xf0] }
 0x3bb   :  { %v5713_v47 = vld [vmem:[#allocation4 + $0x100] sm:$0xff]  ;;  %v5407_v48 = vsel %vm16196_vm8, %v5294_v37, %v5406_v41  ;;  %vm18846_vm12 = vnez %v18845_v16  ;;  %9219 = vmatpush.bf16.msrb.mxu2 %v13104_v60  ;;  %8995 = vmatpush.bf16.msrb.mxu0 %v13644_v28  ;;  %v14395_v60 = vld [vmem:[#allocation11 + $0xde0] sm:$0xf]  ;;  %v5647_v28 = vor.u32 %v17482_v51, %v17443_v18  ;;  %v15517_v34 = vld [vmem:[#allocation11 + $0xdec] sm:$0xf0]  ;;  %vm18876_vm8 = vcmask 1041408  }
 0x3bc   :  { %v6304_v0 = vunpack.c.h.b16 %v5713_v47  ;;  %v6303_v17 = vunpack.c.l.b16 %v5713_v47  ;;  %5408 = vst [vmem:[#allocation4 + $0xb0] sm:$0x1] %v5407_v48  ;;  %v17489_v38 = vadd.f32 %v8887_v6, %v8865_v22  ;;  %v13213_v37 = vld [vmem:[#allocation11 + $0x4b0] sm:$0xf0]  ;;  %9242 = vmatpush.bf16.msrb.mxu3 %v13232_v42  ;;  %v14268_v22 = vor.u32 %v15485_v43, %v14267_v21  ;;  %v15215_v47 = vld [vmem:[#allocation11 + $0x484] sm:$0xf]  ;;  %9018 = vmatpush.bf16.msrb.mxu1 %v13772_v59  ;;  %vm18886_vm4 = vmmov %vm18876_vm8 }
 0x3bd   :  { %v5664_v61 = vld [vmem:[#allocation4 + $0xb0] sm:$0xc]  ;;  %v13216_v6 = vor.u32 %v15219_v45, %v13213_v37  ;;  %v5454_v48 = vld [vmem:[#allocation4 + $0x128] sm:$0xc]  ;;  %v8844_v42 = vadd.f32 %v17472_v30, %v17470_v10  ;;  %v15070_v55 = vld [vmem:[#allocation4 + $0xe8] sm:$0xf0] }
 0x3be   :  { %v8823_v57 = vpop.f32.mrf.mxu0  ;;  %v8846_v13 = vpop.f32.mrf.mxu1  ;;  %v5665_v35 = vsel %vm18846_vm12, %v5624_v12, %v5664_v61  ;;  %v17493_v29 = vpack.c.b16 %v6304_v0, %v6304_v0  ;;  %v17497_v26 = vpack.c.b16 %v6303_v17, %v6303_v17  ;;  %v13197_v12 = vld [vmem:[#allocation11 + $0x490] sm:$0xf0]  ;;  %v15179_v11 = vld [vmem:[#allocation11 + $0x364] sm:$0xf]  ;;  %v13072_v0 = vor.u32 %v15183_v19, %v13069_v1  ;;  %v14251_v37 = vld [vmem:[#allocation11 + $0xcc0] sm:$0xf] }
 0x3bf   :  { %v17495_v41 = vadd.f32 %v8846_v13, %v8823_v57  ;;  %5666 = vst [vmem:[#allocation4 + $0xb0] sm:$0xc] %v5665_v35  ;;  %9220 = vmatpush.bf16.msrb.mxu2 %v13088_v49  ;;  %v14396_v17 = vor.u32 %v15517_v34, %v14395_v60  ;;  %v5455_v61 = vsel %vm18846_vm12, 0, %v5454_v48  ;;  %v13053_v45 = vld [vmem:[#allocation11 + $0x370] sm:$0xf0]  ;;  %9080 = vmatpush.bf16.msra.mxu0 %v14268_v22  ;;  %v5648_v43 = vrot.slane %v5647_v28, 4  ;;  %vm18891_vm3 = vmmov %vm18886_vm4 }
 0x3c0   :  { %18847 = vst [vmem:[#allocation46_spill] sm:$0xff] %v17493_v29  ;;  %8937 = vmatmul.bf16.gmra.mxu1 %v17493_v29  ;;  %v15211_v57 = vld [vmem:[#allocation11 + $0x464] sm:$0xf]  ;;  %9243 = vmatpush.bf16.msrb.mxu3 %v13216_v6  ;;  %v13200_v51 = vor.u32 %v15215_v47, %v13197_v12  ;;  %v13181_v35 = vld [vmem:[#allocation11 + $0x470] sm:$0xf0]  ;;  %v13056_v22 = vor.u32 %v15179_v11, %v13053_v45  ;;  %vm18935_vm5 = vmmov %vm18891_vm3 }
 0x3c1   :  { %18848 = vst [vmem:[#allocation28_spill] sm:$0xff] %v17497_v26  ;;  %v8866_v13 = vpop.f32.mrf.mxu2  ;;  %v8889_v18 = vpop.f32.mrf.mxu3  ;;  %9103 = vmatpush.bf16.msra.mxu1 %v14396_v17  ;;  %v15481_v10 = vld [vmem:[#allocation11 + $0xccc] sm:$0xf0]  ;;  %v14379_v30 = vld [vmem:[#allocation11 + $0xdc0] sm:$0xf]  ;;  %v13184_v34 = vor.u32 %v15211_v57, %v13181_v35  ;;  %vm18939_vm9 = vmmov %vm18891_vm3 }
 0x3c2   :  { %5456 = vst [vmem:[#allocation4 + $0x128] sm:$0xc] %v5455_v61  ;;  %v8867_v21 = vadd.f32 %v8866_v13, %v8844_v42  ;;  %8914 = vmatmul.bf16.gmra.mxu0 %v17497_v26  ;;  %v15513_v59 = vld [vmem:[#allocation11 + $0xdcc] sm:$0xf0]  ;;  %v14252_v49 = vor.u32 %v15481_v10, %v14251_v37  ;;  %v15175_v47 = vld [vmem:[#allocation11 + $0x344] sm:$0xf]  ;;  %vm18979_vm1 = vmmov %vm18891_vm3 }
 0x3c3   :  { %v14380_v16 = vor.u32 %v15513_v59, %v14379_v30  ;;  %9221 = vmatpush.bf16.msrb.mxu2 %v13072_v0  ;;  %v13037_v48 = vld [vmem:[#allocation11 + $0x350] sm:$0xf0]  ;;  %v14235_v42 = vld [vmem:[#allocation11 + $0xca0] sm:$0xf]  ;;  %v15477_v17 = vld [vmem:[#allocation11 + $0xcac] sm:$0xf0] }
 0x3c4   :  { %v17507_v19 = vadd.f32 %v8889_v18, %v8867_v21  ;;  %9244 = vmatpush.bf16.msrb.mxu3 %v13200_v51  ;;  %9081 = vmatpush.bf16.msra.mxu0 %v14252_v49  ;;  %v15207_v28 = vld [vmem:[#allocation11 + $0x444] sm:$0xf]  ;;  %v13165_v61 = vld [vmem:[#allocation11 + $0x450] sm:$0xf0]  ;;  %v14236_v13 = vor.u32 %v15477_v17, %v14235_v42  ;;  %v14363_v18 = vld [vmem:[#allocation11 + $0xda0] sm:$0xf]  ;;  %v13040_v51 = vor.u32 %v15175_v47, %v13037_v48 }
 0x3c5   :  { %9104 = vmatpush.bf16.msra.mxu1 %v14380_v16  ;;  %v15509_v0 = vld [vmem:[#allocation11 + $0xdac] sm:$0xf0]  ;;  %v15045_v11 = vld [vmem:[#allocation4 + $0x24] sm:$0xf]  ;;  %v12533_v45 = vld [vmem:[#allocation4 + $0x5c] sm:$0xf0]  ;;  %v13168_v49 = vor.u32 %v15207_v28, %v13165_v61 }
 0x3c6   :  { %v12615_v1 = vld [vmem:[#allocation4 + $0xb0] sm:$0xf]  ;;  %v8825_v60 = vpop.f32.mrf.mxu0  ;;  %v8848_v6 = vpop.f32.mrf.mxu1  ;;  %9162 = vmatmul.bf16.gmra.mxu3 %v17199_v50  ;;  %v13021_v35 = vld [vmem:[#allocation11 + $0x330] sm:$0xf0]  ;;  %v14364_v37 = vor.u32 %v15509_v0, %v14363_v18  ;;  %v14347_v47 = vld [vmem:[#allocation11 + $0xd80] sm:$0xf] }
 0x3c7   :  { %v17509_v12 = vor.u32 %v15070_v55, %v12615_v1  ;;  %9222 = vmatpush.bf16.msrb.mxu2 %v13056_v22  ;;  %v15171_v57 = vld [vmem:[#allocation11 + $0x324] sm:$0xf]  ;;  %v13149_v1 = vld [vmem:[#allocation11 + $0x430] sm:$0xf0]  ;;  %v14219_v60 = vld [vmem:[#allocation11 + $0xc80] sm:$0xf] }
 0x3c8   :  { %9245 = vmatpush.bf16.msrb.mxu3 %v13184_v34  ;;  %9082 = vmatpush.bf16.msra.mxu0 %v14236_v13  ;;  %v15203_v16 = vld [vmem:[#allocation11 + $0x424] sm:$0xf]  ;;  %v15473_v22 = vld [vmem:[#allocation11 + $0xc8c] sm:$0xf0]  ;;  %v14203_v17 = vld [vmem:[#allocation11 + $0xc60] sm:$0xf]  ;;  %v17518_v13 = vor.u32 %v15045_v11, %v12533_v45 }
 0x3c9   :  { %18849 = vst [vmem:[#allocation26_spill] sm:$0xff] %v17509_v12  ;;  %9139 = vmatmul.bf16.gmra.mxu2 %v17509_v12  ;;  %v5676_v55 = vld [vmem:[#allocation4 + $0x128] sm:$0x7]  ;;  %v8869_v21 = vpop.f32.mrf.mxu2  ;;  %v8892_v10 = vpop.f32.mrf.mxu3  ;;  %9105 = vmatpush.bf16.msra.mxu1 %v14364_v37  ;;  %v14220_v48 = vor.u32 %v15473_v22, %v14219_v60  ;;  %v15505_v42 = vld [vmem:[#allocation11 + $0xd8c] sm:$0xf0]  ;;  %vm18982_vm0 = vmmov %vm18979_vm1 }
 0x3ca   :  { %v5677_v59 = vsel %vm16279_vm14, %v5648_v43, %v5676_v55  ;;  %v8870_v6 = vadd.f32 %v8869_v21, %v17495_v41  ;;  %v15469_v18 = vld [vmem:[#allocation11 + $0xc6c] sm:$0xf0]  ;;  %v12531_v30 = vld [vmem:[#allocation4 + $0x20] sm:$0xf]  ;;  %v13024_v43 = vor.u32 %v15171_v57, %v13021_v35  ;;  %v14348_v34 = vor.u32 %v15505_v42, %v14347_v47  ;;  %v14331_v28 = vld [vmem:[#allocation11 + $0xd60] sm:$0xf] }
 0x3cb   :  { %5678 = vst [vmem:[#allocation4 + $0x128] sm:$0x7] %v5677_v59  ;;  %9223 = vmatpush.bf16.msrb.mxu2 %v13040_v51  ;;  %v15501_v61 = vld [vmem:[#allocation11 + $0xd6c] sm:$0xf0]  ;;  %v13152_v41 = vor.u32 %v15203_v16, %v13149_v1  ;;  %v15167_v37 = vld [vmem:[#allocation11 + $0x304] sm:$0xf]  ;;  %v14204_v59 = vor.u32 %v15469_v18, %v14203_v17  ;;  %vm18932_vm14 = vmmov %vm18891_vm3 }
 0x3cc   :  { %v17516_v0 = vadd.f32 %v8892_v10, %v8870_v6  ;;  %18851 = vst [vmem:[#allocation30_spill] sm:$0xff] %v17518_v13  ;;  %v15052_v55 = vld [vmem:[#allocation4 + $0x58] sm:$0xf0]  ;;  %9246 = vmatpush.bf16.msrb.mxu3 %v13168_v49  ;;  %v13005_v21 = vld [vmem:[#allocation11 + $0x310] sm:$0xf0]  ;;  %9083 = vmatpush.bf16.msra.mxu0 %v14220_v48  ;;  %v14332_v10 = vor.u32 %v15501_v61, %v14331_v28  ;;  %vm18984_vm6 = vmmov %vm18982_vm0 }
 0x3cd   :  { %v15199_v60 = vld [vmem:[#allocation11 + $0x404] sm:$0xf]  ;;  %v13133_v22 = vld [vmem:[#allocation11 + $0x410] sm:$0xf0]  ;;  %9106 = vmatpush.bf16.msra.mxu1 %v14348_v34  ;;  %v17521_v51 = vor.u32 %v15052_v55, %v12531_v30  ;;  %v13008_v57 = vor.u32 %v15167_v37, %v13005_v21  ;;  %v14187_v16 = vld [vmem:[#allocation11 + $0xc40] sm:$0xf] }
 0x3ce   :  { %v13136_v49 = vor.u32 %v15199_v60, %v13133_v22  ;;  %v15465_v1 = vld [vmem:[#allocation11 + $0xc4c] sm:$0xf0]  ;;  %v14315_v48 = vld [vmem:[#allocation11 + $0xd40] sm:$0xf]  ;;  %v12593_v61 = vld [vmem:[#allocation4 + $0xd4] sm:$0xf0] }
 0x3cf   :  { %18852 = vst [vmem:[#allocation24_spill] sm:$0xff] %v17521_v51  ;;  %9224 = vmatpush.bf16.msrb.mxu2 %v13024_v43  ;;  %v14188_v47 = vor.u32 %v15465_v1, %v14187_v16  ;;  %v15497_v42 = vld [vmem:[#allocation11 + $0xd4c] sm:$0xf0]  ;;  %v14171_v30 = vld [vmem:[#allocation11 + $0xc20] sm:$0xf]  ;;  %vm18990_vm7 = vmmov %vm18982_vm0 }
 0x3d0   :  { %9019 = vmatmul.bf16.vlgmr.msrb.gmra.mxu1 %v17518_v13  ;;  %9247 = vmatpush.bf16.msrb.mxu3 %v13152_v41  ;;  %v14316_v17 = vor.u32 %v15497_v42, %v14315_v48  ;;  %v15461_v43 = vld [vmem:[#allocation11 + $0xc2c] sm:$0xf0]  ;;  %v14299_v34 = vld [vmem:[#allocation11 + $0xd20] sm:$0xf]  ;;  %v15323_v37 = vld [vmem:[#allocation11 + $0x7e4] sm:$0xf] }
 0x3d1   :  { %v8871_v35 = vpop.f32.mrf.mxu2  ;;  %v8894_v11 = vpop.f32.mrf.mxu3  ;;  %9084 = vmatpush.bf16.msra.mxu0 %v14204_v59  ;;  %9107 = vmatpush.bf16.msra.mxu1 %v14332_v10  ;;  %v15060_v28 = vld [vmem:[#allocation4 + $0x9c] sm:$0xf]  ;;  %v14172_v55 = vor.u32 %v15461_v43, %v14171_v30  ;;  %v13629_v21 = vld [vmem:[#allocation11 + $0x7f0] sm:$0xf0]  ;;  %v15319_v16 = vld [vmem:[#allocation11 + $0x7c4] sm:$0xf] }
 0x3d2   :  { %v5718_v45 = vld [vmem:[#allocation4 + $0x128] sm:$0xf]  ;;  %8996 = vmatmul.bf16.vlgmr.msrb.gmra.mxu0 %v17521_v51  ;;  %v15493_v41 = vld [vmem:[#allocation11 + $0xd2c] sm:$0xf0]  ;;  %v13632_v10 = vor.u32 %v15323_v37, %v13629_v21  ;;  %v13757_v35 = vld [vmem:[#allocation11 + $0x8f0] sm:$0xf0] }
 0x3d3   :  { %v6313_v6 = vunpack.c.l.b16 %v5718_v45  ;;  %9225 = vmatpush.bf16.msrb.mxu2 %v13008_v57  ;;  %v14300_v22 = vor.u32 %v15493_v41, %v14299_v34  ;;  %v15355_v57 = vld [vmem:[#allocation11 + $0x8e4] sm:$0xf]  ;;  %v14283_v11 = vld [vmem:[#allocation11 + $0xd00] sm:$0xf]  ;;  %v13613_v1 = vld [vmem:[#allocation11 + $0x7d0] sm:$0xf0]  ;;  %v17532_v34 = vor.u32 %v15060_v28, %v12593_v61 }
 0x3d4   :  { %9248 = vmatpush.bf16.msrb.mxu3 %v13136_v49  ;;  %v13760_v45 = vor.u32 %v15355_v57, %v13757_v35  ;;  %v15489_v49 = vld [vmem:[#allocation11 + $0xd0c] sm:$0xf0]  ;;  %v13741_v48 = vld [vmem:[#allocation11 + $0x8d0] sm:$0xf0]  ;;  %v14155_v42 = vld [vmem:[#allocation11 + $0xc00] sm:$0xf] }
 0x3d5   :  { %v17524_v18 = vpack.c.b16 %v6313_v6, %v6313_v6  ;;  %9085 = vmatpush.bf16.msra.mxu0 %v14188_v47  ;;  %9108 = vmatpush.bf16.msra.mxu1 %v14316_v17  ;;  %v13616_v6 = vor.u32 %v15319_v16, %v13613_v1  ;;  %v15351_v47 = vld [vmem:[#allocation11 + $0x8c4] sm:$0xf]  ;;  %v14284_v17 = vor.u32 %v15489_v49, %v14283_v11  ;;  %v15457_v43 = vld [vmem:[#allocation11 + $0xc0c] sm:$0xf0]  ;;  %v12591_v41 = vld [vmem:[#allocation4 + $0x98] sm:$0xf] }
 0x3d6   :  { %9167 = vmatmul.bf16.gmra.mxu3 %v17238_v4  ;;  %v13744_v30 = vor.u32 %v15351_v47, %v13741_v48  ;;  %18854 = vst [vmem:[#allocation53_spill] sm:$0xff] %v17532_v34  ;;  %v15067_v37 = vld [vmem:[#allocation4 + $0xd0] sm:$0xf0]  ;;  %v14156_v21 = vor.u32 %v15457_v43, %v14155_v42  ;;  %v13597_v57 = vld [vmem:[#allocation11 + $0x7b0] sm:$0xf0]  ;;  %vm18991_vm2 = vmmov %vm18982_vm0 }
 0x3d7   :  { %18853 = vst [vmem:[#allocation47_spill] sm:$0xff] %v17524_v18  ;;  %9310 = vmatpush.bf16.msra.mxu2 %v13632_v10  ;;  %v17535_v10 = vor.u32 %v15067_v37, %v12591_v41  ;;  %v15131_v61 = vld [vmem:[#allocation11 + $0x1e4] sm:$0xf]  ;;  %v12861_v16 = vld [vmem:[#allocation11 + $0x1f0] sm:$0xf0]  ;;  %vm18992_vm15 = vmmov %vm18982_vm0 }
 0x3d8   :  { %9333 = vmatpush.bf16.msra.mxu3 %v13760_v45  ;;  %v13725_v45 = vld [vmem:[#allocation11 + $0x8b0] sm:$0xf0]  ;;  %v15311_v1 = vld [vmem:[#allocation11 + $0x784] sm:$0xf] }
 0x3d9   :  { %9144 = vmatmul.bf16.gmra.mxu2 %v17524_v18  ;;  %v17528_v59 = vpop.f32.mrf.mxu2  ;;  %v17530_v60 = vpop.f32.mrf.mxu3  ;;  %9086 = vmatpush.bf16.msra.mxu0 %v14172_v55  ;;  %v15315_v55 = vld [vmem:[#allocation11 + $0x7a4] sm:$0xf]  ;;  %18855 = vst [vmem:[#allocation56_spill] sm:$0xff] %v17535_v10  ;;  %v13581_v47 = vld [vmem:[#allocation11 + $0x790] sm:$0xf0] }
 0x3da   :  { %9109 = vmatpush.bf16.msra.mxu1 %v14300_v22  ;;  %v15347_v22 = vld [vmem:[#allocation11 + $0x8a4] sm:$0xf]  ;;  %v13600_v35 = vor.u32 %v15315_v55, %v13597_v57  ;;  %v13709_v42 = vld [vmem:[#allocation11 + $0x890] sm:$0xf0] }
 0x3db   :  { %9311 = vmatpush.bf16.msra.mxu2 %v13616_v6  ;;  %v13728_v28 = vor.u32 %v15347_v22, %v13725_v45  ;;  %v12864_v6 = vor.u32 %v15131_v61, %v12861_v16  ;;  %v15343_v48 = vld [vmem:[#allocation11 + $0x884] sm:$0xf]  ;;  %v12989_v41 = vld [vmem:[#allocation11 + $0x2f0] sm:$0xf0] }
 0x3dc   :  { %9334 = vmatpush.bf16.msra.mxu3 %v13744_v30  ;;  %v13712_v30 = vor.u32 %v15343_v48, %v13709_v42  ;;  %v15163_v43 = vld [vmem:[#allocation11 + $0x2e4] sm:$0xf]  ;;  %v13565_v57 = vld [vmem:[#allocation11 + $0x770] sm:$0xf0] }
 0x3dd   :  { %9087 = vmatpush.bf16.msra.mxu0 %v14156_v21  ;;  %v12992_v37 = vor.u32 %v15163_v43, %v12989_v41  ;;  %v5715_v21 = vld [vmem:[#allocation4 + $0x110] sm:$0xff]  ;;  %v13693_v45 = vld [vmem:[#allocation11 + $0x870] sm:$0xf0] }
 0x3de   :  { %9110 = vmatpush.bf16.msra.mxu1 %v14284_v17  ;;  %v13584_v17 = vor.u32 %v15311_v1, %v13581_v47  ;;  %v15307_v55 = vld [vmem:[#allocation11 + $0x764] sm:$0xf]  ;;  %v6308_v16 = vunpack.c.h.b16 %v5715_v21  ;;  %v12845_v47 = vld [vmem:[#allocation11 + $0x1d0] sm:$0xf0] }
 0x3df   :  { %9312 = vmatpush.bf16.msra.mxu2 %v13600_v35  ;;  %v15339_v22 = vld [vmem:[#allocation11 + $0x864] sm:$0xf]  ;;  %v13568_v35 = vor.u32 %v15307_v55, %v13565_v57  ;;  %v12973_v43 = vld [vmem:[#allocation11 + $0x2d0] sm:$0xf0] }
 0x3e0   :  { %9024 = vmatmul.bf16.gmra.mxu1 %v17532_v34  ;;  %9335 = vmatpush.bf16.msra.mxu3 %v13728_v28  ;;  %v13696_v1 = vor.u32 %v15339_v22, %v13693_v45  ;;  %v15159_v48 = vld [vmem:[#allocation11 + $0x2c4] sm:$0xf]  ;;  %v13677_v12 = vld [vmem:[#allocation11 + $0x850] sm:$0xf0]  ;;  %v17548_v57 = vpack.c.b16 %v6308_v16, %v6308_v16  ;;  %v15062_v34 = vld [vmem:[#allocation4 + $0xac] sm:$0xf] }
 0x3e1   :  { %v17537_v11 = vpop.f32.mrf.mxu2  ;;  %v17539_v49 = vpop.f32.mrf.mxu3  ;;  %9172 = vmatpush.bf16.msrb.mxu0 %v12864_v6  ;;  %v15127_v6 = vld [vmem:[#allocation11 + $0x1c4] sm:$0xf]  ;;  %v12829_v45 = vld [vmem:[#allocation11 + $0x1b0] sm:$0xf0] }
 0x3e2   :  { %9001 = vmatmul.bf16.gmra.mxu0 %v17535_v10  ;;  %9195 = vmatpush.bf16.msrb.mxu1 %v12992_v37  ;;  %v12848_v42 = vor.u32 %v15127_v6, %v12845_v47  ;;  %v15303_v41 = vld [vmem:[#allocation11 + $0x744] sm:$0xf]  ;;  %v13549_v37 = vld [vmem:[#allocation11 + $0x750] sm:$0xf0]  ;;  %18856 = vst [vmem:[#allocation18_spill] sm:$0xff] %v17548_v57 }
 0x3e3   :  { %9313 = vmatpush.bf16.msra.mxu2 %v13584_v17  ;;  %v15335_v18 = vld [vmem:[#allocation11 + $0x844] sm:$0xf]  ;;  %v6307_v17 = vunpack.c.l.b16 %v5715_v21 }
 0x3e4   :  { %9336 = vmatpush.bf16.msra.mxu3 %v13712_v30  ;;  %v13552_v30 = vor.u32 %v15303_v41, %v13549_v37  ;;  %v13680_v55 = vor.u32 %v15335_v18, %v13677_v12  ;;  %v15123_v22 = vld [vmem:[#allocation11 + $0x1a4] sm:$0xf] }
 0x3e5   :  { %9173 = vmatpush.bf16.msrb.mxu0 %v12848_v42  ;;  %v15299_v6 = vld [vmem:[#allocation11 + $0x724] sm:$0xf]  ;;  %v17551_v47 = vpack.c.b16 %v6307_v17, %v6307_v17  ;;  %v12957_v42 = vld [vmem:[#allocation11 + $0x2b0] sm:$0xf0] }
 0x3e6   :  { %9249 = vmatmul.bf16.vlgmr.msrb.gmra.mxu3 %v17398_v31  ;;  %v15331_v21 = vld [vmem:[#allocation11 + $0x824] sm:$0xf]  ;;  %v13517_v17 = vld [vmem:[#allocation11 + $0x710] sm:$0xf0] }
 0x3e7   :  { %9314 = vmatpush.bf16.msra.mxu2 %v13568_v35  ;;  %18857 = vst [vmem:[#allocation45_spill] sm:$0xff] %v17551_v47  ;;  %v13661_v35 = vld [vmem:[#allocation11 + $0x830] sm:$0xf0]  ;;  %v15295_v37 = vld [vmem:[#allocation11 + $0x704] sm:$0xf] }
 0x3e8   :  { %9337 = vmatpush.bf16.msra.mxu3 %v13696_v1  ;;  %v13664_v16 = vor.u32 %v15331_v21, %v13661_v35  ;;  %v15327_v33 = vld [vmem:[#allocation11 + $0x804] sm:$0xf] }
 0x3e9   :  { %9226 = vmatmul.bf16.vlgmr.msrb.gmra.mxu2 %v17168_v58  ;;  %v17544_v28 = vpop.f32.mrf.mxu2  ;;  %v17546_v61 = vpop.f32.mrf.mxu3  ;;  %v12976_v58 = vor.u32 %v15159_v48, %v12973_v43  ;;  %v12832_v48 = vor.u32 %v15123_v22, %v12829_v45  ;;  %v13533_v43 = vld [vmem:[#allocation11 + $0x730] sm:$0xf0]  ;;  %v13520_v45 = vor.u32 %v15295_v37, %v13517_v17  ;;  %v15047_v17 = vld [vmem:[#allocation4 + $0x34] sm:$0xf]  ;;  %v15103_v31 = vld [vmem:[#allocation11 + $0x104] sm:$0xf] }
 0x3ea   :  { %v13536_v18 = vor.u32 %v15299_v6, %v13533_v43  ;;  %v12813_v22 = vld [vmem:[#allocation11 + $0x190] sm:$0xf0]  ;;  %v15151_v6 = vld [vmem:[#allocation11 + $0x284] sm:$0xf] }
 0x3eb   :  { %9196 = vmatpush.bf16.msrb.mxu1 %v12976_v58  ;;  %9315 = vmatpush.bf16.msra.mxu2 %v13552_v30  ;;  %v15155_v58 = vld [vmem:[#allocation11 + $0x2a4] sm:$0xf]  ;;  %v13645_v30 = vld [vmem:[#allocation11 + $0x810] sm:$0xf0] }
 0x3ec   :  { %9338 = vmatpush.bf16.msra.mxu3 %v13680_v55  ;;  %v12960_v41 = vor.u32 %v15155_v58, %v12957_v42  ;;  %9174 = vmatpush.bf16.msrb.mxu0 %v12832_v48  ;;  %v15119_v55 = vld [vmem:[#allocation11 + $0x184] sm:$0xf]  ;;  %v12941_v43 = vld [vmem:[#allocation11 + $0x290] sm:$0xf0] }
 0x3ed   :  { %v12816_v15 = vor.u32 %v15119_v55, %v12813_v22  ;;  %v12944_v21 = vor.u32 %v15151_v6, %v12941_v43  ;;  %v15147_v58 = vld [vmem:[#allocation11 + $0x264] sm:$0xf]  ;;  %v12781_v43 = vld [vmem:[#allocation11 + $0x150] sm:$0xf0] }
 0x3ee   :  { %v15111_v6 = vld [vmem:[#allocation11 + $0x144] sm:$0xf] }
 0x3ef   :  { %9316 = vmatpush.bf16.msra.mxu2 %v13536_v18  ;;  %9197 = vmatpush.bf16.msrb.mxu1 %v12960_v41  ;;  %v15115_v18 = vld [vmem:[#allocation11 + $0x164] sm:$0xf]  ;;  %v12925_v41 = vld [vmem:[#allocation11 + $0x270] sm:$0xf0] }
 0x3f0   :  { %9029 = vmatmul.bf16.gmra.mxu1 %v17548_v57  ;;  %9339 = vmatpush.bf16.msra.mxu3 %v13664_v16  ;;  %v13648_v57 = vor.u32 %v15327_v33, %v13645_v30  ;;  %v12797_v16 = vld [vmem:[#allocation11 + $0x170] sm:$0xf0]  ;;  %v12549_v33 = vld [vmem:[#allocation4 + $0x6c] sm:$0xf0]  ;;  %v12928_v37 = vor.u32 %v15147_v58, %v12925_v41  ;;  %v15054_v30 = vld [vmem:[#allocation4 + $0x68] sm:$0xf0] }
 0x3f1   :  { %v17553_v1 = vpop.f32.mrf.mxu2  ;;  %v17555_v12 = vpop.f32.mrf.mxu3  ;;  %9175 = vmatpush.bf16.msrb.mxu0 %v12816_v15  ;;  %v12800_v42 = vor.u32 %v15115_v18, %v12797_v16  ;;  %v17564_v15 = vor.u32 %v15047_v17, %v12549_v33  ;;  %v15143_v18 = vld [vmem:[#allocation11 + $0x244] sm:$0xf]  ;;  %v12909_v16 = vld [vmem:[#allocation11 + $0x250] sm:$0xf0] }
 0x3f2   :  { %9006 = vmatmul.bf16.gmra.mxu0 %v17551_v47  ;;  %v12912_v58 = vor.u32 %v15143_v18, %v12909_v16  ;;  %v15107_v33 = vld [vmem:[#allocation11 + $0x124] sm:$0xf]  ;;  %v14269_v16 = vld [vmem:[#allocation11 + $0xcf0] sm:$0xf0] }
 0x3f3   :  { %9317 = vmatpush.bf16.msra.mxu2 %v13520_v45  ;;  %9198 = vmatpush.bf16.msrb.mxu1 %v12944_v21  ;;  %18859 = vst [vmem:[#allocation16_spill] sm:$0xff] %v17564_v15  ;;  %v12784_v21 = vor.u32 %v15111_v6, %v12781_v43  ;;  %v15139_v41 = vld [vmem:[#allocation11 + $0x224] sm:$0xf] }
 0x3f4   :  { %9340 = vmatpush.bf16.msra.mxu3 %v13648_v57  ;;  %v12547_v57 = vld [vmem:[#allocation4 + $0x30] sm:$0xf] }
 0x3f5   :  { %9176 = vmatpush.bf16.msrb.mxu0 %v12800_v42  ;;  %v17567_v55 = vor.u32 %v15054_v30, %v12547_v57  ;;  %v12765_v42 = vld [vmem:[#allocation11 + $0x130] sm:$0xf0]  ;;  %v15451_v57 = vld [vmem:[#allocation11 + $0xbe4] sm:$0xf] }
 0x3f6   :  { %9254 = vmatmul.bf16.gmra.mxu3 %v17453_v53  ;;  %v12768_v17 = vor.u32 %v15107_v33, %v12765_v42  ;;  %v12893_v30 = vld [vmem:[#allocation11 + $0x230] sm:$0xf0]  ;;  %v15479_v42 = vld [vmem:[#allocation11 + $0xcc4] sm:$0xf] }
 0x3f7   :  { %9199 = vmatpush.bf16.msrb.mxu1 %v12928_v37  ;;  %18860 = vst [vmem:[#allocation20_spill] sm:$0xff] %v17567_v55  ;;  %v12609_v37 = vld [vmem:[#allocation4 + $0xe4] sm:$0xf0]  ;;  %v12896_v43 = vor.u32 %v15139_v41, %v12893_v30  ;;  %v14253_v53 = vld [vmem:[#allocation11 + $0xcd0] sm:$0xf0] }
 0x3f8   :  { %v14256_v4 = vor.u32 %v15479_v42, %v14253_v53  ;;  %v12749_v41 = vld [vmem:[#allocation11 + $0x110] sm:$0xf0]  ;;  %v17576_v30 = vor.u32 %v15062_v34, %v12609_v37  ;;  %v15471_v42 = vld [vmem:[#allocation11 + $0xc84] sm:$0xf] }
 0x3f9   :  { %9231 = vmatmul.bf16.gmra.mxu2 %v17225_v46  ;;  %v17560_v48 = vpop.f32.mrf.mxu2  ;;  %v17562_v35 = vpop.f32.mrf.mxu3  ;;  %9177 = vmatpush.bf16.msrb.mxu0 %v12784_v21  ;;  %v15483_v21 = vld [vmem:[#allocation11 + $0xce4] sm:$0xf]  ;;  %v13373_v37 = vld [vmem:[#allocation11 + $0x5f0] sm:$0xf0] }
 0x3fa   :  { %18858 = vst [vmem:[#allocation25_spill] sm:$0xff] %v17562_v35  ;;  %v14272_v46 = vor.u32 %v15483_v21, %v14269_v16  ;;  %v15443_v21 = vld [vmem:[#allocation11 + $0xba4] sm:$0xf] }
 0x3fb   :  { %9200 = vmatpush.bf16.msrb.mxu1 %v12912_v58  ;;  %v15135_v58 = vld [vmem:[#allocation11 + $0x204] sm:$0xf]  ;;  %18861 = vst [vmem:[#allocation29_spill] sm:$0xff] %v17576_v30 }
 0x3fc   :  { %9425 = vmatpush.bf16.msrb.mxu3 %v14272_v46  ;;  %v14237_v46 = vld [vmem:[#allocation11 + $0xcb0] sm:$0xf0]  ;;  %v15439_v16 = vld [vmem:[#allocation11 + $0xb84] sm:$0xf] }
 0x3fd   :  { %9178 = vmatpush.bf16.msrb.mxu0 %v12768_v17  ;;  %v12607_v17 = vld [vmem:[#allocation4 + $0xa8] sm:$0xf] }
 0x3ff   :  { %9201 = vmatpush.bf16.msrb.mxu1 %v12896_v43  ;;  %v14109_v43 = vld [vmem:[#allocation11 + $0xbb0] sm:$0xf0] }
 0x400   :  { %9111 = vmatmul.bf16.vlgmr.msra.gmra.mxu1 %v17564_v15  ;;  %v14125_v15 = vld [vmem:[#allocation11 + $0xbd0] sm:$0xf0]  ;;  %9426 = vmatpush.bf16.msrb.mxu3 %v14256_v4 }
 0x401   :  { %v8963_v22 = vpop.f32.mrf.mxu2  ;;  %v8986_v45 = vpop.f32.mrf.mxu3 }
 0x402   :  { %9088 = vmatmul.bf16.vlgmr.msra.gmra.mxu0 %v17567_v55  ;;  %v14141_v22 = vld [vmem:[#allocation11 + $0xbf0] sm:$0xf0] }
 0x403   :  { %v14144_v18 = vor.u32 %v15451_v57, %v14141_v22  ;;  %v15069_v57 = vld [vmem:[#allocation4 + $0xe0] sm:$0xf0]  ;;  %v12752_v22 = vor.u32 %v15103_v31, %v12749_v41  ;;  %v15259_v31 = vld [vmem:[#allocation11 + $0x5e4] sm:$0xf]  ;;  %v14221_v41 = vld [vmem:[#allocation11 + $0xc90] sm:$0xf0] }
 0x405   :  { %9402 = vmatpush.bf16.msrb.mxu2 %v14144_v18  ;;  %v15475_v18 = vld [vmem:[#allocation11 + $0xca4] sm:$0xf]  ;;  %9179 = vmatpush.bf16.msrb.mxu0 %v12752_v22  ;;  %v5717_v22 = vld [vmem:[#allocation4 + $0x120] sm:$0xff] }
 0x406   :  { %9259 = vmatmul.bf16.gmra.mxu3 %v17497_v26  ;;  %v15447_v26 = vld [vmem:[#allocation11 + $0xbc4] sm:$0xf]  ;;  %v14240_v34 = vor.u32 %v15475_v18, %v14237_v46 }
 0x407   :  { %v14128_v33 = vor.u32 %v15447_v26, %v14125_v15  ;;  %v17579_v26 = vor.u32 %v15069_v57, %v12607_v17  ;;  %v14112_v15 = vor.u32 %v15443_v21, %v14109_v43  ;;  %v15291_v57 = vld [vmem:[#allocation11 + $0x6e4] sm:$0xf]  ;;  %v13501_v17 = vld [vmem:[#allocation11 + $0x6f0] sm:$0xf0]  ;;  %v17586_v43 = vpop.f32.mrf.mxu1 }
 0x408   :  { %9427 = vmatpush.bf16.msrb.mxu3 %v14240_v34  ;;  %v13504_v21 = vor.u32 %v15291_v57, %v13501_v17  ;;  %v15435_v18 = vld [vmem:[#allocation11 + $0xb64] sm:$0xf]  ;;  %v6311_v17 = vunpack.c.l.b16 %v5717_v22 }
 0x409   :  { %9236 = vmatmul.bf16.gmra.mxu2 %v17250_v25  ;;  %v17572_v45 = vpop.f32.mrf.mxu2  ;;  %v17574_v6 = vpop.f32.mrf.mxu3  ;;  %v12877_v25 = vld [vmem:[#allocation11 + $0x210] sm:$0xf0]  ;;  %18862 = vst [vmem:[#allocation22_spill] sm:$0xff] %v17579_v26  ;;  %v15467_v46 = vld [vmem:[#allocation11 + $0xc64] sm:$0xf] }
 0x40a   :  { %v12880_v44 = vor.u32 %v15135_v58, %v12877_v25  ;;  %9403 = vmatpush.bf16.msrb.mxu2 %v14128_v33  ;;  %v13376_v58 = vor.u32 %v15259_v31, %v13373_v37  ;;  %v14093_v33 = vld [vmem:[#allocation11 + $0xb90] sm:$0xf0] }
 0x40b   :  { %v14096_v4 = vor.u32 %v15439_v16, %v14093_v33  ;;  %v14205_v31 = vld [vmem:[#allocation11 + $0xc70] sm:$0xf0] }
 0x40c   :  { %9202 = vmatpush.bf16.msrb.mxu1 %v12880_v44  ;;  %v14224_v44 = vor.u32 %v15471_v42, %v14221_v41  ;;  %9264 = vmatpush.bf16.msra.mxu0 %v13376_v58  ;;  %v6312_v58 = vunpack.c.h.b16 %v5717_v22  ;;  %v14208_v33 = vor.u32 %v15467_v46, %v14205_v31  ;;  %v15255_v42 = vld [vmem:[#allocation11 + $0x5c4] sm:$0xf]  ;;  %v13357_v41 = vld [vmem:[#allocation11 + $0x5d0] sm:$0xf0] }
 0x40d   :  { %v13360_v57 = vor.u32 %v15255_v42, %v13357_v41  ;;  %v15251_v22 = vld [vmem:[#allocation11 + $0x5a4] sm:$0xf]  ;;  %v14045_v42 = vld [vmem:[#allocation11 + $0xb30] sm:$0xf0] }
 0x40e   :  { %9404 = vmatpush.bf16.msrb.mxu2 %v14112_v15  ;;  %v14077_v15 = vld [vmem:[#allocation11 + $0xb70] sm:$0xf0]  ;;  %9428 = vmatpush.bf16.msrb.mxu3 %v14224_v44  ;;  %v15427_v31 = vld [vmem:[#allocation11 + $0xb24] sm:$0xf] }
 0x40f   :  { %v14080_v34 = vor.u32 %v15435_v18, %v14077_v15  ;;  %v14061_v44 = vld [vmem:[#allocation11 + $0xb50] sm:$0xf0]  ;;  %v15463_v18 = vld [vmem:[#allocation11 + $0xc44] sm:$0xf] }
 0x410   :  { %9116 = vmatmul.bf16.gmra.mxu1 %v17576_v30  ;;  %v17594_v30 = vpack.c.b16 %v6312_v58, %v6312_v58  ;;  %9265 = vmatpush.bf16.msra.mxu0 %v13360_v57  ;;  %v14189_v15 = vld [vmem:[#allocation11 + $0xc50] sm:$0xf0]  ;;  %v17602_v58 = vpack.c.b16 %v6311_v17, %v6311_v17  ;;  %v15459_v41 = vld [vmem:[#allocation11 + $0xc24] sm:$0xf] }
 0x411   :  { %v17581_v25 = vpop.f32.mrf.mxu2  ;;  %v17583_v53 = vpop.f32.mrf.mxu3  ;;  %9287 = vmatpush.bf16.msra.mxu1 %v13504_v21  ;;  %v15287_v21 = vld [vmem:[#allocation11 + $0x6c4] sm:$0xf]  ;;  %v14192_v35 = vor.u32 %v15463_v18, %v14189_v15  ;;  %v14173_v57 = vld [vmem:[#allocation11 + $0xc30] sm:$0xf0] }
 0x412   :  { %9093 = vmatmul.bf16.gmra.mxu0 %v17579_v26  ;;  %9405 = vmatpush.bf16.msrb.mxu2 %v14096_v4  ;;  %18863 = vst [vmem:[#allocation50_spill] sm:$0xff] %v17594_v30  ;;  %v13469_v18 = vld [vmem:[#allocation11 + $0x6b0] sm:$0xf0]  ;;  %v15455_v15 = vld [vmem:[#allocation11 + $0xc04] sm:$0xf] }
 0x413   :  { %9429 = vmatpush.bf16.msrb.mxu3 %v14208_v33  ;;  %v17600_v33 = vpop.f32.mrf.mxu1  ;;  %18864 = vst [vmem:[#allocation27_spill] sm:$0xff] %v17602_v58 }
 0x416   :  { %9341 = vmatmul.bf16.vlgmr.msra.gmra.mxu3 %v17521_v51  ;;  %9406 = vmatpush.bf16.msrb.mxu2 %v14080_v34  ;;  %v15431_v51 = vld [vmem:[#allocation11 + $0xb44] sm:$0xf]  ;;  %v13341_v34 = vld [vmem:[#allocation11 + $0x5b0] sm:$0xf0] }
 0x417   :  { %v14064_v9 = vor.u32 %v15431_v51, %v14061_v44  ;;  %9430 = vmatpush.bf16.msrb.mxu3 %v14192_v35  ;;  %v15283_v44 = vld [vmem:[#allocation11 + $0x6a4] sm:$0xf] }
 0x418   :  { %v13472_v17 = vor.u32 %v15283_v44, %v13469_v18 }
 0x419   :  { %9318 = vmatmul.bf16.vlgmr.msra.gmra.mxu2 %v17275_v23  ;;  %v17590_v37 = vpop.f32.mrf.mxu2  ;;  %v17592_v16 = vpop.f32.mrf.mxu3  ;;  %v13485_v23 = vld [vmem:[#allocation11 + $0x6d0] sm:$0xf0] }
 0x41a   :  { %v13488_v4 = vor.u32 %v15287_v21, %v13485_v23  ;;  %9407 = vmatpush.bf16.msrb.mxu2 %v14064_v9  ;;  %v13344_v23 = vor.u32 %v15251_v22, %v13341_v34  ;;  %v14029_v9 = vld [vmem:[#allocation11 + $0xb10] sm:$0xf0] }
 0x41b   :  { %v8905_v13 = vpop.f32.mrf.mxu0  ;;  %v14157_v34 = vld [vmem:[#allocation11 + $0xc10] sm:$0xf0]  ;;  %v17618_v18 = vpop.f32.mrf.mxu1 }
 0x41c   :  { %v17598_v46 = vadd.f32 %v8905_v13, %v17439_v62  ;;  %9288 = vmatpush.bf16.msra.mxu1 %v13488_v4  ;;  %v14048_v62 = vor.u32 %v15427_v31, %v14045_v42  ;;  %v14176_v13 = vor.u32 %v15459_v41, %v14173_v57  ;;  %9266 = vmatpush.bf16.msra.mxu0 %v13344_v23  ;;  %v15423_v4 = vld [vmem:[#allocation11 + $0xb04] sm:$0xf]  ;;  %v13453_v57 = vld [vmem:[#allocation11 + $0x690] sm:$0xf0] }
 0x41d   :  { %v14032_v22 = vor.u32 %v15423_v4, %v14029_v9  ;;  %v14160_v31 = vor.u32 %v15455_v15, %v14157_v34  ;;  %v15279_v41 = vld [vmem:[#allocation11 + $0x684] sm:$0xf]  ;;  %v13437_v9 = vld [vmem:[#allocation11 + $0x670] sm:$0xf0] }
 0x41e   :  { %9408 = vmatpush.bf16.msrb.mxu2 %v14048_v62  ;;  %9431 = vmatpush.bf16.msrb.mxu3 %v14176_v13  ;;  %v13456_v62 = vor.u32 %v15279_v41, %v13453_v57 }
 0x420   :  { %9121 = vmatmul.bf16.gmra.mxu1 %v17594_v30  ;;  %v15247_v30 = vld [vmem:[#allocation11 + $0x584] sm:$0xf] }
 0x421   :  { %v17604_v51 = vpop.f32.mrf.mxu2  ;;  %v17606_v21 = vpop.f32.mrf.mxu3  ;;  %9289 = vmatpush.bf16.msra.mxu1 %v13472_v17  ;;  %v15243_v17 = vld [vmem:[#allocation11 + $0x564] sm:$0xf] }
 0x422   :  { %18865 = vst [vmem:[#allocation55_spill] sm:$0xff] %v17604_v51  ;;  %9098 = vmatmul.bf16.gmra.mxu0 %v17602_v58  ;;  %v13325_v51 = vld [vmem:[#allocation11 + $0x590] sm:$0xf0]  ;;  %9409 = vmatpush.bf16.msrb.mxu2 %v14032_v22 }
 0x423   :  { %v8907_v35 = vpop.f32.mrf.mxu0  ;;  %v13328_v42 = vor.u32 %v15247_v30, %v13325_v51  ;;  %9432 = vmatpush.bf16.msrb.mxu3 %v14160_v31  ;;  %v13309_v30 = vld [vmem:[#allocation11 + $0x570] sm:$0xf0]  ;;  %v15275_v51 = vld [vmem:[#allocation11 + $0x664] sm:$0xf]  ;;  %v8935_v57 = vpop.f32.mrf.mxu1 }
 0x424   :  { %v17612_v23 = vadd.f32 %v8907_v35, %v17466_v40  ;;  %v13312_v4 = vor.u32 %v15243_v17, %v13309_v30  ;;  %v13440_v40 = vor.u32 %v15275_v51, %v13437_v9  ;;  %v15239_v31 = vld [vmem:[#allocation11 + $0x544] sm:$0xf]  ;;  %v13421_v17 = vld [vmem:[#allocation11 + $0x650] sm:$0xf0] }
 0x425   :  { %9267 = vmatpush.bf16.msra.mxu0 %v13328_v42  ;;  %9290 = vmatpush.bf16.msra.mxu1 %v13456_v62  ;;  %v13293_v42 = vld [vmem:[#allocation11 + $0x550] sm:$0xf0]  ;;  %v15271_v62 = vld [vmem:[#allocation11 + $0x644] sm:$0xf] }
 0x426   :  { %9346 = vmatmul.bf16.gmra.mxu3 %v17535_v10  ;;  %v13296_v41 = vor.u32 %v15239_v31, %v13293_v42  ;;  %v13424_v30 = vor.u32 %v15271_v62, %v13421_v17  ;;  %v15267_v9 = vld [vmem:[#allocation11 + $0x624] sm:$0xf]  ;;  %v15102_v31 = vld [vmem:[#allocation11 + $0xf4] sm:$0xf0]  ;;  %v12867_v17 = vld [vmem:[#allocation11 + $0x1e8] sm:$0xf] }
 0x427   :  { %v15098_v10 = vld [vmem:[#allocation11 + $0xd4] sm:$0xf0] }
 0x429   :  { %9323 = vmatmul.bf16.gmra.mxu2 %v17300_v24  ;;  %v17614_v13 = vpop.f32.mrf.mxu2  ;;  %v17616_v44 = vpop.f32.mrf.mxu3  ;;  %9268 = vmatpush.bf16.msra.mxu0 %v13312_v4  ;;  %v13277_v4 = vld [vmem:[#allocation11 + $0x530] sm:$0xf0] }
 0x42a   :  { %18866 = vst [vmem:[#allocation59_spill] sm:$0xff] %v17614_v13  ;;  %9291 = vmatpush.bf16.msra.mxu1 %v13440_v40  ;;  %v15130_v13 = vld [vmem:[#allocation11 + $0x1d4] sm:$0xf0] }
 0x42b   :  { %18867 = vst [vmem:[#allocation60_spill] sm:$0xff] %v17616_v44  ;;  %v12851_v44 = vld [vmem:[#allocation11 + $0x1c8] sm:$0xf] }
 0x42d   :  { %9269 = vmatpush.bf16.msra.mxu0 %v13296_v41 }
 0x42e   :  { %9292 = vmatpush.bf16.msra.mxu1 %v13424_v30 }
 0x42f   :  { %v8910_v15 = vpop.f32.mrf.mxu0 }
 0x430   :  { %9203 = vmatmul.bf16.vlgmr.msrb.gmra.mxu1 %v17166_v52  ;;  %v17622_v22 = vadd.f32 %v8910_v15, %v17489_v38  ;;  %v15235_v38 = vld [vmem:[#allocation11 + $0x524] sm:$0xf] }
 0x431   :  { %v9055_v34 = vpop.f32.mrf.mxu2  ;;  %v9078_v35 = vpop.f32.mrf.mxu3  ;;  %v13280_v15 = vor.u32 %v15235_v38, %v13277_v4  ;;  %v12723_v38 = vld [vmem:[#allocation11 + $0xc8] sm:$0xf] }
 0x432   :  { %9180 = vmatmul.bf16.vlgmr.msrb.gmra.mxu0 %v17144_v3  ;;  %v13405_v34 = vld [vmem:[#allocation11 + $0x630] sm:$0xf0]  ;;  %v12739_v35 = vld [vmem:[#allocation11 + $0xe8] sm:$0xf] }
 0x433   :  { %v13408_v41 = vor.u32 %v15267_v9, %v13405_v34  ;;  %v12740_v62 = vor.u32 %v15102_v31, %v12739_v35  ;;  %9270 = vmatpush.bf16.msra.mxu0 %v13280_v15  ;;  %v12852_v9 = vor.u32 %v15130_v13, %v12851_v44  ;;  %v15231_v34 = vld [vmem:[#allocation11 + $0x504] sm:$0xf]  ;;  %v13261_v35 = vld [vmem:[#allocation11 + $0x510] sm:$0xf0]  ;;  %v15094_v15 = vld [vmem:[#allocation11 + $0xb4] sm:$0xf0] }
 0x434   :  { %v12835_v31 = vld [vmem:[#allocation11 + $0x1a8] sm:$0xf] }
 0x435   :  { %9293 = vmatpush.bf16.msra.mxu1 %v13408_v41  ;;  %9494 = vmatpush.bf16.msra.mxu2 %v12740_v62 }
 0x436   :  { %9351 = vmatmul.bf16.gmra.mxu3 %v17551_v47  ;;  %v15134_v47 = vld [vmem:[#allocation11 + $0x1f4] sm:$0xf0] }
 0x437   :  { %v8912_v51 = vpop.f32.mrf.mxu0  ;;  %v12868_v30 = vor.u32 %v15134_v47, %v12867_v17  ;;  %v12707_v47 = vld [vmem:[#allocation11 + $0xa8] sm:$0xf]  ;;  %v15126_v17 = vld [vmem:[#allocation11 + $0x1b4] sm:$0xf0] }
 0x438   :  { %v8913_v40 = vadd.f32 %v8912_v51, %v17507_v19  ;;  %v15263_v19 = vld [vmem:[#allocation11 + $0x604] sm:$0xf]  ;;  %v13389_v51 = vld [vmem:[#allocation11 + $0x610] sm:$0xf0]  ;;  %v12708_v62 = vor.u32 %v15094_v15, %v12707_v47 }
 0x439   :  { %9328 = vmatmul.bf16.gmra.mxu2 %v17318_v36  ;;  %v17628_v42 = vpop.f32.mrf.mxu2  ;;  %v17630_v24 = vpop.f32.mrf.mxu3  ;;  %9517 = vmatpush.bf16.msra.mxu3 %v12868_v30  ;;  %v13392_v4 = vor.u32 %v15263_v19, %v13389_v51  ;;  %v15387_v51 = vld [vmem:[#allocation11 + $0x9e4] sm:$0xf]  ;;  %v14013_v47 = vld [vmem:[#allocation11 + $0xaf0] sm:$0xf0] }
 0x43a   :  { %18868 = vst [vmem:[#allocation61_spill] sm:$0xff] %v17630_v24  ;;  %v17632_v36 = vadd.f32 %v8935_v57, %v8913_v40  ;;  %v12724_v24 = vor.u32 %v15098_v10, %v12723_v38  ;;  %v13264_v40 = vor.u32 %v15231_v34, %v13261_v35  ;;  %v12836_v10 = vor.u32 %v15126_v17, %v12835_v31  ;;  %v13885_v38 = vld [vmem:[#allocation11 + $0x9f0] sm:$0xf0]  ;;  %v12819_v34 = vld [vmem:[#allocation11 + $0x188] sm:$0xf] }
 0x43b   :  { %9294 = vmatpush.bf16.msra.mxu1 %v13392_v4  ;;  %v15090_v4 = vld [vmem:[#allocation11 + $0x94] sm:$0xf0]  ;;  %v12675_v31 = vld [vmem:[#allocation11 + $0x68] sm:$0xf] }
 0x43c   :  { %9495 = vmatpush.bf16.msra.mxu2 %v12724_v24  ;;  %9271 = vmatpush.bf16.msra.mxu0 %v13264_v40  ;;  %v13888_v24 = vor.u32 %v15387_v51, %v13885_v38  ;;  %v15122_v35 = vld [vmem:[#allocation11 + $0x194] sm:$0xf0]  ;;  %v15419_v40 = vld [vmem:[#allocation11 + $0xae4] sm:$0xf] }
 0x43d   :  { %v8938_v52 = vpop.f32.mrf.mxu1  ;;  %9518 = vmatpush.bf16.msra.mxu3 %v12852_v9  ;;  %v12820_v9 = vor.u32 %v15122_v35, %v12819_v34  ;;  %v14016_v15 = vor.u32 %v15419_v40, %v14013_v47  ;;  %v13997_v40 = vld [vmem:[#allocation11 + $0xad0] sm:$0xf0]  ;;  %v12659_v47 = vld [vmem:[#allocation11 + $0x48] sm:$0xf] }
 0x43f   :  { %v8915_v57 = vpop.f32.mrf.mxu0  ;;  %9379 = vmatpush.bf16.msrb.mxu1 %v14016_v15 }
 0x440   :  { %9208 = vmatmul.bf16.gmra.mxu1 %v17217_v20  ;;  %v8916_v41 = vadd.f32 %v8915_v57, %v17516_v0  ;;  %9496 = vmatpush.bf16.msra.mxu2 %v12708_v62  ;;  %v12691_v0 = vld [vmem:[#allocation11 + $0x88] sm:$0xf] }
 0x441   :  { %v17636_v30 = vpop.f32.mrf.mxu2  ;;  %v17638_v19 = vpop.f32.mrf.mxu3  ;;  %9519 = vmatpush.bf16.msra.mxu3 %v12836_v10  ;;  %v12692_v57 = vor.u32 %v15090_v4, %v12691_v0  ;;  %9356 = vmatpush.bf16.msrb.mxu0 %v13888_v24  ;;  %v12803_v62 = vld [vmem:[#allocation11 + $0x168] sm:$0xf]  ;;  %v15118_v10 = vld [vmem:[#allocation11 + $0x174] sm:$0xf0]  ;;  %v15383_v0 = vld [vmem:[#allocation11 + $0x9c4] sm:$0xf] }
 0x442   :  { %v17640_v13 = vadd.f32 %v8938_v52, %v8916_v41  ;;  %9185 = vmatmul.bf16.gmra.mxu0 %v17201_v54  ;;  %v15086_v41 = vld [vmem:[#allocation11 + $0x74] sm:$0xf0]  ;;  %v12804_v51 = vor.u32 %v15118_v10, %v12803_v62  ;;  %v13869_v4 = vld [vmem:[#allocation11 + $0x9d0] sm:$0xf0]  ;;  %v15415_v24 = vld [vmem:[#allocation11 + $0xac4] sm:$0xf] }
 0x443   :  { %v12676_v17 = vor.u32 %v15086_v41, %v12675_v31  ;;  %v13872_v34 = vor.u32 %v15383_v0, %v13869_v4  ;;  %v12787_v31 = vld [vmem:[#allocation11 + $0x148] sm:$0xf]  ;;  %v15114_v41 = vld [vmem:[#allocation11 + $0x154] sm:$0xf0]  ;;  %v15379_v10 = vld [vmem:[#allocation11 + $0x9a4] sm:$0xf] }
 0x444   :  { %9497 = vmatpush.bf16.msra.mxu2 %v12692_v57  ;;  %v14000_v57 = vor.u32 %v15415_v24, %v13997_v40  ;;  %v12788_v15 = vor.u32 %v15114_v41, %v12787_v31  ;;  %v13853_v0 = vld [vmem:[#allocation11 + $0x9b0] sm:$0xf0]  ;;  %v12643_v4 = vld [vmem:[#allocation11 + $0x28] sm:$0xf] }
 0x445   :  { %v8940_v44 = vpop.f32.mrf.mxu1  ;;  %9520 = vmatpush.bf16.msra.mxu3 %v12820_v9  ;;  %9357 = vmatpush.bf16.msrb.mxu0 %v13872_v34  ;;  %v13981_v31 = vld [vmem:[#allocation11 + $0xab0] sm:$0xf0] }
 0x446   :  { %9433 = vmatmul.bf16.vlgmr.msrb.gmra.mxu3 %v17567_v55  ;;  %9380 = vmatpush.bf16.msrb.mxu1 %v14000_v57  ;;  %v12771_v55 = vld [vmem:[#allocation11 + $0x128] sm:$0xf] }
 0x447   :  { %v8917_v52 = vpop.f32.mrf.mxu0  ;;  %v12627_v57 = vld [vmem:[#allocation11 + $0x8] sm:$0xf] }
 0x448   :  { %9498 = vmatpush.bf16.msra.mxu2 %v12676_v17  ;;  %v15082_v52 = vld [vmem:[#allocation11 + $0x54] sm:$0xf0]  ;;  %v13856_v17 = vor.u32 %v15379_v10, %v13853_v0  ;;  %v12755_v10 = vld [vmem:[#allocation11 + $0x108] sm:$0xf] }
 0x449   :  { %9410 = vmatmul.bf16.vlgmr.msrb.gmra.mxu2 %v17334_v32  ;;  %v17645_v44 = vpop.f32.mrf.mxu3  ;;  %9521 = vmatpush.bf16.msra.mxu3 %v12804_v51  ;;  %v12660_v9 = vor.u32 %v15082_v52, %v12659_v47  ;;  %v15078_v32 = vld [vmem:[#allocation11 + $0x34] sm:$0xf0]  ;;  %v15411_v52 = vld [vmem:[#allocation11 + $0xaa4] sm:$0xf] }
 0x44a   :  { %v15110_v51 = vld [vmem:[#allocation11 + $0x134] sm:$0xf0]  ;;  %v12644_v24 = vor.u32 %v15078_v32, %v12643_v4  ;;  %9358 = vmatpush.bf16.msrb.mxu0 %v13856_v17  ;;  %v13984_v41 = vor.u32 %v15411_v52, %v13981_v31  ;;  %v15375_v32 = vld [vmem:[#allocation11 + $0x984] sm:$0xf]  ;;  %v13965_v31 = vld [vmem:[#allocation11 + $0xa90] sm:$0xf0] }
 0x44b   :  { %v12772_v40 = vor.u32 %v15110_v51, %v12771_v55  ;;  %v13837_v55 = vld [vmem:[#allocation11 + $0x990] sm:$0xf0]  ;;  %v15407_v52 = vld [vmem:[#allocation11 + $0xa84] sm:$0xf] }
 0x44c   :  { %v17647_v38 = vpop.f32.mrf.mxu2  ;;  %9499 = vmatpush.bf16.msra.mxu2 %v12660_v9  ;;  %v15074_v9 = vld [vmem:[#allocation11 + $0x14] sm:$0xf0]  ;;  %9381 = vmatpush.bf16.msrb.mxu1 %v13984_v41  ;;  %v13840_v51 = vor.u32 %v15375_v32, %v13837_v55  ;;  %v13949_v32 = vld [vmem:[#allocation11 + $0xa70] sm:$0xf0] }
 0x44d   :  { %v17649_v35 = vpop.f32.mrf.mxu1  ;;  %9522 = vmatpush.bf16.msra.mxu3 %v12788_v15  ;;  %v12628_v0 = vor.u32 %v15074_v9, %v12627_v57  ;;  %v15106_v15 = vld [vmem:[#allocation11 + $0x114] sm:$0xf0]  ;;  %v15371_v57 = vld [vmem:[#allocation11 + $0x964] sm:$0xf]  ;;  %v13821_v9 = vld [vmem:[#allocation11 + $0x970] sm:$0xf0] }
 0x44e   :  { %v12756_v4 = vor.u32 %v15106_v15, %v12755_v10  ;;  %9359 = vmatpush.bf16.msrb.mxu0 %v13840_v51  ;;  %v15403_v10 = vld [vmem:[#allocation11 + $0xa64] sm:$0xf]  ;;  %v13824_v15 = vor.u32 %v15371_v57, %v13821_v9 }
 0x44f   :  { %v17652_v62 = vpop.f32.mrf.mxu0  ;;  %v13952_v55 = vor.u32 %v15403_v10, %v13949_v32 }
 0x450   :  { %9213 = vmatmul.bf16.gmra.mxu1 %v17248_v27  ;;  %9500 = vmatpush.bf16.msra.mxu2 %v12644_v24  ;;  %v13968_v24 = vor.u32 %v15407_v52, %v13965_v31  ;;  %v8929_v52 = vadd.f32 %v17586_v43, %v17598_v46  ;;  %v8931_v43 = vadd.f32 %v17600_v33, %v17612_v23  ;;  %v15395_v33 = vld [vmem:[#allocation11 + $0xa24] sm:$0xf]  ;;  %v13917_v23 = vld [vmem:[#allocation11 + $0xa30] sm:$0xf0] }
 0x451   :  { %v17654_v34 = vpop.f32.mrf.mxu3  ;;  %9523 = vmatpush.bf16.msra.mxu3 %v12772_v40 }
 0x452   :  { %18869 = vst [vmem:[#allocation62_spill] sm:$0xff] %v17654_v34  ;;  %9190 = vmatmul.bf16.gmra.mxu0 %v17240_v14  ;;  %9382 = vmatpush.bf16.msrb.mxu1 %v13968_v24  ;;  %v8952_v9 = vadd.f32 %v17528_v59, %v8929_v52  ;;  %v15367_v59 = vld [vmem:[#allocation11 + $0x944] sm:$0xf] }
 0x453   :  { %9360 = vmatpush.bf16.msrb.mxu0 %v13824_v15  ;;  %v15399_v52 = vld [vmem:[#allocation11 + $0xa44] sm:$0xf] }
 0x454   :  { %v17656_v47 = vpop.f32.mrf.mxu2  ;;  %9501 = vmatpush.bf16.msra.mxu2 %v12628_v0  ;;  %v8975_v15 = vadd.f32 %v17530_v60, %v8952_v9  ;;  %v13933_v60 = vld [vmem:[#allocation11 + $0xa50] sm:$0xf0]  ;;  %v15363_v9 = vld [vmem:[#allocation11 + $0x924] sm:$0xf] }
 0x455   :  { %v17659_v27 = vpop.f32.mrf.mxu1  ;;  %9524 = vmatpush.bf16.msra.mxu3 %v12756_v4  ;;  %v15391_v34 = vld [vmem:[#allocation11 + $0xa04] sm:$0xf] }
 0x456   :  { %9438 = vmatmul.bf16.gmra.mxu3 %v17579_v26  ;;  %9383 = vmatpush.bf16.msrb.mxu1 %v13952_v55  ;;  %v8998_v46 = vadd.f32 %v17652_v62, %v8975_v15  ;;  %v13936_v26 = vor.u32 %v15399_v52, %v13933_v60  ;;  %v13251_v62 = vld [vmem:[#allocation11 + $0x4e8] sm:$0xf]  ;;  %v15359_v60 = vld [vmem:[#allocation11 + $0x904] sm:$0xf] }
 0x457   :  { %v17663_v17 = vpop.f32.mrf.mxu0  ;;  %v13363_v52 = vld [vmem:[#allocation11 + $0x5c8] sm:$0xf] }
 0x458   :  { %v9021_v15 = vadd.f32 %v17649_v35, %v8998_v46  ;;  %v13235_v35 = vld [vmem:[#allocation11 + $0x4c8] sm:$0xf] }
 0x459   :  { %9415 = vmatmul.bf16.gmra.mxu2 %v17365_v56  ;;  %v17665_v20 = vpop.f32.mrf.mxu3 }
 0x45a   :  { %18870 = vst [vmem:[#allocation63_spill] sm:$0xff] %v17665_v20  ;;  %9384 = vmatpush.bf16.msrb.mxu1 %v13936_v26  ;;  %v15258_v26 = vld [vmem:[#allocation11 + $0x5d4] sm:$0xf0] }
 0x45c   :  { %v17667_v40 = vpop.f32.mrf.mxu2 }
 0x45d   :  { %v17669_v41 = vpop.f32.mrf.mxu1 }
 0x45f   :  { %v17672_v56 = vpop.f32.mrf.mxu0 }
 0x460   :  { %9295 = vmatmul.bf16.vlgmr.msra.gmra.mxu1 %v17273_v7 }
 0x461   :  { %v9170_v0 = vpop.f32.mrf.mxu3 }
 0x462   :  { %9272 = vmatmul.bf16.vlgmr.msra.gmra.mxu0 %v17266_v5 }
 0x464   :  { %v9147_v51 = vpop.f32.mrf.mxu2 }
 0x465   :  { %v17675_v4 = vpop.f32.mrf.mxu1  ;;  %v13805_v51 = vld [vmem:[#allocation11 + $0x950] sm:$0xf0] }
 0x466   :  { %9443 = vmatmul.bf16.gmra.mxu3 %v17602_v58  ;;  %v8954_v58 = vadd.f32 %v17537_v11, %v8931_v43  ;;  %v13901_v43 = vld [vmem:[#allocation11 + $0xa10] sm:$0xf0] }
 0x467   :  { %v17681_v31 = vpop.f32.mrf.mxu0 }
 0x469   :  { %9420 = vmatmul.bf16.gmra.mxu2 %v17411_v2  ;;  %v17683_v24 = vpop.f32.mrf.mxu3  ;;  %v13808_v2 = vor.u32 %v15367_v59, %v13805_v51  ;;  %v13920_v59 = vor.u32 %v15395_v33, %v13917_v23  ;;  %v9044_v23 = vadd.f32 %v17572_v45, %v9021_v15  ;;  %v18875_v15 = vld [vmem:[#allocation40_spill] sm:$0xff] }
 0x46a   :  { %18871 = vst [vmem:[#allocation64_spill] sm:$0xff] %v17683_v24  ;;  %v13379_v24 = vld [vmem:[#allocation11 + $0x5e8] sm:$0xf] }
 0x46b   :  { %9361 = vmatpush.bf16.msrb.mxu0 %v13808_v2  ;;  %v15226_v2 = vld [vmem:[#allocation11 + $0x4d4] sm:$0xf0]  ;;  %9385 = vmatpush.bf16.msrb.mxu1 %v13920_v59 }
 0x46c   :  { %v17685_v57 = vpop.f32.mrf.mxu2  ;;  %v13236_v46 = vor.u32 %v15226_v2, %v13235_v35 }
 0x46d   :  { %18872 = vst [vmem:[#allocation65_spill] sm:$0xff] %v17685_v57  ;;  %v17688_v10 = vpop.f32.mrf.mxu1  ;;  %v15262_v57 = vld [vmem:[#allocation11 + $0x5f4] sm:$0xf0] }
 0x46e   :  { %v13380_v20 = vor.u32 %v15262_v57, %v13379_v24  ;;  %v13364_v24 = vor.u32 %v15258_v26, %v13363_v52  ;;  %v13773_v57 = vld [vmem:[#allocation11 + $0x910] sm:$0xf0] }
 0x46f   :  { %v17692_v32 = vpop.f32.mrf.mxu0 }
 0x470   :  { %9300 = vmatmul.bf16.gmra.mxu1 %v17298_v39  ;;  %v13789_v39 = vld [vmem:[#allocation11 + $0x930] sm:$0xf0]  ;;  %9609 = vmatpush.bf16.msrb.mxu3 %v13380_v20  ;;  %v13776_v20 = vor.u32 %v15359_v60, %v13773_v57 }
 0x471   :  { %v17697_v55 = vpop.f32.mrf.mxu3 }
 0x472   :  { %18873 = vst [vmem:[#allocation66_spill] sm:$0xff] %v17697_v55  ;;  %9277 = vmatmul.bf16.gmra.mxu0 %v17291_v63  ;;  %v13792_v55 = vor.u32 %v15363_v9, %v13789_v39  ;;  %v8977_v39 = vadd.f32 %v17539_v49, %v8954_v58  ;;  %v13904_v49 = vor.u32 %v15391_v34, %v13901_v43  ;;  %v13347_v58 = vld [vmem:[#allocation11 + $0x5a8] sm:$0xf] }
 0x473   :  { %v8959_v43 = vadd.f32 %v17553_v1, %v17632_v36  ;;  %v14397_v36 = vld [vmem:[#allocation11 + $0xdf0] sm:$0xf0] }
 0x474   :  { %v17699_v0 = vpop.f32.mrf.mxu2  ;;  %9362 = vmatpush.bf16.msrb.mxu0 %v13792_v55  ;;  %v9000_v9 = vadd.f32 %v17663_v17, %v8977_v39  ;;  %9610 = vmatpush.bf16.msrb.mxu3 %v13364_v24  ;;  %v9067_v17 = vadd.f32 %v17574_v6, %v9044_v23  ;;  %v15515_v24 = vld [vmem:[#allocation11 + $0xde4] sm:$0xf]  ;;  %v13331_v23 = vld [vmem:[#allocation11 + $0x588] sm:$0xf] }
 0x475   :  { %18874 = vst [vmem:[#allocation67_spill] sm:$0xff] %v17699_v0  ;;  %v9032_v7 = vpop.f32.mrf.mxu1  ;;  %v15230_v0 = vld [vmem:[#allocation11 + $0x4f4] sm:$0xf0]  ;;  %9386 = vmatpush.bf16.msrb.mxu1 %v13904_v49  ;;  %v8982_v1 = vadd.f32 %v17555_v12, %v8959_v43  ;;  %v15511_v43 = vld [vmem:[#allocation11 + $0xdc4] sm:$0xf] }
 0x476   :  { %9525 = vmatmul.bf16.vlgmr.msra.gmra.mxu3 %v17144_v3  ;;  %v13252_v51 = vor.u32 %v15230_v0, %v13251_v62  ;;  %v8934_v7 = vadd.f32 %v17618_v18, %v17622_v22  ;;  %v13219_v18 = vld [vmem:[#allocation11 + $0x4a8] sm:$0xf]  ;;  %v15222_v22 = vld [vmem:[#allocation11 + $0x4b4] sm:$0xf0]  ;;  %v9023_v2 = vadd.f32 %v17659_v27, %v9000_v9  ;;  %v17725_v27 = vld [vmem:[#allocation6] sm:$0xff] }
 0x477   :  { %v9009_v11 = vpop.f32.mrf.mxu0  ;;  %v15254_v62 = vld [vmem:[#allocation11 + $0x5b4] sm:$0xf0]  ;;  %v13220_v55 = vor.u32 %v15222_v22, %v13219_v18  ;;  %v10233_v60 = vrot.slane %v17725_v27, 6  ;;  %v14400_v18 = vor.u32 %v15515_v24, %v14397_v36  ;;  %v13203_v22 = vld [vmem:[#allocation11 + $0x488] sm:$0xf]  ;;  %v8962_v27 = vadd.f32 %v17560_v48, %v17640_v13 }
 0x478   :  { %9586 = vmatpush.bf16.msrb.mxu2 %v13252_v51  ;;  %v8957_v51 = vadd.f32 %v17544_v28, %v8934_v7  ;;  %v13348_v35 = vor.u32 %v15254_v62, %v13347_v58  ;;  %9363 = vmatpush.bf16.msrb.mxu0 %v13776_v20  ;;  %v15218_v9 = vld [vmem:[#allocation11 + $0x494] sm:$0xf0]  ;;  %v15547_v20 = vld [vmem:[#allocation11 + $0xee4] sm:$0xf]  ;;  %v9005_v58 = vadd.f32 %v17681_v31, %v8982_v1  ;;  %v13171_v24 = vld [vmem:[#allocation11 + $0x448] sm:$0xf] }
 0x479   :  { %9502 = vmatmul.bf16.vlgmr.msra.gmra.mxu2 %v17142_v8  ;;  %v17709_v0 = vpop.f32.mrf.mxu3  ;;  %v15250_v49 = vld [vmem:[#allocation11 + $0x594] sm:$0xf0] }
 0x47a   :  { %v8980_v45 = vadd.f32 %v17546_v61, %v8957_v51  ;;  %9611 = vmatpush.bf16.msrb.mxu3 %v13348_v35  ;;  %v9046_v61 = vadd.f32 %v17581_v25, %v9023_v2  ;;  %v13332_v62 = vor.u32 %v15250_v49, %v13331_v23  ;;  %v14525_v51 = vld [vmem:[#allocation11 + $0xef0] sm:$0xf0]  ;;  %v15507_v23 = vld [vmem:[#allocation11 + $0xda4] sm:$0xf]  ;;  %v15430_v8 = vld [vmem:[#allocation11 + $0xb34] sm:$0xf0] }
 0x47b   :  { %v14528_v2 = vor.u32 %v15547_v20, %v14525_v51  ;;  %v14365_v49 = vld [vmem:[#allocation11 + $0xdb0] sm:$0xf0] }
 0x47c   :  { %v17712_v33 = vpop.f32.mrf.mxu2  ;;  %9587 = vmatpush.bf16.msrb.mxu2 %v13236_v46  ;;  %v9003_v28 = vadd.f32 %v17672_v56, %v8980_v45  ;;  %v17731_v46 = vld [vmem:[#allocation6 + $0x20] sm:$0xff]  ;;  %v9069_v57 = vadd.f32 %v17583_v53, %v9046_v61  ;;  %9448 = vmatpush.bf16.msra.mxu0 %v14400_v18  ;;  %v15214_v53 = vld [vmem:[#allocation11 + $0x474] sm:$0xf0]  ;;  %v13315_v45 = vld [vmem:[#allocation11 + $0x568] sm:$0xf] }
 0x47d   :  { %v9112_v11 = vpop.f32.mrf.mxu1  ;;  %v10237_v25 = vrot.slane %v17731_v46, 6  ;;  %9471 = vmatpush.bf16.msra.mxu1 %v14528_v2  ;;  %v15210_v18 = vld [vmem:[#allocation11 + $0x454] sm:$0xf0] }
 0x47e   :  { %v9026_v56 = vadd.f32 %v17669_v41, %v9003_v28  ;;  %v13204_v41 = vor.u32 %v15218_v9, %v13203_v22  ;;  %9612 = vmatpush.bf16.msrb.mxu3 %v13332_v62  ;;  %v13299_v22 = vld [vmem:[#allocation11 + $0x548] sm:$0xf]  ;;  %v15242_v9 = vld [vmem:[#allocation11 + $0x554] sm:$0xf0]  ;;  %v13172_v13 = vor.u32 %v15210_v18, %v13171_v24  ;;  %v17764_v24 = vld [vmem:[#allocation6 + $0x60] sm:$0xff] }
 0x47f   :  { %v9089_v34 = vpop.f32.mrf.mxu0  ;;  %v10238_v61 = vsel %vm18876_vm8, %v10233_v60, %v10237_v25  ;;  %v18877_v62 = vld [vmem:[#allocation25_spill] sm:$0xff] }
 0x480   :  { %9305 = vmatmul.bf16.gmra.mxu1 %v18875_v15  ;;  %v9090_v59 = vadd.f32 %v9089_v34, %v9067_v17  ;;  %9588 = vmatpush.bf16.msrb.mxu2 %v13220_v55  ;;  %v9049_v35 = vadd.f32 %v17590_v37, %v9026_v56  ;;  %v15246_v34 = vld [vmem:[#allocation11 + $0x574] sm:$0xf0]  ;;  %v14509_v56 = vld [vmem:[#allocation11 + $0xed0] sm:$0xf0]  ;;  %v8985_v51 = vadd.f32 %v18877_v62, %v8962_v27  ;;  %v17760_v27 = vld [vmem:[#allocation6 + $0x40] sm:$0xff] }
 0x481   :  { %v17721_v7 = vpop.f32.mrf.mxu3  ;;  %v13316_v31 = vor.u32 %v15246_v34, %v13315_v45 }
 0x482   :  { %v9113_v39 = vadd.f32 %v9112_v11, %v9090_v59  ;;  %9282 = vmatmul.bf16.gmra.mxu0 %v17493_v29  ;;  %v13187_v11 = vld [vmem:[#allocation11 + $0x468] sm:$0xf]  ;;  %v9072_v48 = vadd.f32 %v17592_v16, %v9049_v35  ;;  %v9008_v34 = vadd.f32 %v17692_v32, %v8985_v51 }
 0x483   :  { %v13188_v17 = vor.u32 %v15214_v53, %v13187_v11  ;;  %9613 = vmatpush.bf16.msrb.mxu3 %v13316_v31  ;;  %v18878_v11 = vld [vmem:[#allocation42_spill] sm:$0xff]  ;;  %v13283_v35 = vld [vmem:[#allocation11 + $0x528] sm:$0xf] }
 0x484   :  { %v17727_v6 = vpop.f32.mrf.mxu2  ;;  %v9136_v52 = vadd.f32 %v17628_v42, %v9113_v39  ;;  %9589 = vmatpush.bf16.msrb.mxu2 %v13204_v41  ;;  %v14381_v39 = vld [vmem:[#allocation11 + $0xdd0] sm:$0xf0]  ;;  %v13300_v41 = vor.u32 %v15242_v9, %v13299_v22  ;;  %v9031_v22 = vadd.f32 %v17688_v10, %v9008_v34  ;;  %v10362_v9 = vrot.slane %v17764_v24, 2  ;;  %v15234_v10 = vld [vmem:[#allocation11 + $0x514] sm:$0xf0] }
 0x485   :  { %v9114_v26 = vpop.f32.mrf.mxu1  ;;  %v14384_v37 = vor.u32 %v15511_v43, %v14381_v39  ;;  %v15370_v24 = vld [vmem:[#allocation11 + $0x954] sm:$0xf0] }
 0x486   :  { %10184 = vst [vmem:[#allocation5 + $0x88] sm:$0xff] %v9136_v52  ;;  %9530 = vmatmul.bf16.gmra.mxu3 %v17201_v54  ;;  %v15543_v52 = vld [vmem:[#allocation11 + $0xec4] sm:$0xf] }
 0x487   :  { %v9091_v42 = vpop.f32.mrf.mxu0  ;;  %9449 = vmatpush.bf16.msra.mxu0 %v14384_v37  ;;  %v18879_v37 = vld [vmem:[#allocation30_spill] sm:$0xff]  ;;  %9614 = vmatpush.bf16.msrb.mxu3 %v13300_v41 }
 0x488   :  { %v9092_v12 = vadd.f32 %v9091_v42, %v9069_v57  ;;  %v14512_v57 = vor.u32 %v15543_v52, %v14509_v56  ;;  %9590 = vmatpush.bf16.msrb.mxu2 %v13188_v17  ;;  %v15238_v17 = vld [vmem:[#allocation11 + $0x534] sm:$0xf0] }
 0x489   :  { %9507 = vmatmul.bf16.gmra.mxu2 %v17199_v50  ;;  %v17742_v55 = vpop.f32.mrf.mxu3  ;;  %v18880_v52 = vld [vmem:[#allocation55_spill] sm:$0xff]  ;;  %v13284_v32 = vor.u32 %v15238_v17, %v13283_v35 }
 0x48a   :  { %v9115_v59 = vadd.f32 %v9114_v26, %v9092_v12  ;;  %v9028_v26 = vadd.f32 %v17675_v4, %v9005_v58  ;;  %v14368_v4 = vor.u32 %v15507_v23, %v14365_v49  ;;  %v13155_v58 = vld [vmem:[#allocation11 + $0x428] sm:$0xf]  ;;  %9472 = vmatpush.bf16.msra.mxu1 %v14512_v57  ;;  %v15202_v49 = vld [vmem:[#allocation11 + $0x414] sm:$0xf0] }
 0x48b   :  { %9615 = vmatpush.bf16.msrb.mxu3 %v13284_v32  ;;  %v13139_v23 = vld [vmem:[#allocation11 + $0x408] sm:$0xf]  ;;  %v18882_v17 = vld [vmem:[#allocation59_spill] sm:$0xff]  ;;  %v15495_v32 = vld [vmem:[#allocation11 + $0xd44] sm:$0xf] }
 0x48c   :  { %v17745_v28 = vpop.f32.mrf.mxu2  ;;  %v9138_v36 = vadd.f32 %v17636_v30, %v9115_v59  ;;  %v15206_v30 = vld [vmem:[#allocation11 + $0x434] sm:$0xf0]  ;;  %9591 = vmatpush.bf16.msrb.mxu2 %v13172_v13  ;;  %9450 = vmatpush.bf16.msra.mxu0 %v14368_v4  ;;  %v9051_v56 = vadd.f32 %v18880_v52, %v9028_v26  ;;  %v18881_v13 = vld [vmem:[#allocation54_spill] sm:$0xff]  ;;  %v13140_v4 = vor.u32 %v15202_v49, %v13139_v23  ;;  %v18883_v23 = vld [vmem:[#allocation60_spill] sm:$0xff] }
 0x48d   :  { %v9117_v1 = vpop.f32.mrf.mxu1  ;;  %v10204_v42 = vld [vmem:[#allocation5 + $0x88] sm:$0xfc]  ;;  %v13156_v59 = vor.u32 %v15206_v30, %v13155_v58  ;;  %v15503_v58 = vld [vmem:[#allocation11 + $0xd84] sm:$0xf]  ;;  %v14349_v30 = vld [vmem:[#allocation11 + $0xd90] sm:$0xf0]  ;;  %v9054_v34 = vadd.f32 %v18882_v17, %v9031_v22 }
 0x48e   :  { %v10257_v20 = vadd.f32 %v10233_v60, %v10204_v42  ;;  %v10261_v12 = vadd.f32 %v10238_v61, %v9138_v36  ;;  %v9074_v26 = vadd.f32 %v17606_v21, %v9051_v56  ;;  %v15539_v42 = vld [vmem:[#allocation11 + $0xea4] sm:$0xf]  ;;  %v14352_v51 = vor.u32 %v15503_v58, %v14349_v30  ;;  %v15358_v30 = vld [vmem:[#allocation11 + $0x8f4] sm:$0xf0]  ;;  %v14429_v17 = vld [vmem:[#allocation11 + $0xe30] sm:$0xf0] }
 0x48f   :  { %v9094_v53 = vpop.f32.mrf.mxu0  ;;  %v9077_v49 = vadd.f32 %v18883_v23, %v9054_v34  ;;  %v15519_v23 = vld [vmem:[#allocation11 + $0xe04] sm:$0xf]  ;;  %v15286_v50 = vld [vmem:[#allocation11 + $0x6b4] sm:$0xf0] }
 0x490   :  { %9387 = vmatmul.bf16.vlgmr.msrb.gmra.mxu1 %v18878_v11  ;;  %v10269_v2 = vmax.f32 %v10257_v20, 0.0  ;;  %v10273_v45 = vmax.f32 %v10261_v12, 0.0  ;;  %v9095_v16 = vadd.f32 %v9094_v53, %v9072_v48  ;;  %9592 = vmatpush.bf16.msrb.mxu2 %v13156_v59  ;;  %v14493_v48 = vld [vmem:[#allocation11 + $0xeb0] sm:$0xf0]  ;;  %v13267_v20 = vld [vmem:[#allocation11 + $0x508] sm:$0xf] }
 0x491   :  { %v9262_v60 = vpop.f32.mrf.mxu3  ;;  %v13268_v21 = vor.u32 %v15234_v10, %v13267_v20  ;;  %v15535_v53 = vld [vmem:[#allocation11 + $0xe84] sm:$0xf]  ;;  %v14333_v59 = vld [vmem:[#allocation11 + $0xd70] sm:$0xf0]  ;;  %9451 = vmatpush.bf16.msra.mxu0 %v14352_v51  ;;  %v15390_v51 = vld [vmem:[#allocation11 + $0x9f4] sm:$0xf0] }
 0x492   :  { %v10294_v31 = vrot.slane %v10269_v2, 2  ;;  %v17758_v43 = vrot.slane %v10273_v45, 2  ;;  %v9118_v39 = vadd.f32 %v9117_v1, %v9095_v16  ;;  %9364 = vmatmul.bf16.vlgmr.msrb.gmra.mxu0 %v18879_v37  ;;  %v10358_v1 = vrot.slane %v17760_v27, 2  ;;  %v14477_v2 = vld [vmem:[#allocation11 + $0xe90] sm:$0xf0] }
 0x493   :  { %v15499_v45 = vld [vmem:[#allocation11 + $0xd64] sm:$0xf]  ;;  %v14480_v60 = vor.u32 %v15535_v53, %v14477_v2  ;;  %9616 = vmatpush.bf16.msrb.mxu3 %v13268_v21  ;;  %v13891_v21 = vld [vmem:[#allocation11 + $0x9e8] sm:$0xf] }
 0x494   :  { %v9239_v61 = vpop.f32.mrf.mxu2  ;;  %v10296_v36 = vsel %vm10293_vm10, %v10294_v31, %v17758_v43  ;;  %v9141_v57 = vadd.f32 %v17647_v38, %v9118_v39  ;;  %v14496_v38 = vor.u32 %v15539_v42, %v14493_v48  ;;  %9593 = vmatpush.bf16.msrb.mxu2 %v13140_v4  ;;  %v15531_v31 = vld [vmem:[#allocation11 + $0xe64] sm:$0xf]  ;;  %v14461_v39 = vld [vmem:[#allocation11 + $0xe70] sm:$0xf0]  ;;  %v10363_v27 = vsel %vm10293_vm10, %v10358_v1, %v10362_v9  ;;  %v13763_v4 = vld [vmem:[#allocation11 + $0x8e8] sm:$0xf] }
 0x495   :  { %v9119_v18 = vpop.f32.mrf.mxu1  ;;  %10322 = vst [vmem:[#allocation12] sm:$0xff] %v10296_v36  ;;  %v14336_v61 = vor.u32 %v15499_v45, %v14333_v59  ;;  %v14317_v36 = vld [vmem:[#allocation11 + $0xd50] sm:$0xf0]  ;;  %v15491_v20 = vld [vmem:[#allocation11 + $0xd24] sm:$0xf]  ;;  %v13764_v34 = vor.u32 %v15358_v30, %v13763_v4 }
 0x496   :  { %10192 = vst [vmem:[#allocation5 + $0x20] sm:$0xff] %v9141_v57  ;;  %9535 = vmatmul.bf16.gmra.mxu3 %v17240_v14  ;;  %9473 = vmatpush.bf16.msra.mxu1 %v14496_v38  ;;  %v15527_v57 = vld [vmem:[#allocation11 + $0xe44] sm:$0xf]  ;;  %v14445_v42 = vld [vmem:[#allocation11 + $0xe50] sm:$0xf0]  ;;  %v14320_v58 = vor.u32 %v15495_v32, %v14317_v36  ;;  %v18885_v36 = vld [vmem:[#allocation53_spill] sm:$0xff] }
 0x497   :  { %v9096_v41 = vpop.f32.mrf.mxu0  ;;  %9452 = vmatpush.bf16.msra.mxu0 %v14336_v61  ;;  %v13747_v59 = vld [vmem:[#allocation11 + $0x8c8] sm:$0xf] }
 0x498   :  { %v9097_v12 = vadd.f32 %v9096_v41, %v9074_v26  ;;  %v14464_v26 = vor.u32 %v15531_v31, %v14461_v39  ;;  %v15354_v31 = vld [vmem:[#allocation11 + $0x8d4] sm:$0xf0]  ;;  %9678 = vmatpush.bf16.msra.mxu2 %v13764_v34  ;;  %v13859_v30 = vld [vmem:[#allocation11 + $0x9a8] sm:$0xf] }
 0x499   :  { %9512 = vmatmul.bf16.gmra.mxu2 %v18881_v13  ;;  %v17775_v62 = vpop.f32.mrf.mxu3  ;;  %v13715_v34 = vld [vmem:[#allocation11 + $0x888] sm:$0xf] }
 0x49a   :  { %v9120_v16 = vadd.f32 %v9119_v18, %v9097_v12  ;;  %9474 = vmatpush.bf16.msra.mxu1 %v14480_v60  ;;  %v14301_v12 = vld [vmem:[#allocation11 + $0xd30] sm:$0xf0]  ;;  %v13892_v60 = vor.u32 %v15390_v51, %v13891_v21  ;;  %v15382_v21 = vld [vmem:[#allocation11 + $0x9b4] sm:$0xf0]  ;;  %v14323_v13 = vld [vmem:[#allocation11 + $0xd48] sm:$0xf] }
 0x49b   :  { %9453 = vmatpush.bf16.msra.mxu0 %v14320_v58  ;;  %v13731_v58 = vld [vmem:[#allocation11 + $0x8a8] sm:$0xf]  ;;  %v15166_v51 = vld [vmem:[#allocation11 + $0x2f4] sm:$0xf0] }
 0x49c   :  { %v17777_v35 = vpop.f32.mrf.mxu2  ;;  %v9143_v52 = vadd.f32 %v17656_v47, %v9120_v16  ;;  %v18884_v47 = vld [vmem:[#allocation49_spill] sm:$0xff]  ;;  %v14448_v16 = vor.u32 %v15527_v57, %v14445_v42  ;;  %v15386_v57 = vld [vmem:[#allocation11 + $0x9d4] sm:$0xf0]  ;;  %v15487_v42 = vld [vmem:[#allocation11 + $0xd04] sm:$0xf]  ;;  %9701 = vmatpush.bf16.msra.mxu3 %v13892_v60 }
 0x49d   :  { %v9122_v56 = vpop.f32.mrf.mxu1  ;;  %v10212_v18 = vld [vmem:[#allocation5 + $0x20] sm:$0x3]  ;;  %v10330_v22 = vld [vmem:[#allocation5 + $0x20] sm:$0xc0] }
 0x49e   :  { %v10265_v48 = vadd.f32 %v10237_v25, %v10212_v18  ;;  %v10382_v41 = vadd.f32 %v10358_v1, %v10330_v22  ;;  %v10386_v38 = vadd.f32 %v10363_v27, %v9143_v52  ;;  %v15523_v25 = vld [vmem:[#allocation11 + $0xe24] sm:$0xf]  ;;  %9475 = vmatpush.bf16.msra.mxu1 %v14464_v26  ;;  %v13875_v18 = vld [vmem:[#allocation11 + $0x9c8] sm:$0xf]  ;;  %v14304_v22 = vor.u32 %v15491_v20, %v14301_v12  ;;  %v15350_v20 = vld [vmem:[#allocation11 + $0x8b4] sm:$0xf0] }
 0x49f   :  { %v9099_v10 = vpop.f32.mrf.mxu0  ;;  %v13748_v26 = vor.u32 %v15354_v31, %v13747_v59  ;;  %v13876_v4 = vor.u32 %v15386_v57, %v13875_v18  ;;  %v14432_v12 = vor.u32 %v15523_v25, %v14429_v17  ;;  %v15198_v25 = vld [vmem:[#allocation11 + $0x3f4] sm:$0xf0] }
 0x4a0   :  { %9392 = vmatmul.bf16.gmra.mxu1 %v18884_v47  ;;  %v10277_v53 = vmax.f32 %v10265_v48, 0.0  ;;  %v10394_v2 = vmax.f32 %v10382_v41, 0.0  ;;  %v10398_v45 = vmax.f32 %v10386_v38, 0.0  ;;  %v9100_v46 = vadd.f32 %v9099_v10, %v9077_v49  ;;  %v14413_v49 = vld [vmem:[#allocation11 + $0xe10] sm:$0xf0]  ;;  %9454 = vmatpush.bf16.msra.mxu0 %v14304_v22 }
 0x4a1   :  { %v17788_v1 = vpop.f32.mrf.mxu3  ;;  %v14285_v10 = vld [vmem:[#allocation11 + $0xd10] sm:$0xf0]  ;;  %9679 = vmatpush.bf16.msra.mxu2 %v13748_v26  ;;  %9702 = vmatpush.bf16.msra.mxu3 %v13876_v4  ;;  %v14416_v60 = vor.u32 %v15519_v23, %v14413_v49  ;;  %v15346_v31 = vld [vmem:[#allocation11 + $0x894] sm:$0xf0]  ;;  %v12979_v22 = vld [vmem:[#allocation11 + $0x2c8] sm:$0xf] }
 0x4a2   :  { %v10306_v39 = vrot.slane %v10277_v53, 2  ;;  %v10418_v27 = vrot.slane %v10394_v2, 6  ;;  %v17790_v61 = vrot.slane %v10398_v45, 6  ;;  %v9123_v52 = vadd.f32 %v9122_v56, %v9100_v46  ;;  %9369 = vmatmul.bf16.gmra.mxu0 %v18885_v36  ;;  %9476 = vmatpush.bf16.msra.mxu1 %v14448_v16  ;;  %v13123_v16 = vld [vmem:[#allocation11 + $0x3e8] sm:$0xf] }
 0x4a3   :  { %v14288_v2 = vor.u32 %v15487_v42, %v14285_v10  ;;  %v13732_v45 = vor.u32 %v15350_v20, %v13731_v58  ;;  %v13860_v46 = vor.u32 %v15382_v21, %v13859_v30  ;;  %v13124_v18 = vor.u32 %v15198_v25, %v13123_v16  ;;  %v15162_v57 = vld [vmem:[#allocation11 + $0x2d4] sm:$0xf0]  ;;  %v13827_v49 = vld [vmem:[#allocation11 + $0x968] sm:$0xf]  ;;  %v18888_v30 = vld [vmem:[#allocation52_spill] sm:$0xff] }
 0x4a4   :  { %v17792_v32 = vpop.f32.mrf.mxu2  ;;  %v10307_v48 = vsel %vm10293_vm10, %v17758_v43, %v10306_v39  ;;  %v10420_v41 = vsel %vm18886_vm4, %v10418_v27, %v17790_v61  ;;  %v9146_v38 = vadd.f32 %v17667_v40, %v9123_v52  ;;  %v12995_v43 = vld [vmem:[#allocation11 + $0x2e8] sm:$0xf]  ;;  %v18887_v40 = vld [vmem:[#allocation51_spill] sm:$0xff]  ;;  %v13716_v42 = vor.u32 %v15346_v31, %v13715_v34 }
 0x4a5   :  { %v9124_v56 = vpop.f32.mrf.mxu1  ;;  %10326 = vst [vmem:[#allocation12 + $0x20] sm:$0xff] %v10307_v48  ;;  %v12996_v59 = vor.u32 %v15166_v51, %v12995_v43  ;;  %v13843_v39 = vld [vmem:[#allocation11 + $0x988] sm:$0xf]  ;;  %v15378_v27 = vld [vmem:[#allocation11 + $0x994] sm:$0xf0]  ;;  %9455 = vmatpush.bf16.msra.mxu0 %v14288_v2  ;;  %9680 = vmatpush.bf16.msra.mxu2 %v13732_v45  ;;  %v12980_v10 = vor.u32 %v15162_v57, %v12979_v22 }
 0x4a6   :  { %10447 = vst [vmem:[#allocation12 + $0x40] sm:$0xff] %v10420_v41  ;;  %9617 = vmatmul.bf16.vlgmr.msrb.gmra.mxu3 %v17266_v5  ;;  %9477 = vmatpush.bf16.msra.mxu1 %v14432_v12  ;;  %v13844_v48 = vor.u32 %v15378_v27, %v13843_v39  ;;  %v13699_v41 = vld [vmem:[#allocation11 + $0x868] sm:$0xf]  ;;  %v15194_v56 = vld [vmem:[#allocation11 + $0x3d4] sm:$0xf0]  ;;  %v18890_v27 = vld [vmem:[#allocation18_spill] sm:$0xff] }
 0x4a7   :  { %10200 = vst [vmem:[#allocation5 + $0x28] sm:$0xff] %v9146_v38  ;;  %v9101_v53 = vpop.f32.mrf.mxu0  ;;  %9703 = vmatpush.bf16.msra.mxu3 %v13860_v46  ;;  %v13107_v38 = vld [vmem:[#allocation11 + $0x3c8] sm:$0xf]  ;;  %v15342_v23 = vld [vmem:[#allocation11 + $0x874] sm:$0xf0] }
 0x4a8   :  { %v15374_v4 = vld [vmem:[#allocation11 + $0x974] sm:$0xf0]  ;;  %v13108_v20 = vor.u32 %v15194_v56, %v13107_v38  ;;  %v12963_v43 = vld [vmem:[#allocation11 + $0x2a8] sm:$0xf]  ;;  %v13700_v45 = vor.u32 %v15342_v23, %v13699_v41 }
 0x4a9   :  { %9594 = vmatmul.bf16.vlgmr.msrb.gmra.mxu2 %v18887_v40  ;;  %v17802_v17 = vpop.f32.mrf.mxu3  ;;  %9540 = vmatpush.bf16.msrb.mxu0 %v12996_v59  ;;  %v15158_v51 = vld [vmem:[#allocation11 + $0x2b4] sm:$0xf0]  ;;  %v18889_v53 = vld [vmem:[#allocation61_spill] sm:$0xff]  ;;  %v13828_v46 = vor.u32 %v15374_v4, %v13827_v49 }
 0x4aa   :  { %9478 = vmatpush.bf16.msra.mxu1 %v14416_v60  ;;  %9681 = vmatpush.bf16.msra.mxu2 %v13716_v42  ;;  %v13683_v34 = vld [vmem:[#allocation11 + $0x848] sm:$0xf]  ;;  %v15338_v16 = vld [vmem:[#allocation11 + $0x854] sm:$0xf0] }
 0x4ab   :  { %9704 = vmatpush.bf16.msra.mxu3 %v13844_v48  ;;  %v13811_v59 = vld [vmem:[#allocation11 + $0x948] sm:$0xf]  ;;  %v15190_v22 = vld [vmem:[#allocation11 + $0x3b4] sm:$0xf0]  ;;  %v13684_v41 = vor.u32 %v15338_v16, %v13683_v34 }
 0x4ac   :  { %v17804_v52 = vpop.f32.mrf.mxu2  ;;  %v13812_v38 = vor.u32 %v15370_v24, %v13811_v59  ;;  %v13667_v56 = vld [vmem:[#allocation11 + $0x828] sm:$0xf]  ;;  %v15334_v23 = vld [vmem:[#allocation11 + $0x834] sm:$0xf0] }
 0x4ad   :  { %v9204_v26 = vpop.f32.mrf.mxu1  ;;  %9541 = vmatpush.bf16.msrb.mxu0 %v12980_v10  ;;  %v13795_v49 = vld [vmem:[#allocation11 + $0x928] sm:$0xf]  ;;  %v15366_v4 = vld [vmem:[#allocation11 + $0x934] sm:$0xf0] }
 0x4ae   :  { %v10338_v58 = vld [vmem:[#allocation5 + $0x28] sm:$0x3f]  ;;  %9563 = vmatpush.bf16.msrb.mxu1 %v13124_v18  ;;  %9682 = vmatpush.bf16.msra.mxu2 %v13700_v45  ;;  %v15330_v16 = vld [vmem:[#allocation11 + $0x814] sm:$0xf0] }
 0x4af   :  { %v10390_v12 = vadd.f32 %v10362_v9, %v10338_v58  ;;  %v9181_v21 = vpop.f32.mrf.mxu0  ;;  %v12964_v9 = vor.u32 %v15158_v51, %v12963_v43  ;;  %v13091_v18 = vld [vmem:[#allocation11 + $0x3a8] sm:$0xf]  ;;  %9705 = vmatpush.bf16.msra.mxu3 %v13828_v46  ;;  %v15154_v58 = vld [vmem:[#allocation11 + $0x294] sm:$0xf0]  ;;  %v13668_v43 = vor.u32 %v15334_v23, %v13667_v56 }
 0x4b0   :  { %9397 = vmatmul.bf16.gmra.mxu1 %v18888_v30  ;;  %v9182_v2 = vadd.f32 %v9181_v21, %v18889_v53  ;;  %v13092_v42 = vor.u32 %v15190_v22, %v13091_v18  ;;  %v12947_v10 = vld [vmem:[#allocation11 + $0x288] sm:$0xf]  ;;  %v15186_v53 = vld [vmem:[#allocation11 + $0x394] sm:$0xf0] }
 0x4b1   :  { %v10402_v25 = vmax.f32 %v10390_v12, 0.0  ;;  %v17810_v60 = vpop.f32.mrf.mxu3  ;;  %9542 = vmatpush.bf16.msrb.mxu0 %v12964_v9  ;;  %v18892_v12 = vld [vmem:[#allocation21_spill] sm:$0xff]  ;;  %v15362_v59 = vld [vmem:[#allocation11 + $0x914] sm:$0xf0] }
 0x4b2   :  { %v17812_v31 = vadd.f32 %v9204_v26, %v9182_v2  ;;  %9374 = vmatmul.bf16.gmra.mxu0 %v18890_v27  ;;  %9564 = vmatpush.bf16.msrb.mxu1 %v13108_v20  ;;  %v12948_v20 = vor.u32 %v15154_v58, %v12947_v10  ;;  %v13075_v51 = vld [vmem:[#allocation11 + $0x388] sm:$0xf]  ;;  %v15182_v56 = vld [vmem:[#allocation11 + $0x374] sm:$0xf0] }
 0x4b3   :  { %v10430_v57 = vrot.slane %v10402_v25, 6  ;;  %9683 = vmatpush.bf16.msra.mxu2 %v13684_v41  ;;  %9706 = vmatpush.bf16.msra.mxu3 %v13812_v38  ;;  %v13651_v45 = vld [vmem:[#allocation11 + $0x808] sm:$0xf]  ;;  %v13076_v46 = vor.u32 %v15186_v53, %v13075_v51 }
 0x4b4   :  { %v17814_v39 = vpop.f32.mrf.mxu2  ;;  %v13779_v25 = vld [vmem:[#allocation11 + $0x908] sm:$0xf] }
 0x4b5   :  { %v9206_v48 = vpop.f32.mrf.mxu1  ;;  %v10431_v26 = vsel %vm18891_vm3, %v17790_v61, %v10430_v57  ;;  %v13796_v61 = vor.u32 %v15366_v4, %v13795_v49  ;;  %9543 = vmatpush.bf16.msrb.mxu0 %v12948_v20  ;;  %v13780_v22 = vor.u32 %v15362_v59, %v13779_v25  ;;  %v12931_v57 = vld [vmem:[#allocation11 + $0x268] sm:$0xf]  ;;  %v18893_v49 = vld [vmem:[#allocation19_spill] sm:$0xff]  ;;  %v18894_v20 = vld [vmem:[#allocation16_spill] sm:$0xff] }
 0x4b6   :  { %10451 = vst [vmem:[#allocation12 + $0x60] sm:$0xff] %v10431_v26  ;;  %9622 = vmatmul.bf16.gmra.mxu3 %v17291_v63  ;;  %9565 = vmatpush.bf16.msrb.mxu1 %v13092_v42  ;;  %v15150_v42 = vld [vmem:[#allocation11 + $0x274] sm:$0xf0]  ;;  %v13059_v41 = vld [vmem:[#allocation11 + $0x368] sm:$0xf] }
 0x4b7   :  { %v9183_v21 = vpop.f32.mrf.mxu0  ;;  %9684 = vmatpush.bf16.msra.mxu2 %v13668_v43  ;;  %9707 = vmatpush.bf16.msra.mxu3 %v13796_v61  ;;  %v12932_v38 = vor.u32 %v15150_v42, %v12931_v57  ;;  %v13060_v23 = vor.u32 %v15182_v56, %v13059_v41  ;;  %v15146_v43 = vld [vmem:[#allocation11 + $0x254] sm:$0xf0]  ;;  %v13027_v59 = vld [vmem:[#allocation11 + $0x328] sm:$0xf] }
 0x4b8   :  { %v9184_v2 = vadd.f32 %v9183_v21, %v17638_v19  ;;  %v13652_v19 = vor.u32 %v15330_v16, %v13651_v45  ;;  %v12915_v21 = vld [vmem:[#allocation11 + $0x248] sm:$0xf]  ;;  %v15178_v61 = vld [vmem:[#allocation11 + $0x354] sm:$0xf0] }
 0x4b9   :  { %9599 = vmatmul.bf16.gmra.mxu2 %v18892_v12  ;;  %v17822_v34 = vpop.f32.mrf.mxu3  ;;  %9544 = vmatpush.bf16.msrb.mxu0 %v12932_v38  ;;  %v12916_v51 = vor.u32 %v15146_v43, %v12915_v21  ;;  %v12899_v16 = vld [vmem:[#allocation11 + $0x228] sm:$0xf]  ;;  %v15142_v25 = vld [vmem:[#allocation11 + $0x234] sm:$0xf0] }
 0x4ba   :  { %v17824_v24 = vadd.f32 %v9206_v48, %v9184_v2  ;;  %9566 = vmatpush.bf16.msrb.mxu1 %v13076_v46  ;;  %v13043_v2 = vld [vmem:[#allocation11 + $0x348] sm:$0xf]  ;;  %v15174_v57 = vld [vmem:[#allocation11 + $0x334] sm:$0xf0] }
 0x4bb   :  { %9685 = vmatpush.bf16.msra.mxu2 %v13652_v19  ;;  %9708 = vmatpush.bf16.msra.mxu3 %v13780_v22  ;;  %v13044_v45 = vor.u32 %v15178_v61, %v13043_v2  ;;  %v12900_v22 = vor.u32 %v15142_v25, %v12899_v16  ;;  %v14275_v42 = vld [vmem:[#allocation11 + $0xce8] sm:$0xf]  ;;  %v15486_v41 = vld [vmem:[#allocation11 + $0xcf4] sm:$0xf0]  ;;  %v13028_v56 = vor.u32 %v15174_v57, %v13027_v59 }
 0x4bc   :  { %v17826_v9 = vpop.f32.mrf.mxu2  ;;  %v15170_v2 = vld [vmem:[#allocation11 + $0x314] sm:$0xf0]  ;;  %v14259_v61 = vld [vmem:[#allocation11 + $0xcc8] sm:$0xf] }
 0x4bd   :  { %v9209_v18 = vpop.f32.mrf.mxu1  ;;  %9545 = vmatpush.bf16.msrb.mxu0 %v12916_v51  ;;  %v13011_v51 = vld [vmem:[#allocation11 + $0x308] sm:$0xf]  ;;  %v15514_v25 = vld [vmem:[#allocation11 + $0xdd4] sm:$0xf0] }
 0x4be   :  { %9567 = vmatpush.bf16.msrb.mxu1 %v13060_v23  ;;  %v14276_v23 = vor.u32 %v15486_v41, %v14275_v42  ;;  %v14387_v16 = vld [vmem:[#allocation11 + $0xdc8] sm:$0xf] }
 0x4bf   :  { %v9186_v26 = vpop.f32.mrf.mxu0  ;;  %v12883_v57 = vld [vmem:[#allocation11 + $0x208] sm:$0xf] }
 0x4c0   :  { %9479 = vmatmul.bf16.vlgmr.msra.gmra.mxu1 %v18893_v49  ;;  %v9187_v48 = vadd.f32 %v9186_v26, %v17645_v44  ;;  %v18895_v44 = vld [vmem:[#allocation28_spill] sm:$0xff]  ;;  %v14403_v26 = vld [vmem:[#allocation11 + $0xde8] sm:$0xf]  ;;  %9770 = vmatpush.bf16.msrb.mxu2 %v14276_v23 }
 0x4c1   :  { %v9354_v4 = vpop.f32.mrf.mxu3  ;;  %9546 = vmatpush.bf16.msrb.mxu0 %v12900_v22  ;;  %v14243_v41 = vld [vmem:[#allocation11 + $0xca8] sm:$0xf] }
 0x4c2   :  { %v17830_v10 = vadd.f32 %v9209_v18, %v9187_v48  ;;  %9456 = vmatmul.bf16.vlgmr.msra.gmra.mxu0 %v18894_v20  ;;  %9568 = vmatpush.bf16.msrb.mxu1 %v13044_v45  ;;  %v18896_v18 = vld [vmem:[#allocation62_spill] sm:$0xff]  ;;  %v15518_v48 = vld [vmem:[#allocation11 + $0xdf4] sm:$0xf0]  ;;  %v13012_v45 = vor.u32 %v15170_v2, %v13011_v51  ;;  %v14371_v23 = vld [vmem:[#allocation11 + $0xda8] sm:$0xf] }
 0x4c3   :  { %v14404_v21 = vor.u32 %v15518_v48, %v14403_v26  ;;  %v18898_v26 = vld [vmem:[#allocation63_spill] sm:$0xff]  ;;  %v14339_v12 = vld [vmem:[#allocation11 + $0xd68] sm:$0xf] }
 0x4c4   :  { %v9331_v58 = vpop.f32.mrf.mxu2  ;;  %v15510_v51 = vld [vmem:[#allocation11 + $0xdb4] sm:$0xf0] }
 0x4c5   :  { %v9211_v53 = vpop.f32.mrf.mxu1  ;;  %9793 = vmatpush.bf16.msrb.mxu3 %v14404_v21 }
 0x4c6   :  { %9627 = vmatmul.bf16.gmra.mxu3 %v17493_v29  ;;  %9569 = vmatpush.bf16.msrb.mxu1 %v13028_v56  ;;  %v15478_v56 = vld [vmem:[#allocation11 + $0xcb4] sm:$0xf0] }
 0x4c7   :  { %v9188_v46 = vpop.f32.mrf.mxu0  ;;  %v14244_v21 = vor.u32 %v15478_v56, %v14243_v41  ;;  %v14355_v41 = vld [vmem:[#allocation11 + $0xd88] sm:$0xf]  ;;  %v15506_v56 = vld [vmem:[#allocation11 + $0xd94] sm:$0xf0] }
 0x4c8   :  { %v9189_v19 = vadd.f32 %v9188_v46, %v18896_v18  ;;  %v15482_v46 = vld [vmem:[#allocation11 + $0xcd4] sm:$0xf0]  ;;  %v14388_v18 = vor.u32 %v15514_v25, %v14387_v16  ;;  %v18899_v25 = vld [vmem:[#allocation29_spill] sm:$0xff] }
 0x4c9   :  { %9604 = vmatmul.bf16.gmra.mxu2 %v18895_v44  ;;  %v17836_v38 = vpop.f32.mrf.mxu3  ;;  %v14260_v59 = vor.u32 %v15482_v46, %v14259_v61  ;;  %v14372_v61 = vor.u32 %v15510_v51, %v14371_v23  ;;  %v15294_v44 = vld [vmem:[#allocation11 + $0x6f4] sm:$0xf0] }
 0x4ca   :  { %v17838_v4 = vadd.f32 %v9211_v53, %v9189_v19  ;;  %v15138_v53 = vld [vmem:[#allocation11 + $0x214] sm:$0xf0]  ;;  %v18897_v19 = vld [vmem:[#allocation26_spill] sm:$0xff]  ;;  %9570 = vmatpush.bf16.msrb.mxu1 %v13012_v45  ;;  %9794 = vmatpush.bf16.msrb.mxu3 %v14388_v18 }
 0x4cb   :  { %v12884_v22 = vor.u32 %v15138_v53, %v12883_v57  ;;  %9771 = vmatpush.bf16.msrb.mxu2 %v14260_v59  ;;  %v13507_v53 = vld [vmem:[#allocation11 + $0x6e8] sm:$0xf]  ;;  %v15474_v59 = vld [vmem:[#allocation11 + $0xc94] sm:$0xf0] }
 0x4cc   :  { %v17840_v58 = vpop.f32.mrf.mxu2  ;;  %v13508_v45 = vor.u32 %v15294_v44, %v13507_v53  ;;  %v15326_v23 = vld [vmem:[#allocation11 + $0x7f4] sm:$0xf0] }
 0x4cd   :  { %v9214_v43 = vpop.f32.mrf.mxu1  ;;  %9547 = vmatpush.bf16.msrb.mxu0 %v12884_v22  ;;  %v14356_v22 = vor.u32 %v15506_v56, %v14355_v41  ;;  %v15502_v44 = vld [vmem:[#allocation11 + $0xd74] sm:$0xf0]  ;;  %v13491_v56 = vld [vmem:[#allocation11 + $0x6c8] sm:$0xf] }
 0x4ce   :  { %9795 = vmatpush.bf16.msrb.mxu3 %v14372_v61  ;;  %v14340_v40 = vor.u32 %v15502_v44, %v14339_v12 }
 0x4cf   :  { %v9191_v42 = vpop.f32.mrf.mxu0  ;;  %9772 = vmatpush.bf16.msrb.mxu2 %v14244_v21  ;;  %v14211_v21 = vld [vmem:[#allocation11 + $0xc68] sm:$0xf] }
 0x4d0   :  { %9484 = vmatmul.bf16.gmra.mxu1 %v18897_v19  ;;  %v9192_v48 = vadd.f32 %v9191_v42, %v18898_v26  ;;  %v14227_v42 = vld [vmem:[#allocation11 + $0xc88] sm:$0xf]  ;;  %v18900_v26 = vld [vmem:[#allocation24_spill] sm:$0xff]  ;;  %v18903_v19 = vld [vmem:[#allocation47_spill] sm:$0xff] }
 0x4d1   :  { %v17844_v2 = vpop.f32.mrf.mxu3  ;;  %v14228_v18 = vor.u32 %v15474_v59, %v14227_v42  ;;  %9632 = vmatpush.bf16.msra.mxu0 %v13508_v45  ;;  %v18901_v59 = vld [vmem:[#allocation65_spill] sm:$0xff] }
 0x4d2   :  { %v17846_v46 = vadd.f32 %v9214_v43, %v9192_v48  ;;  %9461 = vmatmul.bf16.gmra.mxu0 %v18899_v25  ;;  %v13635_v43 = vld [vmem:[#allocation11 + $0x7e8] sm:$0xf]  ;;  %9796 = vmatpush.bf16.msrb.mxu3 %v14356_v22  ;;  %v9228_v41 = vadd.f32 %v18901_v59, %v17812_v31  ;;  %v15498_v22 = vld [vmem:[#allocation11 + $0xd54] sm:$0xf0] }
 0x4d3   :  { %v13636_v51 = vor.u32 %v15326_v23, %v13635_v43  ;;  %9773 = vmatpush.bf16.msrb.mxu2 %v14228_v18  ;;  %v13619_v23 = vld [vmem:[#allocation11 + $0x7c8] sm:$0xf] }
 0x4d4   :  { %v17848_v16 = vpop.f32.mrf.mxu2  ;;  %v14195_v18 = vld [vmem:[#allocation11 + $0xc48] sm:$0xf] }
 0x4d5   :  { %v9216_v57 = vpop.f32.mrf.mxu1  ;;  %9655 = vmatpush.bf16.msra.mxu1 %v13636_v51  ;;  %v18902_v51 = vld [vmem:[#allocation64_spill] sm:$0xff]  ;;  %v13475_v59 = vld [vmem:[#allocation11 + $0x6a8] sm:$0xf] }
 0x4d6   :  { %9709 = vmatmul.bf16.vlgmr.msra.gmra.mxu3 %v18879_v37  ;;  %v15470_v57 = vld [vmem:[#allocation11 + $0xc74] sm:$0xf0]  ;;  %v9251_v12 = vadd.f32 %v18902_v51, %v9228_v41  ;;  %v14324_v37 = vor.u32 %v15498_v22, %v14323_v13 }
 0x4d7   :  { %v9193_v48 = vpop.f32.mrf.mxu0  ;;  %v14212_v61 = vor.u32 %v15470_v57, %v14211_v21  ;;  %9797 = vmatpush.bf16.msrb.mxu3 %v14340_v40  ;;  %v15466_v57 = vld [vmem:[#allocation11 + $0xc54] sm:$0xf0] }
 0x4d8   :  { %v15290_v48 = vld [vmem:[#allocation11 + $0x6d4] sm:$0xf0]  ;;  %v14196_v44 = vor.u32 %v15466_v57, %v14195_v18  ;;  %v18904_v57 = vld [vmem:[#allocation50_spill] sm:$0xff] }
 0x4d9   :  { %9686 = vmatmul.bf16.vlgmr.msra.gmra.mxu2 %v18900_v26  ;;  %v17853_v53 = vpop.f32.mrf.mxu3  ;;  %v13492_v43 = vor.u32 %v15290_v48, %v13491_v56  ;;  %v15322_v26 = vld [vmem:[#allocation11 + $0x7d4] sm:$0xf0]  ;;  %v13476_v48 = vor.u32 %v15286_v50, %v13475_v59 }
 0x4da   :  { %9774 = vmatpush.bf16.msrb.mxu2 %v14212_v61  ;;  %v13620_v21 = vor.u32 %v15322_v26, %v13619_v23  ;;  %v14179_v61 = vld [vmem:[#allocation11 + $0xc28] sm:$0xf]  ;;  %v15462_v40 = vld [vmem:[#allocation11 + $0xc34] sm:$0xf0] }
 0x4db   :  { %9633 = vmatpush.bf16.msra.mxu0 %v13492_v43  ;;  %v14307_v26 = vld [vmem:[#allocation11 + $0xd28] sm:$0xf]  ;;  %v15494_v23 = vld [vmem:[#allocation11 + $0xd34] sm:$0xf0]  ;;  %9798 = vmatpush.bf16.msrb.mxu3 %v14324_v37  ;;  %v14180_v41 = vor.u32 %v15462_v40, %v14179_v61 }
 0x4dc   :  { %v17855_v42 = vpop.f32.mrf.mxu2  ;;  %9656 = vmatpush.bf16.msra.mxu1 %v13620_v21  ;;  %v14308_v43 = vor.u32 %v15494_v23, %v14307_v26  ;;  %v18905_v22 = vld [vmem:[#allocation67_spill] sm:$0xff]  ;;  %v13603_v21 = vld [vmem:[#allocation11 + $0x7a8] sm:$0xf]  ;;  %v18906_v26 = vld [vmem:[#allocation66_spill] sm:$0xff] }
 0x4dd   :  { %v9296_v45 = vpop.f32.mrf.mxu1  ;;  %v9230_v51 = vadd.f32 %v18905_v22, %v17824_v24  ;;  %v15318_v50 = vld [vmem:[#allocation11 + $0x7b4] sm:$0xf0]  ;;  %v14291_v37 = vld [vmem:[#allocation11 + $0xd08] sm:$0xf]  ;;  %v18907_v22 = vld [vmem:[#allocation56_spill] sm:$0xff] }
 0x4de   :  { %9775 = vmatpush.bf16.msrb.mxu2 %v14196_v44  ;;  %v13604_v44 = vor.u32 %v15318_v50, %v13603_v21  ;;  %v15458_v59 = vld [vmem:[#allocation11 + $0xc14] sm:$0xf0] }
 0x4df   :  { %v9273_v31 = vpop.f32.mrf.mxu0  ;;  %9634 = vmatpush.bf16.msra.mxu0 %v13476_v48  ;;  %9799 = vmatpush.bf16.msrb.mxu3 %v14308_v43  ;;  %v15282_v40 = vld [vmem:[#allocation11 + $0x694] sm:$0xf0]  ;;  %v9253_v23 = vadd.f32 %v18906_v26, %v9230_v51  ;;  %v9233_v51 = vadd.f32 %v17712_v33, %v17830_v10  ;;  %v18909_v10 = vld [vmem:[#allocation32_spill] sm:$0xff] }
 0x4e0   :  { %9489 = vmatmul.bf16.gmra.mxu1 %v18903_v19  ;;  %v9274_v56 = vadd.f32 %v9273_v31, %v9251_v12  ;;  %v14163_v31 = vld [vmem:[#allocation11 + $0xc08] sm:$0xf]  ;;  %v15314_v21 = vld [vmem:[#allocation11 + $0x794] sm:$0xf0] }
 0x4e1   :  { %v17861_v29 = vpop.f32.mrf.mxu3  ;;  %v14164_v61 = vor.u32 %v15458_v59, %v14163_v31  ;;  %9657 = vmatpush.bf16.msra.mxu1 %v13604_v44 }
 0x4e2   :  { %v17863_v18 = vadd.f32 %v9296_v45, %v9274_v56  ;;  %9466 = vmatmul.bf16.gmra.mxu0 %v18904_v57  ;;  %9776 = vmatpush.bf16.msrb.mxu2 %v14180_v41  ;;  %v15490_v45 = vld [vmem:[#allocation11 + $0xd14] sm:$0xf0]  ;;  %v13459_v56 = vld [vmem:[#allocation11 + $0x688] sm:$0xf] }
 0x4e3   :  { %v14292_v24 = vor.u32 %v15490_v45, %v14291_v37  ;;  %v13460_v48 = vor.u32 %v15282_v40, %v13459_v56  ;;  %v13587_v41 = vld [vmem:[#allocation11 + $0x788] sm:$0xf]  ;;  %v15278_v45 = vld [vmem:[#allocation11 + $0x674] sm:$0xf0] }
 0x4e4   :  { %v17865_v13 = vpop.f32.mrf.mxu2  ;;  %v13588_v43 = vor.u32 %v15314_v21, %v13587_v41  ;;  %v13443_v37 = vld [vmem:[#allocation11 + $0x668] sm:$0xf]  ;;  %v9235_v21 = vadd.f32 %v17727_v6, %v17838_v4 }
 0x4e5   :  { %v9298_v12 = vpop.f32.mrf.mxu1  ;;  %9635 = vmatpush.bf16.msra.mxu0 %v13460_v48  ;;  %9800 = vmatpush.bf16.msrb.mxu3 %v14292_v24  ;;  %v13571_v56 = vld [vmem:[#allocation11 + $0x768] sm:$0xf]  ;;  %v13444_v40 = vor.u32 %v15278_v45, %v13443_v37  ;;  %v15306_v45 = vld [vmem:[#allocation11 + $0x754] sm:$0xf0] }
 0x4e6   :  { %9714 = vmatmul.bf16.gmra.mxu3 %v18885_v36  ;;  %9777 = vmatpush.bf16.msrb.mxu2 %v14164_v61  ;;  %v9256_v61 = vadd.f32 %v17709_v0, %v9233_v51  ;;  %v13555_v51 = vld [vmem:[#allocation11 + $0x748] sm:$0xf] }
 0x4e7   :  { %v9275_v19 = vpop.f32.mrf.mxu0  ;;  %9658 = vmatpush.bf16.msra.mxu1 %v13588_v43  ;;  %v15274_v43 = vld [vmem:[#allocation11 + $0x654] sm:$0xf0] }
 0x4e8   :  { %v9276_v50 = vadd.f32 %v9275_v19, %v9253_v23  ;;  %v15310_v19 = vld [vmem:[#allocation11 + $0x774] sm:$0xf0]  ;;  %v18908_v23 = vld [vmem:[#allocation33_spill] sm:$0xff] }
 0x4e9   :  { %9691 = vmatmul.bf16.gmra.mxu2 %v18907_v22  ;;  %v17873_v31 = vpop.f32.mrf.mxu3  ;;  %v13572_v26 = vor.u32 %v15310_v19, %v13571_v56  ;;  %9636 = vmatpush.bf16.msra.mxu0 %v13444_v40  ;;  %v13556_v56 = vor.u32 %v15306_v45, %v13555_v51  ;;  %v9258_v40 = vadd.f32 %v17721_v7, %v9235_v21  ;;  %v15164_v45 = vld [vmem:[#allocation11 + $0x2ec] sm:$0xf]  ;;  %v12997_v22 = vld [vmem:[#allocation11 + $0x2f8] sm:$0xf0] }
 0x4ea   :  { %v17875_v59 = vadd.f32 %v9298_v12, %v9276_v50  ;;  %v13427_v50 = vld [vmem:[#allocation11 + $0x648] sm:$0xf]  ;;  %v9238_v21 = vadd.f32 %v17745_v28, %v17846_v46  ;;  %v15266_v46 = vld [vmem:[#allocation11 + $0x614] sm:$0xf0] }
 0x4eb   :  { %9659 = vmatpush.bf16.msra.mxu1 %v13572_v26  ;;  %v13428_v0 = vor.u32 %v15274_v43, %v13427_v50  ;;  %v15270_v26 = vld [vmem:[#allocation11 + $0x634] sm:$0xf0]  ;;  %v13395_v28 = vld [vmem:[#allocation11 + $0x608] sm:$0xf] }
 0x4ec   :  { %v17877_v36 = vpop.f32.mrf.mxu2 }
 0x4ed   :  { %v9301_v44 = vpop.f32.mrf.mxu1  ;;  %9637 = vmatpush.bf16.msra.mxu0 %v13428_v0  ;;  %v13000_v0 = vor.u32 %v15164_v45, %v12997_v22  ;;  %v18912_v22 = vld [vmem:[#allocation44_spill] sm:$0xff]  ;;  %v15156_v45 = vld [vmem:[#allocation11 + $0x2ac] sm:$0xf] }
 0x4ef   :  { %v9278_v24 = vpop.f32.mrf.mxu0  ;;  %9660 = vmatpush.bf16.msra.mxu1 %v13556_v56  ;;  %9885 = vmatpush.bf16.msra.mxu3 %v13000_v0 }
 0x4f0   :  { %9571 = vmatmul.bf16.vlgmr.msrb.gmra.mxu1 %v18908_v23  ;;  %v9279_v12 = vadd.f32 %v9278_v24, %v9256_v61  ;;  %v13411_v61 = vld [vmem:[#allocation11 + $0x628] sm:$0xf] }
 0x4f1   :  { %v9446_v48 = vpop.f32.mrf.mxu3  ;;  %v13539_v24 = vld [vmem:[#allocation11 + $0x728] sm:$0xf]  ;;  %v13412_v4 = vor.u32 %v15270_v26, %v13411_v61  ;;  %v15298_v61 = vld [vmem:[#allocation11 + $0x714] sm:$0xf0]  ;;  %v15128_v26 = vld [vmem:[#allocation11 + $0x1cc] sm:$0xf] }
 0x4f2   :  { %v17883_v41 = vadd.f32 %v9301_v44, %v9279_v12  ;;  %9548 = vmatmul.bf16.vlgmr.msrb.gmra.mxu0 %v18909_v10  ;;  %v18910_v44 = vld [vmem:[#allocation45_spill] sm:$0xff]  ;;  %v15302_v12 = vld [vmem:[#allocation11 + $0x734] sm:$0xf0] }
 0x4f3   :  { %v15132_v48 = vld [vmem:[#allocation11 + $0x1ec] sm:$0xf]  ;;  %v13540_v43 = vor.u32 %v15302_v12, %v13539_v24  ;;  %9638 = vmatpush.bf16.msra.mxu0 %v13412_v4  ;;  %v12853_v12 = vld [vmem:[#allocation11 + $0x1d8] sm:$0xf0] }
 0x4f4   :  { %v9423_v33 = vpop.f32.mrf.mxu2 }
 0x4f5   :  { %v9303_v37 = vpop.f32.mrf.mxu1  ;;  %v12869_v33 = vld [vmem:[#allocation11 + $0x1f8] sm:$0xf0]  ;;  %9661 = vmatpush.bf16.msra.mxu1 %v13540_v43  ;;  %v15124_v43 = vld [vmem:[#allocation11 + $0x1ac] sm:$0xf] }
 0x4f6   :  { %9719 = vmatmul.bf16.gmra.mxu3 %v18890_v27  ;;  %v12872_v51 = vor.u32 %v15132_v48, %v12869_v33  ;;  %v15160_v48 = vld [vmem:[#allocation11 + $0x2cc] sm:$0xf]  ;;  %v12856_v33 = vor.u32 %v15128_v26, %v12853_v12  ;;  %v18913_v12 = vld [vmem:[#allocation43_spill] sm:$0xff] }
 0x4f7   :  { %v9280_v19 = vpop.f32.mrf.mxu0 }
 0x4f8   :  { %v9281_v6 = vadd.f32 %v9280_v19, %v9258_v40  ;;  %9862 = vmatpush.bf16.msra.mxu2 %v12872_v51  ;;  %v13523_v19 = vld [vmem:[#allocation11 + $0x708] sm:$0xf]  ;;  %v12837_v51 = vld [vmem:[#allocation11 + $0x1b8] sm:$0xf0] }
 0x4f9   :  { %9696 = vmatmul.bf16.gmra.mxu2 %v18910_v44  ;;  %v9526_v50 = vpop.f32.mrf.mxu3  ;;  %v13524_v24 = vor.u32 %v15298_v61, %v13523_v19  ;;  %v12840_v0 = vor.u32 %v15124_v43, %v12837_v51  ;;  %v12965_v19 = vld [vmem:[#allocation11 + $0x2b8] sm:$0xf0]  ;;  %v15454_v51 = vld [vmem:[#allocation11 + $0xbf4] sm:$0xf0] }
 0x4fa   :  { %v17891_v27 = vadd.f32 %v9303_v37, %v9281_v6  ;;  %v12981_v37 = vld [vmem:[#allocation11 + $0x2d8] sm:$0xf0]  ;;  %v9261_v6 = vadd.f32 %v17742_v55, %v9238_v21  ;;  %v12968_v55 = vor.u32 %v15156_v45, %v12965_v19  ;;  %v18915_v45 = vld [vmem:[#allocation20_spill] sm:$0xff] }
 0x4fb   :  { %v12984_v44 = vor.u32 %v15160_v48, %v12981_v37  ;;  %9662 = vmatpush.bf16.msra.mxu1 %v13524_v24  ;;  %v12949_v43 = vld [vmem:[#allocation11 + $0x298] sm:$0xf0] }
 0x4fc   :  { %v9503_v7 = vpop.f32.mrf.mxu2  ;;  %9863 = vmatpush.bf16.msra.mxu2 %v12856_v33  ;;  %v12821_v33 = vld [vmem:[#allocation11 + $0x198] sm:$0xf0] }
 0x4fd   :  { %v17895_v56 = vadd.f32 %v9526_v50, %v9503_v7  ;;  %v9306_v40 = vpop.f32.mrf.mxu1  ;;  %v13396_v50 = vor.u32 %v15266_v46, %v13395_v28  ;;  %9886 = vmatpush.bf16.msra.mxu3 %v12984_v44  ;;  %v14019_v28 = vld [vmem:[#allocation11 + $0xae8] sm:$0xf]  ;;  %v15422_v46 = vld [vmem:[#allocation11 + $0xaf4] sm:$0xf0] }
 0x4fe   :  { %v14020_v24 = vor.u32 %v15422_v46, %v14019_v28 }
 0x4ff   :  { %18911 = vst [vmem:[#allocation40_spill] sm:$0xff] %v17895_v56  ;;  %v9283_v4 = vpop.f32.mrf.mxu0  ;;  %9639 = vmatpush.bf16.msra.mxu0 %v13396_v50  ;;  %v14147_v50 = vld [vmem:[#allocation11 + $0xbe8] sm:$0xf]  ;;  %v15426_v56 = vld [vmem:[#allocation11 + $0xb14] sm:$0xf0] }
 0x500   :  { %9576 = vmatmul.bf16.gmra.mxu1 %v18912_v22  ;;  %v9284_v7 = vadd.f32 %v9283_v4, %v9261_v6  ;;  %9864 = vmatpush.bf16.msra.mxu2 %v12840_v0  ;;  %v15120_v6 = vld [vmem:[#allocation11 + $0x18c] sm:$0xf]  ;;  %v14148_v19 = vor.u32 %v15454_v51, %v14147_v50  ;;  %v15450_v50 = vld [vmem:[#allocation11 + $0xbd4] sm:$0xf0] }
 0x501   :  { %v9528_v61 = vpop.f32.mrf.mxu3  ;;  %9887 = vmatpush.bf16.msra.mxu3 %v12968_v55  ;;  %v15152_v4 = vld [vmem:[#allocation11 + $0x28c] sm:$0xf]  ;;  %v12824_v44 = vor.u32 %v15120_v6, %v12821_v33  ;;  %v14003_v6 = vld [vmem:[#allocation11 + $0xac8] sm:$0xf]  ;;  %v15418_v33 = vld [vmem:[#allocation11 + $0xad4] sm:$0xf0] }
 0x502   :  { %v17899_v21 = vadd.f32 %v9306_v40, %v9284_v7  ;;  %9553 = vmatmul.bf16.gmra.mxu0 %v18913_v12  ;;  %v12952_v40 = vor.u32 %v15152_v4, %v12949_v43  ;;  %v15116_v0 = vld [vmem:[#allocation11 + $0x16c] sm:$0xf]  ;;  %9747 = vmatpush.bf16.msrb.mxu1 %v14148_v19  ;;  %v14004_v43 = vor.u32 %v15418_v33, %v14003_v6  ;;  %v12773_v33 = vld [vmem:[#allocation11 + $0x138] sm:$0xf0] }
 0x503   :  { %9724 = vmatpush.bf16.msrb.mxu0 %v14020_v24  ;;  %v14131_v24 = vld [vmem:[#allocation11 + $0xbc8] sm:$0xf]  ;;  %v15112_v51 = vld [vmem:[#allocation11 + $0x14c] sm:$0xf] }
 0x504   :  { %v9505_v26 = vpop.f32.mrf.mxu2  ;;  %9865 = vmatpush.bf16.msra.mxu2 %v12824_v44  ;;  %v14132_v44 = vor.u32 %v15450_v50, %v14131_v24  ;;  %v15108_v6 = vld [vmem:[#allocation11 + $0x12c] sm:$0xf] }
 0x505   :  { %v17902_v48 = vadd.f32 %v9528_v61, %v9505_v26  ;;  %v9308_v37 = vpop.f32.mrf.mxu1  ;;  %v12805_v61 = vld [vmem:[#allocation11 + $0x178] sm:$0xf0]  ;;  %v15148_v26 = vld [vmem:[#allocation11 + $0x26c] sm:$0xf]  ;;  %9888 = vmatpush.bf16.msra.mxu3 %v12952_v40  ;;  %v12776_v24 = vor.u32 %v15108_v6, %v12773_v33  ;;  %v15410_v6 = vld [vmem:[#allocation11 + $0xa94] sm:$0xf0] }
 0x506   :  { %9801 = vmatmul.bf16.vlgmr.msrb.gmra.mxu3 %v18894_v20  ;;  %v12808_v55 = vor.u32 %v15116_v0, %v12805_v61  ;;  %v12933_v37 = vld [vmem:[#allocation11 + $0x278] sm:$0xf0]  ;;  %v15144_v0 = vld [vmem:[#allocation11 + $0x24c] sm:$0xf]  ;;  %9748 = vmatpush.bf16.msrb.mxu1 %v14132_v44 }
 0x507   :  { %18914 = vst [vmem:[#allocation25_spill] sm:$0xff] %v17902_v48  ;;  %v9285_v7 = vpop.f32.mrf.mxu0  ;;  %v12936_v46 = vor.u32 %v15148_v26, %v12933_v37  ;;  %9725 = vmatpush.bf16.msrb.mxu0 %v14004_v43  ;;  %v12917_v40 = vld [vmem:[#allocation11 + $0x258] sm:$0xf0]  ;;  %v18917_v26 = vld [vmem:[#allocation58_spill] sm:$0xff]  ;;  %v15140_v22 = vld [vmem:[#allocation11 + $0x22c] sm:$0xf] }
 0x508   :  { %9866 = vmatpush.bf16.msra.mxu2 %v12808_v55  ;;  %v12789_v7 = vld [vmem:[#allocation11 + $0x158] sm:$0xf0]  ;;  %v12920_v61 = vor.u32 %v15144_v0, %v12917_v40  ;;  %v15446_v0 = vld [vmem:[#allocation11 + $0xbb4] sm:$0xf0]  ;;  %v15104_v44 = vld [vmem:[#allocation11 + $0x10c] sm:$0xf] }
 0x509   :  { %9778 = vmatmul.bf16.vlgmr.msrb.gmra.mxu2 %v18915_v45  ;;  %v9531_v28 = vpop.f32.mrf.mxu3  ;;  %9889 = vmatpush.bf16.msra.mxu3 %v12936_v46  ;;  %v12792_v19 = vor.u32 %v15112_v51, %v12789_v7  ;;  %v12901_v46 = vld [vmem:[#allocation11 + $0x238] sm:$0xf0]  ;;  %v18918_v51 = vld [vmem:[#allocation57_spill] sm:$0xff] }
 0x50a   :  { %v12904_v50 = vor.u32 %v15140_v22, %v12901_v46  ;;  %v14115_v7 = vld [vmem:[#allocation11 + $0xba8] sm:$0xf]  ;;  %v15260_v48 = vld [vmem:[#allocation11 + $0x5ec] sm:$0xf] }
 0x50b   :  { %v13971_v22 = vld [vmem:[#allocation11 + $0xa88] sm:$0xf] }
 0x50c   :  { %v9508_v20 = vpop.f32.mrf.mxu2  ;;  %9867 = vmatpush.bf16.msra.mxu2 %v12792_v19  ;;  %v12757_v19 = vld [vmem:[#allocation11 + $0x118] sm:$0xf0]  ;;  %v13972_v46 = vor.u32 %v15410_v6, %v13971_v22  ;;  %v15438_v6 = vld [vmem:[#allocation11 + $0xb74] sm:$0xf0] }
 0x50d   :  { %v17906_v4 = vadd.f32 %v9531_v28, %v9508_v20  ;;  %v17908_v45 = vpop.f32.mrf.mxu1  ;;  %v13987_v20 = vld [vmem:[#allocation11 + $0xaa8] sm:$0xf]  ;;  %v15414_v28 = vld [vmem:[#allocation11 + $0xab4] sm:$0xf0]  ;;  %9890 = vmatpush.bf16.msra.mxu3 %v12920_v61  ;;  %v12760_v61 = vor.u32 %v15104_v44, %v12757_v19 }
 0x50e   :  { %v13988_v55 = vor.u32 %v15414_v28, %v13987_v20  ;;  %v15136_v20 = vld [vmem:[#allocation11 + $0x20c] sm:$0xf]  ;;  %v12885_v28 = vld [vmem:[#allocation11 + $0x218] sm:$0xf0]  ;;  %v13955_v19 = vld [vmem:[#allocation11 + $0xa68] sm:$0xf] }
 0x50f   :  { %18916 = vst [vmem:[#allocation42_spill] sm:$0xff] %v17906_v4  ;;  %v17911_v37 = vpop.f32.mrf.mxu0  ;;  %v12888_v33 = vor.u32 %v15136_v20, %v12885_v28  ;;  %v15406_v20 = vld [vmem:[#allocation11 + $0xa74] sm:$0xf0]  ;;  %v14083_v28 = vld [vmem:[#allocation11 + $0xb68] sm:$0xf] }
 0x510   :  { %9581 = vmatmul.bf16.gmra.mxu1 %v18917_v26  ;;  %9726 = vmatpush.bf16.msrb.mxu0 %v13988_v55  ;;  %v14116_v26 = vor.u32 %v15446_v0, %v14115_v7  ;;  %v15442_v7 = vld [vmem:[#allocation11 + $0xb94] sm:$0xf0]  ;;  %v13956_v22 = vor.u32 %v15406_v20, %v13955_v19  ;;  %v9320_v19 = vadd.f32 %v17777_v35, %v17863_v18  ;;  %v18930_v18 = vld [vmem:[#allocation38_spill] sm:$0xff]  ;;  %v14051_v4 = vld [vmem:[#allocation11 + $0xb28] sm:$0xf] }
 0x511   :  { %v9533_v43 = vpop.f32.mrf.mxu3  ;;  %9868 = vmatpush.bf16.msra.mxu2 %v12776_v24  ;;  %9891 = vmatpush.bf16.msra.mxu3 %v12904_v50  ;;  %v18927_v20 = vld [vmem:[#allocation39_spill] sm:$0xff]  ;;  %v14052_v30 = vor.u32 %v15430_v8, %v14051_v4 }
 0x512   :  { %9558 = vmatmul.bf16.gmra.mxu0 %v18918_v51  ;;  %9749 = vmatpush.bf16.msrb.mxu1 %v14116_v26  ;;  %v13349_v4 = vld [vmem:[#allocation11 + $0x5b8] sm:$0xf0] }
 0x514   :  { %v9510_v23 = vpop.f32.mrf.mxu2  ;;  %9727 = vmatpush.bf16.msrb.mxu0 %v13972_v46  ;;  %v18923_v46 = vld [vmem:[#allocation35_spill] sm:$0xff] }
 0x515   :  { %v17914_v40 = vadd.f32 %v9533_v43, %v9510_v23  ;;  %v17916_v49 = vpop.f32.mrf.mxu1  ;;  %v18920_v23 = vld [vmem:[#allocation22_spill] sm:$0xff]  ;;  %v14099_v43 = vld [vmem:[#allocation11 + $0xb88] sm:$0xf]  ;;  %9869 = vmatpush.bf16.msra.mxu2 %v12760_v61  ;;  %9892 = vmatpush.bf16.msra.mxu3 %v12888_v33 }
 0x516   :  { %9806 = vmatmul.bf16.gmra.mxu3 %v18899_v25  ;;  %v14100_v24 = vor.u32 %v15442_v7, %v14099_v43  ;;  %v18922_v25 = vld [vmem:[#allocation36_spill] sm:$0xff]  ;;  %v18924_v7 = vld [vmem:[#allocation27_spill] sm:$0xff] }
 0x517   :  { %18919 = vst [vmem:[#allocation55_spill] sm:$0xff] %v17914_v40  ;;  %v17920_v55 = vpop.f32.mrf.mxu0 }
 0x518   :  { %9750 = vmatpush.bf16.msrb.mxu1 %v14100_v24  ;;  %9728 = vmatpush.bf16.msrb.mxu0 %v13956_v22  ;;  %v9343_v22 = vadd.f32 %v17775_v62, %v9320_v19  ;;  %v9322_v62 = vadd.f32 %v17792_v32, %v17875_v59  ;;  %v13493_v59 = vld [vmem:[#allocation11 + $0x6d8] sm:$0xf0] }
 0x519   :  { %9783 = vmatmul.bf16.gmra.mxu2 %v18920_v23  ;;  %v9536_v0 = vpop.f32.mrf.mxu3  ;;  %v14084_v23 = vor.u32 %v15438_v6, %v14083_v28  ;;  %v13939_v6 = vld [vmem:[#allocation11 + $0xa48] sm:$0xf] }
 0x51c   :  { %v9513_v26 = vpop.f32.mrf.mxu2  ;;  %9751 = vmatpush.bf16.msrb.mxu1 %v14084_v23 }
 0x51d   :  { %v17922_v50 = vadd.f32 %v9536_v0, %v9513_v26  ;;  %v17924_v44 = vpop.f32.mrf.mxu1 }
 0x51f   :  { %18921 = vst [vmem:[#allocation59_spill] sm:$0xff] %v17922_v50  ;;  %v17927_v40 = vpop.f32.mrf.mxu0  ;;  %v9366_v50 = vadd.f32 %v17911_v37, %v9343_v22 }
 0x520   :  { %9663 = vmatmul.bf16.vlgmr.msra.gmra.mxu1 %v18922_v25  ;;  %v15434_v25 = vld [vmem:[#allocation11 + $0xb54] sm:$0xf0] }
 0x521   :  { %v9538_v61 = vpop.f32.mrf.mxu3 }
 0x522   :  { %9640 = vmatmul.bf16.vlgmr.msra.gmra.mxu0 %v18923_v46  ;;  %v15402_v61 = vld [vmem:[#allocation11 + $0xa54] sm:$0xf0] }
 0x524   :  { %v9515_v33 = vpop.f32.mrf.mxu2 }
 0x525   :  { %v17930_v43 = vpop.f32.mrf.mxu1  ;;  %v14067_v33 = vld [vmem:[#allocation11 + $0xb48] sm:$0xf] }
 0x526   :  { %9811 = vmatmul.bf16.gmra.mxu3 %v18904_v57  ;;  %v13940_v57 = vor.u32 %v15402_v61, %v13939_v6  ;;  %v15292_v6 = vld [vmem:[#allocation11 + $0x6ec] sm:$0xf]  ;;  %v13509_v61 = vld [vmem:[#allocation11 + $0x6f8] sm:$0xf0] }
 0x527   :  { %v17934_v24 = vpop.f32.mrf.mxu0  ;;  %v13512_v22 = vor.u32 %v15292_v6, %v13509_v61 }
 0x528   :  { %9729 = vmatpush.bf16.msrb.mxu0 %v13940_v57  ;;  %v15288_v57 = vld [vmem:[#allocation11 + $0x6cc] sm:$0xf] }
 0x529   :  { %9788 = vmatmul.bf16.gmra.mxu2 %v18924_v7  ;;  %v17936_v0 = vpop.f32.mrf.mxu3  ;;  %9977 = vmatpush.bf16.msrb.mxu3 %v13512_v22 }
 0x52a   :  { %18925 = vst [vmem:[#allocation60_spill] sm:$0xff] %v17936_v0  ;;  %v13923_v0 = vld [vmem:[#allocation11 + $0xa28] sm:$0xf] }
 0x52c   :  { %v17938_v26 = vpop.f32.mrf.mxu2 }
 0x52d   :  { %18926 = vst [vmem:[#allocation49_spill] sm:$0xff] %v17938_v26  ;;  %v17942_v23 = vpop.f32.mrf.mxu1  ;;  %v15398_v26 = vld [vmem:[#allocation11 + $0xa34] sm:$0xf0] }
 0x52e   :  { %v13924_v19 = vor.u32 %v15398_v26, %v13923_v0  ;;  %v13907_v0 = vld [vmem:[#allocation11 + $0xa08] sm:$0xf]  ;;  %v9345_v26 = vadd.f32 %v17788_v1, %v9322_v62 }
 0x52f   :  { %v17945_v28 = vpop.f32.mrf.mxu0 }
 0x530   :  { %9668 = vmatmul.bf16.gmra.mxu1 %v18927_v20  ;;  %v14068_v20 = vor.u32 %v15434_v25, %v14067_v33  ;;  %v13365_v25 = vld [vmem:[#allocation11 + $0x5d8] sm:$0xf0]  ;;  %v9389_v33 = vadd.f32 %v17908_v45, %v9366_v50  ;;  %9730 = vmatpush.bf16.msrb.mxu0 %v13924_v19  ;;  %v13496_v45 = vor.u32 %v15288_v57, %v13493_v59  ;;  %v14531_v59 = vld [vmem:[#allocation11 + $0xee8] sm:$0xf] }
 0x531   :  { %v17948_v7 = vpop.f32.mrf.mxu3  ;;  %v9368_v6 = vadd.f32 %v17920_v55, %v9345_v26  ;;  %v18931_v55 = vld [vmem:[#allocation41_spill] sm:$0xff] }
 0x532   :  { %18928 = vst [vmem:[#allocation61_spill] sm:$0xff] %v17948_v7  ;;  %9645 = vmatmul.bf16.gmra.mxu0 %v18930_v18  ;;  %v13381_v7 = vld [vmem:[#allocation11 + $0x5f8] sm:$0xf0]  ;;  %9752 = vmatpush.bf16.msrb.mxu1 %v14068_v20  ;;  %v15256_v18 = vld [vmem:[#allocation11 + $0x5cc] sm:$0xf] }
 0x533   :  { %v13384_v37 = vor.u32 %v15260_v48, %v13381_v7  ;;  %v13368_v32 = vor.u32 %v15256_v18, %v13365_v25  ;;  %v15252_v48 = vld [vmem:[#allocation11 + $0x5ac] sm:$0xf]  ;;  %v13477_v18 = vld [vmem:[#allocation11 + $0x6b8] sm:$0xf0]  ;;  %9978 = vmatpush.bf16.msrb.mxu3 %v13496_v45 }
 0x534   :  { %v17951_v35 = vpop.f32.mrf.mxu2  ;;  %v15284_v20 = vld [vmem:[#allocation11 + $0x6ac] sm:$0xf]  ;;  %v13352_v1 = vor.u32 %v15252_v48, %v13349_v4  ;;  %v13333_v48 = vld [vmem:[#allocation11 + $0x598] sm:$0xf0] }
 0x535   :  { %18929 = vst [vmem:[#allocation62_spill] sm:$0xff] %v17951_v35  ;;  %v9400_v63 = vpop.f32.mrf.mxu1  ;;  %v14035_v35 = vld [vmem:[#allocation11 + $0xb08] sm:$0xf]  ;;  %9954 = vmatpush.bf16.msrb.mxu2 %v13384_v37  ;;  %v13461_v45 = vld [vmem:[#allocation11 + $0x698] sm:$0xf0] }
 0x536   :  { %9893 = vmatmul.bf16.vlgmr.msra.gmra.mxu3 %v18909_v10  ;;  %v15394_v63 = vld [vmem:[#allocation11 + $0xa14] sm:$0xf0]  ;;  %9753 = vmatpush.bf16.msrb.mxu1 %v14052_v30  ;;  %v14036_v7 = vor.u32 %v15426_v56, %v14035_v35  ;;  %v9325_v30 = vadd.f32 %v17804_v52, %v17883_v41  ;;  %v13480_v56 = vor.u32 %v15284_v20, %v13477_v18  ;;  %v17972_v25 = vld [vmem:[#allocation6 + $0x8] sm:$0xff]  ;;  %v12741_v20 = vld [vmem:[#allocation11 + $0xf8] sm:$0xf0] }
 0x537   :  { %v9377_v8 = vpop.f32.mrf.mxu0  ;;  %v13908_v50 = vor.u32 %v15394_v63, %v13907_v0  ;;  %v9391_v35 = vadd.f32 %v17916_v49, %v9368_v6  ;;  %v17976_v52 = vld [vmem:[#allocation6 + $0x28] sm:$0xff]  ;;  %v10234_v57 = vrot.slane %v17972_v25, 6  ;;  %v15550_v0 = vld [vmem:[#allocation11 + $0xef4] sm:$0xf0]  ;;  %v13317_v6 = vld [vmem:[#allocation11 + $0x578] sm:$0xf0] }
 0x538   :  { %9979 = vmatpush.bf16.msrb.mxu3 %v13480_v56  ;;  %v10239_v8 = vrot.slane %v17976_v52, 6  ;;  %v14532_v63 = vor.u32 %v15550_v0, %v14531_v59  ;;  %v15244_v18 = vld [vmem:[#allocation11 + $0x56c] sm:$0xf]  ;;  %v13445_v56 = vld [vmem:[#allocation11 + $0x678] sm:$0xf0] }
 0x539   :  { %9870 = vmatmul.bf16.vlgmr.msra.gmra.mxu2 %v17144_v3  ;;  %v17960_v10 = vpop.f32.mrf.mxu3  ;;  %v9412_v3 = vadd.f32 %v17840_v58, %v9389_v33  ;;  %9731 = vmatpush.bf16.msrb.mxu0 %v13908_v50  ;;  %v9348_v58 = vadd.f32 %v17802_v17, %v9325_v30  ;;  %v9327_v17 = vadd.f32 %v17814_v39, %v17891_v27  ;;  %v15100_v50 = vld [vmem:[#allocation11 + $0xec] sm:$0xf]  ;;  %v13301_v0 = vld [vmem:[#allocation11 + $0x558] sm:$0xf0] }
 0x53a   :  { %9955 = vmatpush.bf16.msrb.mxu2 %v13368_v32  ;;  %9754 = vmatpush.bf16.msrb.mxu1 %v14036_v7  ;;  %v15280_v7 = vld [vmem:[#allocation11 + $0x68c] sm:$0xf]  ;;  %v12744_v30 = vor.u32 %v15100_v50, %v12741_v20  ;;  %v14499_v50 = vld [vmem:[#allocation11 + $0xea8] sm:$0xf] }
 0x53b   :  { %v9435_v19 = vadd.f32 %v17836_v38, %v9412_v3  ;;  %v9371_v41 = vadd.f32 %v17927_v40, %v9348_v58  ;;  %v9414_v38 = vadd.f32 %v17848_v16, %v9391_v35  ;;  %v15248_v40 = vld [vmem:[#allocation11 + $0x58c] sm:$0xf]  ;;  %v13464_v27 = vor.u32 %v15280_v7, %v13461_v45 }
 0x53c   :  { %v17963_v61 = vpop.f32.mrf.mxu2  ;;  %v13336_v4 = vor.u32 %v15248_v40, %v13333_v48  ;;  %v9350_v3 = vadd.f32 %v17810_v60, %v9327_v17  ;;  %v15240_v25 = vld [vmem:[#allocation11 + $0x54c] sm:$0xf]  ;;  %v13429_v40 = vld [vmem:[#allocation11 + $0x658] sm:$0xf0]  ;;  %v9330_v48 = vadd.f32 %v17826_v9, %v17899_v21 }
 0x53d   :  { %v9480_v62 = vpop.f32.mrf.mxu1  ;;  %v9394_v16 = vadd.f32 %v17924_v44, %v9371_v41  ;;  %v9437_v39 = vadd.f32 %v17844_v2, %v9414_v38  ;;  %9816 = vmatpush.bf16.msra.mxu0 %v14532_v63  ;;  %9980 = vmatpush.bf16.msrb.mxu3 %v13464_v27  ;;  %v13320_v44 = vor.u32 %v15244_v18, %v13317_v6  ;;  %v15546_v2 = vld [vmem:[#allocation11 + $0xed4] sm:$0xf0]  ;;  %v15272_v63 = vld [vmem:[#allocation11 + $0x64c] sm:$0xf]  ;;  %v13413_v6 = vld [vmem:[#allocation11 + $0x638] sm:$0xf0] }
 0x53e   :  { %9956 = vmatpush.bf16.msrb.mxu2 %v13352_v1  ;;  %9839 = vmatpush.bf16.msra.mxu1 %v12744_v30  ;;  %v9373_v41 = vadd.f32 %v17934_v24, %v9350_v3  ;;  %v13304_v7 = vor.u32 %v15240_v25, %v13301_v0  ;;  %v13432_v45 = vor.u32 %v15272_v63, %v13429_v40  ;;  %v15268_v18 = vld [vmem:[#allocation11 + $0x62c] sm:$0xf]  ;;  %v13269_v40 = vld [vmem:[#allocation11 + $0x518] sm:$0xf0] }
 0x53f   :  { %v9457_v37 = vpop.f32.mrf.mxu0  ;;  %v9417_v17 = vadd.f32 %v17855_v42, %v9394_v16  ;;  %v15236_v42 = vld [vmem:[#allocation11 + $0x52c] sm:$0xf]  ;;  %v13285_v16 = vld [vmem:[#allocation11 + $0x538] sm:$0xf0]  ;;  %v9353_v30 = vadd.f32 %v17822_v34, %v9330_v48 }
 0x540   :  { %9673 = vmatmul.bf16.gmra.mxu1 %v18931_v55  ;;  %v9458_v22 = vadd.f32 %v9457_v37, %v9435_v19  ;;  %v14515_v19 = vld [vmem:[#allocation11 + $0xec8] sm:$0xf]  ;;  %v10240_v37 = vsel %vm18932_vm14, %v10234_v57, %v10239_v8  ;;  %v9396_v3 = vadd.f32 %v17930_v43, %v9373_v41  ;;  %v13416_v43 = vor.u32 %v15268_v18, %v13413_v6  ;;  %v15232_v63 = vld [vmem:[#allocation11 + $0x50c] sm:$0xf]  ;;  %v15534_v18 = vld [vmem:[#allocation11 + $0xe74] sm:$0xf0] }
 0x541   :  { %v17974_v33 = vpop.f32.mrf.mxu3  ;;  %v14516_v60 = vor.u32 %v15546_v2, %v14515_v19  ;;  %v18009_v19 = vld [vmem:[#allocation6 + $0x48] sm:$0xff]  ;;  %v9376_v2 = vadd.f32 %v17945_v28, %v9353_v30 }
 0x542   :  { %v9481_v32 = vadd.f32 %v9480_v62, %v9458_v22  ;;  %9650 = vmatmul.bf16.gmra.mxu0 %v18875_v15  ;;  %v15276_v62 = vld [vmem:[#allocation11 + $0x66c] sm:$0xf]  ;;  %9957 = vmatpush.bf16.msrb.mxu2 %v13336_v4  ;;  %v12725_v22 = vld [vmem:[#allocation11 + $0xd8] sm:$0xf0]  ;;  %v10359_v25 = vrot.slane %v18009_v19, 2 }
 0x543   :  { %9817 = vmatpush.bf16.msra.mxu0 %v14516_v60  ;;  %v15092_v28 = vld [vmem:[#allocation11 + $0xac] sm:$0xf]  ;;  %v14451_v30 = vld [vmem:[#allocation11 + $0xe48] sm:$0xf]  ;;  %v12661_v19 = vld [vmem:[#allocation11 + $0x58] sm:$0xf0] }
 0x544   :  { %v17979_v49 = vpop.f32.mrf.mxu2  ;;  %10185 = vst [vmem:[#allocation5 + $0x8] sm:$0xff] %v9481_v32  ;;  %v15264_v48 = vld [vmem:[#allocation11 + $0x60c] sm:$0xf] }
 0x545   :  { %v9482_v26 = vpop.f32.mrf.mxu1  ;;  %v18934_v52 = vld [vmem:[#allocation17_spill] sm:$0xff] }
 0x546   :  { %9898 = vmatmul.bf16.gmra.mxu3 %v18913_v12  ;;  %v13448_v12 = vor.u32 %v15276_v62, %v13445_v56  ;;  %9958 = vmatpush.bf16.msrb.mxu2 %v13320_v44  ;;  %v18933_v62 = vld [vmem:[#allocation48_spill] sm:$0xff]  ;;  %v13288_v56 = vor.u32 %v15236_v42, %v13285_v16 }
 0x547   :  { %v9459_v1 = vpop.f32.mrf.mxu0 }
 0x548   :  { %v9460_v35 = vadd.f32 %v9459_v1, %v9437_v39  ;;  %v15542_v39 = vld [vmem:[#allocation11 + $0xeb4] sm:$0xf0]  ;;  %9981 = vmatpush.bf16.msrb.mxu3 %v13448_v12  ;;  %v9440_v1 = vadd.f32 %v17853_v53, %v9417_v17  ;;  %v18012_v53 = vld [vmem:[#allocation6 + $0x68] sm:$0xff]  ;;  %v12709_v17 = vld [vmem:[#allocation11 + $0xb8] sm:$0xf0] }
 0x549   :  { %9875 = vmatmul.bf16.gmra.mxu2 %v17201_v54  ;;  %v17995_v58 = vpop.f32.mrf.mxu3  ;;  %v15096_v54 = vld [vmem:[#allocation11 + $0xcc] sm:$0xf]  ;;  %v14500_v20 = vor.u32 %v15542_v39, %v14499_v50  ;;  %v12712_v0 = vor.u32 %v15092_v28, %v12709_v17  ;;  %v15538_v50 = vld [vmem:[#allocation11 + $0xe94] sm:$0xf0]  ;;  %v13893_v28 = vld [vmem:[#allocation11 + $0x9f8] sm:$0xf0] }
 0x54a   :  { %v9483_v32 = vadd.f32 %v9482_v26, %v9460_v35  ;;  %v12728_v59 = vor.u32 %v15096_v54, %v12725_v22  ;;  %9959 = vmatpush.bf16.msrb.mxu2 %v13304_v7  ;;  %v9419_v22 = vadd.f32 %v17865_v13, %v9396_v3  ;;  %v13397_v7 = vld [vmem:[#allocation11 + $0x618] sm:$0xf0]  ;;  %v15084_v3 = vld [vmem:[#allocation11 + $0x6c] sm:$0xf] }
 0x54b   :  { %v10205_v4 = vld [vmem:[#allocation5 + $0x8] sm:$0xfc]  ;;  %9818 = vmatpush.bf16.msra.mxu0 %v14500_v20 }
 0x54c   :  { %v17998_v38 = vpop.f32.mrf.mxu2  ;;  %v10258_v27 = vadd.f32 %v10234_v57, %v10205_v4  ;;  %v10262_v24 = vadd.f32 %v10240_v37, %v9483_v32  ;;  %9840 = vmatpush.bf16.msra.mxu1 %v12728_v59  ;;  %9982 = vmatpush.bf16.msrb.mxu3 %v13432_v45  ;;  %v10364_v32 = vrot.slane %v18012_v53, 2  ;;  %v9399_v59 = vadd.f32 %v17942_v23, %v9376_v2  ;;  %v14483_v45 = vld [vmem:[#allocation11 + $0xe88] sm:$0xf]  ;;  %v12693_v23 = vld [vmem:[#allocation11 + $0x98] sm:$0xf0] }
 0x54d   :  { %v9485_v26 = vpop.f32.mrf.mxu1  ;;  %v9442_v13 = vadd.f32 %v17861_v29, %v9419_v22  ;;  %v13272_v4 = vor.u32 %v15232_v63, %v13269_v40  ;;  %v14467_v20 = vld [vmem:[#allocation11 + $0xe68] sm:$0xf]  ;;  %v15420_v17 = vld [vmem:[#allocation11 + $0xaec] sm:$0xf] }
 0x54e   :  { %v10270_v9 = vmax.f32 %v10258_v27, 0.0  ;;  %v10274_v21 = vmax.f32 %v10262_v24, 0.0  ;;  %9960 = vmatpush.bf16.msrb.mxu2 %v13288_v56  ;;  %v13400_v27 = vor.u32 %v15264_v48, %v13397_v7  ;;  %v14484_v24 = vor.u32 %v15538_v50, %v14483_v45  ;;  %v15080_v56 = vld [vmem:[#allocation11 + $0x4c] sm:$0xf]  ;;  %v15526_v48 = vld [vmem:[#allocation11 + $0xe34] sm:$0xf0] }
 0x54f   :  { %v9462_v57 = vpop.f32.mrf.mxu0  ;;  %v10365_v29 = vsel %vm10293_vm10, %v10359_v25, %v10364_v32  ;;  %v9422_v6 = vadd.f32 %v17877_v36, %v9399_v59  ;;  %v14021_v59 = vld [vmem:[#allocation11 + $0xaf8] sm:$0xf0]  ;;  %v15384_v50 = vld [vmem:[#allocation11 + $0x9cc] sm:$0xf] }
 0x550   :  { %9755 = vmatmul.bf16.vlgmr.msrb.gmra.mxu1 %v18933_v62  ;;  %v10297_v35 = vrot.slane %v10270_v9, 2  ;;  %v18007_v44 = vrot.slane %v10274_v21, 2  ;;  %v9463_v12 = vadd.f32 %v9462_v57, %v9440_v1  ;;  %9983 = vmatpush.bf16.msrb.mxu3 %v13416_v43  ;;  %v12677_v9 = vld [vmem:[#allocation11 + $0x78] sm:$0xf0]  ;;  %v15530_v57 = vld [vmem:[#allocation11 + $0xe54] sm:$0xf0]  ;;  %v14024_v45 = vor.u32 %v15420_v17, %v14021_v59 }
 0x551   :  { %v9630_v37 = vpop.f32.mrf.mxu3  ;;  %9841 = vmatpush.bf16.msra.mxu1 %v12712_v0  ;;  %9819 = vmatpush.bf16.msra.mxu0 %v14484_v24  ;;  %v9445_v22 = vadd.f32 %v17873_v31, %v9422_v6  ;;  %v12645_v7 = vld [vmem:[#allocation11 + $0x38] sm:$0xf0]  ;;  %v15522_v6 = vld [vmem:[#allocation11 + $0xe14] sm:$0xf0]  ;;  %v15408_v17 = vld [vmem:[#allocation11 + $0xa8c] sm:$0xf] }
 0x552   :  { %v10299_v34 = vsel %vm10293_vm10, %v10297_v35, %v18007_v44  ;;  %v9486_v60 = vadd.f32 %v9485_v26, %v9463_v12  ;;  %9732 = vmatmul.bf16.vlgmr.msrb.gmra.mxu0 %v18878_v11  ;;  %v15088_v26 = vld [vmem:[#allocation11 + $0x8c] sm:$0xf]  ;;  %9961 = vmatpush.bf16.msrb.mxu2 %v13272_v4  ;;  %v13973_v59 = vld [vmem:[#allocation11 + $0xa98] sm:$0xf0] }
 0x553   :  { %10323 = vst [vmem:[#allocation12 + $0x8] sm:$0xff] %v10299_v34  ;;  %v12696_v16 = vor.u32 %v15088_v26, %v12693_v23  ;;  %v12680_v34 = vor.u32 %v15084_v3, %v12677_v9  ;;  %v15076_v4 = vld [vmem:[#allocation11 + $0x2c] sm:$0xf] }
 0x554   :  { %v9607_v54 = vpop.f32.mrf.mxu2  ;;  %10193 = vst [vmem:[#allocation5 + $0x48] sm:$0xff] %v9486_v60  ;;  %9984 = vmatpush.bf16.msrb.mxu3 %v13400_v27  ;;  %v14435_v60 = vld [vmem:[#allocation11 + $0xe28] sm:$0xf]  ;;  %v15416_v23 = vld [vmem:[#allocation11 + $0xacc] sm:$0xf] }
 0x555   :  { %v9487_v41 = vpop.f32.mrf.mxu1  ;;  %9842 = vmatpush.bf16.msra.mxu1 %v12696_v16  ;;  %v15388_v54 = vld [vmem:[#allocation11 + $0x9ec] sm:$0xf] }
 0x556   :  { %9903 = vmatmul.bf16.gmra.mxu3 %v18918_v51 }
 0x557   :  { %v9464_v39 = vpop.f32.mrf.mxu0 }
 0x558   :  { %v9465_v42 = vadd.f32 %v9464_v39, %v9442_v13  ;;  %v13896_v13 = vor.u32 %v15388_v54, %v13893_v28  ;;  %v13877_v39 = vld [vmem:[#allocation11 + $0x9d8] sm:$0xf0]  ;;  %10069 = vmatpush.bf16.msra.mxu3 %v14024_v45  ;;  %v15404_v45 = vld [vmem:[#allocation11 + $0xa6c] sm:$0xf] }
 0x559   :  { %9880 = vmatmul.bf16.gmra.mxu2 %v17240_v14  ;;  %v18027_v51 = vpop.f32.mrf.mxu3  ;;  %v14468_v14 = vor.u32 %v15534_v18, %v14467_v20  ;;  %9843 = vmatpush.bf16.msra.mxu1 %v12680_v34  ;;  %v13880_v16 = vor.u32 %v15384_v50, %v13877_v39  ;;  %v14005_v18 = vld [vmem:[#allocation11 + $0xad8] sm:$0xf0]  ;;  %v15196_v34 = vld [vmem:[#allocation11 + $0x3ec] sm:$0xf] }
 0x55a   :  { %v9488_v21 = vadd.f32 %v9487_v41, %v9465_v42  ;;  %v14452_v41 = vor.u32 %v15530_v57, %v14451_v30  ;;  %10046 = vmatpush.bf16.msra.mxu2 %v13896_v13  ;;  %v14436_v42 = vor.u32 %v15526_v48, %v14435_v60  ;;  %v14008_v30 = vor.u32 %v15416_v23, %v14005_v18  ;;  %v15380_v57 = vld [vmem:[#allocation11 + $0x9ac] sm:$0xf]  ;;  %v13957_v39 = vld [vmem:[#allocation11 + $0xa78] sm:$0xf0] }
 0x55b   :  { %v10213_v35 = vld [vmem:[#allocation5 + $0x48] sm:$0x3]  ;;  %v10331_v12 = vld [vmem:[#allocation5 + $0x48] sm:$0xc0]  ;;  %9820 = vmatpush.bf16.msra.mxu0 %v14468_v14  ;;  %v13237_v18 = vld [vmem:[#allocation11 + $0x4d8] sm:$0xf0] }
 0x55c   :  { %v18030_v1 = vpop.f32.mrf.mxu2  ;;  %v10266_v43 = vadd.f32 %v10239_v8, %v10213_v35  ;;  %v10383_v2 = vadd.f32 %v10359_v25, %v10331_v12  ;;  %v10387_v36 = vadd.f32 %v10365_v29, %v9488_v21  ;;  %v12664_v25 = vor.u32 %v15080_v56, %v12661_v19  ;;  %v14419_v29 = vld [vmem:[#allocation11 + $0xe08] sm:$0xf]  ;;  %v13861_v56 = vld [vmem:[#allocation11 + $0x9b8] sm:$0xf0]  ;;  %v15412_v35 = vld [vmem:[#allocation11 + $0xaac] sm:$0xf]  ;;  %10070 = vmatpush.bf16.msra.mxu3 %v14008_v30 }
 0x55d   :  { %v9490_v37 = vpop.f32.mrf.mxu1  ;;  %v15072_v12 = vld [vmem:[#allocation11 + $0xc] sm:$0xf]  ;;  %v12629_v19 = vld [vmem:[#allocation11 + $0x18] sm:$0xf0]  ;;  %v14420_v60 = vor.u32 %v15522_v6, %v14419_v29  ;;  %v13960_v6 = vor.u32 %v15404_v45, %v13957_v39  ;;  %v18940_v39 = vld [vmem:[#allocation38_spill] sm:$0xff] }
 0x55e   :  { %v10278_v0 = vmax.f32 %v10266_v43, 0.0  ;;  %v10395_v63 = vmax.f32 %v10383_v2, 0.0  ;;  %v10399_v40 = vmax.f32 %v10387_v36, 0.0  ;;  %v13989_v43 = vld [vmem:[#allocation11 + $0xab8] sm:$0xf0]  ;;  %9844 = vmatpush.bf16.msra.mxu1 %v12664_v25  ;;  %10047 = vmatpush.bf16.msra.mxu2 %v13880_v16  ;;  %v13864_v36 = vor.u32 %v15380_v57, %v13861_v56 }
 0x55f   :  { %v9467_v8 = vpop.f32.mrf.mxu0  ;;  %9821 = vmatpush.bf16.msra.mxu0 %v14452_v41  ;;  %v13992_v54 = vor.u32 %v15412_v35, %v13989_v43  ;;  %v13845_v41 = vld [vmem:[#allocation11 + $0x998] sm:$0xf0]  ;;  %v12632_v48 = vor.u32 %v15072_v12, %v12629_v19  ;;  %v13976_v25 = vor.u32 %v15408_v17, %v13973_v59  ;;  %v15224_v16 = vld [vmem:[#allocation11 + $0x4cc] sm:$0xf]  ;;  %v18938_v17 = vld [vmem:[#allocation52_spill] sm:$0xff] }
 0x560   :  { %9760 = vmatmul.bf16.gmra.mxu1 %v18934_v52  ;;  %v10308_v31 = vrot.slane %v10278_v0, 2  ;;  %v10421_v27 = vrot.slane %v10395_v63, 6  ;;  %v18036_v24 = vrot.slane %v10399_v40, 6  ;;  %v9468_v26 = vadd.f32 %v9467_v8, %v9445_v22  ;;  %v15376_v22 = vld [vmem:[#allocation11 + $0x98c] sm:$0xf]  ;;  %v18936_v35 = vld [vmem:[#allocation23_spill] sm:$0xff] }
 0x561   :  { %v18038_v20 = vpop.f32.mrf.mxu3  ;;  %v15228_v0 = vld [vmem:[#allocation11 + $0x4ec] sm:$0xf]  ;;  %v13253_v40 = vld [vmem:[#allocation11 + $0x4f8] sm:$0xf0]  ;;  %v13848_v13 = vor.u32 %v15376_v22, %v13845_v41  ;;  %10071 = vmatpush.bf16.msra.mxu3 %v13992_v54 }
 0x562   :  { %v10309_v14 = vsel %vm10293_vm10, %v18007_v44, %v10308_v31  ;;  %v10423_v3 = vsel %vm18935_vm5, %v10421_v27, %v18036_v24  ;;  %v9491_v9 = vadd.f32 %v9490_v37, %v9468_v26  ;;  %9737 = vmatmul.bf16.gmra.mxu0 %v18884_v47  ;;  %v12648_v44 = vor.u32 %v15076_v4, %v12645_v7  ;;  %v13125_v37 = vld [vmem:[#allocation11 + $0x3f8] sm:$0xf0]  ;;  %v15372_v7 = vld [vmem:[#allocation11 + $0x96c] sm:$0xf] }
 0x563   :  { %10327 = vst [vmem:[#allocation12 + $0x28] sm:$0xff] %v10309_v14  ;;  %9822 = vmatpush.bf16.msra.mxu0 %v14436_v42  ;;  %v13128_v28 = vor.u32 %v15196_v34, %v13125_v37  ;;  %10048 = vmatpush.bf16.msra.mxu2 %v13864_v36  ;;  %v13256_v4 = vor.u32 %v15228_v0, %v13253_v40  ;;  %v13109_v31 = vld [vmem:[#allocation11 + $0x3d8] sm:$0xf0]  ;;  %v15400_v30 = vld [vmem:[#allocation11 + $0xa4c] sm:$0xf] }
 0x564   :  { %v18044_v21 = vpop.f32.mrf.mxu2  ;;  %10448 = vst [vmem:[#allocation12 + $0x48] sm:$0xff] %v10423_v3  ;;  %9845 = vmatpush.bf16.msra.mxu1 %v12648_v44  ;;  %v13240_v14 = vor.u32 %v15224_v16, %v13237_v18  ;;  %v15368_v3 = vld [vmem:[#allocation11 + $0x94c] sm:$0xf]  ;;  %v13941_v57 = vld [vmem:[#allocation11 + $0xa58] sm:$0xf0] }
 0x565   :  { %v9492_v2 = vpop.f32.mrf.mxu1  ;;  %10201 = vst [vmem:[#allocation5 + $0x60] sm:$0xff] %v9491_v9  ;;  %10072 = vmatpush.bf16.msra.mxu3 %v13976_v25  ;;  %v13813_v9 = vld [vmem:[#allocation11 + $0x958] sm:$0xf0]  ;;  %v15188_v19 = vld [vmem:[#allocation11 + $0x3ac] sm:$0xf] }
 0x566   :  { %9985 = vmatmul.bf16.vlgmr.msrb.gmra.mxu3 %v18923_v46  ;;  %v13829_v46 = vld [vmem:[#allocation11 + $0x978] sm:$0xf0]  ;;  %v18937_v2 = vld [vmem:[#allocation40_spill] sm:$0xff]  ;;  %v13816_v53 = vor.u32 %v15368_v3, %v13813_v9  ;;  %v15364_v36 = vld [vmem:[#allocation11 + $0x92c] sm:$0xf] }
 0x567   :  { %v9469_v63 = vpop.f32.mrf.mxu0  ;;  %9823 = vmatpush.bf16.msra.mxu0 %v14420_v60  ;;  %10049 = vmatpush.bf16.msra.mxu2 %v13848_v13  ;;  %v13832_v42 = vor.u32 %v15372_v7, %v13829_v46  ;;  %v13093_v43 = vld [vmem:[#allocation11 + $0x3b8] sm:$0xf0]  ;;  %v13944_v60 = vor.u32 %v15400_v30, %v13941_v57  ;;  %v15396_v22 = vld [vmem:[#allocation11 + $0xa2c] sm:$0xf] }
 0x568   :  { %9846 = vmatpush.bf16.msra.mxu1 %v12632_v48  ;;  %v13797_v54 = vld [vmem:[#allocation11 + $0x938] sm:$0xf0]  ;;  %v15220_v0 = vld [vmem:[#allocation11 + $0x4ac] sm:$0xf] }
 0x569   :  { %9962 = vmatmul.bf16.vlgmr.msrb.gmra.mxu2 %v17266_v5  ;;  %v18049_v8 = vpop.f32.mrf.mxu3  ;;  %v15192_v5 = vld [vmem:[#allocation11 + $0x3cc] sm:$0xf]  ;;  %10073 = vmatpush.bf16.msra.mxu3 %v13960_v6  ;;  %v13925_v59 = vld [vmem:[#allocation11 + $0xa38] sm:$0xf0]  ;;  %v13800_v25 = vor.u32 %v15364_v36, %v13797_v54 }
 0x56a   :  { %v13112_v27 = vor.u32 %v15192_v5, %v13109_v31  ;;  %v13221_v63 = vld [vmem:[#allocation11 + $0x4b8] sm:$0xf0]  ;;  %v15360_v7 = vld [vmem:[#allocation11 + $0x90c] sm:$0xf] }
 0x56b   :  { %9908 = vmatpush.bf16.msrb.mxu0 %v13128_v28  ;;  %10050 = vmatpush.bf16.msra.mxu2 %v13832_v42  ;;  %v13224_v48 = vor.u32 %v15220_v0, %v13221_v63  ;;  %v13781_v46 = vld [vmem:[#allocation11 + $0x918] sm:$0xf0]  ;;  %v15184_v45 = vld [vmem:[#allocation11 + $0x38c] sm:$0xf] }
 0x56c   :  { %v18051_v50 = vpop.f32.mrf.mxu2  ;;  %v10339_v26 = vld [vmem:[#allocation5 + $0x60] sm:$0x3f]  ;;  %9931 = vmatpush.bf16.msrb.mxu1 %v13256_v4  ;;  %v13928_v4 = vor.u32 %v15396_v22, %v13925_v59  ;;  %v15392_v5 = vld [vmem:[#allocation11 + $0xa0c] sm:$0xf]  ;;  %v13909_v31 = vld [vmem:[#allocation11 + $0xa18] sm:$0xf0]  ;;  %v13784_v6 = vor.u32 %v15360_v7, %v13781_v46 }
 0x56d   :  { %v9572_v23 = vpop.f32.mrf.mxu1  ;;  %v10391_v29 = vadd.f32 %v10364_v32, %v10339_v26  ;;  %v13096_v32 = vor.u32 %v15188_v19, %v13093_v43  ;;  %10074 = vmatpush.bf16.msra.mxu3 %v13944_v60  ;;  %v18941_v26 = vld [vmem:[#allocation37_spill] sm:$0xff]  ;;  %v13205_v16 = vld [vmem:[#allocation11 + $0x498] sm:$0xf0]  ;;  %v13912_v9 = vor.u32 %v15392_v5, %v13909_v31  ;;  %v18946_v46 = vld [vmem:[#allocation46_spill] sm:$0xff] }
 0x56e   :  { %v15216_v42 = vld [vmem:[#allocation11 + $0x48c] sm:$0xf]  ;;  %v13061_v19 = vld [vmem:[#allocation11 + $0x378] sm:$0xf0] }
 0x56f   :  { %9909 = vmatpush.bf16.msrb.mxu0 %v13112_v27  ;;  %v10403_v56 = vmax.f32 %v10391_v29, 0.0  ;;  %v9549_v12 = vpop.f32.mrf.mxu0  ;;  %10051 = vmatpush.bf16.msra.mxu2 %v13816_v53  ;;  %v13077_v27 = vld [vmem:[#allocation11 + $0x398] sm:$0xf0]  ;;  %v18942_v18 = vld [vmem:[#allocation25_spill] sm:$0xff] }
 0x570   :  { %9765 = vmatmul.bf16.gmra.mxu1 %v18936_v35  ;;  %v9550_v44 = vadd.f32 %v9549_v12, %v18937_v2  ;;  %v15180_v12 = vld [vmem:[#allocation11 + $0x36c] sm:$0xf]  ;;  %v18945_v0 = vld [vmem:[#allocation19_spill] sm:$0xff] }
 0x571   :  { %v10432_v34 = vrot.slane %v10403_v56, 6  ;;  %v18057_v37 = vpop.f32.mrf.mxu3  ;;  %9932 = vmatpush.bf16.msrb.mxu1 %v13240_v14  ;;  %v13208_v14 = vor.u32 %v15216_v42, %v13205_v16  ;;  %10075 = vmatpush.bf16.msra.mxu3 %v13928_v4  ;;  %v15212_v43 = vld [vmem:[#allocation11 + $0x46c] sm:$0xf]  ;;  %v13064_v2 = vor.u32 %v15180_v12, %v13061_v19  ;;  %v13173_v4 = vld [vmem:[#allocation11 + $0x458] sm:$0xf0] }
 0x572   :  { %v18059_v41 = vadd.f32 %v9572_v23, %v9550_v44  ;;  %9742 = vmatmul.bf16.gmra.mxu0 %v18938_v17  ;;  %v13080_v23 = vor.u32 %v15184_v45, %v13077_v27  ;;  %v13189_v44 = vld [vmem:[#allocation11 + $0x478] sm:$0xf0]  ;;  %v15176_v63 = vld [vmem:[#allocation11 + $0x34c] sm:$0xf] }
 0x573   :  { %v10433_v40 = vsel %vm18939_vm9, %v18036_v24, %v10432_v34  ;;  %9910 = vmatpush.bf16.msrb.mxu0 %v13096_v32  ;;  %10052 = vmatpush.bf16.msra.mxu2 %v13800_v25  ;;  %v13192_v53 = vor.u32 %v15212_v43, %v13189_v44  ;;  %v18943_v32 = vld [vmem:[#allocation31_spill] sm:$0xff]  ;;  %v18944_v34 = vld [vmem:[#allocation42_spill] sm:$0xff]  ;;  %v15208_v25 = vld [vmem:[#allocation11 + $0x44c] sm:$0xf] }
 0x574   :  { %v18061_v28 = vpop.f32.mrf.mxu2  ;;  %10452 = vst [vmem:[#allocation12 + $0x68] sm:$0xff] %v10433_v40  ;;  %v13045_v40 = vld [vmem:[#allocation11 + $0x358] sm:$0xf0]  ;;  %v13176_v7 = vor.u32 %v15208_v25, %v13173_v4  ;;  %v15204_v31 = vld [vmem:[#allocation11 + $0x42c] sm:$0xf] }
 0x575   :  { %v9574_v13 = vpop.f32.mrf.mxu1  ;;  %9933 = vmatpush.bf16.msrb.mxu1 %v13224_v48  ;;  %10076 = vmatpush.bf16.msra.mxu3 %v13912_v9  ;;  %v13048_v48 = vor.u32 %v15176_v63, %v13045_v40  ;;  %v13029_v5 = vld [vmem:[#allocation11 + $0x338] sm:$0xf0]  ;;  %v15516_v42 = vld [vmem:[#allocation11 + $0xdec] sm:$0xf]  ;;  %v18948_v40 = vld [vmem:[#allocation34_spill] sm:$0xff] }
 0x576   :  { %9990 = vmatmul.bf16.gmra.mxu3 %v18940_v39  ;;  %v15172_v39 = vld [vmem:[#allocation11 + $0x32c] sm:$0xf]  ;;  %v18947_v27 = vld [vmem:[#allocation55_spill] sm:$0xff] }
 0x577   :  { %v9551_v24 = vpop.f32.mrf.mxu0  ;;  %9911 = vmatpush.bf16.msrb.mxu0 %v13080_v23  ;;  %10053 = vmatpush.bf16.msra.mxu2 %v13784_v6  ;;  %v13157_v23 = vld [vmem:[#allocation11 + $0x438] sm:$0xf0]  ;;  %v15200_v43 = vld [vmem:[#allocation11 + $0x40c] sm:$0xf] }
 0x578   :  { %v9552_v29 = vadd.f32 %v9551_v24, %v18942_v18  ;;  %v13032_v24 = vor.u32 %v15172_v39, %v13029_v5  ;;  %v14405_v16 = vld [vmem:[#allocation11 + $0xdf8] sm:$0xf0]  ;;  %v15512_v44 = vld [vmem:[#allocation11 + $0xdcc] sm:$0xf] }
 0x579   :  { %9967 = vmatmul.bf16.gmra.mxu2 %v18941_v26  ;;  %v18069_v3 = vpop.f32.mrf.mxu3  ;;  %9934 = vmatpush.bf16.msrb.mxu1 %v13208_v14  ;;  %v14408_v6 = vor.u32 %v15516_v42, %v14405_v16  ;;  %v15548_v14 = vld [vmem:[#allocation11 + $0xeec] sm:$0xf]  ;;  %v14533_v9 = vld [vmem:[#allocation11 + $0xef8] sm:$0xf0] }
 0x57a   :  { %v18071_v30 = vadd.f32 %v9574_v13, %v9552_v29  ;;  %v13160_v29 = vor.u32 %v15204_v31, %v13157_v23  ;;  %v14536_v12 = vor.u32 %v15548_v14, %v14533_v9  ;;  %v13013_v63 = vld [vmem:[#allocation11 + $0x318] sm:$0xf0]  ;;  %v15508_v25 = vld [vmem:[#allocation11 + $0xdac] sm:$0xf]  ;;  %v18950_v23 = vld [vmem:[#allocation26_spill] sm:$0xff] }
 0x57b   :  { %9912 = vmatpush.bf16.msrb.mxu0 %v13064_v2  ;;  %10138 = vmatpush.bf16.msrb.mxu2 %v14408_v6  ;;  %v13141_v2 = vld [vmem:[#allocation11 + $0x418] sm:$0xf0]  ;;  %v15324_v16 = vld [vmem:[#allocation11 + $0x7ec] sm:$0xf] }
 0x57c   :  { %v18073_v57 = vpop.f32.mrf.mxu2  ;;  %10161 = vmatpush.bf16.msrb.mxu3 %v14536_v12  ;;  %v14373_v4 = vld [vmem:[#allocation11 + $0xdb8] sm:$0xf0]  ;;  %v15504_v6 = vld [vmem:[#allocation11 + $0xd8c] sm:$0xf] }
 0x57d   :  { %v9577_v56 = vpop.f32.mrf.mxu1  ;;  %9935 = vmatpush.bf16.msrb.mxu1 %v13192_v53  ;;  %v13144_v53 = vor.u32 %v15200_v43, %v13141_v2  ;;  %v14376_v39 = vor.u32 %v15508_v25, %v14373_v4  ;;  %v14501_v5 = vld [vmem:[#allocation11 + $0xeb8] sm:$0xf0]  ;;  %v15536_v12 = vld [vmem:[#allocation11 + $0xe8c] sm:$0xf] }
 0x57e   :  { %v14357_v9 = vld [vmem:[#allocation11 + $0xd98] sm:$0xf0]  ;;  %v18952_v25 = vld [vmem:[#allocation49_spill] sm:$0xff] }
 0x57f   :  { %v9554_v36 = vpop.f32.mrf.mxu0  ;;  %9913 = vmatpush.bf16.msrb.mxu0 %v13048_v48  ;;  %v14485_v43 = vld [vmem:[#allocation11 + $0xe98] sm:$0xf0]  ;;  %v14360_v2 = vor.u32 %v15504_v6, %v14357_v9  ;;  %v9596_v4 = vadd.f32 %v18952_v25, %v18059_v41  ;;  %v15528_v6 = vld [vmem:[#allocation11 + $0xe4c] sm:$0xf]  ;;  %v18953_v9 = vld [vmem:[#allocation60_spill] sm:$0xff] }
 0x580   :  { %9847 = vmatmul.bf16.vlgmr.msra.gmra.mxu1 %v18943_v32  ;;  %v9555_v60 = vadd.f32 %v9554_v36, %v18944_v34  ;;  %v14389_v32 = vld [vmem:[#allocation11 + $0xdd8] sm:$0xf0]  ;;  %v15544_v36 = vld [vmem:[#allocation11 + $0xecc] sm:$0xf] }
 0x581   :  { %v9722_v54 = vpop.f32.mrf.mxu3  ;;  %9936 = vmatpush.bf16.msrb.mxu1 %v13176_v7  ;;  %v14517_v34 = vld [vmem:[#allocation11 + $0xed8] sm:$0xf0]  ;;  %v15540_v7 = vld [vmem:[#allocation11 + $0xeac] sm:$0xf] }
 0x582   :  { %v18077_v22 = vadd.f32 %v9577_v56, %v9555_v60  ;;  %9824 = vmatmul.bf16.vlgmr.msra.gmra.mxu0 %v18945_v0  ;;  %v14392_v60 = vor.u32 %v15512_v44, %v14389_v32  ;;  %v14520_v54 = vor.u32 %v15544_v36, %v14517_v34  ;;  %v14488_v44 = vor.u32 %v15536_v12, %v14485_v43  ;;  %v18951_v32 = vld [vmem:[#allocation30_spill] sm:$0xff] }
 0x583   :  { %9914 = vmatpush.bf16.msrb.mxu0 %v13032_v24  ;;  %v9619_v12 = vadd.f32 %v18953_v9, %v9596_v4  ;;  %v14421_v9 = vld [vmem:[#allocation11 + $0xe18] sm:$0xf0] }
 0x584   :  { %v9699_v59 = vpop.f32.mrf.mxu2  ;;  %10139 = vmatpush.bf16.msrb.mxu2 %v14392_v60  ;;  %10162 = vmatpush.bf16.msrb.mxu3 %v14520_v54  ;;  %v15500_v60 = vld [vmem:[#allocation11 + $0xd6c] sm:$0xf]  ;;  %v14341_v54 = vld [vmem:[#allocation11 + $0xd78] sm:$0xf0] }
 0x585   :  { %v9579_v13 = vpop.f32.mrf.mxu1  ;;  %9937 = vmatpush.bf16.msrb.mxu1 %v13160_v29  ;;  %v15168_v59 = vld [vmem:[#allocation11 + $0x30c] sm:$0xf]  ;;  %v13637_v29 = vld [vmem:[#allocation11 + $0x7f8] sm:$0xf0] }
 0x586   :  { %9995 = vmatmul.bf16.gmra.mxu3 %v18875_v15  ;;  %v13640_v14 = vor.u32 %v15324_v16, %v13637_v29  ;;  %v14325_v29 = vld [vmem:[#allocation11 + $0xd58] sm:$0xf0] }
 0x587   :  { %v9556_v45 = vpop.f32.mrf.mxu0 }
 0x588   :  { %v9557_v26 = vadd.f32 %v9556_v45, %v18947_v27  ;;  %v14504_v27 = vor.u32 %v15540_v7, %v14501_v5  ;;  %10140 = vmatpush.bf16.msrb.mxu2 %v14376_v39  ;;  %v15320_v7 = vld [vmem:[#allocation11 + $0x7cc] sm:$0xf] }
 0x589   :  { %9972 = vmatmul.bf16.gmra.mxu2 %v18946_v46  ;;  %v18083_v18 = vpop.f32.mrf.mxu3  ;;  %v18949_v46 = vld [vmem:[#allocation59_spill] sm:$0xff]  ;;  %9938 = vmatpush.bf16.msrb.mxu1 %v13144_v53  ;;  %v15352_v5 = vld [vmem:[#allocation11 + $0x8cc] sm:$0xf] }
 0x58a   :  { %v18085_v15 = vadd.f32 %v9579_v13, %v9557_v26  ;;  %v13016_v13 = vor.u32 %v15168_v59, %v13013_v63  ;;  %10163 = vmatpush.bf16.msrb.mxu3 %v14504_v27  ;;  %v13765_v53 = vld [vmem:[#allocation11 + $0x8f8] sm:$0xf0]  ;;  %v15532_v59 = vld [vmem:[#allocation11 + $0xe6c] sm:$0xf]  ;;  %v14344_v63 = vor.u32 %v15500_v60, %v14341_v54 }
 0x58b   :  { %v13749_v27 = vld [vmem:[#allocation11 + $0x8d8] sm:$0xf0]  ;;  %v15524_v54 = vld [vmem:[#allocation11 + $0xe2c] sm:$0xf] }
 0x58c   :  { %v18087_v56 = vpop.f32.mrf.mxu2  ;;  %9915 = vmatpush.bf16.msrb.mxu0 %v13016_v13  ;;  %10141 = vmatpush.bf16.msrb.mxu2 %v14360_v2  ;;  %v13752_v16 = vor.u32 %v15352_v5, %v13749_v27  ;;  %v14309_v60 = vld [vmem:[#allocation11 + $0xd38] sm:$0xf0]  ;;  %v15348_v5 = vld [vmem:[#allocation11 + $0x8ac] sm:$0xf] }
 0x58d   :  { %v9582_v19 = vpop.f32.mrf.mxu1  ;;  %v13733_v27 = vld [vmem:[#allocation11 + $0x8b8] sm:$0xf0] }
 0x58e   :  { %10164 = vmatpush.bf16.msrb.mxu3 %v14488_v44  ;;  %v18954_v44 = vld [vmem:[#allocation54_spill] sm:$0xff] }
 0x58f   :  { %v9559_v48 = vpop.f32.mrf.mxu0 }
 0x590   :  { %9852 = vmatmul.bf16.gmra.mxu1 %v18948_v40  ;;  %v9560_v45 = vadd.f32 %v9559_v48, %v18949_v46  ;;  %10000 = vmatpush.bf16.msra.mxu0 %v13640_v14  ;;  %v14469_v40 = vld [vmem:[#allocation11 + $0xe78] sm:$0xf0] }
 0x591   :  { %v18091_v31 = vpop.f32.mrf.mxu3  ;;  %v13621_v46 = vld [vmem:[#allocation11 + $0x7d8] sm:$0xf0]  ;;  %10142 = vmatpush.bf16.msrb.mxu2 %v14344_v63 }
 0x592   :  { %v18093_v26 = vadd.f32 %v9582_v19, %v9560_v45  ;;  %9829 = vmatmul.bf16.gmra.mxu0 %v18950_v23  ;;  %v15356_v19 = vld [vmem:[#allocation11 + $0x8ec] sm:$0xf]  ;;  %v13624_v45 = vor.u32 %v15320_v7, %v13621_v46  ;;  %v14453_v14 = vld [vmem:[#allocation11 + $0xe58] sm:$0xf0]  ;;  %v18956_v46 = vld [vmem:[#allocation62_spill] sm:$0xff] }
 0x593   :  { %v13768_v34 = vor.u32 %v15356_v19, %v13765_v53  ;;  %v14456_v2 = vor.u32 %v15528_v6, %v14453_v14  ;;  %v15316_v19 = vld [vmem:[#allocation11 + $0x7ac] sm:$0xf]  ;;  %v13605_v53 = vld [vmem:[#allocation11 + $0x7b8] sm:$0xf0] }
 0x594   :  { %v18095_v24 = vpop.f32.mrf.mxu2  ;;  %10001 = vmatpush.bf16.msra.mxu0 %v13624_v45  ;;  %v18955_v7 = vld [vmem:[#allocation47_spill] sm:$0xff]  ;;  %v9598_v45 = vadd.f32 %v18956_v46, %v18071_v30  ;;  %v15520_v14 = vld [vmem:[#allocation11 + $0xe0c] sm:$0xf] }
 0x595   :  { %v9584_v42 = vpop.f32.mrf.mxu1  ;;  %10023 = vmatpush.bf16.msra.mxu1 %v13768_v34  ;;  %v13608_v34 = vor.u32 %v15316_v19, %v13605_v53  ;;  %v14293_v6 = vld [vmem:[#allocation11 + $0xd18] sm:$0xf0]  ;;  %v14424_v30 = vor.u32 %v15520_v14, %v14421_v9  ;;  %v18958_v19 = vld [vmem:[#allocation53_spill] sm:$0xff] }
 0x596   :  { %10077 = vmatmul.bf16.vlgmr.msra.gmra.mxu3 %v18878_v11  ;;  %v14472_v11 = vor.u32 %v15532_v59, %v14469_v40  ;;  %v15496_v42 = vld [vmem:[#allocation11 + $0xd4c] sm:$0xf]  ;;  %v14437_v59 = vld [vmem:[#allocation11 + $0xe38] sm:$0xf0] }
 0x597   :  { %v9561_v36 = vpop.f32.mrf.mxu0  ;;  %v14328_v43 = vor.u32 %v15496_v42, %v14325_v29  ;;  %v13736_v42 = vor.u32 %v15348_v5, %v13733_v27  ;;  %v15488_v29 = vld [vmem:[#allocation11 + $0xd0c] sm:$0xf]  ;;  %v18959_v14 = vld [vmem:[#allocation51_spill] sm:$0xff] }
 0x598   :  { %10165 = vmatpush.bf16.msrb.mxu3 %v14472_v11  ;;  %v14440_v11 = vor.u32 %v15524_v54, %v14437_v59  ;;  %10002 = vmatpush.bf16.msra.mxu0 %v13608_v34  ;;  %v15308_v46 = vld [vmem:[#allocation11 + $0x76c] sm:$0xf] }
 0x599   :  { %10054 = vmatmul.bf16.vlgmr.msra.gmra.mxu2 %v18951_v32  ;;  %v18100_v48 = vpop.f32.mrf.mxu3  ;;  %v15492_v32 = vld [vmem:[#allocation11 + $0xd2c] sm:$0xf]  ;;  %10024 = vmatpush.bf16.msra.mxu1 %v13752_v16 }
 0x59a   :  { %10143 = vmatpush.bf16.msrb.mxu2 %v14328_v43  ;;  %v14312_v40 = vor.u32 %v15492_v32, %v14309_v60  ;;  %v13589_v43 = vld [vmem:[#allocation11 + $0x798] sm:$0xf0]  ;;  %v15344_v32 = vld [vmem:[#allocation11 + $0x88c] sm:$0xf] }
 0x59b   :  { %v15340_v5 = vld [vmem:[#allocation11 + $0x86c] sm:$0xf] }
 0x59c   :  { %v18102_v13 = vpop.f32.mrf.mxu2  ;;  %10166 = vmatpush.bf16.msrb.mxu3 %v14456_v2  ;;  %v18957_v2 = vld [vmem:[#allocation61_spill] sm:$0xff] }
 0x59d   :  { %v9664_v39 = vpop.f32.mrf.mxu1  ;;  %10025 = vmatpush.bf16.msra.mxu1 %v13736_v42  ;;  %v13701_v42 = vld [vmem:[#allocation11 + $0x878] sm:$0xf0] }
 0x59e   :  { %10144 = vmatpush.bf16.msrb.mxu2 %v14312_v40 }
 0x59f   :  { %v9641_v41 = vpop.f32.mrf.mxu0 }
 0x5a0   :  { %9857 = vmatmul.bf16.gmra.mxu1 %v18954_v44  ;;  %v9642_v36 = vadd.f32 %v9641_v41, %v9619_v12  ;;  %10167 = vmatpush.bf16.msrb.mxu3 %v14440_v11  ;;  %v15312_v12 = vld [vmem:[#allocation11 + $0x78c] sm:$0xf]  ;;  %v9621_v44 = vadd.f32 %v18957_v2, %v9598_v45  ;;  %v13573_v45 = vld [vmem:[#allocation11 + $0x778] sm:$0xf0] }
 0x5a1   :  { %v18108_v63 = vpop.f32.mrf.mxu3  ;;  %v13592_v41 = vor.u32 %v15312_v12, %v13589_v43  ;;  %v13576_v27 = vor.u32 %v15308_v46, %v13573_v45  ;;  %v9603_v43 = vadd.f32 %v17979_v49, %v18085_v15  ;;  %v15304_v2 = vld [vmem:[#allocation11 + $0x74c] sm:$0xf]  ;;  %v13669_v46 = vld [vmem:[#allocation11 + $0x838] sm:$0xf0] }
 0x5a2   :  { %v18110_v25 = vadd.f32 %v9664_v39, %v9642_v36  ;;  %9834 = vmatmul.bf16.gmra.mxu0 %v18955_v7  ;;  %v14296_v39 = vor.u32 %v15488_v29, %v14293_v6  ;;  %v13717_v36 = vld [vmem:[#allocation11 + $0x898] sm:$0xf0]  ;;  %v13704_v6 = vor.u32 %v15340_v5, %v13701_v42 }
 0x5a3   :  { %10003 = vmatpush.bf16.msra.mxu0 %v13592_v41  ;;  %v13720_v60 = vor.u32 %v15344_v32, %v13717_v36  ;;  %v15336_v41 = vld [vmem:[#allocation11 + $0x84c] sm:$0xf]  ;;  %v9626_v32 = vadd.f32 %v17974_v33, %v9603_v43  ;;  %v18961_v36 = vld [vmem:[#allocation18_spill] sm:$0xff]  ;;  %v9606_v33 = vadd.f32 %v17998_v38, %v18093_v26 }
 0x5a4   :  { %v18112_v4 = vpop.f32.mrf.mxu2  ;;  %10145 = vmatpush.bf16.msrb.mxu2 %v14296_v39  ;;  %10168 = vmatpush.bf16.msrb.mxu3 %v14424_v30 }
 0x5a5   :  { %v9666_v16 = vpop.f32.mrf.mxu1  ;;  %10026 = vmatpush.bf16.msra.mxu1 %v13720_v60  ;;  %v15300_v60 = vld [vmem:[#allocation11 + $0x72c] sm:$0xf] }
 0x5a6   :  { %10082 = vmatmul.bf16.gmra.mxu3 %v18884_v47  ;;  %v9601_v47 = vadd.f32 %v17963_v61, %v18077_v22  ;;  %v18960_v22 = vld [vmem:[#allocation33_spill] sm:$0xff] }
 0x5a7   :  { %v9643_v53 = vpop.f32.mrf.mxu0  ;;  %10004 = vmatpush.bf16.msra.mxu0 %v13576_v27 }
 0x5a8   :  { %v9644_v34 = vadd.f32 %v9643_v53, %v9621_v44  ;;  %v9624_v29 = vadd.f32 %v17960_v10, %v9601_v47  ;;  %v13557_v44 = vld [vmem:[#allocation11 + $0x758] sm:$0xf0] }
 0x5a9   :  { %10059 = vmatmul.bf16.gmra.mxu2 %v18958_v19  ;;  %v18120_v54 = vpop.f32.mrf.mxu3  ;;  %10027 = vmatpush.bf16.msra.mxu1 %v13704_v6  ;;  %v13560_v30 = vor.u32 %v15304_v2, %v13557_v44  ;;  %v13685_v19 = vld [vmem:[#allocation11 + $0x858] sm:$0xf0] }
 0x5aa   :  { %v18122_v59 = vadd.f32 %v9666_v16, %v9644_v34  ;;  %v13688_v53 = vor.u32 %v15336_v41, %v13685_v19  ;;  %v13541_v47 = vld [vmem:[#allocation11 + $0x738] sm:$0xf0]  ;;  %v15452_v41 = vld [vmem:[#allocation11 + $0xbec] sm:$0xf] }
 0x5ab   :  { %10005 = vmatpush.bf16.msra.mxu0 %v13560_v30  ;;  %v13544_v15 = vor.u32 %v15300_v60, %v13541_v47  ;;  %v13653_v6 = vld [vmem:[#allocation11 + $0x818] sm:$0xf0]  ;;  %v18963_v30 = vld [vmem:[#allocation44_spill] sm:$0xff] }
 0x5ac   :  { %v18124_v40 = vpop.f32.mrf.mxu2  ;;  %v14149_v19 = vld [vmem:[#allocation11 + $0xbf8] sm:$0xf0] }
 0x5ad   :  { %v9669_v11 = vpop.f32.mrf.mxu1  ;;  %10028 = vmatpush.bf16.msra.mxu1 %v13688_v53  ;;  %v15484_v53 = vld [vmem:[#allocation11 + $0xcec] sm:$0xf] }
 0x5af   :  { %v9646_v39 = vpop.f32.mrf.mxu0  ;;  %10006 = vmatpush.bf16.msra.mxu0 %v13544_v15  ;;  %v14133_v15 = vld [vmem:[#allocation11 + $0xbd8] sm:$0xf0] }
 0x5b0   :  { %9939 = vmatmul.bf16.vlgmr.msrb.gmra.mxu1 %v18959_v14  ;;  %v9647_v16 = vadd.f32 %v9646_v39, %v9624_v29  ;;  %v15328_v29 = vld [vmem:[#allocation11 + $0x80c] sm:$0xf] }
 0x5b1   :  { %v9814_v9 = vpop.f32.mrf.mxu3  ;;  %v15296_v14 = vld [vmem:[#allocation11 + $0x70c] sm:$0xf]  ;;  %v13656_v39 = vor.u32 %v15328_v29, %v13653_v6 }
 0x5b2   :  { %v18130_v12 = vadd.f32 %v9669_v11, %v9647_v16  ;;  %9916 = vmatmul.bf16.vlgmr.msrb.gmra.mxu0 %v18960_v22  ;;  %v15332_v11 = vld [vmem:[#allocation11 + $0x82c] sm:$0xf]  ;;  %v13525_v16 = vld [vmem:[#allocation11 + $0x718] sm:$0xf0]  ;;  %v9629_v9 = vadd.f32 %v17995_v58, %v9606_v33  ;;  %v14152_v58 = vor.u32 %v15452_v41, %v14149_v19 }
 0x5b3   :  { %v13672_v5 = vor.u32 %v15332_v11, %v13669_v46  ;;  %v18962_v22 = vld [vmem:[#allocation21_spill] sm:$0xff]  ;;  %v14101_v19 = vld [vmem:[#allocation11 + $0xb98] sm:$0xf0] }
 0x5b4   :  { %v9791_v61 = vpop.f32.mrf.mxu2  ;;  %v15480_v33 = vld [vmem:[#allocation11 + $0xccc] sm:$0xf] }
 0x5b5   :  { %v9671_v10 = vpop.f32.mrf.mxu1  ;;  %10029 = vmatpush.bf16.msra.mxu1 %v13672_v5  ;;  %v13528_v61 = vor.u32 %v15296_v14, %v13525_v16  ;;  %v15444_v14 = vld [vmem:[#allocation11 + $0xbac] sm:$0xf] }
 0x5b6   :  { %10087 = vmatmul.bf16.gmra.mxu3 %v18938_v17  ;;  %v15440_v41 = vld [vmem:[#allocation11 + $0xb8c] sm:$0xf] }
 0x5b7   :  { %v9648_v34 = vpop.f32.mrf.mxu0  ;;  %10007 = vmatpush.bf16.msra.mxu0 %v13528_v61 }
 0x5b8   :  { %v9649_v49 = vadd.f32 %v9648_v34, %v9626_v32  ;;  %v14277_v32 = vld [vmem:[#allocation11 + $0xcf8] sm:$0xf0]  ;;  %v18964_v34 = vld [vmem:[#allocation16_spill] sm:$0xff] }
 0x5b9   :  { %10064 = vmatmul.bf16.gmra.mxu2 %v18961_v36  ;;  %v18138_v45 = vpop.f32.mrf.mxu3  ;;  %10030 = vmatpush.bf16.msra.mxu1 %v13656_v39  ;;  %v14280_v36 = vor.u32 %v15484_v53, %v14277_v32  ;;  %v14117_v39 = vld [vmem:[#allocation11 + $0xbb8] sm:$0xf0]  ;;  %v15472_v53 = vld [vmem:[#allocation11 + $0xc8c] sm:$0xf] }
 0x5ba   :  { %v18140_v27 = vadd.f32 %v9671_v10, %v9649_v49  ;;  %v15448_v49 = vld [vmem:[#allocation11 + $0xbcc] sm:$0xf]  ;;  %v14120_v16 = vor.u32 %v15444_v14, %v14117_v39  ;;  %v14229_v32 = vld [vmem:[#allocation11 + $0xc98] sm:$0xf0]  ;;  %v18971_v39 = vld [vmem:[#allocation24_spill] sm:$0xff] }
 0x5bb   :  { %10092 = vmatpush.bf16.msrb.mxu0 %v14152_v58  ;;  %v14136_v46 = vor.u32 %v15448_v49, %v14133_v15  ;;  %v14104_v58 = vor.u32 %v15440_v41, %v14101_v19  ;;  %v14213_v14 = vld [vmem:[#allocation11 + $0xc78] sm:$0xf0]  ;;  %v18973_v41 = vld [vmem:[#allocation50_spill] sm:$0xff] }
 0x5bc   :  { %v18142_v42 = vpop.f32.mrf.mxu2 }
 0x5bd   :  { %v9674_v17 = vpop.f32.mrf.mxu1  ;;  %10115 = vmatpush.bf16.msrb.mxu1 %v14280_v36  ;;  %v14232_v36 = vor.u32 %v15472_v53, %v14229_v32  ;;  %v9688_v32 = vadd.f32 %v18030_v1, %v18110_v25 }
 0x5bf   :  { %v9651_v43 = vpop.f32.mrf.mxu0  ;;  %10093 = vmatpush.bf16.msrb.mxu0 %v14136_v46 }
 0x5c0   :  { %9944 = vmatmul.bf16.gmra.mxu1 %v18962_v22  ;;  %v9652_v2 = vadd.f32 %v9651_v43, %v9629_v9  ;;  %v18968_v22 = vld [vmem:[#allocation58_spill] sm:$0xff]  ;;  %v15476_v43 = vld [vmem:[#allocation11 + $0xcac] sm:$0xf] }
 0x5c1   :  { %v18148_v44 = vpop.f32.mrf.mxu3 }
 0x5c2   :  { %v18150_v38 = vadd.f32 %v9674_v17, %v9652_v2  ;;  %9921 = vmatmul.bf16.gmra.mxu0 %v18963_v30  ;;  %v14261_v17 = vld [vmem:[#allocation11 + $0xcd8] sm:$0xf0] }
 0x5c3   :  { %v14264_v29 = vor.u32 %v15480_v33, %v14261_v17  ;;  %v14245_v2 = vld [vmem:[#allocation11 + $0xcb8] sm:$0xf0]  ;;  %10094 = vmatpush.bf16.msrb.mxu0 %v14120_v16  ;;  %v15436_v33 = vld [vmem:[#allocation11 + $0xb6c] sm:$0xf] }
 0x5c4   :  { %v18152_v26 = vpop.f32.mrf.mxu2  ;;  %v14248_v30 = vor.u32 %v15476_v43, %v14245_v2  ;;  %v14085_v17 = vld [vmem:[#allocation11 + $0xb78] sm:$0xf0]  ;;  %v18972_v2 = vld [vmem:[#allocation36_spill] sm:$0xff] }
 0x5c5   :  { %v9676_v10 = vpop.f32.mrf.mxu1  ;;  %10116 = vmatpush.bf16.msrb.mxu1 %v14264_v29  ;;  %v15468_v29 = vld [vmem:[#allocation11 + $0xc6c] sm:$0xf] }
 0x5c6   :  { %10169 = vmatmul.bf16.vlgmr.msrb.gmra.mxu3 %v18945_v0  ;;  %v18966_v0 = vld [vmem:[#allocation28_spill] sm:$0xff]  ;;  %v14216_v16 = vor.u32 %v15468_v29, %v14213_v14  ;;  %v14197_v14 = vld [vmem:[#allocation11 + $0xc58] sm:$0xf0] }
 0x5c7   :  { %v9653_v60 = vpop.f32.mrf.mxu0  ;;  %10095 = vmatpush.bf16.msrb.mxu0 %v14104_v58  ;;  %v18976_v29 = vld [vmem:[#allocation56_spill] sm:$0xff] }
 0x5c9   :  { %10146 = vmatmul.bf16.vlgmr.msrb.gmra.mxu2 %v18964_v34  ;;  %v18157_v47 = vpop.f32.mrf.mxu3  ;;  %10117 = vmatpush.bf16.msrb.mxu1 %v14248_v30  ;;  %v18969_v34 = vld [vmem:[#allocation29_spill] sm:$0xff] }
 0x5ca   :  { %18965 = vst [vmem:[#allocation63_spill] sm:$0xff] %v18157_v47  ;;  %v14165_v47 = vld [vmem:[#allocation11 + $0xc18] sm:$0xf0] }
 0x5cc   :  { %v18159_v11 = vpop.f32.mrf.mxu2 }
 0x5cd   :  { %v18161_v5 = vpop.f32.mrf.mxu1  ;;  %10118 = vmatpush.bf16.msrb.mxu1 %v14232_v36 }
 0x5cf   :  { %v18164_v6 = vpop.f32.mrf.mxu0 }
 0x5d0   :  { %9949 = vmatmul.bf16.gmra.mxu1 %v18966_v0  ;;  %v14088_v0 = vor.u32 %v15436_v33, %v14085_v17  ;;  %v14069_v33 = vld [vmem:[#allocation11 + $0xb58] sm:$0xf0]  ;;  %v15464_v17 = vld [vmem:[#allocation11 + $0xc4c] sm:$0xf] }
 0x5d1   :  { %v18166_v9 = vpop.f32.mrf.mxu3  ;;  %10119 = vmatpush.bf16.msrb.mxu1 %v14216_v16  ;;  %v14053_v16 = vld [vmem:[#allocation11 + $0xb38] sm:$0xf0] }
 0x5d2   :  { %18967 = vst [vmem:[#allocation65_spill] sm:$0xff] %v18166_v9  ;;  %9926 = vmatmul.bf16.gmra.mxu0 %v18968_v22  ;;  %v15456_v9 = vld [vmem:[#allocation11 + $0xc0c] sm:$0xf] }
 0x5d3   :  { %10096 = vmatpush.bf16.msrb.mxu0 %v14088_v0 }
 0x5d4   :  { %v18168_v61 = vpop.f32.mrf.mxu2 }
 0x5d5   :  { %v18171_v10 = vpop.f32.mrf.mxu1 }
 0x5d6   :  { %10174 = vmatmul.bf16.gmra.mxu3 %v18950_v23 }
 0x5d7   :  { %v18175_v60 = vpop.f32.mrf.mxu0 }
 0x5d9   :  { %10151 = vmatmul.bf16.gmra.mxu2 %v18969_v34  ;;  %v18177_v49 = vpop.f32.mrf.mxu3  ;;  %v15432_v34 = vld [vmem:[#allocation11 + $0xb4c] sm:$0xf] }
 0x5da   :  { %18970 = vst [vmem:[#allocation64_spill] sm:$0xff] %v18177_v49  ;;  %v14037_v49 = vld [vmem:[#allocation11 + $0xb18] sm:$0xf0] }
 0x5dc   :  { %v18179_v15 = vpop.f32.mrf.mxu2 }
 0x5dd   :  { %v18181_v46 = vpop.f32.mrf.mxu1 }
 0x5df   :  { %v18184_v23 = vpop.f32.mrf.mxu0 }
 0x5e0   :  { %10031 = vmatmul.bf16.vlgmr.msra.gmra.mxu1 %v18971_v39  ;;  %v15428_v39 = vld [vmem:[#allocation11 + $0xb2c] sm:$0xf] }
 0x5e1   :  { %v9906_v22 = vpop.f32.mrf.mxu3  ;;  %v14056_v1 = vor.u32 %v15428_v39, %v14053_v16 }
 0x5e2   :  { %10008 = vmatmul.bf16.vlgmr.msra.gmra.mxu0 %v18972_v2  ;;  %v9711_v22 = vadd.f32 %v18027_v51, %v9688_v32  ;;  %v15460_v2 = vld [vmem:[#allocation11 + $0xc2c] sm:$0xf]  ;;  %v9690_v51 = vadd.f32 %v18044_v21, %v18122_v59  ;;  %v9693_v21 = vadd.f32 %v18051_v50, %v18130_v12 }
 0x5e4   :  { %v9883_v43 = vpop.f32.mrf.mxu2  ;;  %v9734_v25 = vadd.f32 %v18164_v6, %v9711_v22  ;;  %v14168_v6 = vor.u32 %v15456_v9, %v14165_v47  ;;  %v9713_v39 = vadd.f32 %v18038_v20, %v9690_v51  ;;  %v18978_v9 = vld [vmem:[#allocation45_spill] sm:$0xff] }
 0x5e5   :  { %v18187_v30 = vpop.f32.mrf.mxu1  ;;  %v14200_v43 = vor.u32 %v15464_v17, %v14197_v14 }
 0x5e6   :  { %10179 = vmatmul.bf16.gmra.mxu3 %v18955_v7  ;;  %v14072_v7 = vor.u32 %v15432_v34, %v14069_v33  ;;  %v15424_v33 = vld [vmem:[#allocation11 + $0xb0c] sm:$0xf]  ;;  %v9736_v22 = vadd.f32 %v18175_v60, %v9713_v39  ;;  %v9716_v60 = vadd.f32 %v18049_v8, %v9693_v21 }
 0x5e7   :  { %v18191_v19 = vpop.f32.mrf.mxu0  ;;  %10120 = vmatpush.bf16.msrb.mxu1 %v14200_v43  ;;  %v14040_v17 = vor.u32 %v15424_v33, %v14037_v49 }
 0x5e8   :  { %10097 = vmatpush.bf16.msrb.mxu0 %v14072_v7  ;;  %v9757_v7 = vadd.f32 %v18161_v5, %v9734_v25  ;;  %v9759_v47 = vadd.f32 %v18171_v10, %v9736_v22  ;;  %v9739_v50 = vadd.f32 %v18184_v23, %v9716_v60 }
 0x5e9   :  { %10156 = vmatmul.bf16.gmra.mxu2 %v18973_v41  ;;  %v18193_v53 = vpop.f32.mrf.mxu3  ;;  %v14181_v41 = vld [vmem:[#allocation11 + $0xc38] sm:$0xf0] }
 0x5ea   :  { %18974 = vst [vmem:[#allocation67_spill] sm:$0xff] %v18193_v53  ;;  %v14184_v34 = vor.u32 %v15460_v2, %v14181_v41  ;;  %v9780_v2 = vadd.f32 %v18087_v56, %v9757_v7  ;;  %v10222_v56 = vld [vmem:[#allocation6 + $0x30] sm:$0xff]  ;;  %v9762_v33 = vadd.f32 %v18181_v46, %v9739_v50 }
 0x5eb   :  { %v10241_v10 = vrot.slane %v10222_v56, 6 }
 0x5ec   :  { %v18195_v58 = vpop.f32.mrf.mxu2  ;;  %10098 = vmatpush.bf16.msrb.mxu0 %v14056_v1  ;;  %10121 = vmatpush.bf16.msrb.mxu1 %v14184_v34  ;;  %v9803_v20 = vadd.f32 %v18083_v18, %v9780_v2  ;;  %v10218_v1 = vld [vmem:[#allocation6 + $0x10] sm:$0xff] }
 0x5ed   :  { %18975 = vst [vmem:[#allocation66_spill] sm:$0xff] %v18195_v58  ;;  %v18199_v36 = vpop.f32.mrf.mxu1  ;;  %v10235_v18 = vrot.slane %v10218_v1, 6 }
 0x5ef   :  { %v18202_v0 = vpop.f32.mrf.mxu0 }
 0x5f0   :  { %10036 = vmatmul.bf16.gmra.mxu1 %v18976_v29  ;;  %v18977_v29 = vld [vmem:[#allocation39_spill] sm:$0xff]  ;;  %10099 = vmatpush.bf16.msrb.mxu0 %v14040_v17 }
 0x5f1   :  { %v18205_v53 = vpop.f32.mrf.mxu3  ;;  %10122 = vmatpush.bf16.msrb.mxu1 %v14168_v6 }
 0x5f2   :  { %10013 = vmatmul.bf16.gmra.mxu0 %v18977_v29  ;;  %v9695_v29 = vadd.f32 %v18061_v28, %v18140_v27 }
 0x5f4   :  { %v18208_v58 = vpop.f32.mrf.mxu2 }
 0x5f5   :  { %v9768_v32 = vpop.f32.mrf.mxu1 }
 0x5f6   :  { %v10242_v32 = vsel %vm18979_vm1, %v10235_v18, %v10241_v10 }
 0x5f7   :  { %v9745_v14 = vpop.f32.mrf.mxu0 }
 0x5f9   :  { %v18215_v16 = vpop.f32.mrf.mxu3 }
 0x5fc   :  { %v18218_v43 = vpop.f32.mrf.mxu2 }
 0x5fd   :  { %v9848_v59 = vpop.f32.mrf.mxu1 }
 0x5fe   :  { %v18224_v5 = vadd.f32 %v18142_v42, %v9848_v59  ;;  %v9782_v42 = vadd.f32 %v18095_v24, %v9759_v47  ;;  %v18980_v47 = vld [vmem:[#allocation20_spill] sm:$0xff] }
 0x5ff   :  { %v9825_v49 = vpop.f32.mrf.mxu0 }
 0x600   :  { %10041 = vmatmul.bf16.gmra.mxu1 %v18978_v9  ;;  %v9826_v41 = vadd.f32 %v9825_v49, %v9803_v20  ;;  %v9805_v23 = vadd.f32 %v18091_v31, %v9782_v42  ;;  %v9698_v31 = vadd.f32 %v18073_v57, %v18150_v38  ;;  %v10344_v38 = vld [vmem:[#allocation6 + $0x50] sm:$0xff] }
 0x601   :  { %v18230_v25 = vpop.f32.mrf.mxu3  ;;  %v10348_v49 = vld [vmem:[#allocation6 + $0x70] sm:$0xff] }
 0x602   :  { %10186 = vst [vmem:[#allocation5 + $0x58] sm:$0xff] %v9826_v41  ;;  %10018 = vmatmul.bf16.gmra.mxu0 %v18931_v55  ;;  %v9718_v55 = vadd.f32 %v18057_v37, %v9695_v29  ;;  %v10360_v41 = vrot.slane %v10344_v38, 2  ;;  %v10366_v1 = vrot.slane %v10348_v49, 2  ;;  %v18983_v38 = vld [vmem:[#allocation27_spill] sm:$0xff] }
 0x604   :  { %v18233_v12 = vpop.f32.mrf.mxu2  ;;  %v9741_v6 = vadd.f32 %v18191_v19, %v9718_v55  ;;  %v10367_v29 = vsel %vm10293_vm10, %v10360_v41, %v10366_v1 }
 0x605   :  { %v9850_v8 = vpop.f32.mrf.mxu1 }
 0x606   :  { %v18240_v34 = vadd.f32 %v18152_v26, %v9850_v8  ;;  %v9785_v26 = vadd.f32 %v18102_v13, %v9762_v33  ;;  %v9764_v2 = vadd.f32 %v18187_v30, %v9741_v6  ;;  %v9721_v13 = vadd.f32 %v18069_v3, %v9698_v31  ;;  %v18981_v31 = vld [vmem:[#allocation22_spill] sm:$0xff] }
 0x607   :  { %v9827_v51 = vpop.f32.mrf.mxu0 }
 0x608   :  { %v9828_v17 = vadd.f32 %v9827_v51, %v9805_v23  ;;  %v9808_v19 = vadd.f32 %v18100_v48, %v9785_v26  ;;  %v9787_v48 = vadd.f32 %v18112_v4, %v9764_v2 }
 0x609   :  { %v10206_v24 = vld [vmem:[#allocation5 + $0x58] sm:$0xfc]  ;;  %v18246_v7 = vpop.f32.mrf.mxu3 }
 0x60a   :  { %v10259_v28 = vadd.f32 %v10235_v18, %v10206_v24  ;;  %v10263_v27 = vadd.f32 %v10242_v32, %v9828_v17  ;;  %v9810_v42 = vadd.f32 %v18108_v63, %v9787_v48 }
 0x60c   :  { %v18249_v14 = vpop.f32.mrf.mxu2  ;;  %v10271_v46 = vmax.f32 %v10259_v28, 0.0  ;;  %v10275_v39 = vmax.f32 %v10263_v27, 0.0 }
 0x60d   :  { %v9853_v22 = vpop.f32.mrf.mxu1 }
 0x60e   :  { %v18255_v37 = vadd.f32 %v18159_v11, %v9853_v22  ;;  %v10300_v21 = vrot.slane %v10271_v46, 2  ;;  %v10301_v59 = vrot.slane %v10275_v39, 2  ;;  %v9744_v11 = vadd.f32 %v18202_v0, %v9721_v13 }
 0x60f   :  { %v9830_v20 = vpop.f32.mrf.mxu0 }
 0x610   :  { %10123 = vmatmul.bf16.vlgmr.msrb.gmra.mxu1 %v18980_v47  ;;  %v10302_v9 = vsel %vm10293_vm10, %v10300_v21, %v10301_v59  ;;  %v9831_v57 = vadd.f32 %v9830_v20, %v9808_v19  ;;  %v9767_v50 = vadd.f32 %v18199_v36, %v9744_v11 }
 0x611   :  { %10324 = vst [vmem:[#allocation12 + $0x10] sm:$0xff] %v10302_v9  ;;  %v9998_v60 = vpop.f32.mrf.mxu3  ;;  %v9895_v9 = vadd.f32 %v18138_v45, %v18224_v5 }
 0x612   :  { %10194 = vst [vmem:[#allocation5 + $0x30] sm:$0xff] %v9831_v57  ;;  %10100 = vmatmul.bf16.vlgmr.msrb.gmra.mxu0 %v18933_v62 }
 0x614   :  { %v9975_v30 = vpop.f32.mrf.mxu2 }
 0x615   :  { %v9855_v56 = vpop.f32.mrf.mxu1 }
 0x616   :  { %v18266_v3 = vadd.f32 %v18168_v61, %v9855_v56  ;;  %v9790_v61 = vadd.f32 %v18124_v40, %v9767_v50 }
 0x617   :  { %v9832_v18 = vpop.f32.mrf.mxu0 }
 0x618   :  { %v9833_v0 = vadd.f32 %v9832_v18, %v9810_v42  ;;  %v9813_v26 = vadd.f32 %v18120_v54, %v9790_v61  ;;  %v18986_v61 = vld [vmem:[#allocation65_spill] sm:$0xff] }
 0x619   :  { %v10214_v8 = vld [vmem:[#allocation5 + $0x30] sm:$0x3]  ;;  %v10332_v33 = vld [vmem:[#allocation5 + $0x30] sm:$0xc0]  ;;  %v18271_v23 = vpop.f32.mrf.mxu3 }
 0x61a   :  { %v10267_v62 = vadd.f32 %v10241_v10, %v10214_v8  ;;  %v10384_v4 = vadd.f32 %v10360_v41, %v10332_v33  ;;  %v10388_v51 = vadd.f32 %v10367_v29, %v9833_v0  ;;  %v18985_v29 = vld [vmem:[#allocation63_spill] sm:$0xff] }
 0x61b   :  { %v9900_v0 = vadd.f32 %v18985_v29, %v18255_v37 }
 0x61c   :  { %v18273_v32 = vpop.f32.mrf.mxu2  ;;  %v10279_v55 = vmax.f32 %v10267_v62, 0.0  ;;  %v10396_v17 = vmax.f32 %v10384_v4, 0.0  ;;  %v10400_v36 = vmax.f32 %v10388_v51, 0.0 }
 0x61d   :  { %v9858_v24 = vpop.f32.mrf.mxu1 }
 0x61e   :  { %v9882_v63 = vadd.f32 %v18179_v15, %v9858_v24  ;;  %v10310_v6 = vrot.slane %v10279_v55, 2  ;;  %v10424_v28 = vrot.slane %v10396_v17, 6  ;;  %v10425_v27 = vrot.slane %v10400_v36, 6 }
 0x61f   :  { %v9835_v10 = vpop.f32.mrf.mxu0 }
 0x620   :  { %10128 = vmatmul.bf16.gmra.mxu1 %v18981_v31  ;;  %v10311_v46 = vsel %vm10293_vm10, %v10301_v59, %v10310_v6  ;;  %v10426_v39 = vsel %vm18982_vm0, %v10424_v28, %v10425_v27  ;;  %v9836_v22 = vadd.f32 %v9835_v10, %v9813_v26  ;;  %v18987_v28 = vld [vmem:[#allocation64_spill] sm:$0xff] }
 0x621   :  { %10328 = vst [vmem:[#allocation12 + $0x30] sm:$0xff] %v10311_v46  ;;  %v18281_v40 = vpop.f32.mrf.mxu3 }
 0x622   :  { %10449 = vst [vmem:[#allocation12 + $0x50] sm:$0xff] %v10426_v39  ;;  %10105 = vmatmul.bf16.gmra.mxu0 %v18934_v52 }
 0x623   :  { %10202 = vst [vmem:[#allocation5 + $0x78] sm:$0xff] %v9836_v22 }
 0x624   :  { %v18283_v2 = vpop.f32.mrf.mxu2 }
 0x625   :  { %v9860_v15 = vpop.f32.mrf.mxu1 }
 0x627   :  { %v9837_v21 = vpop.f32.mrf.mxu0 }
 0x629   :  { %v18286_v54 = vpop.f32.mrf.mxu3 }
 0x62a   :  { %v10340_v19 = vld [vmem:[#allocation5 + $0x78] sm:$0x3f] }
 0x62b   :  { %v10392_v59 = vadd.f32 %v10366_v1, %v10340_v19  ;;  %v9897_v1 = vadd.f32 %v18148_v44, %v18240_v34  ;;  %v9902_v44 = vadd.f32 %v18986_v61, %v18266_v3 }
 0x62c   :  { %v18288_v47 = vpop.f32.mrf.mxu2 }
 0x62d   :  { %v9940_v20 = vpop.f32.mrf.mxu1  ;;  %v10404_v13 = vmax.f32 %v10392_v59, 0.0 }
 0x62f   :  { %v10434_v57 = vrot.slane %v10404_v13, 6  ;;  %v9917_v49 = vpop.f32.mrf.mxu0 }
 0x630   :  { %10133 = vmatmul.bf16.gmra.mxu1 %v18983_v38  ;;  %v9918_v60 = vadd.f32 %v9917_v49, %v9895_v9 }
 0x631   :  { %v10435_v52 = vsel %vm18984_vm6, %v10425_v27, %v10434_v57  ;;  %v18294_v11 = vpop.f32.mrf.mxu3  ;;  %v9905_v27 = vadd.f32 %v18987_v28, %v9882_v63 }
 0x632   :  { %10453 = vst [vmem:[#allocation12 + $0x70] sm:$0xff] %v10435_v52  ;;  %v9941_v30 = vadd.f32 %v9940_v20, %v9918_v60  ;;  %10110 = vmatmul.bf16.gmra.mxu0 %v18936_v35 }
 0x634   :  { %v18296_v48 = vpop.f32.mrf.mxu2 }
 0x635   :  { %v9942_v41 = vpop.f32.mrf.mxu1 }
 0x637   :  { %v9919_v45 = vpop.f32.mrf.mxu0 }
 0x638   :  { %v9920_v5 = vadd.f32 %v9919_v45, %v9897_v1  ;;  %v18988_v45 = vld [vmem:[#allocation66_spill] sm:$0xff] }
 0x639   :  { %v18301_v56 = vpop.f32.mrf.mxu3 }
 0x63a   :  { %v9943_v50 = vadd.f32 %v9942_v41, %v9920_v5  ;;  %v9964_v5 = vadd.f32 %v18988_v45, %v9941_v30 }
 0x63c   :  { %v18303_v42 = vpop.f32.mrf.mxu2 }
 0x63d   :  { %v9945_v18 = vpop.f32.mrf.mxu1 }
 0x63f   :  { %v9922_v8 = vpop.f32.mrf.mxu0 }
 0x640   :  { %v9923_v33 = vadd.f32 %v9922_v8, %v9900_v0  ;;  %v18989_v0 = vld [vmem:[#allocation67_spill] sm:$0xff] }
 0x641   :  { %v10090_v62 = vpop.f32.mrf.mxu3  ;;  %v9987_v8 = vadd.f32 %v18989_v0, %v9964_v5 }
 0x642   :  { %v9946_v4 = vadd.f32 %v9945_v18, %v9923_v33  ;;  %v9966_v62 = vadd.f32 %v18208_v58, %v9943_v50 }
 0x644   :  { %v10067_v35 = vpop.f32.mrf.mxu2 }
 0x645   :  { %v9947_v51 = vpop.f32.mrf.mxu1 }
 0x647   :  { %v9924_v34 = vpop.f32.mrf.mxu0 }
 0x648   :  { %v9925_v55 = vadd.f32 %v9924_v34, %v9902_v44  ;;  %v9989_v44 = vadd.f32 %v18205_v53, %v9966_v62 }
 0x649   :  { %v10170_v17 = vpop.f32.mrf.mxu3 }
 0x64a   :  { %v9948_v36 = vadd.f32 %v9947_v51, %v9925_v55 }
 0x64c   :  { %v10147_v24 = vpop.f32.mrf.mxu2 }
 0x64d   :  { %v9950_v6 = vpop.f32.mrf.mxu1 }
 0x64f   :  { %v9927_v26 = vpop.f32.mrf.mxu0 }
 0x650   :  { %v9928_v31 = vadd.f32 %v9927_v26, %v9905_v27 }
 0x651   :  { %v18310_v37 = vpop.f32.mrf.mxu3 }
 0x652   :  { %v9951_v10 = vadd.f32 %v9950_v6, %v9928_v31  ;;  %v9969_v6 = vadd.f32 %v18218_v43, %v9946_v4  ;;  %v10223_v4 = vld [vmem:[#allocation6 + $0x38] sm:$0xff] }
 0x654   :  { %v10149_v46 = vpop.f32.mrf.mxu2  ;;  %v9992_v31 = vadd.f32 %v18215_v16, %v9969_v6 }
 0x655   :  { %v9952_v39 = vpop.f32.mrf.mxu1 }
 0x657   :  { %v9929_v22 = vpop.f32.mrf.mxu0 }
 0x659   :  { %v18312_v15 = vpop.f32.mrf.mxu3 }
 0x65c   :  { %v18314_v21 = vpop.f32.mrf.mxu2 }
 0x65d   :  { %v10032_v3 = vpop.f32.mrf.mxu1 }
 0x65f   :  { %v10009_v19 = vpop.f32.mrf.mxu0 }
 0x660   :  { %v10010_v33 = vadd.f32 %v10009_v19, %v9987_v8 }
 0x661   :  { %v18316_v59 = vpop.f32.mrf.mxu3 }
 0x662   :  { %v10033_v51 = vadd.f32 %v10032_v3, %v10010_v33  ;;  %v9971_v3 = vadd.f32 %v18233_v12, %v9948_v36  ;;  %v9974_v12 = vadd.f32 %v18249_v14, %v9951_v10 }
 0x664   :  { %v18318_v20 = vpop.f32.mrf.mxu2  ;;  %v10056_v55 = vadd.f32 %v18273_v32, %v10033_v51 }
 0x665   :  { %v10034_v13 = vpop.f32.mrf.mxu1 }
 0x666   :  { %v10079_v30 = vadd.f32 %v18271_v23, %v10056_v55  ;;  %v9994_v23 = vadd.f32 %v18230_v25, %v9971_v3  ;;  %v9997_v25 = vadd.f32 %v18246_v7, %v9974_v12  ;;  %v10345_v55 = vld [vmem:[#allocation6 + $0x58] sm:$0xff] }
 0x667   :  { %v10011_v63 = vpop.f32.mrf.mxu0 }
 0x668   :  { %v10012_v34 = vadd.f32 %v10011_v63, %v9989_v44 }
 0x669   :  { %v18320_v9 = vpop.f32.mrf.mxu3 }
 0x66a   :  { %v10035_v27 = vadd.f32 %v10034_v13, %v10012_v34 }
 0x66c   :  { %v18322_v57 = vpop.f32.mrf.mxu2  ;;  %v10058_v50 = vadd.f32 %v18283_v2, %v10035_v27 }
 0x66d   :  { %v10037_v38 = vpop.f32.mrf.mxu1 }
 0x66e   :  { %v10081_v43 = vadd.f32 %v18281_v40, %v10058_v50 }
 0x66f   :  { %v10014_v49 = vpop.f32.mrf.mxu0 }
 0x670   :  { %v10015_v22 = vadd.f32 %v10014_v49, %v9992_v31  ;;  %v10243_v49 = vrot.slane %v10223_v4, 6 }
 0x671   :  { %v10182_v60 = vpop.f32.mrf.mxu3 }
 0x672   :  { %v10038_v63 = vadd.f32 %v10037_v38, %v10015_v22  ;;  %v10219_v60 = vld [vmem:[#allocation6 + $0x18] sm:$0xff] }
 0x674   :  { %v10159_v52 = vpop.f32.mrf.mxu2  ;;  %v10061_v2 = vadd.f32 %v18288_v47, %v10038_v63 }
 0x675   :  { %v10039_v41 = vpop.f32.mrf.mxu1  ;;  %v10236_v52 = vrot.slane %v10219_v60, 6 }
 0x676   :  { %v10084_v0 = vadd.f32 %v18286_v54, %v10061_v2 }
 0x677   :  { %v10016_v1 = vpop.f32.mrf.mxu0 }
 0x678   :  { %v10017_v45 = vadd.f32 %v10016_v1, %v9994_v23 }
 0x67a   :  { %v10040_v38 = vadd.f32 %v10039_v41, %v10017_v45 }
 0x67c   :  { %v10063_v10 = vadd.f32 %v18296_v48, %v10040_v38 }
 0x67d   :  { %v10042_v18 = vpop.f32.mrf.mxu1 }
 0x67e   :  { %v10086_v6 = vadd.f32 %v18294_v11, %v10063_v10 }
 0x67f   :  { %v10019_v29 = vpop.f32.mrf.mxu0 }
 0x680   :  { %v10020_v51 = vadd.f32 %v10019_v29, %v9997_v25 }
 0x682   :  { %v10043_v34 = vadd.f32 %v10042_v18, %v10020_v51 }
 0x684   :  { %v10066_v31 = vadd.f32 %v18303_v42, %v10043_v34 }
 0x685   :  { %v10044_v35 = vpop.f32.mrf.mxu1 }
 0x686   :  { %v10089_v22 = vadd.f32 %v18301_v56, %v10066_v31 }
 0x687   :  { %v10021_v61 = vpop.f32.mrf.mxu0 }
 0x68d   :  { %v10124_v28 = vpop.f32.mrf.mxu1 }
 0x68f   :  { %v10101_v26 = vpop.f32.mrf.mxu0 }
 0x690   :  { %v10102_v39 = vadd.f32 %v10101_v26, %v10079_v30  ;;  %v10361_v30 = vrot.slane %v10345_v55, 2 }
 0x692   :  { %v10125_v58 = vadd.f32 %v10124_v28, %v10102_v39  ;;  %v10349_v28 = vld [vmem:[#allocation6 + $0x78] sm:$0xff] }
 0x693   :  { %v10368_v48 = vrot.slane %v10349_v28, 2 }
 0x694   :  { %v10148_v53 = vadd.f32 %v10147_v24, %v10125_v58 }
 0x695   :  { %v10126_v19 = vpop.f32.mrf.mxu1  ;;  %v10369_v39 = vsel %vm10293_vm10, %v10361_v30, %v10368_v48 }
 0x696   :  { %v10171_v32 = vadd.f32 %v10170_v17, %v10148_v53  ;;  %v10244_v17 = vsel %vm18990_vm7, %v10236_v52, %v10243_v49 }
 0x697   :  { %v10103_v13 = vpop.f32.mrf.mxu0 }
 0x698   :  { %10187 = vst [vmem:[#allocation5 + $0x50] sm:$0xff] %v10171_v32  ;;  %v10104_v16 = vadd.f32 %v10103_v13, %v10081_v43 }
 0x69a   :  { %v10127_v5 = vadd.f32 %v10126_v19, %v10104_v16 }
 0x69c   :  { %v10150_v36 = vadd.f32 %v10149_v46, %v10127_v5 }
 0x69d   :  { %v10129_v24 = vpop.f32.mrf.mxu1 }
 0x69e   :  { %v10173_v40 = vadd.f32 %v18310_v37, %v10150_v36 }
 0x69f   :  { %v10207_v8 = vld [vmem:[#allocation5 + $0x50] sm:$0xfc]  ;;  %v10106_v33 = vpop.f32.mrf.mxu0 }
 0x6a0   :  { %v10260_v62 = vadd.f32 %v10236_v52, %v10207_v8  ;;  %v10264_v1 = vadd.f32 %v10244_v17, %v10173_v40  ;;  %v10107_v35 = vadd.f32 %v10106_v33, %v10084_v0 }
 0x6a2   :  { %v10272_v47 = vmax.f32 %v10260_v62, 0.0  ;;  %v10276_v61 = vmax.f32 %v10264_v1, 0.0  ;;  %v10130_v14 = vadd.f32 %v10129_v24, %v10107_v35 }
 0x6a4   :  { %v10303_v46 = vrot.slane %v10272_v47, 2  ;;  %v10304_v44 = vrot.slane %v10276_v61, 2  ;;  %v10153_v41 = vadd.f32 %v18314_v21, %v10130_v14 }
 0x6a5   :  { %v10131_v37 = vpop.f32.mrf.mxu1 }
 0x6a6   :  { %v10305_v54 = vsel %vm10293_vm10, %v10303_v46, %v10304_v44  ;;  %v10176_v7 = vadd.f32 %v18312_v15, %v10153_v41 }
 0x6a7   :  { %10325 = vst [vmem:[#allocation12 + $0x18] sm:$0xff] %v10305_v54  ;;  %v10108_v29 = vpop.f32.mrf.mxu0 }
 0x6a8   :  { %10195 = vst [vmem:[#allocation5 + $0x80] sm:$0xff] %v10176_v7  ;;  %v10109_v27 = vadd.f32 %v10108_v29, %v10086_v6 }
 0x6aa   :  { %v10132_v26 = vadd.f32 %v10131_v37, %v10109_v27 }
 0x6ac   :  { %v10155_v21 = vadd.f32 %v18318_v20, %v10132_v26 }
 0x6ad   :  { %v10134_v18 = vpop.f32.mrf.mxu1 }
 0x6ae   :  { %v10178_v15 = vadd.f32 %v18316_v59, %v10155_v21 }
 0x6af   :  { %v10215_v11 = vld [vmem:[#allocation5 + $0x80] sm:$0x3]  ;;  %v10333_v58 = vld [vmem:[#allocation5 + $0x80] sm:$0xc0]  ;;  %v10111_v50 = vpop.f32.mrf.mxu0 }
 0x6b0   :  { %v10268_v3 = vadd.f32 %v10243_v49, %v10215_v11  ;;  %v10385_v53 = vadd.f32 %v10361_v30, %v10333_v58  ;;  %v10389_v19 = vadd.f32 %v10369_v39, %v10178_v15  ;;  %v10112_v63 = vadd.f32 %v10111_v50, %v10089_v22 }
 0x6b2   :  { %v10280_v32 = vmax.f32 %v10268_v3, 0.0  ;;  %v10397_v60 = vmax.f32 %v10385_v53, 0.0  ;;  %v10401_v43 = vmax.f32 %v10389_v19, 0.0  ;;  %v10135_v42 = vadd.f32 %v10134_v18, %v10112_v63 }
 0x6b4   :  { %v10312_v4 = vrot.slane %v10280_v32, 2  ;;  %v10427_v20 = vrot.slane %v10397_v60, 6  ;;  %v10428_v13 = vrot.slane %v10401_v43, 6  ;;  %v10158_v23 = vadd.f32 %v18322_v57, %v10135_v42 }
 0x6b5   :  { %v10136_v16 = vpop.f32.mrf.mxu1 }
 0x6b6   :  { %v10313_v59 = vsel %vm10293_vm10, %v10304_v44, %v10312_v4  ;;  %v10429_v56 = vsel %vm18991_vm2, %v10427_v20, %v10428_v13  ;;  %v10181_v52 = vadd.f32 %v18320_v9, %v10158_v23 }
 0x6b7   :  { %10329 = vst [vmem:[#allocation12 + $0x38] sm:$0xff] %v10313_v59  ;;  %v10113_v49 = vpop.f32.mrf.mxu0 }
 0x6b8   :  { %10450 = vst [vmem:[#allocation12 + $0x58] sm:$0xff] %v10429_v56 }
 0x6b9   :  { %10203 = vst [vmem:[#allocation5 + $0x70] sm:$0xff] %v10181_v52 }
 0x6c0   :  { %v10341_v45 = vld [vmem:[#allocation5 + $0x70] sm:$0x3f] }
 0x6c1   :  { %v10393_v5 = vadd.f32 %v10368_v48, %v10341_v45 }
 0x6c3   :  { %v10405_v2 = vmax.f32 %v10393_v5, 0.0 }
 0x6c5   :  { %v10436_v57 = vrot.slane %v10405_v2, 6 }
 0x6c7   :  { %v10437_v12 = vsel %vm18992_vm15, %v10428_v13, %v10436_v57 }
 0x6c8   :  { %10454 = vst [vmem:[#allocation12 + $0x78] sm:$0xff] %v10437_v12 }
 0x6c9   :  { %10467 = dma.vmem_to_hbm [thread:$0]  %s10460_s4, 2048, %s10462_s7, [#allocation8], %s15672_s24, %s15672_s24, %s15673_s25  }
 0x6ca   :  { %15666 = dma.done.wait [#allocation8], 2048  }
 0x6cb   :  { %15667 = vsyncadd [#allocation8], 4294965248 }
 0x6cc   :  { %10472 = vsyncpa [#allocation7], 1 }
 0x6cd   :  { %10473 = vsyncpa [#allocation10], 1 }
 0x6ce   :  { %10474 = vsyncpa [#allocation8], 1 }

</bundles_post_ra>
